<compile_context>
chip_gen: v6e
topology: v6e:2x2x1
jax: 0.10.0
libtpu: 0.0.40
codegen_flags: <defaults>
</compile_context>

<pallas_src>
import functools

import jax
import jax.numpy as jnp
from jax.experimental import pallas as pl
from jax.experimental.pallas import tpu as pltpu


COMPUTE_DTYPE = jnp.bfloat16   # MXU operand dtype
OUT_DTYPE = jnp.float32        # HBM output dtype


# ----------------------------------------------------------------------------
# helpers
# ----------------------------------------------------------------------------
def _round_up(x, m):
    return ((x + m - 1) // m) * m


def _cdiv(a, b):
    return -(-a // b)


def _pad2d(a, rows, cols):
    r, c = a.shape
    if r == rows and c == cols:
        return a
    return jnp.pad(a, ((0, rows - r), (0, cols - c)))


# ----------------------------------------------------------------------------
# Fused forward kernel: entire autoencoder in one pallas_call invocation.
# ----------------------------------------------------------------------------
def _fused_forward_kernel(*refs):
    (gene_ref, prot_ref, mut_ref,
     ge1w, ge1b, ge2w, ge2b,
     pe1w, pe1b, pe2w, pe2b,
     me1w, me1b, me2w, me2b,
     fwg, fwp, fwm, fb,
     d1w, d1b,
     gd2w, gd2b, gd3w, gd3b,
     pd2w, pd2b, pd3w, pd3b,
     md2w, md2b, md3w, md3b,
     lat_ref, grec_ref, prec_ref, mrec_ref) = refs

    def lin(x, w_ref, b_ref, act):
        # bf16 operands, f32 accumulation on the MXU; bias/activation in f32 (VPU/EUP).
        y = jnp.dot(x.astype(w_ref.dtype), w_ref[...],
                    preferred_element_type=jnp.float32)
        y = y + b_ref[...]                       # (1, N) broadcasts over batch tile
        if act == "relu":
            y = jnp.maximum(y, 0.0)
        elif act == "sigmoid":
            y = jax.nn.sigmoid(y)                # f32 EUP
        return y

    # ---- encoders (all intermediates stay in VMEM / vregs) ----
    g = lin(lin(gene_ref[...], ge1w, ge1b, "relu"), ge2w, ge2b, "relu")   # [tm, 256]
    p = lin(lin(prot_ref[...], pe1w, pe1b, "relu"), pe2w, pe2b, "relu")   # [tm, 128]
    m = lin(lin(mut_ref[...], me1w, me1b, "relu"), me2w, me2b, "relu")    # [tm, 128] (64 padded)

    # ---- fusion layer without concatenation: relu(g@Wg + p@Wp + m@Wm + b) ----
    lat = jnp.dot(g.astype(fwg.dtype), fwg[...], preferred_element_type=jnp.float32)
    lat = lat + jnp.dot(p.astype(fwp.dtype), fwp[...], preferred_element_type=jnp.float32)
    lat = lat + jnp.dot(m.astype(fwm.dtype), fwm[...], preferred_element_type=jnp.float32)
    lat = jnp.maximum(lat + fb[...], 0.0)                                 # [tm, L_pad]
    lat_ref[...] = lat.astype(lat_ref.dtype)

    # ---- merged first decoder level (gd1 | pd1 | md1_pad), lane-dense 512 cols ----
    h = jnp.maximum(
        jnp.dot(lat.astype(d1w.dtype), d1w[...],
                preferred_element_type=jnp.float32) + d1b[...], 0.0)      # [tm, 512]
    hg = h[:, 0:256]       # gene-decoder hidden
    hp = h[:, 256:384]     # protein-decoder hidden
    hm = h[:, 384:512]     # mutation-decoder hidden (upper 64 lanes are zero)

    grec_ref[...] = lin(lin(hg, gd2w, gd2b, "relu"),
                        gd3w, gd3b, "none").astype(grec_ref.dtype)
    prec_ref[...] = lin(lin(hp, pd2w, pd2b, "relu"),
                        pd3w, pd3b, "none").astype(prec_ref.dtype)
    mrec_ref[...] = lin(lin(hm, md2w, md2b, "relu"),
                        md3w, md3b, "sigmoid").astype(mrec_ref.dtype)


# ----------------------------------------------------------------------------
# Parameter init (deterministic, PyTorch-style uniform(-1/sqrt(fan_in), ...))
# ----------------------------------------------------------------------------
def _init_linear(key, in_dim, out_dim, dtype=jnp.float32):
    kw, kb = jax.random.split(key)
    bound = 1.0 / (in_dim ** 0.5)
    w = jax.random.uniform(kw, (in_dim, out_dim), dtype, minval=-bound, maxval=bound)
    b = jax.random.uniform(kb, (out_dim,), dtype, minval=-bound, maxval=bound)
    return w, b


def init_params(key, gene_dim, protein_dim, mutation_dim, latent_dim):
    keys = jax.random.split(key, 32)
    k = iter(keys)
    p = {}
    p["ge1"] = _init_linear(next(k), gene_dim, 512)
    p["ge2"] = _init_linear(next(k), 512, 256)
    p["pe1"] = _init_linear(next(k), protein_dim, 256)
    p["pe2"] = _init_linear(next(k), 256, 128)
    p["me1"] = _init_linear(next(k), mutation_dim, 128)
    p["me2"] = _init_linear(next(k), 128, 64)
    p["fuse"] = _init_linear(next(k), 256 + 128 + 64, latent_dim)
    p["gd1"] = _init_linear(next(k), latent_dim, 256)
    p["gd2"] = _init_linear(next(k), 256, 512)
    p["gd3"] = _init_linear(next(k), 512, gene_dim)
    p["pd1"] = _init_linear(next(k), latent_dim, 128)
    p["pd2"] = _init_linear(next(k), 128, 256)
    p["pd3"] = _init_linear(next(k), 256, protein_dim)
    p["md1"] = _init_linear(next(k), latent_dim, 64)
    p["md2"] = _init_linear(next(k), 64, 128)
    p["md3"] = _init_linear(next(k), 128, mutation_dim)
    return p


# ----------------------------------------------------------------------------
# One-time prep: split fuse weights, merge decoder heads, pad to lane-dense dims,
# cast weights to bf16 (biases stay f32).
# ----------------------------------------------------------------------------
def prepare_params(p, gene_dim, protein_dim, mutation_dim, latent_dim,
                   weight_dtype=COMPUTE_DTYPE, bias_dtype=jnp.float32):
    pads = dict(
        L_pad=_round_up(latent_dim, 128),
        gene_in_pad=_round_up(gene_dim, 128),
        prot_in_pad=_round_up(protein_dim, 128),
        mut_in_pad=_round_up(mutation_dim, 128),
        gene_out_pad=_round_up(gene_dim, 128),
        prot_out_pad=_round_up(protein_dim, 128),
        mut_out_pad=_round_up(mutation_dim, 128),
    )

    def wb(key, in_pad=None, out_pad=None):
        w, b = p[key]
        K, N = w.shape
        rp = in_pad if in_pad is not None else K
        cp = out_pad if out_pad is not None else N
        wq = _pad2d(w, rp, cp).astype(weight_dtype)
        bb = jnp.pad(b, (0, cp - N)).astype(bias_dtype).reshape(1, cp)
        return wq, bb

    ge1w, ge1b = wb("ge1", in_pad=pads["gene_in_pad"])
    ge2w, ge2b = wb("ge2")
    pe1w, pe1b = wb("pe1", in_pad=pads["prot_in_pad"])
    pe2w, pe2b = wb("pe2")
    me1w, me1b = wb("me1", in_pad=pads["mut_in_pad"])
    me2w, me2b = wb("me2", out_pad=128)   # 64 -> 128 lane-dense mutation features

    # fusion layer: split [448, latent] rows (gene 256 | protein 128 | mutation 64->128),
    # pad out-dim to L_pad. Padded rows/cols are zero, so they contribute nothing.
    fw, fbias = p["fuse"]
    fwg = _pad2d(fw[:256], 256, pads["L_pad"]).astype(weight_dtype)
    fwp = _pad2d(fw[256:384], 128, pads["L_pad"]).astype(weight_dtype)
    fwm = _pad2d(fw[384:448], 128, pads["L_pad"]).astype(weight_dtype)
    fb = jnp.pad(fbias, (0, pads["L_pad"] - latent_dim)
                 ).astype(bias_dtype).reshape(1, pads["L_pad"])

    # merged first decoder layer, padded to 512 lanes: [gd1 (256) | pd1 (128) | md1 (64->128)]
    gd1w, gd1b = p["gd1"]
    pd1w, pd1b = p["pd1"]
    md1w, md1b = p["md1"]
    d1w = jnp.concatenate([gd1w, pd1w, _pad2d(md1w, latent_dim, 128)], axis=1)
    d1w = _pad2d(d1w, pads["L_pad"], 512).astype(weight_dtype)
    d1b = jnp.concatenate([gd1b, pd1b, jnp.pad(md1b, (0, 64))]
                          ).astype(bias_dtype).reshape(1, 512)

    gd2w, gd2b = wb("gd2")
    gd3w, gd3b = wb("gd3", out_pad=pads["gene_out_pad"])
    pd2w, pd2b = wb("pd2")
    pd3w, pd3b = wb("pd3", out_pad=pads["prot_out_pad"])
    md2w, md2b = wb("md2", in_pad=128)    # zero rows matching hm's padded lanes
    md3w, md3b = wb("md3", out_pad=pads["mut_out_pad"])

    weights = (ge1w, ge1b, ge2w, ge2b,
               pe1w, pe1b, pe2w, pe2b,
               me1w, me1b, me2w, me2b,
               fwg, fwp, fwm, fb,
               d1w, d1b,
               gd2w, gd2b, gd3w, gd3b,
               pd2w, pd2b, pd3w, pd3b,
               md2w, md2b, md3w, md3b)
    return weights, pads


# ----------------------------------------------------------------------------
# Batch tiling + one-time input prep (padding hoisted out of the hot path)
# ----------------------------------------------------------------------------
def choose_batch_tile(B, max_tile=256):
    """Minimise batch padding; multiple of 16 (bf16 sublane packing), up to max_tile."""
    if B <= max_tile:
        return min(_round_up(B, 16), max_tile)
    n_steps = _cdiv(B, max_tile)
    return _round_up(_cdiv(B, n_steps), 16)


def prepare_inputs(gene, protein, mutation, *, pads, tm):
    B = gene.shape[0]
    B_pad = _round_up(B, tm)
    gene_p = _pad2d(gene, B_pad, pads["gene_in_pad"]).astype(COMPUTE_DTYPE)
    prot_p = _pad2d(protein, B_pad, pads["prot_in_pad"]).astype(COMPUTE_DTYPE)
    mut_p = _pad2d(mutation, B_pad, pads["mut_in_pad"]).astype(COMPUTE_DTYPE)
    return gene_p, prot_p, mut_p


# ----------------------------------------------------------------------------
# Fused forward wrapper (expects pre-padded/cast inputs)
# ----------------------------------------------------------------------------
def fused_forward(weights, gene_p, prot_p, mut_p, *, dims, pads, tm, batch,
                  buffered_weights=True):
    latent_dim, gene_dim, protein_dim, mutation_dim = dims
    B_pad = gene_p.shape[0]
    assert B_pad % tm == 0, (B_pad, tm)
    grid = (B_pad // tm,)

    data_specs = [
        pl.BlockSpec((tm, pads["gene_in_pad"]), lambda i: (i, 0)),
        pl.BlockSpec((tm, pads["prot_in_pad"]), lambda i: (i, 0)),
        pl.BlockSpec((tm, pads["mut_in_pad"]), lambda i: (i, 0)),
    ]
    # full-array, VMEM-resident weights (constant block index -> DMA'd once).
    # Single-buffered: double-buffering a constant block is pure VMEM waste.
    if buffered_weights:
        weight_specs = [
            pl.BlockSpec(w.shape, lambda i: (0, 0),
                         pipeline_mode=pl.Buffered(buffer_count=1))
            for w in weights]
    else:
        weight_specs = [pl.BlockSpec(w.shape, lambda i: (0, 0)) for w in weights]

    out_shape = (
        jax.ShapeDtypeStruct((B_pad, pads["L_pad"]), OUT_DTYPE),
        jax.ShapeDtypeStruct((B_pad, pads["gene_out_pad"]), OUT_DTYPE),
        jax.ShapeDtypeStruct((B_pad, pads["prot_out_pad"]), OUT_DTYPE),
        jax.ShapeDtypeStruct((B_pad, pads["mut_out_pad"]), OUT_DTYPE),
    )
    out_specs = (
        pl.BlockSpec((tm, pads["L_pad"]), lambda i: (i, 0)),
        pl.BlockSpec((tm, pads["gene_out_pad"]), lambda i: (i, 0)),
        pl.BlockSpec((tm, pads["prot_out_pad"]), lambda i: (i, 0)),
        pl.BlockSpec((tm, pads["mut_out_pad"]), lambda i: (i, 0)),
    )

    # explicit scoped-VMEM budget: resident weights + double-buffered I/O tiles + headroom
    wbuf = 1 if buffered_weights else 2
    weight_bytes = sum(int(w.size) * w.dtype.itemsize for w in weights)
    in_tile_bytes = tm * (pads["gene_in_pad"] + pads["prot_in_pad"]
                          + pads["mut_in_pad"]) * gene_p.dtype.itemsize
    out_tile_bytes = tm * (pads["L_pad"] + pads["gene_out_pad"]
                           + pads["prot_out_pad"] + pads["mut_out_pad"]) * 4
    vmem_limit = int(1.3 * (wbuf * weight_bytes + 2 * (in_tile_bytes + out_tile_bytes)))
    vmem_limit = max(vmem_limit, 16 << 20)
    vmem_limit = min(vmem_limit, 64 << 20)   # v7x physical VMEM per TensorCore

    # advisory cost estimate (padded dims)
    matmul_kn = [
        (pads["gene_in_pad"], 512), (512, 256),
        (pads["prot_in_pad"], 256), (256, 128),
        (pads["mut_in_pad"], 128), (128, 128),
        (256, pads["L_pad"]), (128, pads["L_pad"]), (128, pads["L_pad"]),
        (pads["L_pad"], 512),
        (256, 512), (512, pads["gene_out_pad"]),
        (128, 256), (256, pads["prot_out_pad"]),
        (128, 128), (128, pads["mut_out_pad"]),
    ]
    flops = int(2 * B_pad * sum(k * n for k, n in matmul_kn))
    out_elems = B_pad * (pads["L_pad"] + pads["gene_out_pad"]
                         + pads["prot_out_pad"] + pads["mut_out_pad"])
    in_bytes = (int(gene_p.size) + int(prot_p.size) + int(mut_p.size)) * gene_p.dtype.itemsize
    bytes_accessed = int(weight_bytes + in_bytes + 4 * out_elems)
    cost = pl.CostEstimate(flops=flops,
                           transcendentals=int(B_pad * pads["mut_out_pad"]),
                           bytes_accessed=bytes_accessed)

    lat, grec, prec, mrec = pl.pallas_call(
        _fused_forward_kernel,
        out_shape=out_shape,
        grid=grid,
        in_specs=data_specs + weight_specs,
        out_specs=out_specs,
        compiler_params=pltpu.CompilerParams(
            # TODO(synk): consider pltpu.CORE_PARALLEL here for explicit per-TC
            # sharding of the batch axis on v7x.
            dimension_semantics=("parallel",),
            vmem_limit_bytes=vmem_limit),
        cost_estimate=cost,
    )(gene_p, prot_p, mut_p, *weights)

    return (lat[:batch, :latent_dim],
            grec[:batch, :gene_dim],
            prec[:batch, :protein_dim],
            mrec[:batch, :mutation_dim])


# ----------------------------------------------------------------------------
# Pure-JAX reference (operates on the original, unpadded f32 params)
# ----------------------------------------------------------------------------
def _ref_forward(params, gene, protein, mutation):
    def lin(x, wb, act):
        w, b = wb
        y = x @ w + b
        if act == "relu":
            y = jnp.maximum(y, 0.0)
        elif act == "sigmoid":
            y = jax.nn.sigmoid(y)
        return y

    g = lin(lin(gene, params["ge1"], "relu"), params["ge2"], "relu")
    pr = lin(lin(protein, params["pe1"], "relu"), params["pe2"], "relu")
    m = lin(lin(mutation, params["me1"], "relu"), params["me2"], "relu")
    latent = lin(jnp.concatenate([g, pr, m], axis=1), params["fuse"], "relu")
    gr = lin(lin(lin(latent, params["gd1"], "relu"), params["gd2"], "relu"),
             params["gd3"], "none")
    prr = lin(lin(lin(latent, params["pd1"], "relu"), params["pd2"], "relu"),
              params["pd3"], "none")
    mr = lin(lin(lin(latent, params["md1"], "relu"), params["md2"], "relu"),
             params["md3"], "sigmoid")
    return latent, gr, prr, mr


if __name__ == "__main__":
    # small, module-consistent shapes
    batch = 8
    gene_dim = 256
    protein_dim = 128
    mutation_dim = 200   # matches n_mutations=200 in the reference file
    latent_dim = 64

    key = jax.random.PRNGKey(0)
    kp, kg, kpr, km = jax.random.split(key, 4)

    params = init_params(kp, gene_dim, protein_dim, mutation_dim, latent_dim)

    gene_data = jax.random.normal(kg, (batch, gene_dim), jnp.float32)
    protein_data = jax.random.normal(kpr, (batch, protein_dim), jnp.float32)
    # binary mutation matrix like np.random.binomial(1, 0.05, ...)
    mutation_data = (jax.random.uniform(km, (batch, mutation_dim)) < 0.05).astype(jnp.float32)

    # one-time weight prep: split fuse, merge + pad decoder heads, bf16-cast, pad lanes
    weights, pads = prepare_params(params, gene_dim, protein_dim, mutation_dim, latent_dim)
    dims = (latent_dim, gene_dim, protein_dim, mutation_dim)

    # one-time input prep (padding/cast hoisted out of the hot path)
    tm = choose_batch_tile(batch)
    gene_p, prot_p, mut_p = prepare_inputs(
        gene_data, protein_data, mutation_data, pads=pads, tm=tm)

    def run(buffered):
        fwd = jax.jit(functools.partial(
            fused_forward, dims=dims, pads=pads, tm=tm, batch=batch,
            buffered_weights=buffered))
        outs = fwd(weights, gene_p, prot_p, mut_p)
        jax.block_until_ready(outs)
        return outs

    try:
        outs = run(True)
    except Exception:
        # fallback if pipeline_mode=pl.Buffered(1) is unsupported in this jax build
        outs = run(False)

    latent, gene_recon, protein_recon, mutation_recon = outs

    # correctness check against pure-JAX f32 reference; tolerance loosened for bf16 MXU
    ref = _ref_forward(params, gene_data, protein_data, mutation_data)
    for got, want in zip(outs, ref):
        assert got.shape == want.shape, (got.shape, want.shape)
        err = float(jnp.max(jnp.abs(got.astype(jnp.float32) - want)))
        tol = 0.05 + 0.02 * float(jnp.max(jnp.abs(want)))
        assert err < tol, (err, tol)

    print("KERNEL_OK")
</pallas_src>

<mosaic_0001>
module attributes {stable_mosaic.version = 11 : i64} {
  func.func @_fused_forward_kernel(%arg0: i32, %arg1: memref<16x256xbf16, #tpu.memory_space<vmem>>, %arg2: memref<16x128xbf16, #tpu.memory_space<vmem>>, %arg3: memref<16x256xbf16, #tpu.memory_space<vmem>>, %arg4: memref<256x512xbf16, #tpu.memory_space<vmem>>, %arg5: memref<1x512xf32, #tpu.memory_space<vmem>>, %arg6: memref<512x256xbf16, #tpu.memory_space<vmem>>, %arg7: memref<1x256xf32, #tpu.memory_space<vmem>>, %arg8: memref<128x256xbf16, #tpu.memory_space<vmem>>, %arg9: memref<1x256xf32, #tpu.memory_space<vmem>>, %arg10: memref<256x128xbf16, #tpu.memory_space<vmem>>, %arg11: memref<1x128xf32, #tpu.memory_space<vmem>>, %arg12: memref<256x128xbf16, #tpu.memory_space<vmem>>, %arg13: memref<1x128xf32, #tpu.memory_space<vmem>>, %arg14: memref<128x128xbf16, #tpu.memory_space<vmem>>, %arg15: memref<1x128xf32, #tpu.memory_space<vmem>>, %arg16: memref<256x128xbf16, #tpu.memory_space<vmem>>, %arg17: memref<128x128xbf16, #tpu.memory_space<vmem>>, %arg18: memref<128x128xbf16, #tpu.memory_space<vmem>>, %arg19: memref<1x128xf32, #tpu.memory_space<vmem>>, %arg20: memref<128x512xbf16, #tpu.memory_space<vmem>>, %arg21: memref<1x512xf32, #tpu.memory_space<vmem>>, %arg22: memref<256x512xbf16, #tpu.memory_space<vmem>>, %arg23: memref<1x512xf32, #tpu.memory_space<vmem>>, %arg24: memref<512x256xbf16, #tpu.memory_space<vmem>>, %arg25: memref<1x256xf32, #tpu.memory_space<vmem>>, %arg26: memref<128x256xbf16, #tpu.memory_space<vmem>>, %arg27: memref<1x256xf32, #tpu.memory_space<vmem>>, %arg28: memref<256x128xbf16, #tpu.memory_space<vmem>>, %arg29: memref<1x128xf32, #tpu.memory_space<vmem>>, %arg30: memref<128x128xbf16, #tpu.memory_space<vmem>>, %arg31: memref<1x128xf32, #tpu.memory_space<vmem>>, %arg32: memref<128x256xbf16, #tpu.memory_space<vmem>>, %arg33: memref<1x256xf32, #tpu.memory_space<vmem>>, %arg34: memref<16x128xf32, #tpu.memory_space<vmem>>, %arg35: memref<16x256xf32, #tpu.memory_space<vmem>>, %arg36: memref<16x128xf32, #tpu.memory_space<vmem>>, %arg37: memref<16x256xf32, #tpu.memory_space<vmem>>) attributes {dimension_semantics = [#tpu.dimension_semantics<parallel>], iteration_bounds = array<i64: 1>, scalar_prefetch = 0 : i64, scratch_operands = 0 : i64, tpu.core_type = #tpu.core_type<tc>, window_params = [{transform_indices = @transform_0, window_bounds = array<i64: 16, 256>}, {transform_indices = @transform_1, window_bounds = array<i64: 16, 128>}, {transform_indices = @transform_2, window_bounds = array<i64: 16, 256>}, {pipeline_mode = #tpu.pipeline_mode<synchronous>, transform_indices = @transform_3, window_bounds = array<i64: 256, 512>}, {pipeline_mode = #tpu.pipeline_mode<synchronous>, transform_indices = @transform_4, window_bounds = array<i64: 1, 512>}, {pipeline_mode = #tpu.pipeline_mode<synchronous>, transform_indices = @transform_5, window_bounds = array<i64: 512, 256>}, {pipeline_mode = #tpu.pipeline_mode<synchronous>, transform_indices = @transform_6, window_bounds = array<i64: 1, 256>}, {pipeline_mode = #tpu.pipeline_mode<synchronous>, transform_indices = @transform_7, window_bounds = array<i64: 128, 256>}, {pipeline_mode = #tpu.pipeline_mode<synchronous>, transform_indices = @transform_8, window_bounds = array<i64: 1, 256>}, {pipeline_mode = #tpu.pipeline_mode<synchronous>, transform_indices = @transform_9, window_bounds = array<i64: 256, 128>}, {pipeline_mode = #tpu.pipeline_mode<synchronous>, transform_indices = @transform_10, window_bounds = array<i64: 1, 128>}, {pipeline_mode = #tpu.pipeline_mode<synchronous>, transform_indices = @transform_11, window_bounds = array<i64: 256, 128>}, {pipeline_mode = #tpu.pipeline_mode<synchronous>, transform_indices = @transform_12, window_bounds = array<i64: 1, 128>}, {pipeline_mode = #tpu.pipeline_mode<synchronous>, transform_indices = @transform_13, window_bounds = array<i64: 128, 128>}, {pipeline_mode = #tpu.pipeline_mode<synchronous>, transform_indices = @transform_14, window_bounds = array<i64: 1, 128>}, {pipeline_mode = #tpu.pipeline_mode<synchronous>, transform_indices = @transform_15, window_bounds = array<i64: 256, 128>}, {pipeline_mode = #tpu.pipeline_mode<synchronous>, transform_indices = @transform_16, window_bounds = array<i64: 128, 128>}, {pipeline_mode = #tpu.pipeline_mode<synchronous>, transform_indices = @transform_17, window_bounds = array<i64: 128, 128>}, {pipeline_mode = #tpu.pipeline_mode<synchronous>, transform_indices = @transform_18, window_bounds = array<i64: 1, 128>}, {pipeline_mode = #tpu.pipeline_mode<synchronous>, transform_indices = @transform_19, window_bounds = array<i64: 128, 512>}, {pipeline_mode = #tpu.pipeline_mode<synchronous>, transform_indices = @transform_20, window_bounds = array<i64: 1, 512>}, {pipeline_mode = #tpu.pipeline_mode<synchronous>, transform_indices = @transform_21, window_bounds = array<i64: 256, 512>}, {pipeline_mode = #tpu.pipeline_mode<synchronous>, transform_indices = @transform_22, window_bounds = array<i64: 1, 512>}, {pipeline_mode = #tpu.pipeline_mode<synchronous>, transform_indices = @transform_23, window_bounds = array<i64: 512, 256>}, {pipeline_mode = #tpu.pipeline_mode<synchronous>, transform_indices = @transform_24, window_bounds = array<i64: 1, 256>}, {pipeline_mode = #tpu.pipeline_mode<synchronous>, transform_indices = @transform_25, window_bounds = array<i64: 128, 256>}, {pipeline_mode = #tpu.pipeline_mode<synchronous>, transform_indices = @transform_26, window_bounds = array<i64: 1, 256>}, {pipeline_mode = #tpu.pipeline_mode<synchronous>, transform_indices = @transform_27, window_bounds = array<i64: 256, 128>}, {pipeline_mode = #tpu.pipeline_mode<synchronous>, transform_indices = @transform_28, window_bounds = array<i64: 1, 128>}, {pipeline_mode = #tpu.pipeline_mode<synchronous>, transform_indices = @transform_29, window_bounds = array<i64: 128, 128>}, {pipeline_mode = #tpu.pipeline_mode<synchronous>, transform_indices = @transform_30, window_bounds = array<i64: 1, 128>}, {pipeline_mode = #tpu.pipeline_mode<synchronous>, transform_indices = @transform_31, window_bounds = array<i64: 128, 256>}, {pipeline_mode = #tpu.pipeline_mode<synchronous>, transform_indices = @transform_32, window_bounds = array<i64: 1, 256>}, {transform_indices = @transform_33, window_bounds = array<i64: 16, 128>}, {transform_indices = @transform_34, window_bounds = array<i64: 16, 256>}, {transform_indices = @transform_35, window_bounds = array<i64: 16, 128>}, {transform_indices = @transform_36, window_bounds = array<i64: 16, 256>}]} {
    %c0 = arith.constant 0 : index
    %c0_0 = arith.constant 0 : index
    %0 = vector.load %arg1[%c0, %c0_0] : memref<16x256xbf16, #tpu.memory_space<vmem>>, vector<16x256xbf16>
    %c0_1 = arith.constant 0 : index
    %c0_2 = arith.constant 0 : index
    %1 = vector.load %arg4[%c0_1, %c0_2] : memref<256x512xbf16, #tpu.memory_space<vmem>>, vector<256x512xbf16>
    %cst = arith.constant dense<0.000000e+00> : vector<16x512xf32>
    %2 = tpu.matmul %0, %1, %cst {dimension_numbers = #tpu.dot_dimension_numbers<[1], [0], [0], [1], [0, 0, 1, 1], [], []>} : vector<16x256xbf16>, vector<256x512xbf16>, vector<16x512xf32> -> vector<16x512xf32>
    %c0_3 = arith.constant 0 : index
    %c0_4 = arith.constant 0 : index
    %3 = vector.load %arg5[%c0_3, %c0_4] : memref<1x512xf32, #tpu.memory_space<vmem>>, vector<1x512xf32>
    %4 = vector.broadcast %3 : vector<1x512xf32> to vector<16x512xf32>
    %5 = arith.addf %2, %4 : vector<16x512xf32>
    %cst_5 = arith.constant 0.000000e+00 : f32
    %6 = vector.broadcast %cst_5 : f32 to vector<16x512xf32>
    %7 = arith.maximumf %5, %6 : vector<16x512xf32>
    %8 = arith.truncf %7 : vector<16x512xf32> to vector<16x512xbf16>
    %c0_6 = arith.constant 0 : index
    %c0_7 = arith.constant 0 : index
    %9 = vector.load %arg6[%c0_6, %c0_7] : memref<512x256xbf16, #tpu.memory_space<vmem>>, vector<512x256xbf16>
    %cst_8 = arith.constant dense<0.000000e+00> : vector<16x256xf32>
    %10 = tpu.matmul %8, %9, %cst_8 {dimension_numbers = #tpu.dot_dimension_numbers<[1], [0], [0], [1], [0, 0, 1, 1], [], []>} : vector<16x512xbf16>, vector<512x256xbf16>, vector<16x256xf32> -> vector<16x256xf32>
    %c0_9 = arith.constant 0 : index
    %c0_10 = arith.constant 0 : index
    %11 = vector.load %arg7[%c0_9, %c0_10] : memref<1x256xf32, #tpu.memory_space<vmem>>, vector<1x256xf32>
    %12 = vector.broadcast %11 : vector<1x256xf32> to vector<16x256xf32>
    %13 = arith.addf %10, %12 : vector<16x256xf32>
    %cst_11 = arith.constant 0.000000e+00 : f32
    %14 = vector.broadcast %cst_11 : f32 to vector<16x256xf32>
    %15 = arith.maximumf %13, %14 : vector<16x256xf32>
    %c0_12 = arith.constant 0 : index
    %c0_13 = arith.constant 0 : index
    %16 = vector.load %arg2[%c0_12, %c0_13] : memref<16x128xbf16, #tpu.memory_space<vmem>>, vector<16x128xbf16>
    %c0_14 = arith.constant 0 : index
    %c0_15 = arith.constant 0 : index
    %17 = vector.load %arg8[%c0_14, %c0_15] : memref<128x256xbf16, #tpu.memory_space<vmem>>, vector<128x256xbf16>
    %cst_16 = arith.constant dense<0.000000e+00> : vector<16x256xf32>
    %18 = tpu.matmul %16, %17, %cst_16 {dimension_numbers = #tpu.dot_dimension_numbers<[1], [0], [0], [1], [0, 0, 1, 1], [], []>} : vector<16x128xbf16>, vector<128x256xbf16>, vector<16x256xf32> -> vector<16x256xf32>
    %c0_17 = arith.constant 0 : index
    %c0_18 = arith.constant 0 : index
    %19 = vector.load %arg9[%c0_17, %c0_18] : memref<1x256xf32, #tpu.memory_space<vmem>>, vector<1x256xf32>
    %20 = vector.broadcast %19 : vector<1x256xf32> to vector<16x256xf32>
    %21 = arith.addf %18, %20 : vector<16x256xf32>
    %cst_19 = arith.constant 0.000000e+00 : f32
    %22 = vector.broadcast %cst_19 : f32 to vector<16x256xf32>
    %23 = arith.maximumf %21, %22 : vector<16x256xf32>
    %24 = arith.truncf %23 : vector<16x256xf32> to vector<16x256xbf16>
    %c0_20 = arith.constant 0 : index
    %c0_21 = arith.constant 0 : index
    %25 = vector.load %arg10[%c0_20, %c0_21] : memref<256x128xbf16, #tpu.memory_space<vmem>>, vector<256x128xbf16>
    %cst_22 = arith.constant dense<0.000000e+00> : vector<16x128xf32>
    %26 = tpu.matmul %24, %25, %cst_22 {dimension_numbers = #tpu.dot_dimension_numbers<[1], [0], [0], [1], [0, 0, 1, 1], [], []>} : vector<16x256xbf16>, vector<256x128xbf16>, vector<16x128xf32> -> vector<16x128xf32>
    %c0_23 = arith.constant 0 : index
    %c0_24 = arith.constant 0 : index
    %27 = vector.load %arg11[%c0_23, %c0_24] : memref<1x128xf32, #tpu.memory_space<vmem>>, vector<1x128xf32>
    %28 = vector.broadcast %27 : vector<1x128xf32> to vector<16x128xf32>
    %29 = arith.addf %26, %28 : vector<16x128xf32>
    %cst_25 = arith.constant 0.000000e+00 : f32
    %30 = vector.broadcast %cst_25 : f32 to vector<16x128xf32>
    %31 = arith.maximumf %29, %30 : vector<16x128xf32>
    %c0_26 = arith.constant 0 : index
    %c0_27 = arith.constant 0 : index
    %32 = vector.load %arg3[%c0_26, %c0_27] : memref<16x256xbf16, #tpu.memory_space<vmem>>, vector<16x256xbf16>
    %c0_28 = arith.constant 0 : index
    %c0_29 = arith.constant 0 : index
    %33 = vector.load %arg12[%c0_28, %c0_29] : memref<256x128xbf16, #tpu.memory_space<vmem>>, vector<256x128xbf16>
    %cst_30 = arith.constant dense<0.000000e+00> : vector<16x128xf32>
    %34 = tpu.matmul %32, %33, %cst_30 {dimension_numbers = #tpu.dot_dimension_numbers<[1], [0], [0], [1], [0, 0, 1, 1], [], []>} : vector<16x256xbf16>, vector<256x128xbf16>, vector<16x128xf32> -> vector<16x128xf32>
    %c0_31 = arith.constant 0 : index
    %c0_32 = arith.constant 0 : index
    %35 = vector.load %arg13[%c0_31, %c0_32] : memref<1x128xf32, #tpu.memory_space<vmem>>, vector<1x128xf32>
    %36 = vector.broadcast %35 : vector<1x128xf32> to vector<16x128xf32>
    %37 = arith.addf %34, %36 : vector<16x128xf32>
    %cst_33 = arith.constant 0.000000e+00 : f32
    %38 = vector.broadcast %cst_33 : f32 to vector<16x128xf32>
    %39 = arith.maximumf %37, %38 : vector<16x128xf32>
    %40 = arith.truncf %39 : vector<16x128xf32> to vector<16x128xbf16>
    %c0_34 = arith.constant 0 : index
    %c0_35 = arith.constant 0 : index
    %41 = vector.load %arg14[%c0_34, %c0_35] : memref<128x128xbf16, #tpu.memory_space<vmem>>, vector<128x128xbf16>
    %cst_36 = arith.constant dense<0.000000e+00> : vector<16x128xf32>
    %42 = tpu.matmul %40, %41, %cst_36 {dimension_numbers = #tpu.dot_dimension_numbers<[1], [0], [0], [1], [0, 0, 1, 1], [], []>} : vector<16x128xbf16>, vector<128x128xbf16>, vector<16x128xf32> -> vector<16x128xf32>
    %c0_37 = arith.constant 0 : index
    %c0_38 = arith.constant 0 : index
    %43 = vector.load %arg15[%c0_37, %c0_38] : memref<1x128xf32, #tpu.memory_space<vmem>>, vector<1x128xf32>
    %44 = vector.broadcast %43 : vector<1x128xf32> to vector<16x128xf32>
    %45 = arith.addf %42, %44 : vector<16x128xf32>
    %cst_39 = arith.constant 0.000000e+00 : f32
    %46 = vector.broadcast %cst_39 : f32 to vector<16x128xf32>
    %47 = arith.maximumf %45, %46 : vector<16x128xf32>
    %48 = arith.truncf %15 : vector<16x256xf32> to vector<16x256xbf16>
    %c0_40 = arith.constant 0 : index
    %c0_41 = arith.constant 0 : index
    %49 = vector.load %arg16[%c0_40, %c0_41] : memref<256x128xbf16, #tpu.memory_space<vmem>>, vector<256x128xbf16>
    %cst_42 = arith.constant dense<0.000000e+00> : vector<16x128xf32>
    %50 = tpu.matmul %48, %49, %cst_42 {dimension_numbers = #tpu.dot_dimension_numbers<[1], [0], [0], [1], [0, 0, 1, 1], [], []>} : vector<16x256xbf16>, vector<256x128xbf16>, vector<16x128xf32> -> vector<16x128xf32>
    %51 = arith.truncf %31 : vector<16x128xf32> to vector<16x128xbf16>
    %c0_43 = arith.constant 0 : index
    %c0_44 = arith.constant 0 : index
    %52 = vector.load %arg17[%c0_43, %c0_44] : memref<128x128xbf16, #tpu.memory_space<vmem>>, vector<128x128xbf16>
    %cst_45 = arith.constant dense<0.000000e+00> : vector<16x128xf32>
    %53 = tpu.matmul %51, %52, %cst_45 {dimension_numbers = #tpu.dot_dimension_numbers<[1], [0], [0], [1], [0, 0, 1, 1], [], []>} : vector<16x128xbf16>, vector<128x128xbf16>, vector<16x128xf32> -> vector<16x128xf32>
    %54 = arith.addf %50, %53 : vector<16x128xf32>
    %55 = arith.truncf %47 : vector<16x128xf32> to vector<16x128xbf16>
    %c0_46 = arith.constant 0 : index
    %c0_47 = arith.constant 0 : index
    %56 = vector.load %arg18[%c0_46, %c0_47] : memref<128x128xbf16, #tpu.memory_space<vmem>>, vector<128x128xbf16>
    %cst_48 = arith.constant dense<0.000000e+00> : vector<16x128xf32>
    %57 = tpu.matmul %55, %56, %cst_48 {dimension_numbers = #tpu.dot_dimension_numbers<[1], [0], [0], [1], [0, 0, 1, 1], [], []>} : vector<16x128xbf16>, vector<128x128xbf16>, vector<16x128xf32> -> vector<16x128xf32>
    %58 = arith.addf %54, %57 : vector<16x128xf32>
    %c0_49 = arith.constant 0 : index
    %c0_50 = arith.constant 0 : index
    %59 = vector.load %arg19[%c0_49, %c0_50] : memref<1x128xf32, #tpu.memory_space<vmem>>, vector<1x128xf32>
    %60 = vector.broadcast %59 : vector<1x128xf32> to vector<16x128xf32>
    %61 = arith.addf %58, %60 : vector<16x128xf32>
    %cst_51 = arith.constant 0.000000e+00 : f32
    %62 = vector.broadcast %cst_51 : f32 to vector<16x128xf32>
    %63 = arith.maximumf %61, %62 : vector<16x128xf32>
    %c0_52 = arith.constant 0 : index
    %c0_53 = arith.constant 0 : index
    %64 = vector.load %arg34[%c0_52, %c0_53] : memref<16x128xf32, #tpu.memory_space<vmem>>, vector<16x128xf32>
    tpu.vector_store %arg34[%c0_52, %c0_53], %63 {strides = array<i32>} : memref<16x128xf32, #tpu.memory_space<vmem>>, vector<16x128xf32>,
    %65 = arith.truncf %63 : vector<16x128xf32> to vector<16x128xbf16>
    %c0_54 = arith.constant 0 : index
    %c0_55 = arith.constant 0 : index
    %66 = vector.load %arg20[%c0_54, %c0_55] : memref<128x512xbf16, #tpu.memory_space<vmem>>, vector<128x512xbf16>
    %cst_56 = arith.constant dense<0.000000e+00> : vector<16x512xf32>
    %67 = tpu.matmul %65, %66, %cst_56 {dimension_numbers = #tpu.dot_dimension_numbers<[1], [0], [0], [1], [0, 0, 1, 1], [], []>} : vector<16x128xbf16>, vector<128x512xbf16>, vector<16x512xf32> -> vector<16x512xf32>
    %c0_57 = arith.constant 0 : index
    %c0_58 = arith.constant 0 : index
    %68 = vector.load %arg21[%c0_57, %c0_58] : memref<1x512xf32, #tpu.memory_space<vmem>>, vector<1x512xf32>
    %69 = vector.broadcast %68 : vector<1x512xf32> to vector<16x512xf32>
    %70 = arith.addf %67, %69 : vector<16x512xf32>
    %cst_59 = arith.constant 0.000000e+00 : f32
    %71 = vector.broadcast %cst_59 : f32 to vector<16x512xf32>
    %72 = arith.maximumf %70, %71 : vector<16x512xf32>
    %73 = vector.extract_strided_slice %72 {offsets = [0, 0], sizes = [16, 256], strides = [1, 1]} : vector<16x512xf32> to vector<16x256xf32>
    %74 = vector.extract_strided_slice %72 {offsets = [0, 256], sizes = [16, 128], strides = [1, 1]} : vector<16x512xf32> to vector<16x128xf32>
    %75 = vector.extract_strided_slice %72 {offsets = [0, 384], sizes = [16, 128], strides = [1, 1]} : vector<16x512xf32> to vector<16x128xf32>
    %76 = arith.truncf %73 : vector<16x256xf32> to vector<16x256xbf16>
    %c0_60 = arith.constant 0 : index
    %c0_61 = arith.constant 0 : index
    %77 = vector.load %arg22[%c0_60, %c0_61] : memref<256x512xbf16, #tpu.memory_space<vmem>>, vector<256x512xbf16>
    %cst_62 = arith.constant dense<0.000000e+00> : vector<16x512xf32>
    %78 = tpu.matmul %76, %77, %cst_62 {dimension_numbers = #tpu.dot_dimension_numbers<[1], [0], [0], [1], [0, 0, 1, 1], [], []>} : vector<16x256xbf16>, vector<256x512xbf16>, vector<16x512xf32> -> vector<16x512xf32>
    %c0_63 = arith.constant 0 : index
    %c0_64 = arith.constant 0 : index
    %79 = vector.load %arg23[%c0_63, %c0_64] : memref<1x512xf32, #tpu.memory_space<vmem>>, vector<1x512xf32>
    %80 = vector.broadcast %79 : vector<1x512xf32> to vector<16x512xf32>
    %81 = arith.addf %78, %80 : vector<16x512xf32>
    %cst_65 = arith.constant 0.000000e+00 : f32
    %82 = vector.broadcast %cst_65 : f32 to vector<16x512xf32>
    %83 = arith.maximumf %81, %82 : vector<16x512xf32>
    %84 = arith.truncf %83 : vector<16x512xf32> to vector<16x512xbf16>
    %c0_66 = arith.constant 0 : index
    %c0_67 = arith.constant 0 : index
    %85 = vector.load %arg24[%c0_66, %c0_67] : memref<512x256xbf16, #tpu.memory_space<vmem>>, vector<512x256xbf16>
    %cst_68 = arith.constant dense<0.000000e+00> : vector<16x256xf32>
    %86 = tpu.matmul %84, %85, %cst_68 {dimension_numbers = #tpu.dot_dimension_numbers<[1], [0], [0], [1], [0, 0, 1, 1], [], []>} : vector<16x512xbf16>, vector<512x256xbf16>, vector<16x256xf32> -> vector<16x256xf32>
    %c0_69 = arith.constant 0 : index
    %c0_70 = arith.constant 0 : index
    %87 = vector.load %arg25[%c0_69, %c0_70] : memref<1x256xf32, #tpu.memory_space<vmem>>, vector<1x256xf32>
    %88 = vector.broadcast %87 : vector<1x256xf32> to vector<16x256xf32>
    %89 = arith.addf %86, %88 : vector<16x256xf32>
    %c0_71 = arith.constant 0 : index
    %c0_72 = arith.constant 0 : index
    %90 = vector.load %arg35[%c0_71, %c0_72] : memref<16x256xf32, #tpu.memory_space<vmem>>, vector<16x256xf32>
    tpu.vector_store %arg35[%c0_71, %c0_72], %89 {strides = array<i32>} : memref<16x256xf32, #tpu.memory_space<vmem>>, vector<16x256xf32>,
    %91 = arith.truncf %74 : vector<16x128xf32> to vector<16x128xbf16>
    %c0_73 = arith.constant 0 : index
    %c0_74 = arith.constant 0 : index
    %92 = vector.load %arg26[%c0_73, %c0_74] : memref<128x256xbf16, #tpu.memory_space<vmem>>, vector<128x256xbf16>
    %cst_75 = arith.constant dense<0.000000e+00> : vector<16x256xf32>
    %93 = tpu.matmul %91, %92, %cst_75 {dimension_numbers = #tpu.dot_dimension_numbers<[1], [0], [0], [1], [0, 0, 1, 1], [], []>} : vector<16x128xbf16>, vector<128x256xbf16>, vector<16x256xf32> -> vector<16x256xf32>
    %c0_76 = arith.constant 0 : index
    %c0_77 = arith.constant 0 : index
    %94 = vector.load %arg27[%c0_76, %c0_77] : memref<1x256xf32, #tpu.memory_space<vmem>>, vector<1x256xf32>
    %95 = vector.broadcast %94 : vector<1x256xf32> to vector<16x256xf32>
    %96 = arith.addf %93, %95 : vector<16x256xf32>
    %cst_78 = arith.constant 0.000000e+00 : f32
    %97 = vector.broadcast %cst_78 : f32 to vector<16x256xf32>
    %98 = arith.maximumf %96, %97 : vector<16x256xf32>
    %99 = arith.truncf %98 : vector<16x256xf32> to vector<16x256xbf16>
    %c0_79 = arith.constant 0 : index
    %c0_80 = arith.constant 0 : index
    %100 = vector.load %arg28[%c0_79, %c0_80] : memref<256x128xbf16, #tpu.memory_space<vmem>>, vector<256x128xbf16>
    %cst_81 = arith.constant dense<0.000000e+00> : vector<16x128xf32>
    %101 = tpu.matmul %99, %100, %cst_81 {dimension_numbers = #tpu.dot_dimension_numbers<[1], [0], [0], [1], [0, 0, 1, 1], [], []>} : vector<16x256xbf16>, vector<256x128xbf16>, vector<16x128xf32> -> vector<16x128xf32>
    %c0_82 = arith.constant 0 : index
    %c0_83 = arith.constant 0 : index
    %102 = vector.load %arg29[%c0_82, %c0_83] : memref<1x128xf32, #tpu.memory_space<vmem>>, vector<1x128xf32>
    %103 = vector.broadcast %102 : vector<1x128xf32> to vector<16x128xf32>
    %104 = arith.addf %101, %103 : vector<16x128xf32>
    %c0_84 = arith.constant 0 : index
    %c0_85 = arith.constant 0 : index
    %105 = vector.load %arg36[%c0_84, %c0_85] : memref<16x128xf32, #tpu.memory_space<vmem>>, vector<16x128xf32>
    tpu.vector_store %arg36[%c0_84, %c0_85], %104 {strides = array<i32>} : memref<16x128xf32, #tpu.memory_space<vmem>>, vector<16x128xf32>,
    %106 = arith.truncf %75 : vector<16x128xf32> to vector<16x128xbf16>
    %c0_86 = arith.constant 0 : index
    %c0_87 = arith.constant 0 : index
    %107 = vector.load %arg30[%c0_86, %c0_87] : memref<128x128xbf16, #tpu.memory_space<vmem>>, vector<128x128xbf16>
    %cst_88 = arith.constant dense<0.000000e+00> : vector<16x128xf32>
    %108 = tpu.matmul %106, %107, %cst_88 {dimension_numbers = #tpu.dot_dimension_numbers<[1], [0], [0], [1], [0, 0, 1, 1], [], []>} : vector<16x128xbf16>, vector<128x128xbf16>, vector<16x128xf32> -> vector<16x128xf32>
    %c0_89 = arith.constant 0 : index
    %c0_90 = arith.constant 0 : index
    %109 = vector.load %arg31[%c0_89, %c0_90] : memref<1x128xf32, #tpu.memory_space<vmem>>, vector<1x128xf32>
    %110 = vector.broadcast %109 : vector<1x128xf32> to vector<16x128xf32>
    %111 = arith.addf %108, %110 : vector<16x128xf32>
    %cst_91 = arith.constant 0.000000e+00 : f32
    %112 = vector.broadcast %cst_91 : f32 to vector<16x128xf32>
    %113 = arith.maximumf %111, %112 : vector<16x128xf32>
    %114 = arith.truncf %113 : vector<16x128xf32> to vector<16x128xbf16>
    %c0_92 = arith.constant 0 : index
    %c0_93 = arith.constant 0 : index
    %115 = vector.load %arg32[%c0_92, %c0_93] : memref<128x256xbf16, #tpu.memory_space<vmem>>, vector<128x256xbf16>
    %cst_94 = arith.constant dense<0.000000e+00> : vector<16x256xf32>
    %116 = tpu.matmul %114, %115, %cst_94 {dimension_numbers = #tpu.dot_dimension_numbers<[1], [0], [0], [1], [0, 0, 1, 1], [], []>} : vector<16x128xbf16>, vector<128x256xbf16>, vector<16x256xf32> -> vector<16x256xf32>
    %c0_95 = arith.constant 0 : index
    %c0_96 = arith.constant 0 : index
    %117 = vector.load %arg33[%c0_95, %c0_96] : memref<1x256xf32, #tpu.memory_space<vmem>>, vector<1x256xf32>
    %118 = vector.broadcast %117 : vector<1x256xf32> to vector<16x256xf32>
    %119 = arith.addf %116, %118 : vector<16x256xf32>
    %120 = arith.negf %119 : vector<16x256xf32>
    %121 = math.exp %120 : vector<16x256xf32>
    %cst_97 = arith.constant 1.000000e+00 : f32
    %122 = vector.broadcast %cst_97 : f32 to vector<16x256xf32>
    %123 = arith.addf %122, %121 : vector<16x256xf32>
    %124 = arith.divf %122, %123 : vector<16x256xf32>
    %c0_98 = arith.constant 0 : index
    %c0_99 = arith.constant 0 : index
    %125 = vector.load %arg37[%c0_98, %c0_99] : memref<16x256xf32, #tpu.memory_space<vmem>>, vector<16x256xf32>
    tpu.vector_store %arg37[%c0_98, %c0_99], %124 {strides = array<i32>} : memref<16x256xf32, #tpu.memory_space<vmem>>, vector<16x256xf32>,
    return
  }
  func.func @transform_0(%arg0: i32) -> (i32, i32) {
    %c0_i32 = arith.constant 0 : i32
    %c0_i32_0 = arith.constant 0 : i32
    return %arg0, %c0_i32 : i32, i32
  }
  func.func @transform_1(%arg0: i32) -> (i32, i32) {
    %c0_i32 = arith.constant 0 : i32
    %c0_i32_0 = arith.constant 0 : i32
    return %arg0, %c0_i32 : i32, i32
  }
  func.func @transform_2(%arg0: i32) -> (i32, i32) {
    %c0_i32 = arith.constant 0 : i32
    %c0_i32_0 = arith.constant 0 : i32
    return %arg0, %c0_i32 : i32, i32
  }
  func.func @transform_3(%arg0: i32) -> (i32, i32) {
    %c0_i32 = arith.constant 0 : i32
    %c0_i32_0 = arith.constant 0 : i32
    %c0_i32_1 = arith.constant 0 : i32
    return %c0_i32, %c0_i32_0 : i32, i32
  }
  func.func @transform_4(%arg0: i32) -> (i32, i32) {
    %c0_i32 = arith.constant 0 : i32
    %c0_i32_0 = arith.constant 0 : i32
    %c0_i32_1 = arith.constant 0 : i32
    return %c0_i32, %c0_i32_0 : i32, i32
  }
  func.func @transform_5(%arg0: i32) -> (i32, i32) {
    %c0_i32 = arith.constant 0 : i32
    %c0_i32_0 = arith.constant 0 : i32
    %c0_i32_1 = arith.constant 0 : i32
    return %c0_i32, %c0_i32_0 : i32, i32
  }
  func.func @transform_6(%arg0: i32) -> (i32, i32) {
    %c0_i32 = arith.constant 0 : i32
    %c0_i32_0 = arith.constant 0 : i32
    %c0_i32_1 = arith.constant 0 : i32
    return %c0_i32, %c0_i32_0 : i32, i32
  }
  func.func @transform_7(%arg0: i32) -> (i32, i32) {
    %c0_i32 = arith.constant 0 : i32
    %c0_i32_0 = arith.constant 0 : i32
    %c0_i32_1 = arith.constant 0 : i32
    return %c0_i32, %c0_i32_0 : i32, i32
  }
  func.func @transform_8(%arg0: i32) -> (i32, i32) {
    %c0_i32 = arith.constant 0 : i32
    %c0_i32_0 = arith.constant 0 : i32
    %c0_i32_1 = arith.constant 0 : i32
    return %c0_i32, %c0_i32_0 : i32, i32
  }
  func.func @transform_9(%arg0: i32) -> (i32, i32) {
    %c0_i32 = arith.constant 0 : i32
    %c0_i32_0 = arith.constant 0 : i32
    %c0_i32_1 = arith.constant 0 : i32
    return %c0_i32, %c0_i32_0 : i32, i32
  }
  func.func @transform_10(%arg0: i32) -> (i32, i32) {
    %c0_i32 = arith.constant 0 : i32
    %c0_i32_0 = arith.constant 0 : i32
    %c0_i32_1 = arith.constant 0 : i32
    return %c0_i32, %c0_i32_0 : i32, i32
  }
  func.func @transform_11(%arg0: i32) -> (i32, i32) {
    %c0_i32 = arith.constant 0 : i32
    %c0_i32_0 = arith.constant 0 : i32
    %c0_i32_1 = arith.constant 0 : i32
    return %c0_i32, %c0_i32_0 : i32, i32
  }
  func.func @transform_12(%arg0: i32) -> (i32, i32) {
    %c0_i32 = arith.constant 0 : i32
    %c0_i32_0 = arith.constant 0 : i32
    %c0_i32_1 = arith.constant 0 : i32
    return %c0_i32, %c0_i32_0 : i32, i32
  }
  func.func @transform_13(%arg0: i32) -> (i32, i32) {
    %c0_i32 = arith.constant 0 : i32
    %c0_i32_0 = arith.constant 0 : i32
    %c0_i32_1 = arith.constant 0 : i32
    return %c0_i32, %c0_i32_0 : i32, i32
  }
  func.func @transform_14(%arg0: i32) -> (i32, i32) {
    %c0_i32 = arith.constant 0 : i32
    %c0_i32_0 = arith.constant 0 : i32
    %c0_i32_1 = arith.constant 0 : i32
    return %c0_i32, %c0_i32_0 : i32, i32
  }
  func.func @transform_15(%arg0: i32) -> (i32, i32) {
    %c0_i32 = arith.constant 0 : i32
    %c0_i32_0 = arith.constant 0 : i32
    %c0_i32_1 = arith.constant 0 : i32
    return %c0_i32, %c0_i32_0 : i32, i32
  }
  func.func @transform_16(%arg0: i32) -> (i32, i32) {
    %c0_i32 = arith.constant 0 : i32
    %c0_i32_0 = arith.constant 0 : i32
    %c0_i32_1 = arith.constant 0 : i32
    return %c0_i32, %c0_i32_0 : i32, i32
  }
  func.func @transform_17(%arg0: i32) -> (i32, i32) {
    %c0_i32 = arith.constant 0 : i32
    %c0_i32_0 = arith.constant 0 : i32
    %c0_i32_1 = arith.constant 0 : i32
    return %c0_i32, %c0_i32_0 : i32, i32
  }
  func.func @transform_18(%arg0: i32) -> (i32, i32) {
    %c0_i32 = arith.constant 0 : i32
    %c0_i32_0 = arith.constant 0 : i32
    %c0_i32_1 = arith.constant 0 : i32
    return %c0_i32, %c0_i32_0 : i32, i32
  }
  func.func @transform_19(%arg0: i32) -> (i32, i32) {
    %c0_i32 = arith.constant 0 : i32
    %c0_i32_0 = arith.constant 0 : i32
    %c0_i32_1 = arith.constant 0 : i32
    return %c0_i32, %c0_i32_0 : i32, i32
  }
  func.func @transform_20(%arg0: i32) -> (i32, i32) {
    %c0_i32 = arith.constant 0 : i32
    %c0_i32_0 = arith.constant 0 : i32
    %c0_i32_1 = arith.constant 0 : i32
    return %c0_i32, %c0_i32_0 : i32, i32
  }
  func.func @transform_21(%arg0: i32) -> (i32, i32) {
    %c0_i32 = arith.constant 0 : i32
    %c0_i32_0 = arith.constant 0 : i32
    %c0_i32_1 = arith.constant 0 : i32
    return %c0_i32, %c0_i32_0 : i32, i32
  }
  func.func @transform_22(%arg0: i32) -> (i32, i32) {
    %c0_i32 = arith.constant 0 : i32
    %c0_i32_0 = arith.constant 0 : i32
    %c0_i32_1 = arith.constant 0 : i32
    return %c0_i32, %c0_i32_0 : i32, i32
  }
  func.func @transform_23(%arg0: i32) -> (i32, i32) {
    %c0_i32 = arith.constant 0 : i32
    %c0_i32_0 = arith.constant 0 : i32
    %c0_i32_1 = arith.constant 0 : i32
    return %c0_i32, %c0_i32_0 : i32, i32
  }
  func.func @transform_24(%arg0: i32) -> (i32, i32) {
    %c0_i32 = arith.constant 0 : i32
    %c0_i32_0 = arith.constant 0 : i32
    %c0_i32_1 = arith.constant 0 : i32
    return %c0_i32, %c0_i32_0 : i32, i32
  }
  func.func @transform_25(%arg0: i32) -> (i32, i32) {
    %c0_i32 = arith.constant 0 : i32
    %c0_i32_0 = arith.constant 0 : i32
    %c0_i32_1 = arith.constant 0 : i32
    return %c0_i32, %c0_i32_0 : i32, i32
  }
  func.func @transform_26(%arg0: i32) -> (i32, i32) {
    %c0_i32 = arith.constant 0 : i32
    %c0_i32_0 = arith.constant 0 : i32
    %c0_i32_1 = arith.constant 0 : i32
    return %c0_i32, %c0_i32_0 : i32, i32
  }
  func.func @transform_27(%arg0: i32) -> (i32, i32) {
    %c0_i32 = arith.constant 0 : i32
    %c0_i32_0 = arith.constant 0 : i32
    %c0_i32_1 = arith.constant 0 : i32
    return %c0_i32, %c0_i32_0 : i32, i32
  }
  func.func @transform_28(%arg0: i32) -> (i32, i32) {
    %c0_i32 = arith.constant 0 : i32
    %c0_i32_0 = arith.constant 0 : i32
    %c0_i32_1 = arith.constant 0 : i32
    return %c0_i32, %c0_i32_0 : i32, i32
  }
  func.func @transform_29(%arg0: i32) -> (i32, i32) {
    %c0_i32 = arith.constant 0 : i32
    %c0_i32_0 = arith.constant 0 : i32
    %c0_i32_1 = arith.constant 0 : i32
    return %c0_i32, %c0_i32_0 : i32, i32
  }
  func.func @transform_30(%arg0: i32) -> (i32, i32) {
    %c0_i32 = arith.constant 0 : i32
    %c0_i32_0 = arith.constant 0 : i32
    %c0_i32_1 = arith.constant 0 : i32
    return %c0_i32, %c0_i32_0 : i32, i32
  }
  func.func @transform_31(%arg0: i32) -> (i32, i32) {
    %c0_i32 = arith.constant 0 : i32
    %c0_i32_0 = arith.constant 0 : i32
    %c0_i32_1 = arith.constant 0 : i32
    return %c0_i32, %c0_i32_0 : i32, i32
  }
  func.func @transform_32(%arg0: i32) -> (i32, i32) {
    %c0_i32 = arith.constant 0 : i32
    %c0_i32_0 = arith.constant 0 : i32
    %c0_i32_1 = arith.constant 0 : i32
    return %c0_i32, %c0_i32_0 : i32, i32
  }
  func.func @transform_33(%arg0: i32) -> (i32, i32) {
    %c0_i32 = arith.constant 0 : i32
    %c0_i32_0 = arith.constant 0 : i32
    return %arg0, %c0_i32 : i32, i32
  }
  func.func @transform_34(%arg0: i32) -> (i32, i32) {
    %c0_i32 = arith.constant 0 : i32
    %c0_i32_0 = arith.constant 0 : i32
    return %arg0, %c0_i32 : i32, i32
  }
  func.func @transform_35(%arg0: i32) -> (i32, i32) {
    %c0_i32 = arith.constant 0 : i32
    %c0_i32_0 = arith.constant 0 : i32
    return %arg0, %c0_i32 : i32, i32
  }
  func.func @transform_36(%arg0: i32) -> (i32, i32) {
    %c0_i32 = arith.constant 0 : i32
    %c0_i32_0 = arith.constant 0 : i32
    return %arg0, %c0_i32 : i32, i32
  }
}

module attributes {stable_mosaic.version = 11 : i64} {
  func.func @_fused_forward_kernel(%arg0: i32, %arg1: memref<16x256xbf16, #tpu.memory_space<vmem>>, %arg2: memref<16x128xbf16, #tpu.memory_space<vmem>>, %arg3: memref<16x256xbf16, #tpu.memory_space<vmem>>, %arg4: memref<256x512xbf16, #tpu.memory_space<vmem>>, %arg5: memref<1x512xf32, #tpu.memory_space<vmem>>, %arg6: memref<512x256xbf16, #tpu.memory_space<vmem>>, %arg7: memref<1x256xf32, #tpu.memory_space<vmem>>, %arg8: memref<128x256xbf16, #tpu.memory_space<vmem>>, %arg9: memref<1x256xf32, #tpu.memory_space<vmem>>, %arg10: memref<256x128xbf16, #tpu.memory_space<vmem>>, %arg11: memref<1x128xf32, #tpu.memory_space<vmem>>, %arg12: memref<256x128xbf16, #tpu.memory_space<vmem>>, %arg13: memref<1x128xf32, #tpu.memory_space<vmem>>, %arg14: memref<128x128xbf16, #tpu.memory_space<vmem>>, %arg15: memref<1x128xf32, #tpu.memory_space<vmem>>, %arg16: memref<256x128xbf16, #tpu.memory_space<vmem>>, %arg17: memref<128x128xbf16, #tpu.memory_space<vmem>>, %arg18: memref<128x128xbf16, #tpu.memory_space<vmem>>, %arg19: memref<1x128xf32, #tpu.memory_space<vmem>>, %arg20: memref<128x512xbf16, #tpu.memory_space<vmem>>, %arg21: memref<1x512xf32, #tpu.memory_space<vmem>>, %arg22: memref<256x512xbf16, #tpu.memory_space<vmem>>, %arg23: memref<1x512xf32, #tpu.memory_space<vmem>>, %arg24: memref<512x256xbf16, #tpu.memory_space<vmem>>, %arg25: memref<1x256xf32, #tpu.memory_space<vmem>>, %arg26: memref<128x256xbf16, #tpu.memory_space<vmem>>, %arg27: memref<1x256xf32, #tpu.memory_space<vmem>>, %arg28: memref<256x128xbf16, #tpu.memory_space<vmem>>, %arg29: memref<1x128xf32, #tpu.memory_space<vmem>>, %arg30: memref<128x128xbf16, #tpu.memory_space<vmem>>, %arg31: memref<1x128xf32, #tpu.memory_space<vmem>>, %arg32: memref<128x256xbf16, #tpu.memory_space<vmem>>, %arg33: memref<1x256xf32, #tpu.memory_space<vmem>>, %arg34: memref<16x128xf32, #tpu.memory_space<vmem>>, %arg35: memref<16x256xf32, #tpu.memory_space<vmem>>, %arg36: memref<16x128xf32, #tpu.memory_space<vmem>>, %arg37: memref<16x256xf32, #tpu.memory_space<vmem>>) attributes {dimension_semantics = [#tpu.dimension_semantics<parallel>], iteration_bounds = array<i64: 1>, scalar_prefetch = 0 : i64, scratch_operands = 0 : i64, tpu.core_type = #tpu.core_type<tc>, window_params = [{transform_indices = @transform_0, window_bounds = array<i64: 16, 256>}, {transform_indices = @transform_1, window_bounds = array<i64: 16, 128>}, {transform_indices = @transform_2, window_bounds = array<i64: 16, 256>}, {pipeline_mode = #tpu.pipeline_mode<synchronous>, transform_indices = @transform_3, window_bounds = array<i64: 256, 512>}, {pipeline_mode = #tpu.pipeline_mode<synchronous>, transform_indices = @transform_4, window_bounds = array<i64: 1, 512>}, {pipeline_mode = #tpu.pipeline_mode<synchronous>, transform_indices = @transform_5, window_bounds = array<i64: 512, 256>}, {pipeline_mode = #tpu.pipeline_mode<synchronous>, transform_indices = @transform_6, window_bounds = array<i64: 1, 256>}, {pipeline_mode = #tpu.pipeline_mode<synchronous>, transform_indices = @transform_7, window_bounds = array<i64: 128, 256>}, {pipeline_mode = #tpu.pipeline_mode<synchronous>, transform_indices = @transform_8, window_bounds = array<i64: 1, 256>}, {pipeline_mode = #tpu.pipeline_mode<synchronous>, transform_indices = @transform_9, window_bounds = array<i64: 256, 128>}, {pipeline_mode = #tpu.pipeline_mode<synchronous>, transform_indices = @transform_10, window_bounds = array<i64: 1, 128>}, {pipeline_mode = #tpu.pipeline_mode<synchronous>, transform_indices = @transform_11, window_bounds = array<i64: 256, 128>}, {pipeline_mode = #tpu.pipeline_mode<synchronous>, transform_indices = @transform_12, window_bounds = array<i64: 1, 128>}, {pipeline_mode = #tpu.pipeline_mode<synchronous>, transform_indices = @transform_13, window_bounds = array<i64: 128, 128>}, {pipeline_mode = #tpu.pipeline_mode<synchronous>, transform_indices = @transform_14, window_bounds = array<i64: 1, 128>}, {pipeline_mode = #tpu.pipeline_mode<synchronous>, transform_indices = @transform_15, window_bounds = array<i64: 256, 128>}, {pipeline_mode = #tpu.pipeline_mode<synchronous>, transform_indices = @transform_16, window_bounds = array<i64: 128, 128>}, {pipeline_mode = #tpu.pipeline_mode<synchronous>, transform_indices = @transform_17, window_bounds = array<i64: 128, 128>}, {pipeline_mode = #tpu.pipeline_mode<synchronous>, transform_indices = @transform_18, window_bounds = array<i64: 1, 128>}, {pipeline_mode = #tpu.pipeline_mode<synchronous>, transform_indices = @transform_19, window_bounds = array<i64: 128, 512>}, {pipeline_mode = #tpu.pipeline_mode<synchronous>, transform_indices = @transform_20, window_bounds = array<i64: 1, 512>}, {pipeline_mode = #tpu.pipeline_mode<synchronous>, transform_indices = @transform_21, window_bounds = array<i64: 256, 512>}, {pipeline_mode = #tpu.pipeline_mode<synchronous>, transform_indices = @transform_22, window_bounds = array<i64: 1, 512>}, {pipeline_mode = #tpu.pipeline_mode<synchronous>, transform_indices = @transform_23, window_bounds = array<i64: 512, 256>}, {pipeline_mode = #tpu.pipeline_mode<synchronous>, transform_indices = @transform_24, window_bounds = array<i64: 1, 256>}, {pipeline_mode = #tpu.pipeline_mode<synchronous>, transform_indices = @transform_25, window_bounds = array<i64: 128, 256>}, {pipeline_mode = #tpu.pipeline_mode<synchronous>, transform_indices = @transform_26, window_bounds = array<i64: 1, 256>}, {pipeline_mode = #tpu.pipeline_mode<synchronous>, transform_indices = @transform_27, window_bounds = array<i64: 256, 128>}, {pipeline_mode = #tpu.pipeline_mode<synchronous>, transform_indices = @transform_28, window_bounds = array<i64: 1, 128>}, {pipeline_mode = #tpu.pipeline_mode<synchronous>, transform_indices = @transform_29, window_bounds = array<i64: 128, 128>}, {pipeline_mode = #tpu.pipeline_mode<synchronous>, transform_indices = @transform_30, window_bounds = array<i64: 1, 128>}, {pipeline_mode = #tpu.pipeline_mode<synchronous>, transform_indices = @transform_31, window_bounds = array<i64: 128, 256>}, {pipeline_mode = #tpu.pipeline_mode<synchronous>, transform_indices = @transform_32, window_bounds = array<i64: 1, 256>}, {transform_indices = @transform_33, window_bounds = array<i64: 16, 128>}, {transform_indices = @transform_34, window_bounds = array<i64: 16, 256>}, {transform_indices = @transform_35, window_bounds = array<i64: 16, 128>}, {transform_indices = @transform_36, window_bounds = array<i64: 16, 256>}]} {
    %c0 = arith.constant 0 : index
    %c0_0 = arith.constant 0 : index
    %0 = vector.load %arg1[%c0, %c0_0] : memref<16x256xbf16, #tpu.memory_space<vmem>>, vector<16x256xbf16>
    %c0_1 = arith.constant 0 : index
    %c0_2 = arith.constant 0 : index
    %1 = vector.load %arg4[%c0_1, %c0_2] : memref<256x512xbf16, #tpu.memory_space<vmem>>, vector<256x512xbf16>
    %cst = arith.constant dense<0.000000e+00> : vector<16x512xf32>
    %2 = tpu.matmul %0, %1, %cst {dimension_numbers = #tpu.dot_dimension_numbers<[1], [0], [0], [1], [0, 0, 1, 1], [], []>} : vector<16x256xbf16>, vector<256x512xbf16>, vector<16x512xf32> -> vector<16x512xf32>
    %c0_3 = arith.constant 0 : index
    %c0_4 = arith.constant 0 : index
    %3 = vector.load %arg5[%c0_3, %c0_4] : memref<1x512xf32, #tpu.memory_space<vmem>>, vector<1x512xf32>
    %4 = vector.broadcast %3 : vector<1x512xf32> to vector<16x512xf32>
    %5 = arith.addf %2, %4 : vector<16x512xf32>
    %cst_5 = arith.constant 0.000000e+00 : f32
    %6 = vector.broadcast %cst_5 : f32 to vector<16x512xf32>
    %7 = arith.maximumf %5, %6 : vector<16x512xf32>
    %8 = arith.truncf %7 : vector<16x512xf32> to vector<16x512xbf16>
    %c0_6 = arith.constant 0 : index
    %c0_7 = arith.constant 0 : index
    %9 = vector.load %arg6[%c0_6, %c0_7] : memref<512x256xbf16, #tpu.memory_space<vmem>>, vector<512x256xbf16>
    %cst_8 = arith.constant dense<0.000000e+00> : vector<16x256xf32>
    %10 = tpu.matmul %8, %9, %cst_8 {dimension_numbers = #tpu.dot_dimension_numbers<[1], [0], [0], [1], [0, 0, 1, 1], [], []>} : vector<16x512xbf16>, vector<512x256xbf16>, vector<16x256xf32> -> vector<16x256xf32>
    %c0_9 = arith.constant 0 : index
    %c0_10 = arith.constant 0 : index
    %11 = vector.load %arg7[%c0_9, %c0_10] : memref<1x256xf32, #tpu.memory_space<vmem>>, vector<1x256xf32>
    %12 = vector.broadcast %11 : vector<1x256xf32> to vector<16x256xf32>
    %13 = arith.addf %10, %12 : vector<16x256xf32>
    %cst_11 = arith.constant 0.000000e+00 : f32
    %14 = vector.broadcast %cst_11 : f32 to vector<16x256xf32>
    %15 = arith.maximumf %13, %14 : vector<16x256xf32>
    %c0_12 = arith.constant 0 : index
    %c0_13 = arith.constant 0 : index
    %16 = vector.load %arg2[%c0_12, %c0_13] : memref<16x128xbf16, #tpu.memory_space<vmem>>, vector<16x128xbf16>
    %c0_14 = arith.constant 0 : index
    %c0_15 = arith.constant 0 : index
    %17 = vector.load %arg8[%c0_14, %c0_15] : memref<128x256xbf16, #tpu.memory_space<vmem>>, vector<128x256xbf16>
    %cst_16 = arith.constant dense<0.000000e+00> : vector<16x256xf32>
    %18 = tpu.matmul %16, %17, %cst_16 {dimension_numbers = #tpu.dot_dimension_numbers<[1], [0], [0], [1], [0, 0, 1, 1], [], []>} : vector<16x128xbf16>, vector<128x256xbf16>, vector<16x256xf32> -> vector<16x256xf32>
    %c0_17 = arith.constant 0 : index
    %c0_18 = arith.constant 0 : index
    %19 = vector.load %arg9[%c0_17, %c0_18] : memref<1x256xf32, #tpu.memory_space<vmem>>, vector<1x256xf32>
    %20 = vector.broadcast %19 : vector<1x256xf32> to vector<16x256xf32>
    %21 = arith.addf %18, %20 : vector<16x256xf32>
    %cst_19 = arith.constant 0.000000e+00 : f32
    %22 = vector.broadcast %cst_19 : f32 to vector<16x256xf32>
    %23 = arith.maximumf %21, %22 : vector<16x256xf32>
    %24 = arith.truncf %23 : vector<16x256xf32> to vector<16x256xbf16>
    %c0_20 = arith.constant 0 : index
    %c0_21 = arith.constant 0 : index
    %25 = vector.load %arg10[%c0_20, %c0_21] : memref<256x128xbf16, #tpu.memory_space<vmem>>, vector<256x128xbf16>
    %cst_22 = arith.constant dense<0.000000e+00> : vector<16x128xf32>
    %26 = tpu.matmul %24, %25, %cst_22 {dimension_numbers = #tpu.dot_dimension_numbers<[1], [0], [0], [1], [0, 0, 1, 1], [], []>} : vector<16x256xbf16>, vector<256x128xbf16>, vector<16x128xf32> -> vector<16x128xf32>
    %c0_23 = arith.constant 0 : index
    %c0_24 = arith.constant 0 : index
    %27 = vector.load %arg11[%c0_23, %c0_24] : memref<1x128xf32, #tpu.memory_space<vmem>>, vector<1x128xf32>
    %28 = vector.broadcast %27 : vector<1x128xf32> to vector<16x128xf32>
    %29 = arith.addf %26, %28 : vector<16x128xf32>
    %cst_25 = arith.constant 0.000000e+00 : f32
    %30 = vector.broadcast %cst_25 : f32 to vector<16x128xf32>
    %31 = arith.maximumf %29, %30 : vector<16x128xf32>
    %c0_26 = arith.constant 0 : index
    %c0_27 = arith.constant 0 : index
    %32 = vector.load %arg3[%c0_26, %c0_27] : memref<16x256xbf16, #tpu.memory_space<vmem>>, vector<16x256xbf16>
    %c0_28 = arith.constant 0 : index
    %c0_29 = arith.constant 0 : index
    %33 = vector.load %arg12[%c0_28, %c0_29] : memref<256x128xbf16, #tpu.memory_space<vmem>>, vector<256x128xbf16>
    %cst_30 = arith.constant dense<0.000000e+00> : vector<16x128xf32>
    %34 = tpu.matmul %32, %33, %cst_30 {dimension_numbers = #tpu.dot_dimension_numbers<[1], [0], [0], [1], [0, 0, 1, 1], [], []>} : vector<16x256xbf16>, vector<256x128xbf16>, vector<16x128xf32> -> vector<16x128xf32>
    %c0_31 = arith.constant 0 : index
    %c0_32 = arith.constant 0 : index
    %35 = vector.load %arg13[%c0_31, %c0_32] : memref<1x128xf32, #tpu.memory_space<vmem>>, vector<1x128xf32>
    %36 = vector.broadcast %35 : vector<1x128xf32> to vector<16x128xf32>
    %37 = arith.addf %34, %36 : vector<16x128xf32>
    %cst_33 = arith.constant 0.000000e+00 : f32
    %38 = vector.broadcast %cst_33 : f32 to vector<16x128xf32>
    %39 = arith.maximumf %37, %38 : vector<16x128xf32>
    %40 = arith.truncf %39 : vector<16x128xf32> to vector<16x128xbf16>
    %c0_34 = arith.constant 0 : index
    %c0_35 = arith.constant 0 : index
    %41 = vector.load %arg14[%c0_34, %c0_35] : memref<128x128xbf16, #tpu.memory_space<vmem>>, vector<128x128xbf16>
    %cst_36 = arith.constant dense<0.000000e+00> : vector<16x128xf32>
    %42 = tpu.matmul %40, %41, %cst_36 {dimension_numbers = #tpu.dot_dimension_numbers<[1], [0], [0], [1], [0, 0, 1, 1], [], []>} : vector<16x128xbf16>, vector<128x128xbf16>, vector<16x128xf32> -> vector<16x128xf32>
    %c0_37 = arith.constant 0 : index
    %c0_38 = arith.constant 0 : index
    %43 = vector.load %arg15[%c0_37, %c0_38] : memref<1x128xf32, #tpu.memory_space<vmem>>, vector<1x128xf32>
    %44 = vector.broadcast %43 : vector<1x128xf32> to vector<16x128xf32>
    %45 = arith.addf %42, %44 : vector<16x128xf32>
    %cst_39 = arith.constant 0.000000e+00 : f32
    %46 = vector.broadcast %cst_39 : f32 to vector<16x128xf32>
    %47 = arith.maximumf %45, %46 : vector<16x128xf32>
    %48 = arith.truncf %15 : vector<16x256xf32> to vector<16x256xbf16>
    %c0_40 = arith.constant 0 : index
    %c0_41 = arith.constant 0 : index
    %49 = vector.load %arg16[%c0_40, %c0_41] : memref<256x128xbf16, #tpu.memory_space<vmem>>, vector<256x128xbf16>
    %cst_42 = arith.constant dense<0.000000e+00> : vector<16x128xf32>
    %50 = tpu.matmul %48, %49, %cst_42 {dimension_numbers = #tpu.dot_dimension_numbers<[1], [0], [0], [1], [0, 0, 1, 1], [], []>} : vector<16x256xbf16>, vector<256x128xbf16>, vector<16x128xf32> -> vector<16x128xf32>
    %51 = arith.truncf %31 : vector<16x128xf32> to vector<16x128xbf16>
    %c0_43 = arith.constant 0 : index
    %c0_44 = arith.constant 0 : index
    %52 = vector.load %arg17[%c0_43, %c0_44] : memref<128x128xbf16, #tpu.memory_space<vmem>>, vector<128x128xbf16>
    %cst_45 = arith.constant dense<0.000000e+00> : vector<16x128xf32>
    %53 = tpu.matmul %51, %52, %cst_45 {dimension_numbers = #tpu.dot_dimension_numbers<[1], [0], [0], [1], [0, 0, 1, 1], [], []>} : vector<16x128xbf16>, vector<128x128xbf16>, vector<16x128xf32> -> vector<16x128xf32>
    %54 = arith.addf %50, %53 : vector<16x128xf32>
    %55 = arith.truncf %47 : vector<16x128xf32> to vector<16x128xbf16>
    %c0_46 = arith.constant 0 : index
    %c0_47 = arith.constant 0 : index
    %56 = vector.load %arg18[%c0_46, %c0_47] : memref<128x128xbf16, #tpu.memory_space<vmem>>, vector<128x128xbf16>
    %cst_48 = arith.constant dense<0.000000e+00> : vector<16x128xf32>
    %57 = tpu.matmul %55, %56, %cst_48 {dimension_numbers = #tpu.dot_dimension_numbers<[1], [0], [0], [1], [0, 0, 1, 1], [], []>} : vector<16x128xbf16>, vector<128x128xbf16>, vector<16x128xf32> -> vector<16x128xf32>
    %58 = arith.addf %54, %57 : vector<16x128xf32>
    %c0_49 = arith.constant 0 : index
    %c0_50 = arith.constant 0 : index
    %59 = vector.load %arg19[%c0_49, %c0_50] : memref<1x128xf32, #tpu.memory_space<vmem>>, vector<1x128xf32>
    %60 = vector.broadcast %59 : vector<1x128xf32> to vector<16x128xf32>
    %61 = arith.addf %58, %60 : vector<16x128xf32>
    %cst_51 = arith.constant 0.000000e+00 : f32
    %62 = vector.broadcast %cst_51 : f32 to vector<16x128xf32>
    %63 = arith.maximumf %61, %62 : vector<16x128xf32>
    %c0_52 = arith.constant 0 : index
    %c0_53 = arith.constant 0 : index
    %64 = vector.load %arg34[%c0_52, %c0_53] : memref<16x128xf32, #tpu.memory_space<vmem>>, vector<16x128xf32>
    tpu.vector_store %arg34[%c0_52, %c0_53], %63 {strides = array<i32>} : memref<16x128xf32, #tpu.memory_space<vmem>>, vector<16x128xf32>,
    %65 = arith.truncf %63 : vector<16x128xf32> to vector<16x128xbf16>
    %c0_54 = arith.constant 0 : index
    %c0_55 = arith.constant 0 : index
    %66 = vector.load %arg20[%c0_54, %c0_55] : memref<128x512xbf16, #tpu.memory_space<vmem>>, vector<128x512xbf16>
    %cst_56 = arith.constant dense<0.000000e+00> : vector<16x512xf32>
    %67 = tpu.matmul %65, %66, %cst_56 {dimension_numbers = #tpu.dot_dimension_numbers<[1], [0], [0], [1], [0, 0, 1, 1], [], []>} : vector<16x128xbf16>, vector<128x512xbf16>, vector<16x512xf32> -> vector<16x512xf32>
    %c0_57 = arith.constant 0 : index
    %c0_58 = arith.constant 0 : index
    %68 = vector.load %arg21[%c0_57, %c0_58] : memref<1x512xf32, #tpu.memory_space<vmem>>, vector<1x512xf32>
    %69 = vector.broadcast %68 : vector<1x512xf32> to vector<16x512xf32>
    %70 = arith.addf %67, %69 : vector<16x512xf32>
    %cst_59 = arith.constant 0.000000e+00 : f32
    %71 = vector.broadcast %cst_59 : f32 to vector<16x512xf32>
    %72 = arith.maximumf %70, %71 : vector<16x512xf32>
    %73 = vector.extract_strided_slice %72 {offsets = [0, 0], sizes = [16, 256], strides = [1, 1]} : vector<16x512xf32> to vector<16x256xf32>
    %74 = vector.extract_strided_slice %72 {offsets = [0, 256], sizes = [16, 128], strides = [1, 1]} : vector<16x512xf32> to vector<16x128xf32>
    %75 = vector.extract_strided_slice %72 {offsets = [0, 384], sizes = [16, 128], strides = [1, 1]} : vector<16x512xf32> to vector<16x128xf32>
    %76 = arith.truncf %73 : vector<16x256xf32> to vector<16x256xbf16>
    %c0_60 = arith.constant 0 : index
    %c0_61 = arith.constant 0 : index
    %77 = vector.load %arg22[%c0_60, %c0_61] : memref<256x512xbf16, #tpu.memory_space<vmem>>, vector<256x512xbf16>
    %cst_62 = arith.constant dense<0.000000e+00> : vector<16x512xf32>
    %78 = tpu.matmul %76, %77, %cst_62 {dimension_numbers = #tpu.dot_dimension_numbers<[1], [0], [0], [1], [0, 0, 1, 1], [], []>} : vector<16x256xbf16>, vector<256x512xbf16>, vector<16x512xf32> -> vector<16x512xf32>
    %c0_63 = arith.constant 0 : index
    %c0_64 = arith.constant 0 : index
    %79 = vector.load %arg23[%c0_63, %c0_64] : memref<1x512xf32, #tpu.memory_space<vmem>>, vector<1x512xf32>
    %80 = vector.broadcast %79 : vector<1x512xf32> to vector<16x512xf32>
    %81 = arith.addf %78, %80 : vector<16x512xf32>
    %cst_65 = arith.constant 0.000000e+00 : f32
    %82 = vector.broadcast %cst_65 : f32 to vector<16x512xf32>
    %83 = arith.maximumf %81, %82 : vector<16x512xf32>
    %84 = arith.truncf %83 : vector<16x512xf32> to vector<16x512xbf16>
    %c0_66 = arith.constant 0 : index
    %c0_67 = arith.constant 0 : index
    %85 = vector.load %arg24[%c0_66, %c0_67] : memref<512x256xbf16, #tpu.memory_space<vmem>>, vector<512x256xbf16>
    %cst_68 = arith.constant dense<0.000000e+00> : vector<16x256xf32>
    %86 = tpu.matmul %84, %85, %cst_68 {dimension_numbers = #tpu.dot_dimension_numbers<[1], [0], [0], [1], [0, 0, 1, 1], [], []>} : vector<16x512xbf16>, vector<512x256xbf16>, vector<16x256xf32> -> vector<16x256xf32>
    %c0_69 = arith.constant 0 : index
    %c0_70 = arith.constant 0 : index
    %87 = vector.load %arg25[%c0_69, %c0_70] : memref<1x256xf32, #tpu.memory_space<vmem>>, vector<1x256xf32>
    %88 = vector.broadcast %87 : vector<1x256xf32> to vector<16x256xf32>
    %89 = arith.addf %86, %88 : vector<16x256xf32>
    %c0_71 = arith.constant 0 : index
    %c0_72 = arith.constant 0 : index
    %90 = vector.load %arg35[%c0_71, %c0_72] : memref<16x256xf32, #tpu.memory_space<vmem>>, vector<16x256xf32>
    tpu.vector_store %arg35[%c0_71, %c0_72], %89 {strides = array<i32>} : memref<16x256xf32, #tpu.memory_space<vmem>>, vector<16x256xf32>,
    %91 = arith.truncf %74 : vector<16x128xf32> to vector<16x128xbf16>
    %c0_73 = arith.constant 0 : index
    %c0_74 = arith.constant 0 : index
    %92 = vector.load %arg26[%c0_73, %c0_74] : memref<128x256xbf16, #tpu.memory_space<vmem>>, vector<128x256xbf16>
    %cst_75 = arith.constant dense<0.000000e+00> : vector<16x256xf32>
    %93 = tpu.matmul %91, %92, %cst_75 {dimension_numbers = #tpu.dot_dimension_numbers<[1], [0], [0], [1], [0, 0, 1, 1], [], []>} : vector<16x128xbf16>, vector<128x256xbf16>, vector<16x256xf32> -> vector<16x256xf32>
    %c0_76 = arith.constant 0 : index
    %c0_77 = arith.constant 0 : index
    %94 = vector.load %arg27[%c0_76, %c0_77] : memref<1x256xf32, #tpu.memory_space<vmem>>, vector<1x256xf32>
    %95 = vector.broadcast %94 : vector<1x256xf32> to vector<16x256xf32>
    %96 = arith.addf %93, %95 : vector<16x256xf32>
    %cst_78 = arith.constant 0.000000e+00 : f32
    %97 = vector.broadcast %cst_78 : f32 to vector<16x256xf32>
    %98 = arith.maximumf %96, %97 : vector<16x256xf32>
    %99 = arith.truncf %98 : vector<16x256xf32> to vector<16x256xbf16>
    %c0_79 = arith.constant 0 : index
    %c0_80 = arith.constant 0 : index
    %100 = vector.load %arg28[%c0_79, %c0_80] : memref<256x128xbf16, #tpu.memory_space<vmem>>, vector<256x128xbf16>
    %cst_81 = arith.constant dense<0.000000e+00> : vector<16x128xf32>
    %101 = tpu.matmul %99, %100, %cst_81 {dimension_numbers = #tpu.dot_dimension_numbers<[1], [0], [0], [1], [0, 0, 1, 1], [], []>} : vector<16x256xbf16>, vector<256x128xbf16>, vector<16x128xf32> -> vector<16x128xf32>
    %c0_82 = arith.constant 0 : index
    %c0_83 = arith.constant 0 : index
    %102 = vector.load %arg29[%c0_82, %c0_83] : memref<1x128xf32, #tpu.memory_space<vmem>>, vector<1x128xf32>
    %103 = vector.broadcast %102 : vector<1x128xf32> to vector<16x128xf32>
    %104 = arith.addf %101, %103 : vector<16x128xf32>
    %c0_84 = arith.constant 0 : index
    %c0_85 = arith.constant 0 : index
    %105 = vector.load %arg36[%c0_84, %c0_85] : memref<16x128xf32, #tpu.memory_space<vmem>>, vector<16x128xf32>
    tpu.vector_store %arg36[%c0_84, %c0_85], %104 {strides = array<i32>} : memref<16x128xf32, #tpu.memory_space<vmem>>, vector<16x128xf32>,
    %106 = arith.truncf %75 : vector<16x128xf32> to vector<16x128xbf16>
    %c0_86 = arith.constant 0 : index
    %c0_87 = arith.constant 0 : index
    %107 = vector.load %arg30[%c0_86, %c0_87] : memref<128x128xbf16, #tpu.memory_space<vmem>>, vector<128x128xbf16>
    %cst_88 = arith.constant dense<0.000000e+00> : vector<16x128xf32>
    %108 = tpu.matmul %106, %107, %cst_88 {dimension_numbers = #tpu.dot_dimension_numbers<[1], [0], [0], [1], [0, 0, 1, 1], [], []>} : vector<16x128xbf16>, vector<128x128xbf16>, vector<16x128xf32> -> vector<16x128xf32>
    %c0_89 = arith.constant 0 : index
    %c0_90 = arith.constant 0 : index
    %109 = vector.load %arg31[%c0_89, %c0_90] : memref<1x128xf32, #tpu.memory_space<vmem>>, vector<1x128xf32>
    %110 = vector.broadcast %109 : vector<1x128xf32> to vector<16x128xf32>
    %111 = arith.addf %108, %110 : vector<16x128xf32>
    %cst_91 = arith.constant 0.000000e+00 : f32
    %112 = vector.broadcast %cst_91 : f32 to vector<16x128xf32>
    %113 = arith.maximumf %111, %112 : vector<16x128xf32>
    %114 = arith.truncf %113 : vector<16x128xf32> to vector<16x128xbf16>
    %c0_92 = arith.constant 0 : index
    %c0_93 = arith.constant 0 : index
    %115 = vector.load %arg32[%c0_92, %c0_93] : memref<128x256xbf16, #tpu.memory_space<vmem>>, vector<128x256xbf16>
    %cst_94 = arith.constant dense<0.000000e+00> : vector<16x256xf32>
    %116 = tpu.matmul %114, %115, %cst_94 {dimension_numbers = #tpu.dot_dimension_numbers<[1], [0], [0], [1], [0, 0, 1, 1], [], []>} : vector<16x128xbf16>, vector<128x256xbf16>, vector<16x256xf32> -> vector<16x256xf32>
    %c0_95 = arith.constant 0 : index
    %c0_96 = arith.constant 0 : index
    %117 = vector.load %arg33[%c0_95, %c0_96] : memref<1x256xf32, #tpu.memory_space<vmem>>, vector<1x256xf32>
    %118 = vector.broadcast %117 : vector<1x256xf32> to vector<16x256xf32>
    %119 = arith.addf %116, %118 : vector<16x256xf32>
    %120 = arith.negf %119 : vector<16x256xf32>
    %121 = math.exp %120 : vector<16x256xf32>
    %cst_97 = arith.constant 1.000000e+00 : f32
    %122 = vector.broadcast %cst_97 : f32 to vector<16x256xf32>
    %123 = arith.addf %122, %121 : vector<16x256xf32>
    %124 = arith.divf %122, %123 : vector<16x256xf32>
    %c0_98 = arith.constant 0 : index
    %c0_99 = arith.constant 0 : index
    %125 = vector.load %arg37[%c0_98, %c0_99] : memref<16x256xf32, #tpu.memory_space<vmem>>, vector<16x256xf32>
    tpu.vector_store %arg37[%c0_98, %c0_99], %124 {strides = array<i32>} : memref<16x256xf32, #tpu.memory_space<vmem>>, vector<16x256xf32>,
    return
  }
  func.func @transform_0(%arg0: i32) -> (i32, i32) {
    %c0_i32 = arith.constant 0 : i32
    %c0_i32_0 = arith.constant 0 : i32
    return %arg0, %c0_i32 : i32, i32
  }
  func.func @transform_1(%arg0: i32) -> (i32, i32) {
    %c0_i32 = arith.constant 0 : i32
    %c0_i32_0 = arith.constant 0 : i32
    return %arg0, %c0_i32 : i32, i32
  }
  func.func @transform_2(%arg0: i32) -> (i32, i32) {
    %c0_i32 = arith.constant 0 : i32
    %c0_i32_0 = arith.constant 0 : i32
    return %arg0, %c0_i32 : i32, i32
  }
  func.func @transform_3(%arg0: i32) -> (i32, i32) {
    %c0_i32 = arith.constant 0 : i32
    %c0_i32_0 = arith.constant 0 : i32
    %c0_i32_1 = arith.constant 0 : i32
    return %c0_i32, %c0_i32_0 : i32, i32
  }
  func.func @transform_4(%arg0: i32) -> (i32, i32) {
    %c0_i32 = arith.constant 0 : i32
    %c0_i32_0 = arith.constant 0 : i32
    %c0_i32_1 = arith.constant 0 : i32
    return %c0_i32, %c0_i32_0 : i32, i32
  }
  func.func @transform_5(%arg0: i32) -> (i32, i32) {
    %c0_i32 = arith.constant 0 : i32
    %c0_i32_0 = arith.constant 0 : i32
    %c0_i32_1 = arith.constant 0 : i32
    return %c0_i32, %c0_i32_0 : i32, i32
  }
  func.func @transform_6(%arg0: i32) -> (i32, i32) {
    %c0_i32 = arith.constant 0 : i32
    %c0_i32_0 = arith.constant 0 : i32
    %c0_i32_1 = arith.constant 0 : i32
    return %c0_i32, %c0_i32_0 : i32, i32
  }
  func.func @transform_7(%arg0: i32) -> (i32, i32) {
    %c0_i32 = arith.constant 0 : i32
    %c0_i32_0 = arith.constant 0 : i32
    %c0_i32_1 = arith.constant 0 : i32
    return %c0_i32, %c0_i32_0 : i32, i32
  }
  func.func @transform_8(%arg0: i32) -> (i32, i32) {
    %c0_i32 = arith.constant 0 : i32
    %c0_i32_0 = arith.constant 0 : i32
    %c0_i32_1 = arith.constant 0 : i32
    return %c0_i32, %c0_i32_0 : i32, i32
  }
  func.func @transform_9(%arg0: i32) -> (i32, i32) {
    %c0_i32 = arith.constant 0 : i32
    %c0_i32_0 = arith.constant 0 : i32
    %c0_i32_1 = arith.constant 0 : i32
    return %c0_i32, %c0_i32_0 : i32, i32
  }
  func.func @transform_10(%arg0: i32) -> (i32, i32) {
    %c0_i32 = arith.constant 0 : i32
    %c0_i32_0 = arith.constant 0 : i32
    %c0_i32_1 = arith.constant 0 : i32
    return %c0_i32, %c0_i32_0 : i32, i32
  }
  func.func @transform_11(%arg0: i32) -> (i32, i32) {
    %c0_i32 = arith.constant 0 : i32
    %c0_i32_0 = arith.constant 0 : i32
    %c0_i32_1 = arith.constant 0 : i32
    return %c0_i32, %c0_i32_0 : i32, i32
  }
  func.func @transform_12(%arg0: i32) -> (i32, i32) {
    %c0_i32 = arith.constant 0 : i32
    %c0_i32_0 = arith.constant 0 : i32
    %c0_i32_1 = arith.constant 0 : i32
    return %c0_i32, %c0_i32_0 : i32, i32
  }
  func.func @transform_13(%arg0: i32) -> (i32, i32) {
    %c0_i32 = arith.constant 0 : i32
    %c0_i32_0 = arith.constant 0 : i32
    %c0_i32_1 = arith.constant 0 : i32
    return %c0_i32, %c0_i32_0 : i32, i32
  }
  func.func @transform_14(%arg0: i32) -> (i32, i32) {
    %c0_i32 = arith.constant 0 : i32
    %c0_i32_0 = arith.constant 0 : i32
    %c0_i32_1 = arith.constant 0 : i32
    return %c0_i32, %c0_i32_0 : i32, i32
  }
  func.func @transform_15(%arg0: i32) -> (i32, i32) {
    %c0_i32 = arith.constant 0 : i32
    %c0_i32_0 = arith.constant 0 : i32
    %c0_i32_1 = arith.constant 0 : i32
    return %c0_i32, %c0_i32_0 : i32, i32
  }
  func.func @transform_16(%arg0: i32) -> (i32, i32) {
    %c0_i32 = arith.constant 0 : i32
    %c0_i32_0 = arith.constant 0 : i32
    %c0_i32_1 = arith.constant 0 : i32
    return %c0_i32, %c0_i32_0 : i32, i32
  }
  func.func @transform_17(%arg0: i32) -> (i32, i32) {
    %c0_i32 = arith.constant 0 : i32
    %c0_i32_0 = arith.constant 0 : i32
    %c0_i32_1 = arith.constant 0 : i32
    return %c0_i32, %c0_i32_0 : i32, i32
  }
  func.func @transform_18(%arg0: i32) -> (i32, i32) {
    %c0_i32 = arith.constant 0 : i32
    %c0_i32_0 = arith.constant 0 : i32
    %c0_i32_1 = arith.constant 0 : i32
    return %c0_i32, %c0_i32_0 : i32, i32
  }
  func.func @transform_19(%arg0: i32) -> (i32, i32) {
    %c0_i32 = arith.constant 0 : i32
    %c0_i32_0 = arith.constant 0 : i32
    %c0_i32_1 = arith.constant 0 : i32
    return %c0_i32, %c0_i32_0 : i32, i32
  }
  func.func @transform_20(%arg0: i32) -> (i32, i32) {
    %c0_i32 = arith.constant 0 : i32
    %c0_i32_0 = arith.constant 0 : i32
    %c0_i32_1 = arith.constant 0 : i32
    return %c0_i32, %c0_i32_0 : i32, i32
  }
  func.func @transform_21(%arg0: i32) -> (i32, i32) {
    %c0_i32 = arith.constant 0 : i32
    %c0_i32_0 = arith.constant 0 : i32
    %c0_i32_1 = arith.constant 0 : i32
    return %c0_i32, %c0_i32_0 : i32, i32
  }
  func.func @transform_22(%arg0: i32) -> (i32, i32) {
    %c0_i32 = arith.constant 0 : i32
    %c0_i32_0 = arith.constant 0 : i32
    %c0_i32_1 = arith.constant 0 : i32
    return %c0_i32, %c0_i32_0 : i32, i32
  }
  func.func @transform_23(%arg0: i32) -> (i32, i32) {
    %c0_i32 = arith.constant 0 : i32
    %c0_i32_0 = arith.constant 0 : i32
    %c0_i32_1 = arith.constant 0 : i32
    return %c0_i32, %c0_i32_0 : i32, i32
  }
  func.func @transform_24(%arg0: i32) -> (i32, i32) {
    %c0_i32 = arith.constant 0 : i32
    %c0_i32_0 = arith.constant 0 : i32
    %c0_i32_1 = arith.constant 0 : i32
    return %c0_i32, %c0_i32_0 : i32, i32
  }
  func.func @transform_25(%arg0: i32) -> (i32, i32) {
    %c0_i32 = arith.constant 0 : i32
    %c0_i32_0 = arith.constant 0 : i32
    %c0_i32_1 = arith.constant 0 : i32
    return %c0_i32, %c0_i32_0 : i32, i32
  }
  func.func @transform_26(%arg0: i32) -> (i32, i32) {
    %c0_i32 = arith.constant 0 : i32
    %c0_i32_0 = arith.constant 0 : i32
    %c0_i32_1 = arith.constant 0 : i32
    return %c0_i32, %c0_i32_0 : i32, i32
  }
  func.func @transform_27(%arg0: i32) -> (i32, i32) {
    %c0_i32 = arith.constant 0 : i32
    %c0_i32_0 = arith.constant 0 : i32
    %c0_i32_1 = arith.constant 0 : i32
    return %c0_i32, %c0_i32_0 : i32, i32
  }
  func.func @transform_28(%arg0: i32) -> (i32, i32) {
    %c0_i32 = arith.constant 0 : i32
    %c0_i32_0 = arith.constant 0 : i32
    %c0_i32_1 = arith.constant 0 : i32
    return %c0_i32, %c0_i32_0 : i32, i32
  }
  func.func @transform_29(%arg0: i32) -> (i32, i32) {
    %c0_i32 = arith.constant 0 : i32
    %c0_i32_0 = arith.constant 0 : i32
    %c0_i32_1 = arith.constant 0 : i32
    return %c0_i32, %c0_i32_0 : i32, i32
  }
  func.func @transform_30(%arg0: i32) -> (i32, i32) {
    %c0_i32 = arith.constant 0 : i32
    %c0_i32_0 = arith.constant 0 : i32
    %c0_i32_1 = arith.constant 0 : i32
    return %c0_i32, %c0_i32_0 : i32, i32
  }
  func.func @transform_31(%arg0: i32) -> (i32, i32) {
    %c0_i32 = arith.constant 0 : i32
    %c0_i32_0 = arith.constant 0 : i32
    %c0_i32_1 = arith.constant 0 : i32
    return %c0_i32, %c0_i32_0 : i32, i32
  }
  func.func @transform_32(%arg0: i32) -> (i32, i32) {
    %c0_i32 = arith.constant 0 : i32
    %c0_i32_0 = arith.constant 0 : i32
    %c0_i32_1 = arith.constant 0 : i32
    return %c0_i32, %c0_i32_0 : i32, i32
  }
  func.func @transform_33(%arg0: i32) -> (i32, i32) {
    %c0_i32 = arith.constant 0 : i32
    %c0_i32_0 = arith.constant 0 : i32
    return %arg0, %c0_i32 : i32, i32
  }
  func.func @transform_34(%arg0: i32) -> (i32, i32) {
    %c0_i32 = arith.constant 0 : i32
    %c0_i32_0 = arith.constant 0 : i32
    return %arg0, %c0_i32 : i32, i32
  }
  func.func @transform_35(%arg0: i32) -> (i32, i32) {
    %c0_i32 = arith.constant 0 : i32
    %c0_i32_0 = arith.constant 0 : i32
    return %arg0, %c0_i32 : i32, i32
  }
  func.func @transform_36(%arg0: i32) -> (i32, i32) {
    %c0_i32 = arith.constant 0 : i32
    %c0_i32_0 = arith.constant 0 : i32
    return %arg0, %c0_i32 : i32, i32
  }
}

</mosaic_0001>

<bundles_post_ra>
// kernel: fused_forward.1
= control target key start
LH: loop header
LB: loop body
LE: loop exit
PB: predicated region body
PF: predicated region fallthrough
CT: control target
= control target key end

     0   :  { %s6417_s6 = smov 1   ;;  %s6418_s10 = smov 2   ;;  %s6872_s0 = inlined_call_operand.smem [shape: u32[37], index: -1, kind: input, shape index: {}] }
   0x1   :  { %s6496_s5 = sld [smem:[%s6872_s0]]   ;;  %s6419_s14 = smov 3  }
   0x2   :  { %s6501_s9 = sld [smem:[%s6872_s0 + %s6417_s6]]   ;;  %s6420_s18 = smov 4  }
   0x3   :  { %s6506_s13 = sld [smem:[%s6872_s0 + %s6418_s10]]   ;;  %s6421_s22 = smov 5  }
   0x4   :  { %s6511_s17 = sld [smem:[%s6872_s0 + %s6419_s14]]   ;;  %s6422_s26 = smov 6  }
   0x5   :  { %s6516_s21 = sld [smem:[%s6872_s0 + %s6420_s18]]   ;;  %s6423_s30 = smov 7  }
   0x6   :  { %s6521_s25 = sld [smem:[%s6872_s0 + %s6421_s22]]   ;;  %s6424_s4 = smov 8  }
   0x7   :  { %6875 = sst [smem:[#allocation56_spill]] %s6496_s5  ;;  %s6425_s10 = smov 9  }
   0x8   :  { %6876 = sst [smem:[#allocation57_spill]] %s6501_s9  ;;  %s6426_s15 = smov 10  }
   0x9   :  { %6877 = sst [smem:[#allocation58_spill]] %s6506_s13  ;;  %s6427_s20 = smov 11  }
   0xa   :  { %s6526_s29 = sld [smem:[%s6872_s0 + %s6422_s26]]   ;;  %s6428_s26 = smov 12  }
   0xb   :  { %s6531_s3 = sld [smem:[%s6872_s0 + %s6423_s30]]   ;;  %s6429_s1 = smov 13  }
   0xc   :  { %s6536_s8 = sld [smem:[%s6872_s0 + %s6424_s4]]   ;;  %s6430_s7 = smov 14  }
   0xd   :  { %s6541_s14 = sld [smem:[%s6872_s0 + %s6425_s10]]   ;;  %s6432_s22 = smov 16  }
   0xe   :  { %s6546_s19 = sld [smem:[%s6872_s0 + %s6426_s15]]   ;;  %s6431_s15 = smov 15  }
   0xf   :  { %s6551_s24 = sld [smem:[%s6872_s0 + %s6427_s20]]   ;;  %s6433_s28 = smov 17  }
  0x10   :  { %s6556_s30 = sld [smem:[%s6872_s0 + %s6428_s26]]  }
  0x11   :  { %6878 = sst [smem:[#allocation59_spill]] %s6531_s3 }
  0x12   :  { %s6561_s6 = sld [smem:[%s6872_s0 + %s6429_s1]]  }
  0x13   :  { %6879 = sst [smem:[#allocation60_spill]] %s6541_s14 }
  0x14   :  { %s6566_s12 = sld [smem:[%s6872_s0 + %s6430_s7]]   ;;  %s6434_s7 = smov 18  }
  0x15   :  { %6880 = sst [smem:[#allocation61_spill]] %s6551_s24 }
  0x16   :  { %s6571_s20 = sld [smem:[%s6872_s0 + %s6431_s15]]   ;;  %s6435_s15 = smov 19  }
  0x17   :  { %s6576_s27 = sld [smem:[%s6872_s0 + %s6432_s22]]   ;;  %s6436_s22 = smov 20  }
  0x18   :  { %6881 = sst [smem:[#allocation62_spill]] %s6561_s6 }
  0x19   :  { %s6581_s4 = sld [smem:[%s6872_s0 + %s6433_s28]]   ;;  %s6437_s28 = smov 21  }
  0x1a   :  { %s6586_s13 = sld [smem:[%s6872_s0 + %s6434_s7]]   ;;  %s6438_s7 = smov 22  }
  0x1b   :  { %s6591_s9 = sld [smem:[%s6872_s0 + %s6435_s15]]   ;;  %s6439_s15 = smov 23  }
  0x1c   :  { %6882 = sst [smem:[#allocation63_spill]] %s6571_s20 }
  0x1d   :  { %s6596_s5 = sld [smem:[%s6872_s0 + %s6436_s22]]   ;;  %s6440_s22 = smov 24  }
  0x1e   :  { %s6606_s20 = sld [smem:[%s6872_s0 + %s6438_s7]]   ;;  %s6442_s7 = smov 26  }
  0x1f   :  { %6883 = sst [smem:[#allocation64_spill]] %s6581_s4 }
  0x20   :  { %s6601_s4 = sld [smem:[%s6872_s0 + %s6437_s28]]   ;;  %s6441_s28 = smov 25  }
  0x21   :  { %6884 = sst [smem:[#allocation65_spill]] %s6591_s9 }
  0x22   :  { %s6611_s9 = sld [smem:[%s6872_s0 + %s6439_s15]]   ;;  %s6443_s15 = smov 27  }
  0x23   :  { %s6616_s6 = sld [smem:[%s6872_s0 + %s6440_s22]]   ;;  %s6444_s22 = smov 28  }
  0x24   :  { %s6626_s24 = sld [smem:[%s6872_s0 + %s6442_s7]]   ;;  %s6446_s7 = smov 30  }
  0x25   :  { %s6636_s14 = sld [smem:[%s6872_s0 + %s6444_s22]]   ;;  %s6448_s22 = smov 32  }
  0x26   :  { %6885 = sst [smem:[#allocation66_spill]] %s6601_s4 }
  0x27   :  { %s6621_s4 = sld [smem:[%s6872_s0 + %s6441_s28]]   ;;  %s6445_s28 = smov 29  }
  0x28   :  { %6886 = sst [smem:[#allocation67_spill]] %s6611_s9 }
  0x29   :  { %s6631_s9 = sld [smem:[%s6872_s0 + %s6443_s15]]   ;;  %s6447_s15 = smov 31  }
  0x2a   :  { %6888 = sst [smem:[#allocation69_spill]] %s6626_s24 }
  0x2b   :  { %6889 = sst [smem:[#allocation70_spill]] %s6636_s14 }
  0x2c   :  { %s6646_s24 = sld [smem:[%s6872_s0 + %s6446_s7]]   ;;  %s6450_s7 = smov 34  }
  0x2d   :  { %6887 = sst [smem:[#allocation68_spill]] %s6621_s4 }
  0x2e   :  { %s6641_s4 = sld [smem:[%s6872_s0 + %s6445_s28]]   ;;  %s6449_s28 = smov 33  }
  0x2f   :  { %s6651_s3 = sld [smem:[%s6872_s0 + %s6447_s15]]   ;;  %s6451_s15 = smov 35  }
  0x30   :  { %s6656_s14 = sld [smem:[%s6872_s0 + %s6448_s22]]   ;;  %s6452_s22 = smov 36  }
  0x32   :  { %6891 = sst [smem:[#allocation72_spill]] %s6646_s24 }
  0x33   :  { %s6666_s24 = sld [smem:[%s6872_s0 + %s6450_s7]]  }
  0x34   :  { %6890 = sst [smem:[#allocation71_spill]] %s6641_s4 }
  0x35   :  { %6892 = sst [smem:[#allocation73_spill]] %s6651_s3 }
  0x36   :  { %6893 = sst [smem:[#allocation74_spill]] %s6656_s14 }
  0x37   :  { %s6661_s4 = sld [smem:[%s6872_s0 + %s6449_s28]]  }
  0x38   :  { %s6671_s3 = sld [smem:[%s6872_s0 + %s6451_s15]]  }
  0x39   :  { %s6676_s14 = sld [smem:[%s6872_s0 + %s6452_s22]]  }
  0x3a   :  { %79 = vsyncpa [#allocation3], 0 }
  0x3b   :  { %80 = vsyncpa [#allocation5], 0 }
  0x3c   :  { %81 = vsyncpa [#allocation8], 0 }
  0x3d   :  { %82 = vsyncpa [#allocation11], 0 }
  0x3e   :  { %83 = vsyncpa [#allocation14], 0 }
  0x3f   :  { %84 = vsyncpa [#allocation17], 0 }
  0x40   :  { %85 = vsyncpa [#allocation20], 0 }
  0x41   :  { %86 = vsyncpa [#allocation23], 0 }
  0x42   :  { %87 = vsyncpa [#allocation26], 0 }
  0x43   :  { %88 = vsyncpa [#allocation29], 0 }
  0x44   :  { %89 = vsyncpa [#allocation32], 0 }
  0x45   :  { %90 = vsyncpa [#allocation35], 0 }
  0x46   :  { %91 = vsyncpa [#allocation38], 0 }
  0x47   :  { %92 = vsyncpa [#allocation41], 0  ;;  %s6453_s28 = smov [#allocation4]   ;;  %s6454_s2 = smov [#allocation7]  }
  0x48   :  { %s117_s1 = sshll.u32 %s6453_s28, 4  ;;  %s139_s7 = sshll.u32 %s6454_s2, 4  ;;  %s118_s1 = int_to_ptr.vmem [resolvable:$true] %s117_s1  ;;  %s140_s7 = int_to_ptr.vmem [resolvable:$true] %s139_s7 }
  0x49   :  { %s5877_s0 = scalar_lea.vmem %s118_s1, 64  ;;  %p5882_p1 = scmp.lt.s32.totalorder %s118_s1, %s118_s1 }
  0x4a   :  { %p5878_p0 = scmp.ne.s32.totalorder %s118_s1, %s5877_s0  ;;  %p5883_p2 = scmp.lt.s32.totalorder %s5877_s0, %s5877_s0 }
  0x4c   :  { %p5884_p3 = por %p5883_p2, %p5882_p1 }
  0x4e   :  { %p5885_p4 = pnand %p5884_p3, %p5878_p0 }
  0x50   :  { %5888 = shalt.err (!%p5885_p4)
}
  0x51   :  { %120 = dma.hbm_to_vmem [thread:$0]  %s6516_s21, 64, %s118_s1, [#allocation5]  }
  0x52   :  { %s5897_s10 = scalar_lea.vmem %s140_s7, 32  ;;  %p5902_p6 = scmp.lt.s32.totalorder %s140_s7, %s140_s7 }
  0x53   :  { %p5898_p5 = scmp.ne.s32.totalorder %s140_s7, %s5897_s10  ;;  %p5903_p7 = scmp.lt.s32.totalorder %s5897_s10, %s5897_s10 }
  0x55   :  { %p5904_p8 = por %p5903_p7, %p5902_p6 }
  0x57   :  { %p5905_p9 = pnand %p5904_p8, %p5898_p5 }
  0x59   :  { %5908 = shalt.err (!%p5905_p9)
}
  0x5a   :  { %142 = dma.hbm_to_vmem [thread:$0]  %s6526_s29, 32, %s140_s7, [#allocation8]  }
  0x5b   :  { %s6455_s11 = smov [#allocation10]   ;;  %s6456_s16 = smov [#allocation13]  }
  0x5c   :  { %s161_s15 = sshll.u32 %s6455_s11, 4  ;;  %s183_s18 = sshll.u32 %s6456_s16, 4  ;;  %s162_s15 = int_to_ptr.vmem [resolvable:$true] %s161_s15  ;;  %s184_s18 = int_to_ptr.vmem [resolvable:$true] %s183_s18 }
  0x5d   :  { %s5917_s22 = scalar_lea.vmem %s162_s15, 32  ;;  %p5922_p11 = scmp.lt.s32.totalorder %s162_s15, %s162_s15 }
  0x5e   :  { %p5918_p10 = scmp.ne.s32.totalorder %s162_s15, %s5917_s22  ;;  %p5923_p12 = scmp.lt.s32.totalorder %s5917_s22, %s5917_s22 }
  0x60   :  { %p5924_p13 = por %p5923_p12, %p5922_p11 }
  0x62   :  { %p5925_p0 = pnand %p5924_p13, %p5918_p10 }
  0x64   :  { %5928 = shalt.err (!%p5925_p0)
}
  0x65   :  { %164 = dma.hbm_to_vmem [thread:$0]  %s6536_s8, 32, %s162_s15, [#allocation11]  }
  0x66   :  { %s5937_s21 = scalar_lea.vmem %s184_s18, 16  ;;  %s5941_s23 = scalar_lea.vmem %s184_s18, 32 }
  0x67   :  { %p5938_p1 = scmp.ne.s32.totalorder %s184_s18, %s5937_s21  ;;  %p5942_p2 = scmp.lt.s32.totalorder %s184_s18, %s184_s18 }
  0x68   :  { %p5943_p3 = scmp.lt.s32.totalorder %s5941_s23, %s5937_s21 }
  0x6a   :  { %p5944_p4 = por %p5943_p3, %p5942_p2 }
  0x6c   :  { %p5945_p5 = pnand %p5944_p4, %p5938_p1 }
  0x6e   :  { %5948 = shalt.err (!%p5945_p5)
}
  0x6f   :  { %186 = dma.hbm_to_vmem [thread:$0]  %s6546_s19, 16, %s184_s18, [#allocation14]  }
  0x70   :  { %s6457_s29 = smov [#allocation16]   ;;  %s6458_s28 = smov [#allocation19]  }
  0x71   :  { %s205_s26 = sshll.u32 %s6457_s29, 4  ;;  %s227_s1 = sshll.u32 %s6458_s28, 4  ;;  %s206_s26 = int_to_ptr.vmem [resolvable:$true] %s205_s26  ;;  %s228_s1 = int_to_ptr.vmem [resolvable:$true] %s227_s1 }
  0x72   :  { %s5957_s2 = scalar_lea.vmem %s206_s26, 16  ;;  %s5961_s7 = scalar_lea.vmem %s206_s26, 32 }
  0x73   :  { %p5958_p6 = scmp.ne.s32.totalorder %s206_s26, %s5957_s2  ;;  %p5962_p7 = scmp.lt.s32.totalorder %s206_s26, %s206_s26 }
  0x74   :  { %p5963_p8 = scmp.lt.s32.totalorder %s5961_s7, %s5957_s2 }
  0x76   :  { %p5964_p9 = por %p5963_p8, %p5962_p7 }
  0x78   :  { %p5965_p10 = pnand %p5964_p9, %p5958_p6 }
  0x7a   :  { %5968 = shalt.err (!%p5965_p10)
}
  0x7b   :  { %208 = dma.hbm_to_vmem [thread:$0]  %s6556_s30, 16, %s206_s26, [#allocation17]  }
  0x7c   :  { %s5977_s8 = scalar_lea.vmem %s228_s1, 16  ;;  %s5981_s0 = scalar_lea.vmem %s228_s1, 32 }
  0x7d   :  { %p5978_p11 = scmp.ne.s32.totalorder %s228_s1, %s5977_s8  ;;  %p5982_p12 = scmp.lt.s32.totalorder %s228_s1, %s228_s1 }
  0x7e   :  { %p5983_p13 = scmp.lt.s32.totalorder %s5981_s0, %s5977_s8 }
  0x80   :  { %p5984_p0 = por %p5983_p13, %p5982_p12 }
  0x82   :  { %p5985_p1 = pnand %p5984_p0, %p5978_p11 }
  0x84   :  { %5988 = shalt.err (!%p5985_p1)
}
  0x85   :  { %230 = dma.hbm_to_vmem [thread:$0]  %s6566_s12, 16, %s228_s1, [#allocation20]  }
  0x86   :  { %s6459_s19 = smov [#allocation22]   ;;  %s6460_s11 = smov [#allocation25]  }
  0x87   :  { %s248_s10 = sshll.u32 %s6459_s19, 4  ;;  %s273_s15 = sshll.u32 %s6460_s11, 4  ;;  %s249_s10 = int_to_ptr.vmem [resolvable:$true] %s248_s10  ;;  %s274_s15 = int_to_ptr.vmem [resolvable:$true] %s273_s15 }
  0x88   :  { %s5997_s16 = scalar_lea.vmem %s249_s10, 1024  ;;  %p6002_p3 = scmp.lt.s32.totalorder %s249_s10, %s249_s10 }
  0x89   :  { %p5998_p2 = scmp.ne.s32.totalorder %s249_s10, %s5997_s16  ;;  %p6003_p4 = scmp.lt.s32.totalorder %s5997_s16, %s5997_s16 }
  0x8b   :  { %p6004_p5 = por %p6003_p4, %p6002_p3 }
  0x8d   :  { %p6005_p6 = pnand %p6004_p5, %p5998_p2 }
  0x8f   :  { %6008 = shalt.err (!%p6005_p6)
}
  0x90   :  { %s6461_s30 = smov 64   ;;  %s6462_s18 = smov 4  }
  0x91   :  { %254 = dma.hbm_to_vmem [thread:$0]  %s6576_s27, 1024, %s249_s10, [#allocation23], %s6461_s30, %s6461_s30, %s6462_s18  }
  0x92   :  { %s6017_s12 = scalar_lea.vmem %s274_s15, 16  ;;  %s6021_s22 = scalar_lea.vmem %s274_s15, 32 }
  0x93   :  { %p6018_p7 = scmp.ne.s32.totalorder %s274_s15, %s6017_s12  ;;  %p6022_p8 = scmp.lt.s32.totalorder %s274_s15, %s274_s15 }
  0x94   :  { %p6023_p9 = scmp.lt.s32.totalorder %s6021_s22, %s6017_s12 }
  0x96   :  { %p6024_p10 = por %p6023_p9, %p6022_p8 }
  0x98   :  { %p6025_p11 = pnand %p6024_p10, %p6018_p7 }
  0x9a   :  { %6028 = shalt.err (!%p6025_p11)
}
  0x9b   :  { %276 = dma.hbm_to_vmem [thread:$0]  %s6586_s13, 16, %s274_s15, [#allocation26]  }
  0x9c   :  { %s6463_s21 = smov [#allocation28]   ;;  %s6464_s29 = smov [#allocation31]  }
  0x9d   :  { %s295_s23 = sshll.u32 %s6463_s21, 4  ;;  %s317_s26 = sshll.u32 %s6464_s29, 4  ;;  %s296_s23 = int_to_ptr.vmem [resolvable:$true] %s295_s23  ;;  %s318_s26 = int_to_ptr.vmem [resolvable:$true] %s317_s26 }
  0x9e   :  { %s6037_s28 = scalar_lea.vmem %s296_s23, 64  ;;  %p6042_p13 = scmp.lt.s32.totalorder %s296_s23, %s296_s23 }
  0x9f   :  { %p6038_p12 = scmp.ne.s32.totalorder %s296_s23, %s6037_s28  ;;  %p6043_p0 = scmp.lt.s32.totalorder %s6037_s28, %s6037_s28 }
  0xa1   :  { %p6044_p1 = por %p6043_p0, %p6042_p13 }
  0xa3   :  { %p6045_p2 = pnand %p6044_p1, %p6038_p12 }
  0xa5   :  { %6048 = shalt.err (!%p6045_p2)
}
  0xa6   :  { %298 = dma.hbm_to_vmem [thread:$0]  %s6596_s5, 64, %s296_s23, [#allocation29]  }
  0xa7   :  { %s6057_s27 = scalar_lea.vmem %s318_s26, 64  ;;  %p6062_p4 = scmp.lt.s32.totalorder %s318_s26, %s318_s26 }
  0xa8   :  { %p6058_p3 = scmp.ne.s32.totalorder %s318_s26, %s6057_s27  ;;  %p6063_p5 = scmp.lt.s32.totalorder %s6057_s27, %s6057_s27 }
  0xaa   :  { %p6064_p6 = por %p6063_p5, %p6062_p4 }
  0xac   :  { %p6065_p7 = pnand %p6064_p6, %p6058_p3 }
  0xae   :  { %6068 = shalt.err (!%p6065_p7)
}
  0xaf   :  { %320 = dma.hbm_to_vmem [thread:$0]  %s6606_s20, 64, %s318_s26, [#allocation32]  }
  0xb0   :  { %s6465_s13 = smov [#allocation34]   ;;  %s6466_s2 = smov [#allocation37]  }
  0xb1   :  { %s339_s1 = sshll.u32 %s6465_s13, 4  ;;  %s362_s7 = sshll.u32 %s6466_s2, 4  ;;  %s340_s1 = int_to_ptr.vmem [resolvable:$true] %s339_s1  ;;  %s363_s7 = int_to_ptr.vmem [resolvable:$true] %s362_s7 }
  0xb2   :  { %s6077_s8 = scalar_lea.vmem %s340_s1, 32  ;;  %p6082_p9 = scmp.lt.s32.totalorder %s340_s1, %s340_s1 }
  0xb3   :  { %p6078_p8 = scmp.ne.s32.totalorder %s340_s1, %s6077_s8  ;;  %p6083_p10 = scmp.lt.s32.totalorder %s6077_s8, %s6077_s8 }
  0xb5   :  { %p6084_p11 = por %p6083_p10, %p6082_p9 }
  0xb7   :  { %p6085_p12 = pnand %p6084_p11, %p6078_p8 }
  0xb9   :  { %6088 = shalt.err (!%p6085_p12)
}
  0xba   :  { %342 = dma.hbm_to_vmem [thread:$0]  %s6616_s6, 32, %s340_s1, [#allocation35]  }
  0xbb   :  { %s6097_s5 = scalar_lea.vmem %s363_s7, 2048  ;;  %p6102_p0 = scmp.lt.s32.totalorder %s363_s7, %s363_s7 }
  0xbc   :  { %p6098_p13 = scmp.ne.s32.totalorder %s363_s7, %s6097_s5  ;;  %p6103_p1 = scmp.lt.s32.totalorder %s6097_s5, %s6097_s5 }
  0xbe   :  { %p6104_p2 = por %p6103_p1, %p6102_p0 }
  0xc0   :  { %p6105_p3 = pnand %p6104_p2, %p6098_p13 }
  0xc2   :  { %6108 = shalt.err (!%p6105_p3)
}
  0xc3   :  { %368 = dma.hbm_to_vmem [thread:$0]  %s6631_s9, 2048, %s363_s7, [#allocation38], %s6461_s30, %s6461_s30, %s6462_s18  }
  0xc4   :  { %s6467_s20 = smov [#allocation2]  }
  0xc5   :  { %s104_s0 = sshll.u32 %s6467_s20, 4  ;;  %s105_s0 = int_to_ptr.vmem [resolvable:$true] %s104_s0 }
  0xc6   :  { %s6117_s19 = scalar_lea.vmem %s105_s0, 8192  ;;  %p6122_p5 = scmp.lt.s32.totalorder %s105_s0, %s105_s0 }
  0xc7   :  { %p6118_p4 = scmp.ne.s32.totalorder %s105_s0, %s6117_s19  ;;  %p6123_p6 = scmp.lt.s32.totalorder %s6117_s19, %s6117_s19 }
  0xc9   :  { %p6124_p7 = por %p6123_p6, %p6122_p5 }
  0xcb   :  { %p6125_p8 = pnand %p6124_p7, %p6118_p4 }
  0xcd   :  { %6128 = shalt.err (!%p6125_p8)
}
  0xce   :  { %s6468_s6 = smov 256   ;;  %s6469_s10 = smov 16  }
  0xcf   :  { %110 = dma.hbm_to_vmem [thread:$0]  %s6511_s17, 8192, %s105_s0, [#allocation3], %s6468_s6, %s6468_s6, %s6469_s10  }
  0xd0   :  { %s6470_s11 = smov [#allocation6]  }
  0xd1   :  { %s126_s15 = sshll.u32 %s6470_s11, 4  ;;  %s127_s15 = int_to_ptr.vmem [resolvable:$true] %s126_s15 }
  0xd2   :  { %s6137_s9 = scalar_lea.vmem %s127_s15, 8192  ;;  %p6142_p10 = scmp.lt.s32.totalorder %s127_s15, %s127_s15 }
  0xd3   :  { %p6138_p9 = scmp.ne.s32.totalorder %s127_s15, %s6137_s9  ;;  %p6143_p11 = scmp.lt.s32.totalorder %s6137_s9, %s6137_s9 }
  0xd5   :  { %p6144_p12 = por %p6143_p11, %p6142_p10 }
  0xd7   :  { %p6145_p13 = pnand %p6144_p12, %p6138_p9 }
  0xd9   :  { %6148 = shalt.err (!%p6145_p13)
}
  0xda   :  { %s6471_s16 = smov 128   ;;  %s6472_s12 = smov 8  }
  0xdb   :  { %132 = dma.hbm_to_vmem [thread:$0]  %s6521_s25, 8192, %s127_s15, [#allocation5], %s6471_s16, %s6471_s16, %s6472_s12  }
  0xdc   :  { %s6473_s22 = smov [#allocation9]   ;;  %s6474_s17 = smov [#allocation12]  }
  0xdd   :  { %s148_s21 = sshll.u32 %s6473_s22, 4  ;;  %s170_s23 = sshll.u32 %s6474_s17, 4  ;;  %s149_s21 = int_to_ptr.vmem [resolvable:$true] %s148_s21  ;;  %s171_s23 = int_to_ptr.vmem [resolvable:$true] %s170_s23 }
  0xde   :  { %s6157_s29 = scalar_lea.vmem %s149_s21, 2048  ;;  %p6162_p1 = scmp.lt.s32.totalorder %s149_s21, %s149_s21 }
  0xdf   :  { %p6158_p0 = scmp.ne.s32.totalorder %s149_s21, %s6157_s29  ;;  %p6163_p2 = scmp.lt.s32.totalorder %s6157_s29, %s6157_s29 }
  0xe1   :  { %p6164_p3 = por %p6163_p2, %p6162_p1 }
  0xe3   :  { %p6165_p4 = pnand %p6164_p3, %p6158_p0 }
  0xe5   :  { %6168 = shalt.err (!%p6165_p4)
}
  0xe6   :  { %s6894_s26 = sld [smem:[#allocation59_spill]]  ;;  %s6177_s28 = scalar_lea.vmem %s171_s23, 2048 }
  0xe7   :  { %p6178_p5 = scmp.ne.s32.totalorder %s171_s23, %s6177_s28  ;;  %p6182_p6 = scmp.lt.s32.totalorder %s171_s23, %s171_s23 }
  0xe8   :  { %p6183_p7 = scmp.lt.s32.totalorder %s6177_s28, %s6177_s28 }
  0xea   :  { %p6184_p8 = por %p6183_p7, %p6182_p6 }
  0xec   :  { %154 = dma.hbm_to_vmem [thread:$0]  %s6894_s26, 2048, %s149_s21, [#allocation8], %s6471_s16, %s6471_s16, %s6472_s12  }
  0xed   :  { %p6185_p9 = pnand %p6184_p8, %p6178_p5 }
  0xef   :  { %6188 = shalt.err (!%p6185_p9)
}
  0xf0   :  { %s6895_s25 = sld [smem:[#allocation60_spill]]  ;;  %s6475_s27 = smov [#allocation15]  }
  0xf1   :  { %s192_s13 = sshll.u32 %s6475_s27, 4  ;;  %s6476_s1 = smov [#allocation18]   ;;  %s193_s13 = int_to_ptr.vmem [resolvable:$true] %s192_s13 }
  0xf2   :  { %s214_s2 = sshll.u32 %s6476_s1, 4  ;;  %s6197_s7 = scalar_lea.vmem %s193_s13, 2048  ;;  %s215_s2 = int_to_ptr.vmem [resolvable:$true] %s214_s2 }
  0xf3   :  { %p6198_p10 = scmp.ne.s32.totalorder %s193_s13, %s6197_s7  ;;  %p6202_p11 = scmp.lt.s32.totalorder %s193_s13, %s193_s13 }
  0xf4   :  { %p6203_p12 = scmp.lt.s32.totalorder %s6197_s7, %s6197_s7 }
  0xf6   :  { %176 = dma.hbm_to_vmem [thread:$0]  %s6895_s25, 2048, %s171_s23, [#allocation11], %s6461_s30, %s6461_s30, %s6462_s18  }
  0xf7   :  { %p6204_p13 = por %p6203_p12, %p6202_p11 }
  0xf9   :  { %p6205_p0 = pnand %p6204_p13, %p6198_p10 }
  0xfb   :  { %6208 = shalt.err (!%p6205_p0)
}
  0xfc   :  { %s6896_s8 = sld [smem:[#allocation61_spill]]  ;;  %s6217_s5 = scalar_lea.vmem %s215_s2, 1024 }
  0xfd   :  { %p6218_p1 = scmp.ne.s32.totalorder %s215_s2, %s6217_s5  ;;  %p6222_p2 = scmp.lt.s32.totalorder %s215_s2, %s215_s2 }
  0xfe   :  { %p6223_p3 = scmp.lt.s32.totalorder %s6217_s5, %s6217_s5 }
 0x100   :  { %p6224_p4 = por %p6223_p3, %p6222_p2 }
 0x102   :  { %198 = dma.hbm_to_vmem [thread:$0]  %s6896_s8, 2048, %s193_s13, [#allocation14], %s6461_s30, %s6461_s30, %s6462_s18  }
 0x103   :  { %p6225_p5 = pnand %p6224_p4, %p6218_p1 }
 0x105   :  { %6228 = shalt.err (!%p6225_p5)
}
 0x106   :  { %s6897_s20 = sld [smem:[#allocation62_spill]]  ;;  %s6477_s0 = smov [#allocation21]  }
 0x107   :  { %s236_s19 = sshll.u32 %s6477_s0, 4  ;;  %s6478_s11 = smov [#allocation24]   ;;  %s237_s19 = int_to_ptr.vmem [resolvable:$true] %s236_s19 }
 0x108   :  { %s260_s15 = sshll.u32 %s6478_s11, 4  ;;  %s6237_s9 = scalar_lea.vmem %s237_s19, 2048  ;;  %s261_s15 = int_to_ptr.vmem [resolvable:$true] %s260_s15 }
 0x109   :  { %p6238_p6 = scmp.ne.s32.totalorder %s237_s19, %s6237_s9  ;;  %p6242_p7 = scmp.lt.s32.totalorder %s237_s19, %s237_s19 }
 0x10a   :  { %p6243_p8 = scmp.lt.s32.totalorder %s6237_s9, %s6237_s9 }
 0x10c   :  { %220 = dma.hbm_to_vmem [thread:$0]  %s6897_s20, 1024, %s215_s2, [#allocation17], %s6461_s30, %s6461_s30, %s6462_s18  }
 0x10d   :  { %p6244_p9 = por %p6243_p8, %p6242_p7 }
 0x10f   :  { %p6245_p10 = pnand %p6244_p9, %p6238_p6 }
 0x111   :  { %6248 = shalt.err (!%p6245_p10)
}
 0x112   :  { %s6898_s22 = sld [smem:[#allocation63_spill]]  ;;  %s6257_s21 = scalar_lea.vmem %s261_s15, 1024 }
 0x113   :  { %p6258_p11 = scmp.ne.s32.totalorder %s261_s15, %s6257_s21  ;;  %p6262_p12 = scmp.lt.s32.totalorder %s261_s15, %s261_s15 }
 0x114   :  { %p6263_p13 = scmp.lt.s32.totalorder %s6257_s21, %s6257_s21 }
 0x116   :  { %p6264_p0 = por %p6263_p13, %p6262_p12 }
 0x118   :  { %242 = dma.hbm_to_vmem [thread:$0]  %s6898_s22, 2048, %s237_s19, [#allocation20], %s6461_s30, %s6461_s30, %s6462_s18  }
 0x119   :  { %p6265_p1 = pnand %p6264_p0, %p6258_p11 }
 0x11b   :  { %6268 = shalt.err (!%p6265_p1)
}
 0x11c   :  { %s6899_s17 = sld [smem:[#allocation64_spill]]  ;;  %s6479_s23 = smov [#allocation27]  }
 0x11d   :  { %s282_s29 = sshll.u32 %s6479_s23, 4  ;;  %s6480_s26 = smov [#allocation30]   ;;  %s283_s29 = int_to_ptr.vmem [resolvable:$true] %s282_s29 }
 0x11e   :  { %s304_s28 = sshll.u32 %s6480_s26, 4  ;;  %s6277_s25 = scalar_lea.vmem %s283_s29, 4096  ;;  %s305_s28 = int_to_ptr.vmem [resolvable:$true] %s304_s28 }
 0x11f   :  { %p6278_p2 = scmp.ne.s32.totalorder %s283_s29, %s6277_s25  ;;  %p6282_p3 = scmp.lt.s32.totalorder %s283_s29, %s283_s29 }
 0x120   :  { %p6283_p4 = scmp.lt.s32.totalorder %s6277_s25, %s6277_s25 }
 0x122   :  { %266 = dma.hbm_to_vmem [thread:$0]  %s6899_s17, 1024, %s261_s15, [#allocation23], %s6461_s30, %s6461_s30, %s6462_s18  }
 0x123   :  { %p6284_p5 = por %p6283_p4, %p6282_p3 }
 0x125   :  { %p6285_p6 = pnand %p6284_p5, %p6278_p2 }
 0x127   :  { %6288 = shalt.err (!%p6285_p6)
}
 0x128   :  { %s6900_s27 = sld [smem:[#allocation65_spill]]  ;;  %s6297_s13 = scalar_lea.vmem %s305_s28, 8192 }
 0x129   :  { %p6298_p7 = scmp.ne.s32.totalorder %s305_s28, %s6297_s13  ;;  %p6302_p8 = scmp.lt.s32.totalorder %s305_s28, %s305_s28 }
 0x12a   :  { %p6303_p9 = scmp.lt.s32.totalorder %s6297_s13, %s6297_s13 }
 0x12c   :  { %p6304_p10 = por %p6303_p9, %p6302_p8 }
 0x12e   :  { %288 = dma.hbm_to_vmem [thread:$0]  %s6900_s27, 4096, %s283_s29, [#allocation26], %s6468_s6, %s6468_s6, %s6469_s10  }
 0x12f   :  { %p6305_p11 = pnand %p6304_p10, %p6298_p7 }
 0x131   :  { %6308 = shalt.err (!%p6305_p11)
}
 0x132   :  { %s6901_s1 = sld [smem:[#allocation66_spill]]  ;;  %s6481_s2 = smov [#allocation33]  }
 0x133   :  { %s326_s7 = sshll.u32 %s6481_s2, 4  ;;  %s6482_s8 = smov [#allocation36]   ;;  %s327_s7 = int_to_ptr.vmem [resolvable:$true] %s326_s7 }
 0x134   :  { %s348_s5 = sshll.u32 %s6482_s8, 4  ;;  %s6317_s20 = scalar_lea.vmem %s327_s7, 8192  ;;  %s349_s5 = int_to_ptr.vmem [resolvable:$true] %s348_s5 }
 0x135   :  { %p6318_p12 = scmp.ne.s32.totalorder %s327_s7, %s6317_s20  ;;  %p6322_p13 = scmp.lt.s32.totalorder %s327_s7, %s327_s7 }
 0x136   :  { %p6323_p0 = scmp.lt.s32.totalorder %s6317_s20, %s6317_s20 }
 0x138   :  { %310 = dma.hbm_to_vmem [thread:$0]  %s6901_s1, 8192, %s305_s28, [#allocation29], %s6468_s6, %s6468_s6, %s6469_s10  }
 0x139   :  { %p6324_p1 = por %p6323_p0, %p6322_p13 }
 0x13b   :  { %p6325_p2 = pnand %p6324_p1, %p6318_p12 }
 0x13d   :  { %6328 = shalt.err (!%p6325_p2)
}
 0x13e   :  { %s6902_s0 = sld [smem:[#allocation67_spill]]  ;;  %s6337_s19 = scalar_lea.vmem %s349_s5, 2048 }
 0x13f   :  { %p6338_p3 = scmp.ne.s32.totalorder %s349_s5, %s6337_s19  ;;  %p6342_p4 = scmp.lt.s32.totalorder %s349_s5, %s349_s5 }
 0x140   :  { %p6343_p5 = scmp.lt.s32.totalorder %s6337_s19, %s6337_s19 }
 0x142   :  { %p6344_p6 = por %p6343_p5, %p6342_p4 }
 0x144   :  { %332 = dma.hbm_to_vmem [thread:$0]  %s6902_s0, 8192, %s327_s7, [#allocation32], %s6471_s16, %s6471_s16, %s6472_s12  }
 0x145   :  { %p6345_p7 = pnand %p6344_p6, %p6338_p3 }
 0x147   :  { %6348 = shalt.err (!%p6345_p7)
}
 0x148   :  { %s6903_s6 = sld [smem:[#allocation68_spill]]  ;;  %s6483_s10 = smov [#allocation39]  }
 0x149   :  { %s376_s11 = sshll.u32 %s6483_s10, 4  ;;  %s6484_s15 = smov [#allocation40]   ;;  %s377_s11 = int_to_ptr.vmem [resolvable:$true] %s376_s11 }
 0x14a   :  { %s390_s9 = sshll.u32 %s6484_s15, 4  ;;  %s6357_s22 = scalar_lea.vmem %s377_s11, 1024  ;;  %s391_s9 = int_to_ptr.vmem [resolvable:$true] %s390_s9 }
 0x14b   :  { %p6358_p8 = scmp.ne.s32.totalorder %s377_s11, %s6357_s22  ;;  %p6362_p9 = scmp.lt.s32.totalorder %s377_s11, %s377_s11 }
 0x14c   :  { %p6363_p10 = scmp.lt.s32.totalorder %s6357_s22, %s6357_s22 }
 0x14e   :  { %354 = dma.hbm_to_vmem [thread:$0]  %s6903_s6, 2048, %s349_s5, [#allocation35], %s6471_s16, %s6471_s16, %s6472_s12  }
 0x14f   :  { %p6364_p11 = por %p6363_p10, %p6362_p9 }
 0x151   :  { %p6365_p12 = pnand %p6364_p11, %p6358_p8 }
 0x153   :  { %6368 = shalt.err (!%p6365_p12)
}
 0x154   :  { %s6904_s21 = sld [smem:[#allocation71_spill]]  ;;  %s6377_s17 = scalar_lea.vmem %s391_s9, 2048 }
 0x155   :  { %p6378_p13 = scmp.ne.s32.totalorder %s391_s9, %s6377_s17  ;;  %p6382_p0 = scmp.lt.s32.totalorder %s391_s9, %s391_s9 }
 0x156   :  { %p6383_p1 = scmp.lt.s32.totalorder %s6377_s17, %s6377_s17 }
 0x158   :  { %p6384_p2 = por %p6383_p1, %p6382_p0 }
 0x15a   :  { %382 = dma.hbm_to_vmem [thread:$0]  %s6904_s21, 1024, %s377_s11, [#allocation38], %s6461_s30, %s6461_s30, %s6462_s18  }
 0x15b   :  { %p6385_p3 = pnand %p6384_p2, %p6378_p13 }
 0x15d   :  { %6388 = shalt.err (!%p6385_p3)
}
 0x15e   :  { %s6905_s23 = sld [smem:[#allocation73_spill]] }
 0x164   :  { %396 = dma.hbm_to_vmem [thread:$0]  %s6905_s23, 2048, %s391_s9, [#allocation41], %s6471_s16, %s6471_s16, %s6472_s12  }
 0x165   :  { %6389 = dma.done.wait [#allocation3], 8192  }
 0x166   :  { %6390 = vsyncadd [#allocation3], 4294959104 }
 0x167   :  { %6391 = dma.done.wait [#allocation5], 8256  }
 0x168   :  { %6392 = vsyncadd [#allocation5], 4294959040 }
 0x169   :  { %6393 = dma.done.wait [#allocation8], 2080  }
 0x16a   :  { %6394 = vsyncadd [#allocation8], 4294965216 }
 0x16b   :  { %6395 = dma.done.wait [#allocation11], 2080  }
 0x16c   :  { %6396 = vsyncadd [#allocation11], 4294965216 }
 0x16d   :  { %6397 = dma.done.wait [#allocation14], 2064  }
 0x16e   :  { %6398 = vsyncadd [#allocation14], 4294965232 }
 0x16f   :  { %6399 = dma.done.wait [#allocation17], 1040  }
 0x170   :  { %6400 = vsyncadd [#allocation17], 4294966256 }
 0x171   :  { %6401 = dma.done.wait [#allocation20], 2064  }
 0x172   :  { %6402 = vsyncadd [#allocation20], 4294965232 }
 0x173   :  { %6403 = dma.done.wait [#allocation23], 2048  }
 0x174   :  { %6404 = vsyncadd [#allocation23], 4294965248 }
 0x175   :  { %6405 = dma.done.wait [#allocation26], 4112  }
 0x176   :  { %6406 = vsyncadd [#allocation26], 4294963184 }
 0x177   :  { %6407 = dma.done.wait [#allocation29], 8256  }
 0x178   :  { %6408 = vsyncadd [#allocation29], 4294959040 }
 0x179   :  { %6409 = dma.done.wait [#allocation32], 8256  }
 0x17a   :  { %6410 = vsyncadd [#allocation32], 4294959040 }
 0x17b   :  { %6411 = dma.done.wait [#allocation35], 2080  }
 0x17c   :  { %6412 = vsyncadd [#allocation35], 4294965216 }
 0x17d   :  { %6413 = dma.done.wait [#allocation38], 3072  }
 0x17e   :  { %6414 = vsyncadd [#allocation38], 4294964224 }
 0x17f   :  { %6415 = dma.done.wait [#allocation41], 2048  }
 0x180   :  { %6416 = vsyncadd [#allocation41], 4294965248  ;;  %v5246_v0 = vld [vmem:[#allocation2 + $0xe4] ss:$16 sps:$4 sm:$0xff]   ;;  %v5248_v1 = vld [vmem:[#allocation2 + $0xe0] ss:$16 sps:$4 sm:$0xff]  }
 0x181   :  { %896 = vmatprep.subr.bf16.mxu0 %v5246_v0  ;;  %v5249_v2 = vld [vmem:[#allocation2 + $0xec] ss:$16 sps:$4 sm:$0xff]   ;;  %v5251_v3 = vld [vmem:[#allocation2 + $0xe8] ss:$16 sps:$4 sm:$0xff]   ;;  %v5252_v4 = vld [vmem:[#allocation2 + $0xc4] ss:$16 sps:$4 sm:$0xff]  }
 0x182   :  { %897 = vmatpush1.bf16.msra.mxu0 %v5248_v1  ;;  %v5254_v5 = vld [vmem:[#allocation2 + $0xc0] ss:$16 sps:$4 sm:$0xff]   ;;  %939 = vmatprep.subr.bf16.mxu1 %v5249_v2  ;;  %v5255_v6 = vld [vmem:[#allocation2 + $0xcc] ss:$16 sps:$4 sm:$0xff]   ;;  %v5257_v7 = vld [vmem:[#allocation2 + $0xc8] ss:$16 sps:$4 sm:$0xff]  }
 0x183   :  { %940 = vmatpush1.bf16.msra.mxu1 %v5251_v3  ;;  %898 = vmatprep.subr.bf16.mxu0 %v5252_v4  ;;  %v5258_v8 = vld [vmem:[#allocation2 + $0xa4] ss:$16 sps:$4 sm:$0xff]   ;;  %v5260_v9 = vld [vmem:[#allocation2 + $0xa0] ss:$16 sps:$4 sm:$0xff]   ;;  %v5261_v10 = vld [vmem:[#allocation2 + $0xac] ss:$16 sps:$4 sm:$0xff]  }
 0x184   :  { %941 = vmatprep.subr.bf16.mxu1 %v5255_v6  ;;  %v5264_v11 = vld [vmem:[#allocation2 + $0x84] ss:$16 sps:$4 sm:$0xff]   ;;  %v5263_v12 = vld [vmem:[#allocation2 + $0xa8] ss:$16 sps:$4 sm:$0xff]   ;;  %v5267_v13 = vld [vmem:[#allocation2 + $0x8c] ss:$16 sps:$4 sm:$0xff]  }
 0x185   :  { %v5266_v14 = vld [vmem:[#allocation2 + $0x80] ss:$16 sps:$4 sm:$0xff]   ;;  %v5270_v15 = vld [vmem:[#allocation2 + $0x64] ss:$16 sps:$4 sm:$0xff]   ;;  %v5269_v16 = vld [vmem:[#allocation2 + $0x88] ss:$16 sps:$4 sm:$0xff]  }
 0x186   :  { %899 = vmatpush1.bf16.msra.mxu0 %v5254_v5  ;;  %v5273_v17 = vld [vmem:[#allocation2 + $0x6c] ss:$16 sps:$4 sm:$0xff]   ;;  %v5272_v18 = vld [vmem:[#allocation2 + $0x60] ss:$16 sps:$4 sm:$0xff]   ;;  %v5276_v19 = vld [vmem:[#allocation2 + $0x44] ss:$16 sps:$4 sm:$0xff]  }
 0x187   :  { %900 = vmatprep.subr.bf16.mxu0 %v5258_v8  ;;  %942 = vmatpush1.bf16.msra.mxu1 %v5257_v7  ;;  %v5275_v20 = vld [vmem:[#allocation2 + $0x68] ss:$16 sps:$4 sm:$0xff]   ;;  %v5279_v21 = vld [vmem:[#allocation2 + $0x4c] ss:$16 sps:$4 sm:$0xff]   ;;  %v5278_v22 = vld [vmem:[#allocation2 + $0x40] ss:$16 sps:$4 sm:$0xff]  }
 0x188   :  { %943 = vmatprep.subr.bf16.mxu1 %v5261_v10  ;;  %v5282_v23 = vld [vmem:[#allocation2 + $0x24] ss:$16 sps:$4 sm:$0xff]   ;;  %v5281_v24 = vld [vmem:[#allocation2 + $0x48] ss:$16 sps:$4 sm:$0xff]   ;;  %v5285_v25 = vld [vmem:[#allocation2 + $0x2c] ss:$16 sps:$4 sm:$0xff]  }
 0x189   :  { %v5284_v26 = vld [vmem:[#allocation2 + $0x20] ss:$16 sps:$4 sm:$0xff]   ;;  %v5288_v27 = vld [vmem:[#allocation2 + $0x4] ss:$16 sps:$4 sm:$0xff]   ;;  %v5287_v28 = vld [vmem:[#allocation2 + $0x28] ss:$16 sps:$4 sm:$0xff]  }
 0x18a   :  { %901 = vmatpush1.bf16.msra.mxu0 %v5260_v9  ;;  %v5291_v29 = vld [vmem:[#allocation2 + $0xc] ss:$16 sps:$4 sm:$0xff]   ;;  %v5290_v30 = vld [vmem:[#allocation2] ss:$16 sps:$4 sm:$0xff]   ;;  %v5294_v31 = vld [vmem:[#allocation2 + $0x1e4] ss:$16 sps:$4 sm:$0xff]  }
 0x18b   :  { %902 = vmatprep.subr.bf16.mxu0 %v5264_v11  ;;  %944 = vmatpush1.bf16.msra.mxu1 %v5263_v12  ;;  %v5293_v32 = vld [vmem:[#allocation2 + $0x8] ss:$16 sps:$4 sm:$0xff]   ;;  %v5297_v33 = vld [vmem:[#allocation2 + $0x1ec] ss:$16 sps:$4 sm:$0xff]   ;;  %v5296_v34 = vld [vmem:[#allocation2 + $0x1e0] ss:$16 sps:$4 sm:$0xff]  }
 0x18c   :  { %945 = vmatprep.subr.bf16.mxu1 %v5267_v13  ;;  %v5300_v35 = vld [vmem:[#allocation2 + $0x1c4] ss:$16 sps:$4 sm:$0xff]   ;;  %v5299_v36 = vld [vmem:[#allocation2 + $0x1e8] ss:$16 sps:$4 sm:$0xff]   ;;  %v5303_v37 = vld [vmem:[#allocation2 + $0x1cc] ss:$16 sps:$4 sm:$0xff]  }
 0x18d   :  { %v5302_v38 = vld [vmem:[#allocation2 + $0x1c0] ss:$16 sps:$4 sm:$0xff]   ;;  %s6906_s30 = sld [smem:[#allocation56_spill]]  ;;  %v5306_v39 = vld [vmem:[#allocation2 + $0x1a4] ss:$16 sps:$4 sm:$0xff]   ;;  %vm6487_vm0 = vmmov 0  }
 0x18e   :  { %903 = vmatpush1.bf16.msra.mxu0 %v5266_v14  ;;  %v5305_v40 = vld [vmem:[#allocation2 + $0x1c8] ss:$16 sps:$4 sm:$0xff]   ;;  %v5309_v41 = vld [vmem:[#allocation2 + $0x1ac] ss:$16 sps:$4 sm:$0xff]   ;;  %v5308_v42 = vld [vmem:[#allocation2 + $0x1a0] ss:$16 sps:$4 sm:$0xff]  }
 0x18f   :  { %904 = vmatprep.subr.bf16.mxu0 %v5270_v15  ;;  %946 = vmatpush1.bf16.msra.mxu1 %v5269_v16  ;;  %v5312_v43 = vld [vmem:[#allocation2 + $0x184] ss:$16 sps:$4 sm:$0xff]   ;;  %v5311_v44 = vld [vmem:[#allocation2 + $0x1a8] ss:$16 sps:$4 sm:$0xff]   ;;  %v5315_v45 = vld [vmem:[#allocation2 + $0x18c] ss:$16 sps:$4 sm:$0xff]  }
 0x190   :  { %947 = vmatprep.subr.bf16.mxu1 %v5273_v17  ;;  %v5314_v46 = vld [vmem:[#allocation2 + $0x180] ss:$16 sps:$4 sm:$0xff]   ;;  %v5318_v48 = vld [vmem:[#allocation2 + $0x164] ss:$16 sps:$4 sm:$0xff]   ;;  %v5317_v49 = vld [vmem:[#allocation2 + $0x188] ss:$16 sps:$4 sm:$0xff]  }
 0x191   :  { %v5321_v50 = vld [vmem:[#allocation2 + $0x16c] ss:$16 sps:$4 sm:$0xff]   ;;  %v5320_v51 = vld [vmem:[#allocation2 + $0x160] ss:$16 sps:$4 sm:$0xff]   ;;  %v5324_v52 = vld [vmem:[#allocation2 + $0x144] ss:$16 sps:$4 sm:$0xff]  }
 0x192   :  { %905 = vmatpush1.bf16.msra.mxu0 %v5272_v18  ;;  %v5323_v53 = vld [vmem:[#allocation2 + $0x168] ss:$16 sps:$4 sm:$0xff]   ;;  %v5327_v54 = vld [vmem:[#allocation2 + $0x14c] ss:$16 sps:$4 sm:$0xff]   ;;  %v5326_v55 = vld [vmem:[#allocation2 + $0x140] ss:$16 sps:$4 sm:$0xff]  }
 0x193   :  { %906 = vmatprep.subr.bf16.mxu0 %v5276_v19  ;;  %948 = vmatpush1.bf16.msra.mxu1 %v5275_v20  ;;  %v5343_v47 = vld [vmem:[%s6906_s30 + $0x4] ss:$8 sps:$4 sm:$0xff]   ;;  %v5329_v57 = vld [vmem:[#allocation2 + $0x148] ss:$16 sps:$4 sm:$0xff]   ;;  %v5332_v59 = vld [vmem:[#allocation2 + $0x120] ss:$16 sps:$4 sm:$0xff]  }
 0x194   :  { %949 = vmatprep.subr.bf16.mxu1 %v5279_v21  ;;  %928 = vmatprep.mubr.bf16.mxu0 %v5343_v47  ;;  %v5330_v56 = vld [vmem:[#allocation2 + $0x124] ss:$16 sps:$4 sm:$0xff]   ;;  %v5333_v58 = vld [vmem:[#allocation2 + $0x12c] ss:$16 sps:$4 sm:$0xff]   ;;  %v5335_v61 = vld [vmem:[#allocation2 + $0x128] ss:$16 sps:$4 sm:$0xff]  }
 0x195   :  { %971 = vmatprep.mubr.bf16.mxu1 %v5343_v47  ;;  %v5336_v60 = vld [vmem:[#allocation2 + $0x104] ss:$16 sps:$4 sm:$0xff]   ;;  %v5339_v62 = vld [vmem:[#allocation2 + $0x10c] ss:$16 sps:$4 sm:$0xff]   ;;  %v5338_v63 = vld [vmem:[#allocation2 + $0x100] ss:$16 sps:$4 sm:$0xff]  }
 0x196   :  { %907 = vmatpush1.bf16.msra.mxu0 %v5278_v22  ;;  %v5347_v0 = vld [vmem:[#allocation6 + $0x74] ss:$8 sps:$4 sm:$0xff]   ;;  %v5345_v4 = vld [vmem:[#allocation6 + $0x70] ss:$8 sps:$4 sm:$0xff]   ;;  %v5353_v5 = vld [vmem:[#allocation6 + $0x64] ss:$8 sps:$4 sm:$0xff]  }
 0x197   :  { %908 = vmatprep.subr.bf16.mxu0 %v5282_v23  ;;  %950 = vmatpush1.bf16.msra.mxu1 %v5281_v24  ;;  %v5344_v1 = vld [vmem:[#allocation2 + $0x108] ss:$16 sps:$4 sm:$0xff]   ;;  %v5348_v6 = vld [vmem:[#allocation6 + $0x170] ss:$8 sps:$4 sm:$0xff]   ;;  %v5351_v8 = vld [vmem:[#allocation6 + $0x60] ss:$8 sps:$4 sm:$0xff]  }
 0x198   :  { %951 = vmatprep.subr.bf16.mxu1 %v5285_v25  ;;  %v5341_v2 = vld [vmem:[%s6906_s30] ss:$8 sps:$4 sm:$0xff]   ;;  %v5354_v10 = vld [vmem:[#allocation6 + $0x160] ss:$8 sps:$4 sm:$0xff]   ;;  %v5357_v12 = vld [vmem:[#allocation6 + $0x50] ss:$8 sps:$4 sm:$0xff]  }
 0x199   :  { %v5350_v3 = vld [vmem:[#allocation6 + $0x174] ss:$8 sps:$4 sm:$0xff]   ;;  %v5356_v7 = vld [vmem:[#allocation6 + $0x164] ss:$8 sps:$4 sm:$0xff]   ;;  %v5360_v14 = vld [vmem:[#allocation6 + $0x150] ss:$8 sps:$4 sm:$0xff]  }
 0x19a   :  { %909 = vmatpush1.bf16.msra.mxu0 %v5284_v26  ;;  %v5359_v9 = vld [vmem:[#allocation6 + $0x54] ss:$8 sps:$4 sm:$0xff]   ;;  %v5365_v13 = vld [vmem:[#allocation6 + $0x44] ss:$8 sps:$4 sm:$0xff]   ;;  %v5363_v16 = vld [vmem:[#allocation6 + $0x40] ss:$8 sps:$4 sm:$0xff]  }
 0x19b   :  { %910 = vmatprep.subr.bf16.mxu0 %v5288_v27  ;;  %952 = vmatpush1.bf16.msra.mxu1 %v5287_v28  ;;  %v5362_v11 = vld [vmem:[#allocation6 + $0x154] ss:$8 sps:$4 sm:$0xff]   ;;  %v5368_v15 = vld [vmem:[#allocation6 + $0x144] ss:$8 sps:$4 sm:$0xff]   ;;  %v5366_v17 = vld [vmem:[#allocation6 + $0x140] ss:$8 sps:$4 sm:$0xff]  }
 0x19c   :  { %953 = vmatprep.subr.bf16.mxu1 %v5291_v29  ;;  %v5371_v18 = vld [vmem:[#allocation6 + $0x34] ss:$8 sps:$4 sm:$0xff]   ;;  %v5369_v19 = vld [vmem:[#allocation6 + $0x30] ss:$8 sps:$4 sm:$0xff]   ;;  %v5377_v21 = vld [vmem:[#allocation6 + $0x24] ss:$8 sps:$4 sm:$0xff]  }
 0x19d   :  { %v5374_v20 = vld [vmem:[#allocation6 + $0x134] ss:$8 sps:$4 sm:$0xff]   ;;  %v5372_v22 = vld [vmem:[#allocation6 + $0x130] ss:$8 sps:$4 sm:$0xff]   ;;  %v5380_v23 = vld [vmem:[#allocation6 + $0x124] ss:$8 sps:$4 sm:$0xff]  }
 0x19e   :  { %911 = vmatpush1.bf16.msra.mxu0 %v5290_v30  ;;  %v5375_v24 = vld [vmem:[#allocation6 + $0x20] ss:$8 sps:$4 sm:$0xff]   ;;  %v5383_v25 = vld [vmem:[#allocation6 + $0x14] ss:$8 sps:$4 sm:$0xff]   ;;  %v5381_v28 = vld [vmem:[#allocation6 + $0x10] ss:$8 sps:$4 sm:$0xff]  }
 0x19f   :  { %912 = vmatprep.subr.bf16.mxu0 %v5294_v31  ;;  %954 = vmatpush1.bf16.msra.mxu1 %v5293_v32  ;;  %v5378_v26 = vld [vmem:[#allocation6 + $0x120] ss:$8 sps:$4 sm:$0xff]   ;;  %v5386_v27 = vld [vmem:[#allocation6 + $0x114] ss:$8 sps:$4 sm:$0xff]   ;;  %v5389_v29 = vld [vmem:[#allocation6 + $0x4] ss:$8 sps:$4 sm:$0xff]  }
 0x1a0   :  { %955 = vmatprep.subr.bf16.mxu1 %v5297_v33  ;;  %v5384_v30 = vld [vmem:[#allocation6 + $0x110] ss:$8 sps:$4 sm:$0xff]   ;;  %v5392_v31 = vld [vmem:[#allocation6 + $0x104] ss:$8 sps:$4 sm:$0xff]   ;;  %v5387_v32 = vld [vmem:[#allocation6] ss:$8 sps:$4 sm:$0xff]  }
 0x1a1   :  { %v5395_v33 = vld [vmem:[#allocation6 + $0xf4] ss:$8 sps:$4 sm:$0xff]   ;;  %v5416_v47 = vld [vmem:[#allocation6 + $0x1c4] ss:$8 sps:$4 sm:$0xff]   ;;  %s6907_s18 = sld [smem:[#allocation57_spill]] }
 0x1a2   :  { %913 = vmatpush2.bf16.msra.mxu0 %v5296_v34  ;;  %v5390_v34 = vld [vmem:[#allocation6 + $0x100] ss:$8 sps:$4 sm:$0xff]   ;;  %s6908_s16 = sld [smem:[#allocation58_spill]] }
 0x1a3   :  { %914 = vmatprep.subr.bf16.mxu0 %v5300_v35  ;;  %956 = vmatpush2.bf16.msra.mxu1 %v5299_v36  ;;  %v5398_v35 = vld [vmem:[#allocation6 + $0x1f4] ss:$8 sps:$4 sm:$0xff]   ;;  %v5393_v36 = vld [vmem:[#allocation6 + $0xf0] ss:$8 sps:$4 sm:$0xff]   ;;  %s6911_s12 = sld [smem:[#allocation70_spill]] }
 0x1a4   :  { %957 = vmatprep.subr.bf16.mxu1 %v5303_v37  ;;  %v5401_v37 = vld [vmem:[#allocation6 + $0xe4] ss:$8 sps:$4 sm:$0xff]   ;;  %s6912_s29 = sld [smem:[#allocation74_spill]] }
 0x1a6   :  { %915 = vmatpush2.bf16.msra.mxu0 %v5302_v38  ;;  %v5396_v38 = vld [vmem:[#allocation6 + $0x1f0] ss:$8 sps:$4 sm:$0xff]  }
 0x1a7   :  { %916 = vmatprep.subr.bf16.mxu0 %v5306_v39  ;;  %958 = vmatpush2.bf16.msra.mxu1 %v5305_v40  ;;  %v5404_v39 = vld [vmem:[#allocation6 + $0x1e4] ss:$8 sps:$4 sm:$0xff]   ;;  %v5399_v40 = vld [vmem:[#allocation6 + $0xe0] ss:$8 sps:$4 sm:$0xff]  }
 0x1a8   :  { %959 = vmatprep.subr.bf16.mxu1 %v5309_v41  ;;  %v5407_v41 = vld [vmem:[#allocation6 + $0xd4] ss:$8 sps:$4 sm:$0xff]  }
 0x1aa   :  { %917 = vmatpush2.bf16.msra.mxu0 %v5308_v42  ;;  %v5402_v42 = vld [vmem:[#allocation6 + $0x1e0] ss:$8 sps:$4 sm:$0xff]  }
 0x1ab   :  { %918 = vmatprep.subr.bf16.mxu0 %v5312_v43  ;;  %960 = vmatpush2.bf16.msra.mxu1 %v5311_v44  ;;  %v5410_v43 = vld [vmem:[#allocation6 + $0x1d4] ss:$8 sps:$4 sm:$0xff]   ;;  %v5405_v44 = vld [vmem:[#allocation6 + $0xd0] ss:$8 sps:$4 sm:$0xff]  }
 0x1ac   :  { %961 = vmatprep.subr.bf16.mxu1 %v5315_v45  ;;  %v5413_v45 = vld [vmem:[#allocation6 + $0xc4] ss:$8 sps:$4 sm:$0xff]  }
 0x1ae   :  { %919 = vmatpush2.bf16.msra.mxu0 %v5314_v46  ;;  %v5408_v46 = vld [vmem:[#allocation6 + $0x1d0] ss:$8 sps:$4 sm:$0xff]  }
 0x1af   :  { %920 = vmatprep.subr.bf16.mxu0 %v5318_v48  ;;  %962 = vmatpush2.bf16.msra.mxu1 %v5317_v49  ;;  %v5411_v48 = vld [vmem:[#allocation6 + $0xc0] ss:$8 sps:$4 sm:$0xff]   ;;  %v5419_v49 = vld [vmem:[#allocation6 + $0xb4] ss:$8 sps:$4 sm:$0xff]  }
 0x1b0   :  { %963 = vmatprep.subr.bf16.mxu1 %v5321_v50  ;;  %v5414_v50 = vld [vmem:[#allocation6 + $0x1c0] ss:$8 sps:$4 sm:$0xff]  }
 0x1b2   :  { %921 = vmatpush2.bf16.msra.mxu0 %v5320_v51  ;;  %v5417_v51 = vld [vmem:[#allocation6 + $0xb0] ss:$8 sps:$4 sm:$0xff]  }
 0x1b3   :  { %922 = vmatprep.subr.bf16.mxu0 %v5324_v52  ;;  %964 = vmatpush2.bf16.msra.mxu1 %v5323_v53  ;;  %v5422_v52 = vld [vmem:[#allocation6 + $0x1b4] ss:$8 sps:$4 sm:$0xff]   ;;  %v5420_v53 = vld [vmem:[#allocation6 + $0x1b0] ss:$8 sps:$4 sm:$0xff]  }
 0x1b4   :  { %965 = vmatprep.subr.bf16.mxu1 %v5327_v54  ;;  %v5425_v54 = vld [vmem:[#allocation6 + $0xa4] ss:$8 sps:$4 sm:$0xff]  }
 0x1b6   :  { %923 = vmatpush2.bf16.msra.mxu0 %v5326_v55  ;;  %v5423_v55 = vld [vmem:[#allocation6 + $0xa0] ss:$8 sps:$4 sm:$0xff]  }
 0x1b7   :  { %924 = vmatprep.subr.bf16.mxu0 %v5330_v56  ;;  %966 = vmatpush2.bf16.msra.mxu1 %v5329_v57  ;;  %v5428_v56 = vld [vmem:[#allocation6 + $0x1a4] ss:$8 sps:$4 sm:$0xff]   ;;  %v5426_v57 = vld [vmem:[#allocation6 + $0x1a0] ss:$8 sps:$4 sm:$0xff]  }
 0x1b8   :  { %967 = vmatprep.subr.bf16.mxu1 %v5333_v58  ;;  %v5431_v58 = vld [vmem:[#allocation6 + $0x94] ss:$8 sps:$4 sm:$0xff]  }
 0x1ba   :  { %925 = vmatpush2.bf16.msra.mxu0 %v5332_v59  ;;  %v5429_v59 = vld [vmem:[#allocation6 + $0x90] ss:$8 sps:$4 sm:$0xff]  }
 0x1bb   :  { %926 = vmatprep.subr.bf16.mxu0 %v5336_v60  ;;  %968 = vmatpush2.bf16.msra.mxu1 %v5335_v61  ;;  %v5434_v60 = vld [vmem:[#allocation6 + $0x194] ss:$8 sps:$4 sm:$0xff]   ;;  %v5432_v61 = vld [vmem:[#allocation6 + $0x190] ss:$8 sps:$4 sm:$0xff]  }
 0x1bc   :  { %969 = vmatprep.subr.bf16.mxu1 %v5339_v62  ;;  %v5437_v62 = vld [vmem:[#allocation6 + $0x84] ss:$8 sps:$4 sm:$0xff]  }
 0x1be   :  { %927 = vmatpush2.bf16.msra.mxu0 %v5338_v63  ;;  %v5435_v63 = vld [vmem:[#allocation6 + $0x80] ss:$8 sps:$4 sm:$0xff]  }
 0x1bf   :  { %1390 = vmatprep.subr.bf16.mxu0 %v5347_v0  ;;  %970 = vmatpush2.bf16.msra.mxu1 %v5344_v1  ;;  %v5440_v0 = vld [vmem:[#allocation6 + $0x184] ss:$8 sps:$4 sm:$0xff]   ;;  %v5438_v1 = vld [vmem:[#allocation6 + $0x180] ss:$8 sps:$4 sm:$0xff]  }
 0x1c0   :  { %1433 = vmatprep.subr.bf16.mxu1 %v5350_v3  ;;  %v546_v3 = vlaneseq }
 0x1c1   :  { %929 = vmatmul.mubr.bf16.vlgmr.msra.gmra.mxu0 %v5341_v2 }
 0x1c2   :  { %1391 = vmatpush1.bf16.msra.mxu0 %v5345_v4  ;;  %972 = vmatmul.mubr.bf16.vlgmr.msra.gmra.mxu1 %v5341_v2  ;;  %v5443_v2 = vld [vmem:[#allocation9 + $0x74] ss:$8 sps:$4 sm:$0xff]   ;;  %v547_v4 = vshrl.u32 %v546_v3, 7  ;;  %v5473_v3 = vld [vmem:[#allocation15 + $0x20] sm:$0xff]  }
 0x1c3   :  { %1392 = vmatprep.subr.bf16.mxu0 %v5353_v5  ;;  %1434 = vmatpush1.bf16.msra.mxu1 %v5348_v6 }
 0x1c4   :  { %1435 = vmatprep.subr.bf16.mxu1 %v5356_v7  ;;  %v6754_v5 = vsub.s32 1, %v547_v4  ;;  %v6756_v6 = vsub.s32 2, %v547_v4  ;;  %v6758_v7 = vsub.s32 3, %v547_v4 }
 0x1c6   :  { %1393 = vmatpush1.bf16.msra.mxu0 %v5351_v8  ;;  %v6760_v8 = vsub.s32 0, %v547_v4  ;;  %v5474_v4 = vld [vmem:[#allocation15 + $0x58] sm:$0xff]  }
 0x1c7   :  { %1394 = vmatprep.subr.bf16.mxu0 %v5359_v9  ;;  %1436 = vmatpush1.bf16.msra.mxu1 %v5354_v10  ;;  %v544_v9 = vld [vmem:[#allocation4] sm:$0xf] }
 0x1c8   :  { %1437 = vmatprep.subr.bf16.mxu1 %v5362_v11  ;;  %v553_v11 = vrot.slane %v544_v9, %v6754_v5 }
 0x1ca   :  { %1395 = vmatpush1.bf16.msra.mxu0 %v5357_v12  ;;  %v557_v12 = vrot.slane %v544_v9, %v6756_v6 }
 0x1cb   :  { %1396 = vmatprep.subr.bf16.mxu0 %v5365_v13  ;;  %1438 = vmatpush1.bf16.msra.mxu1 %v5360_v14  ;;  %v561_v13 = vrot.slane %v544_v9, %v6758_v7  ;;  %v549_v14 = vrot.slane %v544_v9, %v6760_v8  ;;  %v5475_v9 = vld [vmem:[#allocation15 + $0x18] sm:$0xff]  }
 0x1cc   :  { %1439 = vmatprep.subr.bf16.mxu1 %v5368_v15 }
 0x1ce   :  { %1397 = vmatpush1.bf16.msra.mxu0 %v5363_v16 }
 0x1cf   :  { %1398 = vmatprep.subr.bf16.mxu0 %v5371_v18  ;;  %1440 = vmatpush1.bf16.msra.mxu1 %v5366_v17 }
 0x1d0   :  { %1441 = vmatprep.subr.bf16.mxu1 %v5374_v20 }
 0x1d2   :  { %1399 = vmatpush1.bf16.msra.mxu0 %v5369_v19 }
 0x1d3   :  { %1400 = vmatprep.subr.bf16.mxu0 %v5377_v21  ;;  %1442 = vmatpush1.bf16.msra.mxu1 %v5372_v22 }
 0x1d4   :  { %1443 = vmatprep.subr.bf16.mxu1 %v5380_v23 }
 0x1d6   :  { %1401 = vmatpush1.bf16.msra.mxu0 %v5375_v24 }
 0x1d7   :  { %1402 = vmatprep.subr.bf16.mxu0 %v5383_v25  ;;  %1444 = vmatpush1.bf16.msra.mxu1 %v5378_v26 }
 0x1d8   :  { %1445 = vmatprep.subr.bf16.mxu1 %v5386_v27 }
 0x1da   :  { %1403 = vmatpush1.bf16.msra.mxu0 %v5381_v28 }
 0x1db   :  { %1404 = vmatprep.subr.bf16.mxu0 %v5389_v29  ;;  %1446 = vmatpush1.bf16.msra.mxu1 %v5384_v30 }
 0x1dc   :  { %1447 = vmatprep.subr.bf16.mxu1 %v5392_v31 }
 0x1de   :  { %1405 = vmatpush1.bf16.msra.mxu0 %v5387_v32 }
 0x1df   :  { %1406 = vmatprep.subr.bf16.mxu0 %v5395_v33  ;;  %1448 = vmatpush1.bf16.msra.mxu1 %v5390_v34 }
 0x1e0   :  { %1449 = vmatprep.subr.bf16.mxu1 %v5398_v35 }
 0x1e2   :  { %1407 = vmatpush2.bf16.msra.mxu0 %v5393_v36 }
 0x1e3   :  { %1408 = vmatprep.subr.bf16.mxu0 %v5401_v37  ;;  %1450 = vmatpush2.bf16.msra.mxu1 %v5396_v38 }
 0x1e4   :  { %1451 = vmatprep.subr.bf16.mxu1 %v5404_v39  ;;  %v5441_v39 = vld [vmem:[#allocation9 + $0x70] ss:$8 sps:$4 sm:$0xff]  }
 0x1e6   :  { %1409 = vmatpush2.bf16.msra.mxu0 %v5399_v40 }
 0x1e7   :  { %1410 = vmatprep.subr.bf16.mxu0 %v5407_v41  ;;  %1452 = vmatpush2.bf16.msra.mxu1 %v5402_v42  ;;  %v5446_v42 = vld [vmem:[#allocation9 + $0x64] ss:$8 sps:$4 sm:$0xff]  }
 0x1e8   :  { %1453 = vmatprep.subr.bf16.mxu1 %v5410_v43 }
 0x1ea   :  { %1411 = vmatpush2.bf16.msra.mxu0 %v5405_v44  ;;  %v5444_v44 = vld [vmem:[#allocation9 + $0x60] ss:$8 sps:$4 sm:$0xff]  }
 0x1eb   :  { %1412 = vmatprep.subr.bf16.mxu0 %v5413_v45  ;;  %1454 = vmatpush2.bf16.msra.mxu1 %v5408_v46  ;;  %v5449_v45 = vld [vmem:[#allocation9 + $0x54] ss:$8 sps:$4 sm:$0xff]   ;;  %v6485_v46 = vmov 0  }
 0x1ec   :  { %1455 = vmatprep.subr.bf16.mxu1 %v5416_v47  ;;  %v5447_v47 = vld [vmem:[#allocation9 + $0x50] ss:$8 sps:$4 sm:$0xff]  }
 0x1ee   :  { %1413 = vmatpush2.bf16.msra.mxu0 %v5411_v48  ;;  %v5452_v48 = vld [vmem:[#allocation9 + $0x44] ss:$8 sps:$4 sm:$0xff]  }
 0x1ef   :  { %1414 = vmatprep.subr.bf16.mxu0 %v5419_v49  ;;  %1456 = vmatpush2.bf16.msra.mxu1 %v5414_v50  ;;  %v5450_v49 = vld [vmem:[#allocation9 + $0x40] ss:$8 sps:$4 sm:$0xff]   ;;  %v5455_v50 = vld [vmem:[#allocation9 + $0x34] ss:$8 sps:$4 sm:$0xff]  }
 0x1f0   :  { %1457 = vmatprep.subr.bf16.mxu1 %v5422_v52  ;;  %v5458_v52 = vld [vmem:[#allocation9 + $0x24] ss:$8 sps:$4 sm:$0xff]  }
 0x1f2   :  { %1415 = vmatpush2.bf16.msra.mxu0 %v5417_v51  ;;  %v5453_v51 = vld [vmem:[#allocation9 + $0x30] ss:$8 sps:$4 sm:$0xff]  }
 0x1f3   :  { %1416 = vmatprep.subr.bf16.mxu0 %v5425_v54  ;;  %1458 = vmatpush2.bf16.msra.mxu1 %v5420_v53  ;;  %v5456_v53 = vld [vmem:[#allocation9 + $0x20] ss:$8 sps:$4 sm:$0xff]   ;;  %v5461_v54 = vld [vmem:[#allocation9 + $0x14] ss:$8 sps:$4 sm:$0xff]  }
 0x1f4   :  { %1459 = vmatprep.subr.bf16.mxu1 %v5428_v56  ;;  %v5464_v56 = vld [vmem:[#allocation9 + $0x4] ss:$8 sps:$4 sm:$0xff]  }
 0x1f6   :  { %1417 = vmatpush2.bf16.msra.mxu0 %v5423_v55  ;;  %v5459_v55 = vld [vmem:[#allocation9 + $0x10] ss:$8 sps:$4 sm:$0xff]  }
 0x1f7   :  { %1418 = vmatprep.subr.bf16.mxu0 %v5431_v58  ;;  %1460 = vmatpush2.bf16.msra.mxu1 %v5426_v57  ;;  %v5462_v57 = vld [vmem:[#allocation9] ss:$8 sps:$4 sm:$0xff]  }
 0x1f8   :  { %1461 = vmatprep.subr.bf16.mxu1 %v5434_v60  ;;  %v5466_v58 = vld [vmem:[#allocation15 + $0x78] sm:$0xff]  }
 0x1f9   :  { %v5467_v60 = vld [vmem:[#allocation15 + $0x38] sm:$0xff]  }
 0x1fa   :  { %1419 = vmatpush2.bf16.msra.mxu0 %v5429_v59  ;;  %v5465_v59 = vld [vmem:[%s6907_s18] sm:$0xff]  }
 0x1fb   :  { %1420 = vmatprep.subr.bf16.mxu0 %v5437_v62  ;;  %1462 = vmatpush2.bf16.msra.mxu1 %v5432_v61  ;;  %v5484_v61 = vld [vmem:[%s6908_s16 + $0x4] ss:$8 sps:$4 sm:$0xff]   ;;  %v5468_v62 = vld [vmem:[#allocation15 + $0x70] sm:$0xff]  }
 0x1fc   :  { %1463 = vmatprep.subr.bf16.mxu1 %v5440_v0  ;;  %v5470_v0 = vld [vmem:[#allocation15 + $0x68] sm:$0xff]  }
 0x1fe   :  { %1421 = vmatpush2.bf16.msra.mxu0 %v5435_v63  ;;  %v5469_v63 = vld [vmem:[#allocation15 + $0x30] sm:$0xff]  }
 0x1ff   :  { %1464 = vmatpush2.bf16.msra.mxu1 %v5438_v1  ;;  %1596 = vmatprep.subr.bf16.mxu0 %v5443_v2  ;;  %v5471_v1 = vld [vmem:[#allocation15 + $0x28] sm:$0xff]   ;;  %v5472_v2 = vld [vmem:[#allocation15 + $0x60] sm:$0xff]  }
 0x281   :  { %v930_v10 = vpop.f32.mrf.mxu0 }
 0x282   :  { %v973_v16 = vpop.f32.mrf.mxu1  ;;  %v931_v23 = vadd.f32 %v930_v10, %v549_v14  ;;  %v5476_v10 = vld [vmem:[#allocation15 + $0x50] sm:$0xff]  }
 0x283   :  { %v932_v15 = vpop.f32.mrf.mxu0  ;;  %v974_v18 = vadd.f32 %v973_v16, %v557_v12  ;;  %v5482_v16 = vld [vmem:[%s6908_s16] ss:$8 sps:$4 sm:$0xff]  }
 0x284   :  { %v933_v17 = vadd.f32 %v932_v15, %v553_v11  ;;  %v975_v20 = vpop.f32.mrf.mxu1  ;;  %v982_v36 = vmax.f32 %v931_v23, 0.0  ;;  %v5481_v15 = vld [vmem:[#allocation15] sm:$0xff]  }
 0x285   :  { %v934_v19 = vpop.f32.mrf.mxu0  ;;  %v976_v22 = vadd.f32 %v975_v20, %v561_v13  ;;  %v984_v29 = vmax.f32 %v974_v18, 0.0  ;;  %v5486_v18 = vld [vmem:[#allocation12 + $0x38] sm:$0xff]   ;;  %v5488_v20 = vld [vmem:[#allocation12 + $0x30] sm:$0xff]   ;;  %v5491_v23 = vld [vmem:[#allocation12 + $0x60] sm:$0xff]  }
 0x286   :  { %v935_v21 = vadd.f32 %v934_v19, %v549_v14  ;;  %v977_v25 = vpop.f32.mrf.mxu1  ;;  %v983_v28 = vmax.f32 %v933_v17, 0.0  ;;  %v5480_v14 = vld [vmem:[#allocation15 + $0x40] sm:$0xff]   ;;  %v5485_v17 = vld [vmem:[#allocation12 + $0x78] sm:$0xff]   ;;  %v5487_v19 = vld [vmem:[#allocation12 + $0x70] sm:$0xff]  }
 0x287   :  { %v936_v24 = vpop.f32.mrf.mxu0  ;;  %v978_v27 = vadd.f32 %v977_v25, %v557_v12  ;;  %v985_v32 = vmax.f32 %v976_v22, 0.0  ;;  %v5478_v12 = vld [vmem:[#allocation15 + $0x48] sm:$0xff]   ;;  %4971 = vmatprep.subr.bf16.mxu1 %v5485_v17  ;;  %v5493_v25 = vld [vmem:[#allocation12 + $0x58] sm:$0xff]  }
 0x288   :  { %v937_v26 = vadd.f32 %v936_v24, %v553_v11  ;;  %v986_v30 = vmax.f32 %v935_v21, 0.0  ;;  %v979_v31 = vpop.f32.mrf.mxu1  ;;  %v5477_v11 = vld [vmem:[#allocation15 + $0x10] sm:$0xff]   ;;  %v5489_v21 = vld [vmem:[#allocation12 + $0x68] sm:$0xff]   ;;  %v5492_v24 = vld [vmem:[#allocation12 + $0x20] sm:$0xff]  }
 0x289   :  { %v988_v34 = vmax.f32 %v978_v27, 0.0  ;;  %v980_v35 = vadd.f32 %v979_v31, %v561_v13  ;;  %v5479_v13 = vld [vmem:[#allocation15 + $0x8] sm:$0xff]   ;;  %v5499_v31 = vld [vmem:[#allocation12 + $0x40] sm:$0xff]  }
 0x28a   :  { %v987_v33 = vmax.f32 %v937_v26, 0.0  ;;  %v990_v40 = vpack.c.bf16 %v986_v30, %v982_v36  ;;  %v5490_v22 = vld [vmem:[#allocation12 + $0x28] sm:$0xff]   ;;  %v5494_v26 = vld [vmem:[#allocation12 + $0x18] sm:$0xff]   ;;  %v5495_v27 = vld [vmem:[#allocation12 + $0x50] sm:$0xff]  }
 0x28b   :  { %v989_v38 = vmax.f32 %v980_v35, 0.0  ;;  %v992_v41 = vpack.c.bf16 %v988_v34, %v984_v29  ;;  %v5497_v29 = vld [vmem:[#allocation12 + $0x48] sm:$0xff]   ;;  %v5525_v34 = vld [vmem:[#allocation22 + $0x38] sm:$0xff]   ;;  %v5526_v35 = vld [vmem:[#allocation22 + $0x30] sm:$0xff]  }
 0x28c   :  { %v991_v37 = vpack.c.bf16 %v987_v33, %v983_v28  ;;  %v5496_v28 = vld [vmem:[#allocation12 + $0x10] sm:$0xff]   ;;  %v5498_v30 = vld [vmem:[#allocation12 + $0x8] sm:$0xff]   ;;  %v6486_v33 = vmov 0.0   ;;  %v5505_v17 = vld [vmem:[#allocation18 + $0x18] sm:$0xff]  }
 0x28d   :  { %v993_v43 = vpack.c.bf16 %v989_v38, %v985_v32  ;;  %v5500_v32 = vld [vmem:[#allocation12] sm:$0xff]   ;;  %v5527_v36 = vld [vmem:[#allocation22 + $0x28] sm:$0xff]   ;;  %v1058_v38 = vld [vmem:[#allocation7] sm:$0x3] }
 0x28e   :  { %1422 = vmatprep.mubr.bf16.mxu0 %v991_v37  ;;  %v5528_v37 = vld [vmem:[#allocation22 + $0x20] sm:$0xff]  }
 0x28f   :  { %1423 = vmatmul.mubr.bf16.vlgmr.msra.gmra.mxu0 %v990_v40  ;;  %1465 = vmatprep.mubr.bf16.mxu1 %v993_v43  ;;  %v5529_v40 = vld [vmem:[#allocation22 + $0x18] sm:$0xff]  }
 0x290   :  { %1597 = vmatpush1.bf16.msra.mxu0 %v5441_v39  ;;  %1466 = vmatmul.mubr.bf16.vlgmr.msra.gmra.mxu1 %v992_v41  ;;  %v1063_v39 = vrot.slane %v1058_v38, %v6760_v8 }
 0x291   :  { %1598 = vmatprep.subr.bf16.mxu0 %v5446_v42  ;;  %1628 = vmatprep.mubr.bf16.mxu0 %v6485_v46 }
 0x292   :  { %4972 = vmatpush3.bf16.msra.mxu1 %v5486_v18  ;;  %v5506_v18 = vld [vmem:[#allocation18 + $0x10] sm:$0xff]  }
 0x293   :  { %4973 = vmatprep.subr.bf16.mxu1 %v5487_v19  ;;  %v1067_v19 = vrot.slane %v1058_v38, %v6754_v5 }
 0x294   :  { %1599 = vmatpush1.bf16.msra.mxu0 %v5444_v44 }
 0x295   :  { %1600 = vmatprep.subr.bf16.mxu0 %v5449_v45 }
 0x296   :  { %4974 = vmatpush3.bf16.msra.mxu1 %v5488_v20 }
 0x297   :  { %4975 = vmatprep.subr.bf16.mxu1 %v5489_v21 }
 0x298   :  { %1601 = vmatpush1.bf16.msra.mxu0 %v5447_v47 }
 0x299   :  { %1602 = vmatprep.subr.bf16.mxu0 %v5452_v48 }
 0x29a   :  { %4976 = vmatpush3.bf16.msra.mxu1 %v5490_v22 }
 0x29b   :  { %4977 = vmatprep.subr.bf16.mxu1 %v5491_v23 }
 0x29c   :  { %1603 = vmatpush1.bf16.msra.mxu0 %v5450_v49 }
 0x29d   :  { %1604 = vmatprep.subr.bf16.mxu0 %v5455_v50 }
 0x29e   :  { %4978 = vmatpush3.bf16.msra.mxu1 %v5492_v24 }
 0x29f   :  { %4979 = vmatprep.subr.bf16.mxu1 %v5493_v25  ;;  %v5507_v25 = vld [vmem:[#allocation18 + $0x8] sm:$0xff]  }
 0x2a0   :  { %1605 = vmatpush1.bf16.msra.mxu0 %v5453_v51 }
 0x2a1   :  { %1606 = vmatprep.subr.bf16.mxu0 %v5458_v52 }
 0x2a2   :  { %4980 = vmatpush3.bf16.msra.mxu1 %v5494_v26 }
 0x2a3   :  { %4981 = vmatprep.subr.bf16.mxu1 %v5495_v27  ;;  %v4688_v27 = vld [vmem:[#allocation16] ss:$0 sm:$0xff] }
 0x2a4   :  { %1607 = vmatpush1.bf16.msra.mxu0 %v5456_v53 }
 0x2a5   :  { %1608 = vmatprep.subr.bf16.mxu0 %v5461_v54 }
 0x2a6   :  { %4982 = vmatpush3.bf16.msra.mxu1 %v5496_v28 }
 0x2a7   :  { %4983 = vmatprep.subr.bf16.mxu1 %v5497_v29 }
 0x2a8   :  { %1609 = vmatpush1.bf16.msra.mxu0 %v5459_v55 }
 0x2a9   :  { %1610 = vmatprep.subr.bf16.mxu0 %v5464_v56  ;;  %v1498_v56 = vld [vmem:[#allocation10] sm:$0x3] }
 0x2aa   :  { %4984 = vmatpush3.bf16.msra.mxu1 %v5498_v30 }
 0x2ab   :  { %4985 = vmatprep.subr.bf16.mxu1 %v5499_v31 }
 0x2ac   :  { %1611 = vmatpush1.bf16.msra.mxu0 %v5462_v57 }
 0x2ad   :  { %4993 = vmatprep.subr.bf16.mxu0 %v5466_v58  ;;  %v1507_v58 = vrot.slane %v1498_v56, %v6754_v5 }
 0x2ae   :  { %4986 = vmatpush3.bf16.msra.mxu1 %v5500_v32 }
 0x2af   :  { %1629 = vmatmul.mubr.bf16.vlgmr.msra.gmra.mxu0 %v5465_v59  ;;  %5095 = vmatprep.subr.bf16.mxu1 %v6486_v33  ;;  %v1503_v59 = vrot.slane %v1498_v56, %v6760_v8  ;;  %v5520_v56 = vld [vmem:[#allocation21 + $0x10] sm:$0xff]  }
 0x2b0   :  { %4994 = vmatpush3.bf16.msra.mxu0 %v5467_v60  ;;  %2002 = vmatprep.mubr.bf16.mxu0 %v5484_v61 }
 0x2b1   :  { %4995 = vmatprep.subr.bf16.mxu0 %v5468_v62 }
 0x2b4   :  { %4996 = vmatpush3.bf16.msra.mxu0 %v5469_v63 }
 0x2b5   :  { %4997 = vmatprep.subr.bf16.mxu0 %v5470_v0 }
 0x2b8   :  { %4998 = vmatpush3.bf16.msra.mxu0 %v5471_v1 }
 0x2b9   :  { %4999 = vmatprep.subr.bf16.mxu0 %v5472_v2 }
 0x2bc   :  { %5000 = vmatpush3.bf16.msra.mxu0 %v5473_v3 }
 0x2bd   :  { %5001 = vmatprep.subr.bf16.mxu0 %v5474_v4 }
 0x2c0   :  { %5002 = vmatpush3.bf16.msra.mxu0 %v5475_v9 }
 0x2c1   :  { %5003 = vmatprep.subr.bf16.mxu0 %v5476_v10 }
 0x2c4   :  { %5004 = vmatpush3.bf16.msra.mxu0 %v5477_v11 }
 0x2c5   :  { %5005 = vmatprep.subr.bf16.mxu0 %v5478_v12  ;;  %v5501_v12 = vld [vmem:[#allocation18 + $0x38] sm:$0xff]  }
 0x2c8   :  { %5006 = vmatpush3.bf16.msra.mxu0 %v5479_v13 }
 0x2c9   :  { %5007 = vmatprep.subr.bf16.mxu0 %v5480_v14  ;;  %v5502_v14 = vld [vmem:[#allocation18 + $0x30] sm:$0xff]  }
 0x2cc   :  { %5008 = vmatpush3.bf16.msra.mxu0 %v5481_v15  ;;  %v5503_v15 = vld [vmem:[#allocation18 + $0x28] sm:$0xff]  }
 0x2cd   :  { %5115 = vmatprep.subr.bf16.mxu0 %v6486_v33 }
 0x2cf   :  { %2003 = vmatmul.mubr.bf16.vlgmr.msra.gmra.mxu0 %v5482_v16  ;;  %v5504_v16 = vld [vmem:[#allocation18 + $0x20] sm:$0xff]  }
 0x2d0   :  { %5131 = vmatprep.mubr.msk.bf16.mxu0 %vm6487_vm0, %v6486_v33  ;;  %5116 = vmatpush3.bf16.msra.mxu0 %v5525_v34  ;;  %v5508_v34 = vld [vmem:[#allocation18] sm:$0xff]  }
 0x2d1   :  { %5117 = vmatprep.subr.bf16.mxu0 %v6486_v33 }
 0x2d4   :  { %5118 = vmatpush3.bf16.msra.mxu0 %v5526_v35 }
 0x2d5   :  { %5119 = vmatprep.subr.bf16.mxu0 %v6486_v33 }
 0x2d8   :  { %5120 = vmatpush3.bf16.msra.mxu0 %v5527_v36  ;;  %v5509_v36 = vld [vmem:[#allocation21 + $0x78] sm:$0xff]  }
 0x2d9   :  { %5121 = vmatprep.subr.bf16.mxu0 %v6486_v33 }
 0x2dc   :  { %5122 = vmatpush3.bf16.msra.mxu0 %v5528_v37 }
 0x2dd   :  { %5123 = vmatprep.subr.bf16.mxu0 %v6486_v33 }
 0x2e0   :  { %5124 = vmatpush3.bf16.msra.mxu0 %v5529_v40 }
 0x2e1   :  { %5125 = vmatprep.subr.bf16.mxu0 %v6486_v33 }
 0x34f   :  { %v1424_v41 = vpop.f32.mrf.mxu0 }
 0x350   :  { %v1425_v42 = vadd.f32 %v1424_v41, %v1063_v39  ;;  %v1467_v44 = vpop.f32.mrf.mxu1 }
 0x351   :  { %v1426_v43 = vpop.f32.mrf.mxu0 }
 0x352   :  { %v6780_v47 = vpop.f32.mrf.mxu1  ;;  %v1468_v48 = vadd.f32 %v1467_v44, %v1425_v42  ;;  %v1427_v26 = vadd.f32 %v1426_v43, %v1067_v19  ;;  %v5510_v42 = vld [vmem:[#allocation21 + $0x38] sm:$0xff]   ;;  %v5511_v44 = vld [vmem:[#allocation21 + $0x70] sm:$0xff]  }
 0x353   :  { %v1428_v45 = vpop.f32.mrf.mxu0 }
 0x354   :  { %v1429_v49 = vadd.f32 %v1428_v45, %v1063_v39  ;;  %v1471_v50 = vpop.f32.mrf.mxu1  ;;  %v1476_v52 = vmax.f32 %v1468_v48, 0.0  ;;  %v1470_v35 = vadd.f32 %v6780_v47, %v1427_v26  ;;  %v5512_v48 = vld [vmem:[#allocation21 + $0x30] sm:$0xff]   ;;  %v5513_v47 = vld [vmem:[#allocation21 + $0x68] sm:$0xff]  }
 0x355   :  { %v1430_v55 = vpop.f32.mrf.mxu0 }
 0x356   :  { %v1472_v51 = vadd.f32 %v1471_v50, %v1429_v49  ;;  %v1431_v21 = vadd.f32 %v1430_v55, %v1067_v19  ;;  %v1473_v23 = vpop.f32.mrf.mxu1  ;;  %v1477_v41 = vmax.f32 %v1470_v35, 0.0  ;;  %v5514_v49 = vld [vmem:[#allocation21 + $0x28] sm:$0xff]   ;;  %v5515_v50 = vld [vmem:[#allocation21 + $0x60] sm:$0xff]   ;;  %v5519_v55 = vld [vmem:[#allocation21 + $0x50] sm:$0xff]  }
 0x357   :  { %v5537_v19 = vld [vmem:[#allocation24 + $0x18] sm:$0xff]  }
 0x358   :  { %v1478_v53 = vmax.f32 %v1472_v51, 0.0  ;;  %v1474_v29 = vadd.f32 %v1473_v23, %v1431_v21  ;;  %v5516_v51 = vld [vmem:[#allocation21 + $0x20] sm:$0xff]   ;;  %v4707_v23 = vld [vmem:[#allocation19] ss:$0 sm:$0xff] }
 0x359   :  { %v5543_v35 = vld [vmem:[#allocation27 + $0xe4] ss:$16 sps:$4 sm:$0xff]  }
 0x35a   :  { %v6782_v54 = vpack.c.bf16 %v1478_v53, %v1476_v52  ;;  %v1479_v38 = vmax.f32 %v1474_v29, 0.0  ;;  %v5517_v52 = vld [vmem:[#allocation21 + $0x58] sm:$0xff]   ;;  %v5540_v29 = vld [vmem:[#allocation24] sm:$0xff]  }
 0x35b   :  { %v5518_v53 = vld [vmem:[#allocation21 + $0x18] sm:$0xff]  }
 0x35c   :  { %v2129_v45 = vpack.c.bf16 %v1479_v38, %v1477_v41  ;;  %v5549_v38 = vld [vmem:[#allocation27 + $0xc4] ss:$16 sps:$4 sm:$0xff]   ;;  %v5550_v41 = vld [vmem:[#allocation27 + $0xc8] ss:$16 sps:$4 sm:$0xff]  }
 0x36f   :  { %v1630_v57 = vpop.f32.mrf.mxu0 }
 0x370   :  { %v1631_v0 = vadd.f32 %v1630_v57, %v1503_v59  ;;  %v5521_v57 = vld [vmem:[#allocation21 + $0x48] sm:$0xff]  }
 0x371   :  { %v1632_v60 = vpop.f32.mrf.mxu0 }
 0x372   :  { %v1633_v62 = vadd.f32 %v1632_v60, %v1507_v58  ;;  %v1639_v10 = vmax.f32 %v1631_v0, 0.0  ;;  %v5524_v60 = vld [vmem:[#allocation21] sm:$0xff]  }
 0x373   :  { %v1634_v61 = vpop.f32.mrf.mxu0 }
 0x374   :  { %v1635_v63 = vadd.f32 %v1634_v61, %v1503_v59  ;;  %v1640_v4 = vmax.f32 %v1633_v62, 0.0  ;;  %v5523_v59 = vld [vmem:[#allocation21 + $0x40] sm:$0xff]   ;;  %v5530_v61 = vld [vmem:[#allocation22 + $0x10] sm:$0xff]   ;;  %v5531_v62 = vld [vmem:[#allocation22 + $0x8] sm:$0xff]  }
 0x375   :  { %v1636_v1 = vpop.f32.mrf.mxu0  ;;  %5126 = vmatpush3.bf16.msra.mxu0 %v5530_v61  ;;  %v5582_v61 = vld [vmem:[#allocation27 + $0x2c] ss:$16 sps:$4 sm:$0xff]  }
 0x376   :  { %v1637_v2 = vadd.f32 %v1636_v1, %v1507_v58  ;;  %v1641_v3 = vmax.f32 %v1635_v63, 0.0  ;;  %v5522_v58 = vld [vmem:[#allocation21 + $0x8] sm:$0xff]   ;;  %5127 = vmatprep.subr.bf16.mxu0 %v6486_v33  ;;  %v5532_v63 = vld [vmem:[#allocation22] sm:$0xff]  }
 0x378   :  { %v1642_v9 = vmax.f32 %v1637_v2, 0.0  ;;  %v1643_v13 = vpack.c.bf16 %v1641_v3, %v1639_v10  ;;  %v4671_v3 = vld [vmem:[#allocation13] ss:$0 sm:$0xff] }
 0x379   :  { %5128 = vmatpush3.bf16.msra.mxu0 %v5531_v62  ;;  %v5577_v62 = vld [vmem:[#allocation27 + $0x20] ss:$16 sps:$4 sm:$0xff]  }
 0x37a   :  { %v1644_v11 = vpack.c.bf16 %v1642_v9, %v1640_v4  ;;  %5129 = vmatprep.subr.bf16.mxu0 %v6486_v33 }
 0x37c   :  { %1812 = vmatprep.mubr.bf16.mxu1 %v1644_v11 }
 0x37d   :  { %1813 = vmatmul.mubr.bf16.vlgmr.msra.gmra.mxu1 %v1643_v13  ;;  %5130 = vmatpush3.bf16.msra.mxu0 %v5532_v63  ;;  %v5580_v63 = vld [vmem:[#allocation27 + $0x28] ss:$16 sps:$4 sm:$0xff]  }
 0x37e   :  { %5096 = vmatpush3.bf16.msra.mxu1 %v5501_v12  ;;  %5111 = vmatprep.mubr.msk.bf16.mxu1 %vm6487_vm0, %v6486_v33 }
 0x37f   :  { %5097 = vmatprep.subr.bf16.mxu1 %v6486_v33  ;;  %5135 = vmatprep.subr.bf16.mxu0 %v6486_v33 }
 0x382   :  { %5098 = vmatpush3.bf16.msra.mxu1 %v5502_v14  ;;  %v5533_v14 = vld [vmem:[#allocation24 + $0x38] sm:$0xff]  }
 0x383   :  { %5099 = vmatprep.subr.bf16.mxu1 %v6486_v33 }
 0x386   :  { %5100 = vmatpush3.bf16.msra.mxu1 %v5503_v15 }
 0x387   :  { %5101 = vmatprep.subr.bf16.mxu1 %v6486_v33 }
 0x38a   :  { %5102 = vmatpush3.bf16.msra.mxu1 %v5504_v16  ;;  %v5534_v16 = vld [vmem:[#allocation24 + $0x30] sm:$0xff]  }
 0x38b   :  { %5103 = vmatprep.subr.bf16.mxu1 %v6486_v33 }
 0x38e   :  { %5104 = vmatpush3.bf16.msra.mxu1 %v5505_v17  ;;  %v5535_v17 = vld [vmem:[#allocation24 + $0x28] sm:$0xff]  }
 0x38f   :  { %v5009_v20 = vpop.f32.mrf.mxu0  ;;  %5105 = vmatprep.subr.bf16.mxu1 %v6486_v33 }
 0x391   :  { %v5010_v22 = vpop.f32.mrf.mxu0 }
 0x392   :  { %v5011_v24 = vadd.f32 %v5010_v22, %v5009_v20  ;;  %5106 = vmatpush3.bf16.msra.mxu1 %v5506_v18  ;;  %v5536_v18 = vld [vmem:[#allocation24 + $0x20] sm:$0xff]   ;;  %v5538_v20 = vld [vmem:[#allocation24 + $0x10] sm:$0xff]  }
 0x393   :  { %v5012_v28 = vpop.f32.mrf.mxu0  ;;  %5107 = vmatprep.subr.bf16.mxu1 %v6486_v33 }
 0x394   :  { %v2005_v31 = vadd.f32 %v5011_v24, %v4688_v27  ;;  %v5539_v24 = vld [vmem:[#allocation24 + $0x8] sm:$0xff]  }
 0x395   :  { %v5013_v30 = vpop.f32.mrf.mxu0 }
 0x396   :  { %v5014_v32 = vadd.f32 %v5013_v30, %v5012_v28  ;;  %5108 = vmatpush3.bf16.msra.mxu1 %v5507_v25  ;;  %v2011_v39 = vmax.f32 %v2005_v31, 0.0 }
 0x397   :  { %5109 = vmatprep.subr.bf16.mxu1 %v6486_v33 }
 0x398   :  { %v2008_v37 = vadd.f32 %v5014_v32, %v4688_v27 }
 0x39a   :  { %v2012_v40 = vmax.f32 %v2008_v37, 0.0  ;;  %5110 = vmatpush3.bf16.msra.mxu1 %v5508_v34  ;;  %v5541_v34 = vld [vmem:[#allocation27 + $0xe0] ss:$16 sps:$4 sm:$0xff]   ;;  %v5546_v37 = vld [vmem:[#allocation27 + $0xec] ss:$16 sps:$4 sm:$0xff]  }
 0x39b   :  { %5033 = vmatprep.subr.bf16.mxu1 %v5509_v36  ;;  %v5544_v36 = vld [vmem:[#allocation27 + $0xe8] ss:$16 sps:$4 sm:$0xff]  }
 0x39c   :  { %v2013_v43 = vpack.c.bf16 %v2012_v40, %v2011_v39  ;;  %v5552_v39 = vld [vmem:[#allocation27 + $0xcc] ss:$16 sps:$4 sm:$0xff]   ;;  %v5547_v40 = vld [vmem:[#allocation27 + $0xc0] ss:$16 sps:$4 sm:$0xff]  }
 0x39e   :  { %5112 = vmatmul.mubr.bf16.vlgmr.msra.gmra.mxu1 %v2013_v43  ;;  %v5558_v43 = vld [vmem:[#allocation27 + $0xac] ss:$16 sps:$4 sm:$0xff]  }
 0x39f   :  { %5034 = vmatpush3.bf16.msra.mxu1 %v5510_v42  ;;  %2396 = vmatprep.mubr.bf16.mxu1 %v2129_v45  ;;  %v5555_v42 = vld [vmem:[#allocation27 + $0xa4] ss:$16 sps:$4 sm:$0xff]   ;;  %v5556_v45 = vld [vmem:[#allocation27 + $0xa8] ss:$16 sps:$4 sm:$0xff]  }
 0x3a0   :  { %5035 = vmatprep.subr.bf16.mxu1 %v5511_v44  ;;  %v5553_v44 = vld [vmem:[#allocation27 + $0xa0] ss:$16 sps:$4 sm:$0xff]  }
 0x3a3   :  { %5036 = vmatpush3.bf16.msra.mxu1 %v5512_v48  ;;  %v5561_v48 = vld [vmem:[#allocation27 + $0x84] ss:$16 sps:$4 sm:$0xff]  }
 0x3a4   :  { %5037 = vmatprep.subr.bf16.mxu1 %v5513_v47  ;;  %v5564_v47 = vld [vmem:[#allocation27 + $0x8c] ss:$16 sps:$4 sm:$0xff]  }
 0x3a7   :  { %5038 = vmatpush3.bf16.msra.mxu1 %v5514_v49  ;;  %v5559_v49 = vld [vmem:[#allocation27 + $0x80] ss:$16 sps:$4 sm:$0xff]  }
 0x3a8   :  { %5039 = vmatprep.subr.bf16.mxu1 %v5515_v50  ;;  %v5562_v50 = vld [vmem:[#allocation27 + $0x88] ss:$16 sps:$4 sm:$0xff]  }
 0x3ab   :  { %5040 = vmatpush3.bf16.msra.mxu1 %v5516_v51  ;;  %v5567_v51 = vld [vmem:[#allocation27 + $0x64] ss:$16 sps:$4 sm:$0xff]  }
 0x3ac   :  { %5041 = vmatprep.subr.bf16.mxu1 %v5517_v52  ;;  %v5570_v52 = vld [vmem:[#allocation27 + $0x6c] ss:$16 sps:$4 sm:$0xff]  }
 0x3af   :  { %5042 = vmatpush3.bf16.msra.mxu1 %v5518_v53  ;;  %v5565_v53 = vld [vmem:[#allocation27 + $0x60] ss:$16 sps:$4 sm:$0xff]  }
 0x3b0   :  { %5043 = vmatprep.subr.bf16.mxu1 %v5519_v55  ;;  %v5568_v55 = vld [vmem:[#allocation27 + $0x68] ss:$16 sps:$4 sm:$0xff]  }
 0x3b3   :  { %5044 = vmatpush3.bf16.msra.mxu1 %v5520_v56  ;;  %v5573_v56 = vld [vmem:[#allocation27 + $0x44] ss:$16 sps:$4 sm:$0xff]  }
 0x3b4   :  { %5045 = vmatprep.subr.bf16.mxu1 %v5521_v57  ;;  %v5576_v57 = vld [vmem:[#allocation27 + $0x4c] ss:$16 sps:$4 sm:$0xff]  }
 0x3b7   :  { %5046 = vmatpush3.bf16.msra.mxu1 %v5522_v58  ;;  %v5571_v58 = vld [vmem:[#allocation27 + $0x40] ss:$16 sps:$4 sm:$0xff]  }
 0x3b8   :  { %5047 = vmatprep.subr.bf16.mxu1 %v5523_v59  ;;  %v5574_v59 = vld [vmem:[#allocation27 + $0x48] ss:$16 sps:$4 sm:$0xff]  }
 0x3bb   :  { %5048 = vmatpush3.bf16.msra.mxu1 %v5524_v60  ;;  %v5579_v60 = vld [vmem:[#allocation27 + $0x24] ss:$16 sps:$4 sm:$0xff]  }
 0x3bc   :  { %2741 = vmatprep.subr.bf16.mxu1 %v5543_v35 }
 0x3be   :  { %2397 = vmatmul.mubr.bf16.vlgmr.msra.gmra.mxu1 %v6782_v54 }
 0x3bf   :  { %2773 = vmatprep.mubr.bf16.mxu1 %v6485_v46  ;;  %2742 = vmatpush1.bf16.msra.mxu1 %v5541_v34  ;;  %v5592_v34 = vld [vmem:[#allocation30 + $0xe8] ss:$16 sps:$4 sm:$0xff]  }
 0x3c0   :  { %2743 = vmatprep.subr.bf16.mxu1 %v5549_v38  ;;  %v5595_v38 = vld [vmem:[#allocation30 + $0xc0] ss:$16 sps:$4 sm:$0xff]  }
 0x3c3   :  { %2744 = vmatpush1.bf16.msra.mxu1 %v5547_v40  ;;  %v5603_v40 = vld [vmem:[#allocation30 + $0xa4] ss:$16 sps:$4 sm:$0xff]  }
 0x3c4   :  { %2745 = vmatprep.subr.bf16.mxu1 %v5555_v42  ;;  %v5601_v42 = vld [vmem:[#allocation30 + $0xa0] ss:$16 sps:$4 sm:$0xff]  }
 0x3c7   :  { %2746 = vmatpush1.bf16.msra.mxu1 %v5553_v44  ;;  %v5609_v44 = vld [vmem:[#allocation30 + $0x84] ss:$16 sps:$4 sm:$0xff]  }
 0x3c8   :  { %2747 = vmatprep.subr.bf16.mxu1 %v5561_v48  ;;  %v5607_v48 = vld [vmem:[#allocation30 + $0x80] ss:$16 sps:$4 sm:$0xff]  }
 0x3cb   :  { %2748 = vmatpush1.bf16.msra.mxu1 %v5559_v49  ;;  %v5615_v49 = vld [vmem:[#allocation30 + $0x64] ss:$16 sps:$4 sm:$0xff]  }
 0x3cc   :  { %2749 = vmatprep.subr.bf16.mxu1 %v5567_v51  ;;  %v5613_v51 = vld [vmem:[#allocation30 + $0x60] ss:$16 sps:$4 sm:$0xff]  }
 0x3cf   :  { %2750 = vmatpush1.bf16.msra.mxu1 %v5565_v53  ;;  %v5621_v53 = vld [vmem:[#allocation30 + $0x44] ss:$16 sps:$4 sm:$0xff]  }
 0x3d0   :  { %2751 = vmatprep.subr.bf16.mxu1 %v5573_v56  ;;  %v5619_v56 = vld [vmem:[#allocation30 + $0x40] ss:$16 sps:$4 sm:$0xff]  }
 0x3d3   :  { %2752 = vmatpush1.bf16.msra.mxu1 %v5571_v58  ;;  %v5627_v58 = vld [vmem:[#allocation30 + $0x24] ss:$16 sps:$4 sm:$0xff]  }
 0x3d4   :  { %2753 = vmatprep.subr.bf16.mxu1 %v5579_v60  ;;  %v5625_v60 = vld [vmem:[#allocation30 + $0x20] ss:$16 sps:$4 sm:$0xff]  }
 0x3d7   :  { %2754 = vmatpush1.bf16.msra.mxu1 %v5577_v62  ;;  %v5633_v62 = vld [vmem:[#allocation30 + $0x4] ss:$16 sps:$4 sm:$0xff]  }
 0x43d   :  { %v4987_v0 = vpop.f32.mrf.mxu1 }
 0x43f   :  { %v4988_v1 = vpop.f32.mrf.mxu1 }
 0x440   :  { %v4989_v2 = vadd.f32 %v4988_v1, %v4987_v0  ;;  %v5585_v0 = vld [vmem:[#allocation27 + $0x4] ss:$16 sps:$4 sm:$0xff]   ;;  %v5588_v1 = vld [vmem:[#allocation27 + $0xc] ss:$16 sps:$4 sm:$0xff]  }
 0x441   :  { %v4990_v4 = vpop.f32.mrf.mxu1  ;;  %2755 = vmatprep.subr.bf16.mxu1 %v5585_v0  ;;  %v5631_v0 = vld [vmem:[#allocation30] ss:$16 sps:$4 sm:$0xff]  }
 0x442   :  { %v1815_v9 = vadd.f32 %v4989_v2, %v4671_v3  ;;  %v5583_v2 = vld [vmem:[#allocation27] ss:$16 sps:$4 sm:$0xff]  }
 0x443   :  { %v4991_v54 = vpop.f32.mrf.mxu1  ;;  %2756 = vmatpush1.bf16.msra.mxu1 %v5583_v2  ;;  %v5639_v2 = vld [vmem:[#allocation30 + $0x1e4] ss:$16 sps:$4 sm:$0xff]  }
 0x444   :  { %v4992_v10 = vadd.f32 %v4991_v54, %v4990_v4  ;;  %v1821_v12 = vmax.f32 %v1815_v9, 0.0  ;;  %v5591_v4 = vld [vmem:[#allocation30 + $0xe4] ss:$16 sps:$4 sm:$0xff]   ;;  %v5594_v54 = vld [vmem:[#allocation30 + $0xec] ss:$16 sps:$4 sm:$0xff]  }
 0x445   :  { %3243 = vmatprep.subr.bf16.mxu1 %v5591_v4  ;;  %v5637_v4 = vld [vmem:[#allocation30 + $0x1e0] ss:$16 sps:$4 sm:$0xff]  }
 0x446   :  { %v1818_v11 = vadd.f32 %v4992_v10, %v4671_v3  ;;  %v5586_v3 = vld [vmem:[#allocation27 + $0x8] ss:$16 sps:$4 sm:$0xff]  }
 0x448   :  { %v1822_v13 = vmax.f32 %v1818_v11, 0.0 }
 0x44a   :  { %v2162_v15 = vpack.c.bf16 %v1822_v13, %v1821_v12 }
 0x44c   :  { %5132 = vmatmul.mubr.bf16.vlgmr.msra.gmra.mxu0 %v2162_v15 }
 0x44d   :  { %5136 = vmatpush3.bf16.msra.mxu0 %v5533_v14  ;;  %5151 = vmatprep.mubr.msk.bf16.mxu0 %vm6487_vm0, %v6486_v33 }
 0x44e   :  { %5137 = vmatprep.subr.bf16.mxu0 %v6486_v33 }
 0x451   :  { %5138 = vmatpush3.bf16.msra.mxu0 %v5534_v16 }
 0x452   :  { %5139 = vmatprep.subr.bf16.mxu0 %v6486_v33 }
 0x455   :  { %5140 = vmatpush3.bf16.msra.mxu0 %v5535_v17 }
 0x456   :  { %5141 = vmatprep.subr.bf16.mxu0 %v6486_v33 }
 0x459   :  { %5142 = vmatpush3.bf16.msra.mxu0 %v5536_v18 }
 0x45a   :  { %5143 = vmatprep.subr.bf16.mxu0 %v6486_v33 }
 0x45d   :  { %5144 = vmatpush3.bf16.msra.mxu0 %v5537_v19 }
 0x45e   :  { %v2119_v21 = vpop.f32.mrf.mxu1  ;;  %5145 = vmatprep.subr.bf16.mxu0 %v6486_v33 }
 0x45f   :  { %v2120_v27 = vadd.f32 %v4707_v23, %v2119_v21 }
 0x460   :  { %v5113_v22 = vpop.f32.mrf.mxu1 }
 0x461   :  { %5146 = vmatpush3.bf16.msra.mxu0 %v5538_v20  ;;  %v2126_v31 = vmax.f32 %v2120_v27, 0.0  ;;  %v4748_v20 = vld [vmem:[#allocation25] ss:$0 sm:$0xff] }
 0x462   :  { %v2122_v25 = vpop.f32.mrf.mxu1  ;;  %5147 = vmatprep.subr.bf16.mxu0 %v6486_v33 }
 0x463   :  { %v2123_v26 = vadd.f32 %v4707_v23, %v2122_v25 }
 0x464   :  { %v5114_v28 = vpop.f32.mrf.mxu1 }
 0x465   :  { %5148 = vmatpush3.bf16.msra.mxu0 %v5539_v24  ;;  %v2127_v30 = vmax.f32 %v2123_v26, 0.0 }
 0x466   :  { %5149 = vmatprep.subr.bf16.mxu0 %v6486_v33 }
 0x467   :  { %v2405_v32 = vpack.c.bf16 %v2127_v30, %v2126_v31 }
 0x469   :  { %5150 = vmatpush3.bf16.msra.mxu0 %v5540_v29 }
 0x46a   :  { %2784 = vmatprep.subr.bf16.mxu0 %v5546_v37  ;;  %v5600_v37 = vld [vmem:[#allocation30 + $0xcc] ss:$16 sps:$4 sm:$0xff]  }
 0x46c   :  { %5152 = vmatmul.mubr.bf16.vlgmr.msra.gmra.mxu0 %v2405_v32  ;;  %v5589_v32 = vld [vmem:[#allocation30 + $0xe0] ss:$16 sps:$4 sm:$0xff]  }
 0x46d   :  { %2816 = vmatprep.mubr.bf16.mxu0 %v6485_v46  ;;  %2785 = vmatpush1.bf16.msra.mxu0 %v5544_v36  ;;  %v5597_v36 = vld [vmem:[#allocation30 + $0xc4] ss:$16 sps:$4 sm:$0xff]  }
 0x46e   :  { %2786 = vmatprep.subr.bf16.mxu0 %v5552_v39  ;;  %v5598_v39 = vld [vmem:[#allocation30 + $0xc8] ss:$16 sps:$4 sm:$0xff]  }
 0x471   :  { %2787 = vmatpush1.bf16.msra.mxu0 %v5550_v41  ;;  %v5606_v41 = vld [vmem:[#allocation30 + $0xac] ss:$16 sps:$4 sm:$0xff]  }
 0x472   :  { %2788 = vmatprep.subr.bf16.mxu0 %v5558_v43  ;;  %v5604_v43 = vld [vmem:[#allocation30 + $0xa8] ss:$16 sps:$4 sm:$0xff]  }
 0x475   :  { %2789 = vmatpush1.bf16.msra.mxu0 %v5556_v45  ;;  %v5612_v45 = vld [vmem:[#allocation30 + $0x8c] ss:$16 sps:$4 sm:$0xff]  }
 0x476   :  { %2790 = vmatprep.subr.bf16.mxu0 %v5564_v47  ;;  %v5610_v47 = vld [vmem:[#allocation30 + $0x88] ss:$16 sps:$4 sm:$0xff]  }
 0x479   :  { %2791 = vmatpush1.bf16.msra.mxu0 %v5562_v50  ;;  %v5618_v50 = vld [vmem:[#allocation30 + $0x6c] ss:$16 sps:$4 sm:$0xff]  }
 0x47a   :  { %2792 = vmatprep.subr.bf16.mxu0 %v5570_v52  ;;  %v5616_v52 = vld [vmem:[#allocation30 + $0x68] ss:$16 sps:$4 sm:$0xff]  }
 0x47d   :  { %2793 = vmatpush1.bf16.msra.mxu0 %v5568_v55  ;;  %v5624_v55 = vld [vmem:[#allocation30 + $0x4c] ss:$16 sps:$4 sm:$0xff]  }
 0x47e   :  { %2794 = vmatprep.subr.bf16.mxu0 %v5576_v57  ;;  %v5049_v13 = vpop.f32.mrf.mxu1  ;;  %v5622_v57 = vld [vmem:[#allocation30 + $0x48] ss:$16 sps:$4 sm:$0xff]  }
 0x480   :  { %v5050_v14 = vpop.f32.mrf.mxu1 }
 0x481   :  { %2795 = vmatpush1.bf16.msra.mxu0 %v5574_v59  ;;  %v5051_v16 = vadd.f32 %v5050_v14, %v5049_v13  ;;  %v5630_v59 = vld [vmem:[#allocation30 + $0x2c] ss:$16 sps:$4 sm:$0xff]   ;;  %v5651_v13 = vld [vmem:[#allocation30 + $0x1a4] ss:$16 sps:$4 sm:$0xff]  }
 0x482   :  { %2796 = vmatprep.subr.bf16.mxu0 %v5582_v61  ;;  %v5052_v15 = vpop.f32.mrf.mxu1  ;;  %v5628_v61 = vld [vmem:[#allocation30 + $0x28] ss:$16 sps:$4 sm:$0xff]   ;;  %v5654_v14 = vld [vmem:[#allocation30 + $0x1ac] ss:$16 sps:$4 sm:$0xff]  }
 0x484   :  { %v5053_v17 = vpop.f32.mrf.mxu1 }
 0x485   :  { %2797 = vmatpush1.bf16.msra.mxu0 %v5580_v63  ;;  %v5054_v21 = vadd.f32 %v5053_v17, %v5052_v15  ;;  %v5636_v63 = vld [vmem:[#allocation30 + $0xc] ss:$16 sps:$4 sm:$0xff]   ;;  %v5649_v15 = vld [vmem:[#allocation30 + $0x1a0] ss:$16 sps:$4 sm:$0xff]   ;;  %v5657_v17 = vld [vmem:[#allocation30 + $0x184] ss:$16 sps:$4 sm:$0xff]  }
 0x486   :  { %2798 = vmatprep.subr.bf16.mxu0 %v5588_v1  ;;  %v5634_v1 = vld [vmem:[#allocation30 + $0x8] ss:$16 sps:$4 sm:$0xff]  }
 0x489   :  { %2799 = vmatpush1.bf16.msra.mxu0 %v5586_v3  ;;  %v5642_v3 = vld [vmem:[#allocation30 + $0x1ec] ss:$16 sps:$4 sm:$0xff]  }
 0x48a   :  { %3286 = vmatprep.subr.bf16.mxu0 %v5594_v54  ;;  %v5640_v54 = vld [vmem:[#allocation30 + $0x1e8] ss:$16 sps:$4 sm:$0xff]  }
 0x50c   :  { %v2261_v9 = vpop.f32.mrf.mxu0 }
 0x50d   :  { %v2399_v18 = vadd.f32 %v5051_v16, %v2261_v9  ;;  %v5645_v9 = vld [vmem:[#allocation30 + $0x1c4] ss:$16 sps:$4 sm:$0xff]   ;;  %v5652_v16 = vld [vmem:[#allocation30 + $0x1a8] ss:$16 sps:$4 sm:$0xff]  }
 0x50e   :  { %v5133_v10 = vpop.f32.mrf.mxu0 }
 0x50f   :  { %v5648_v10 = vld [vmem:[#allocation30 + $0x1cc] ss:$16 sps:$4 sm:$0xff]  }
 0x510   :  { %v2264_v11 = vpop.f32.mrf.mxu0 }
 0x511   :  { %v2402_v24 = vadd.f32 %v5054_v21, %v2264_v11  ;;  %v5643_v11 = vld [vmem:[#allocation30 + $0x1c0] ss:$16 sps:$4 sm:$0xff]   ;;  %v5663_v21 = vld [vmem:[#allocation30 + $0x164] ss:$16 sps:$4 sm:$0xff]  }
 0x512   :  { %v5134_v12 = vpop.f32.mrf.mxu0 }
 0x513   :  { %v5646_v12 = vld [vmem:[#allocation30 + $0x1c8] ss:$16 sps:$4 sm:$0xff]  }
 0x52c   :  { %v2504_v19 = vpop.f32.mrf.mxu0 }
 0x52d   :  { %v2511_v22 = vadd.f32 %v2504_v19, %v2399_v18  ;;  %v5660_v18 = vld [vmem:[#allocation30 + $0x18c] ss:$16 sps:$4 sm:$0xff]   ;;  %v5655_v19 = vld [vmem:[#allocation30 + $0x180] ss:$16 sps:$4 sm:$0xff]  }
 0x52e   :  { %v5153_v23 = vpop.f32.mrf.mxu0 }
 0x52f   :  { %v2520_v25 = vadd.f32 %v4748_v20, %v2511_v22  ;;  %v5666_v22 = vld [vmem:[#allocation30 + $0x16c] ss:$16 sps:$4 sm:$0xff]   ;;  %v5661_v23 = vld [vmem:[#allocation30 + $0x160] ss:$16 sps:$4 sm:$0xff]  }
 0x530   :  { %v2507_v26 = vpop.f32.mrf.mxu0 }
 0x531   :  { %v2522_v27 = vmax.f32 %v2520_v25, 0.0  ;;  %v2512_v28 = vadd.f32 %v2507_v26, %v2402_v24  ;;  %v5664_v24 = vld [vmem:[#allocation30 + $0x168] ss:$16 sps:$4 sm:$0xff]   ;;  %v5669_v25 = vld [vmem:[#allocation30 + $0x144] ss:$16 sps:$4 sm:$0xff]  }
 0x532   :  { %v5154_v29 = vpop.f32.mrf.mxu0  ;;  %v5672_v26 = vld [vmem:[#allocation30 + $0x14c] ss:$16 sps:$4 sm:$0xff]  }
 0x533   :  { %2524 = vst [vmem:[%s6661_s4] sm:$0xff] %v2522_v27  ;;  %v2521_v30 = vadd.f32 %v4748_v20, %v2512_v28  ;;  %v5658_v20 = vld [vmem:[#allocation30 + $0x188] ss:$16 sps:$4 sm:$0xff]   ;;  %v5675_v29 = vld [vmem:[#allocation30 + $0x124] ss:$16 sps:$4 sm:$0xff]  }
 0x534   :  { %v5670_v28 = vld [vmem:[#allocation30 + $0x148] ss:$16 sps:$4 sm:$0xff]  }
 0x535   :  { %v2523_v31 = vmax.f32 %v2521_v30, 0.0  ;;  %v5678_v30 = vld [vmem:[#allocation30 + $0x12c] ss:$16 sps:$4 sm:$0xff]  }
 0x537   :  { %2525 = vst [vmem:[%s6661_s4 + $0x8] sm:$0xff] %v2523_v31  ;;  %v2526_v35 = vpack.c.bf16 %v2523_v31, %v2522_v27  ;;  %v5667_v27 = vld [vmem:[#allocation30 + $0x140] ss:$16 sps:$4 sm:$0xff]   ;;  %s6909_s4 = sld [smem:[#allocation69_spill]] }
 0x538   :  { %v5673_v31 = vld [vmem:[#allocation30 + $0x120] ss:$16 sps:$4 sm:$0xff]  }
 0x539   :  { %2774 = vmatmul.mubr.bf16.vlgmr.msra.gmra.mxu1 %v2526_v35  ;;  %2817 = vmatmul.mubr.bf16.vlgmr.msra.gmra.mxu0 %v2526_v35  ;;  %v5684_v35 = vld [vmem:[#allocation30 + $0x10c] ss:$16 sps:$4 sm:$0xff]  }
 0x53a   :  { %3244 = vmatpush1.bf16.msra.mxu1 %v5589_v32  ;;  %3287 = vmatpush1.bf16.msra.mxu0 %v5592_v34  ;;  %v5676_v32 = vld [vmem:[#allocation30 + $0x128] ss:$16 sps:$4 sm:$0xff]   ;;  %v5681_v34 = vld [vmem:[#allocation30 + $0x104] ss:$16 sps:$4 sm:$0xff]  }
 0x53b   :  { %3245 = vmatprep.subr.bf16.mxu1 %v5597_v36  ;;  %3288 = vmatprep.subr.bf16.mxu0 %v5600_v37  ;;  %v5679_v36 = vld [vmem:[#allocation30 + $0x100] ss:$16 sps:$4 sm:$0xff]   ;;  %v5682_v37 = vld [vmem:[#allocation30 + $0x108] ss:$16 sps:$4 sm:$0xff]  }
 0x53e   :  { %3246 = vmatpush1.bf16.msra.mxu1 %v5595_v38  ;;  %3289 = vmatpush1.bf16.msra.mxu0 %v5598_v39  ;;  %v5687_v38 = vld [vmem:[#allocation33 + $0x74] ss:$8 sps:$4 sm:$0xff]  }
 0x53f   :  { %3247 = vmatprep.subr.bf16.mxu1 %v5603_v40  ;;  %3290 = vmatprep.subr.bf16.mxu0 %v5606_v41  ;;  %v5690_v39 = vld [vmem:[#allocation33 + $0x174] ss:$8 sps:$4 sm:$0xff]   ;;  %v6814_v40 = vld [vmem:[#allocation28] sm:$0xf] }
 0x542   :  { %3248 = vmatpush1.bf16.msra.mxu1 %v5601_v42  ;;  %3291 = vmatpush1.bf16.msra.mxu0 %v5604_v43  ;;  %v2568_v42 = vrot.slane %v6814_v40, %v6754_v5  ;;  %v2564_v43 = vrot.slane %v6814_v40, %v6760_v8 }
 0x543   :  { %3249 = vmatprep.subr.bf16.mxu1 %v5609_v44  ;;  %3292 = vmatprep.subr.bf16.mxu0 %v5612_v45 }
 0x546   :  { %3250 = vmatpush1.bf16.msra.mxu1 %v5607_v48  ;;  %3293 = vmatpush1.bf16.msra.mxu0 %v5610_v47 }
 0x547   :  { %3251 = vmatprep.subr.bf16.mxu1 %v5615_v49  ;;  %3294 = vmatprep.subr.bf16.mxu0 %v5618_v50 }
 0x54a   :  { %3252 = vmatpush1.bf16.msra.mxu1 %v5613_v51  ;;  %3295 = vmatpush1.bf16.msra.mxu0 %v5616_v52 }
 0x54b   :  { %3253 = vmatprep.subr.bf16.mxu1 %v5621_v53  ;;  %3296 = vmatprep.subr.bf16.mxu0 %v5624_v55 }
 0x54e   :  { %3254 = vmatpush1.bf16.msra.mxu1 %v5619_v56  ;;  %3297 = vmatpush1.bf16.msra.mxu0 %v5622_v57 }
 0x54f   :  { %3255 = vmatprep.subr.bf16.mxu1 %v5627_v58  ;;  %3298 = vmatprep.subr.bf16.mxu0 %v5630_v59  ;;  %v5685_v58 = vld [vmem:[#allocation33 + $0x70] ss:$8 sps:$4 sm:$0xff]  }
 0x550   :  { %v5688_v59 = vld [vmem:[#allocation33 + $0x170] ss:$8 sps:$4 sm:$0xff]  }
 0x552   :  { %3256 = vmatpush1.bf16.msra.mxu1 %v5625_v60  ;;  %3299 = vmatpush1.bf16.msra.mxu0 %v5628_v61  ;;  %v5693_v61 = vld [vmem:[#allocation33 + $0x64] ss:$8 sps:$4 sm:$0xff]  }
 0x553   :  { %3257 = vmatprep.subr.bf16.mxu1 %v5633_v62  ;;  %3300 = vmatprep.subr.bf16.mxu0 %v5636_v63  ;;  %v5696_v62 = vld [vmem:[#allocation33 + $0x164] ss:$8 sps:$4 sm:$0xff]   ;;  %v5691_v63 = vld [vmem:[#allocation33 + $0x60] ss:$8 sps:$4 sm:$0xff]  }
 0x556   :  { %3258 = vmatpush1.bf16.msra.mxu1 %v5631_v0  ;;  %3301 = vmatpush1.bf16.msra.mxu0 %v5634_v1  ;;  %v5694_v0 = vld [vmem:[#allocation33 + $0x160] ss:$8 sps:$4 sm:$0xff]   ;;  %v5699_v1 = vld [vmem:[#allocation33 + $0x54] ss:$8 sps:$4 sm:$0xff]  }
 0x557   :  { %3259 = vmatprep.subr.bf16.mxu1 %v5639_v2  ;;  %3302 = vmatprep.subr.bf16.mxu0 %v5642_v3  ;;  %v5702_v2 = vld [vmem:[#allocation33 + $0x154] ss:$8 sps:$4 sm:$0xff]   ;;  %v5697_v3 = vld [vmem:[#allocation33 + $0x50] ss:$8 sps:$4 sm:$0xff]  }
 0x55a   :  { %3260 = vmatpush2.bf16.msra.mxu1 %v5637_v4  ;;  %3303 = vmatpush2.bf16.msra.mxu0 %v5640_v54  ;;  %v5700_v4 = vld [vmem:[#allocation33 + $0x150] ss:$8 sps:$4 sm:$0xff]   ;;  %v5705_v54 = vld [vmem:[#allocation33 + $0x44] ss:$8 sps:$4 sm:$0xff]  }
 0x55b   :  { %3261 = vmatprep.subr.bf16.mxu1 %v5645_v9  ;;  %3304 = vmatprep.subr.bf16.mxu0 %v5648_v10  ;;  %v5708_v9 = vld [vmem:[#allocation33 + $0x144] ss:$8 sps:$4 sm:$0xff]   ;;  %v5703_v10 = vld [vmem:[#allocation33 + $0x40] ss:$8 sps:$4 sm:$0xff]  }
 0x55e   :  { %3262 = vmatpush2.bf16.msra.mxu1 %v5643_v11  ;;  %3305 = vmatpush2.bf16.msra.mxu0 %v5646_v12  ;;  %v5706_v11 = vld [vmem:[#allocation33 + $0x140] ss:$8 sps:$4 sm:$0xff]   ;;  %v5711_v12 = vld [vmem:[#allocation33 + $0x34] ss:$8 sps:$4 sm:$0xff]  }
 0x55f   :  { %3263 = vmatprep.subr.bf16.mxu1 %v5651_v13  ;;  %3306 = vmatprep.subr.bf16.mxu0 %v5654_v14  ;;  %v5714_v13 = vld [vmem:[#allocation33 + $0x134] ss:$8 sps:$4 sm:$0xff]   ;;  %v5709_v14 = vld [vmem:[#allocation33 + $0x30] ss:$8 sps:$4 sm:$0xff]  }
 0x562   :  { %3264 = vmatpush2.bf16.msra.mxu1 %v5649_v15  ;;  %3307 = vmatpush2.bf16.msra.mxu0 %v5652_v16  ;;  %v5712_v15 = vld [vmem:[#allocation33 + $0x130] ss:$8 sps:$4 sm:$0xff]   ;;  %v5717_v16 = vld [vmem:[#allocation33 + $0x24] ss:$8 sps:$4 sm:$0xff]  }
 0x563   :  { %3265 = vmatprep.subr.bf16.mxu1 %v5657_v17  ;;  %3308 = vmatprep.subr.bf16.mxu0 %v5660_v18  ;;  %v5720_v17 = vld [vmem:[#allocation33 + $0x124] ss:$8 sps:$4 sm:$0xff]   ;;  %v5715_v18 = vld [vmem:[#allocation33 + $0x20] ss:$8 sps:$4 sm:$0xff]  }
 0x566   :  { %3266 = vmatpush2.bf16.msra.mxu1 %v5655_v19  ;;  %3309 = vmatpush2.bf16.msra.mxu0 %v5658_v20  ;;  %v5718_v19 = vld [vmem:[#allocation33 + $0x120] ss:$8 sps:$4 sm:$0xff]   ;;  %v5723_v20 = vld [vmem:[#allocation33 + $0x14] ss:$8 sps:$4 sm:$0xff]  }
 0x567   :  { %3267 = vmatprep.subr.bf16.mxu1 %v5663_v21  ;;  %3310 = vmatprep.subr.bf16.mxu0 %v5666_v22  ;;  %v5726_v21 = vld [vmem:[#allocation33 + $0x114] ss:$8 sps:$4 sm:$0xff]   ;;  %v5721_v22 = vld [vmem:[#allocation33 + $0x10] ss:$8 sps:$4 sm:$0xff]  }
 0x56a   :  { %3268 = vmatpush2.bf16.msra.mxu1 %v5661_v23  ;;  %3311 = vmatpush2.bf16.msra.mxu0 %v5664_v24  ;;  %v5724_v23 = vld [vmem:[#allocation33 + $0x110] ss:$8 sps:$4 sm:$0xff]   ;;  %v5729_v24 = vld [vmem:[#allocation33 + $0x4] ss:$8 sps:$4 sm:$0xff]  }
 0x56b   :  { %3269 = vmatprep.subr.bf16.mxu1 %v5669_v25  ;;  %3312 = vmatprep.subr.bf16.mxu0 %v5672_v26  ;;  %v5732_v25 = vld [vmem:[#allocation33 + $0x104] ss:$8 sps:$4 sm:$0xff]   ;;  %v5727_v26 = vld [vmem:[#allocation33] ss:$8 sps:$4 sm:$0xff]  }
 0x56e   :  { %3270 = vmatpush2.bf16.msra.mxu1 %v5667_v27  ;;  %3313 = vmatpush2.bf16.msra.mxu0 %v5670_v28  ;;  %v5730_v27 = vld [vmem:[#allocation33 + $0x100] ss:$8 sps:$4 sm:$0xff]   ;;  %v5735_v28 = vld [vmem:[#allocation33 + $0xf4] ss:$8 sps:$4 sm:$0xff]  }
 0x56f   :  { %3271 = vmatprep.subr.bf16.mxu1 %v5675_v29  ;;  %3314 = vmatprep.subr.bf16.mxu0 %v5678_v30  ;;  %v5738_v29 = vld [vmem:[#allocation33 + $0x1f4] ss:$8 sps:$4 sm:$0xff]   ;;  %v5733_v30 = vld [vmem:[#allocation33 + $0xf0] ss:$8 sps:$4 sm:$0xff]  }
 0x572   :  { %3272 = vmatpush2.bf16.msra.mxu1 %v5673_v31  ;;  %3315 = vmatpush2.bf16.msra.mxu0 %v5676_v32  ;;  %v5736_v31 = vld [vmem:[#allocation33 + $0x1f0] ss:$8 sps:$4 sm:$0xff]   ;;  %v5741_v32 = vld [vmem:[#allocation33 + $0xe4] ss:$8 sps:$4 sm:$0xff]  }
 0x573   :  { %3273 = vmatprep.subr.bf16.mxu1 %v5681_v34  ;;  %3316 = vmatprep.subr.bf16.mxu0 %v5684_v35  ;;  %v5744_v34 = vld [vmem:[#allocation33 + $0x1e4] ss:$8 sps:$4 sm:$0xff]   ;;  %v5739_v35 = vld [vmem:[#allocation33 + $0xe0] ss:$8 sps:$4 sm:$0xff]  }
 0x576   :  { %3274 = vmatpush2.bf16.msra.mxu1 %v5679_v36  ;;  %3317 = vmatpush2.bf16.msra.mxu0 %v5682_v37  ;;  %v5742_v36 = vld [vmem:[#allocation33 + $0x1e0] ss:$8 sps:$4 sm:$0xff]   ;;  %v5747_v37 = vld [vmem:[#allocation33 + $0xd4] ss:$8 sps:$4 sm:$0xff]  }
 0x577   :  { %3737 = vmatprep.subr.bf16.mxu1 %v5687_v38  ;;  %3780 = vmatprep.subr.bf16.mxu0 %v5690_v39  ;;  %v5750_v38 = vld [vmem:[#allocation33 + $0x1d4] ss:$8 sps:$4 sm:$0xff]   ;;  %v5745_v39 = vld [vmem:[#allocation33 + $0xd0] ss:$8 sps:$4 sm:$0xff]  }
 0x5f9   :  { %v2775_v41 = vpop.f32.mrf.mxu1 }
 0x5fa   :  { %v2776_v49 = vadd.f32 %v2775_v41, %v2564_v43  ;;  %v5748_v41 = vld [vmem:[#allocation33 + $0x1d0] ss:$8 sps:$4 sm:$0xff]  }
 0x5fb   :  { %v2777_v44 = vpop.f32.mrf.mxu1 }
 0x5fc   :  { %v2778_v48 = vadd.f32 %v2777_v44, %v2568_v42  ;;  %v2827_v56 = vmax.f32 %v2776_v49, 0.0  ;;  %v5751_v44 = vld [vmem:[#allocation33 + $0xc0] ss:$8 sps:$4 sm:$0xff]   ;;  %v5757_v49 = vld [vmem:[#allocation33 + $0xb0] ss:$8 sps:$4 sm:$0xff]  }
 0x5fd   :  { %v2779_v45 = vpop.f32.mrf.mxu1 }
 0x5fe   :  { %v2780_v47 = vadd.f32 %v2779_v45, %v2564_v43  ;;  %v2828_v53 = vmax.f32 %v2778_v48, 0.0  ;;  %v5756_v43 = vld [vmem:[#allocation33 + $0x1c4] ss:$8 sps:$4 sm:$0xff]   ;;  %v5754_v45 = vld [vmem:[#allocation33 + $0x1c0] ss:$8 sps:$4 sm:$0xff]  }
 0x5ff   :  { %v2781_v50 = vpop.f32.mrf.mxu1  ;;  %v5759_v48 = vld [vmem:[#allocation33 + $0xb4] ss:$8 sps:$4 sm:$0xff]  }
 0x600   :  { %v2782_v51 = vadd.f32 %v2781_v50, %v2568_v42  ;;  %v2831_v52 = vmax.f32 %v2780_v47, 0.0  ;;  %v5753_v42 = vld [vmem:[#allocation33 + $0xc4] ss:$8 sps:$4 sm:$0xff]   ;;  %v5762_v47 = vld [vmem:[#allocation33 + $0x1b4] ss:$8 sps:$4 sm:$0xff]  }
 0x601   :  { %v5760_v50 = vld [vmem:[#allocation33 + $0x1b0] ss:$8 sps:$4 sm:$0xff]  }
 0x602   :  { %v2832_v55 = vmax.f32 %v2782_v51, 0.0  ;;  %v2835_v60 = vpack.c.bf16 %v2831_v52, %v2827_v56  ;;  %v5765_v51 = vld [vmem:[#allocation33 + $0xa4] ss:$8 sps:$4 sm:$0xff]   ;;  %v5763_v52 = vld [vmem:[#allocation33 + $0xa0] ss:$8 sps:$4 sm:$0xff]  }
 0x603   :  { %v5771_v56 = vld [vmem:[#allocation33 + $0x94] ss:$8 sps:$4 sm:$0xff]  }
 0x604   :  { %v2836_v57 = vpack.c.bf16 %v2832_v55, %v2828_v53  ;;  %v5768_v53 = vld [vmem:[#allocation33 + $0x1a4] ss:$8 sps:$4 sm:$0xff]   ;;  %v5766_v55 = vld [vmem:[#allocation33 + $0x1a0] ss:$8 sps:$4 sm:$0xff]  }
 0x606   :  { %3275 = vmatprep.mubr.bf16.mxu1 %v2836_v57  ;;  %3318 = vmatprep.mubr.bf16.mxu0 %v2836_v57  ;;  %v5769_v57 = vld [vmem:[#allocation33 + $0x90] ss:$8 sps:$4 sm:$0xff]  }
 0x607   :  { %3276 = vmatmul.mubr.bf16.vlgmr.msra.gmra.mxu1 %v2835_v60  ;;  %3319 = vmatmul.mubr.bf16.vlgmr.msra.gmra.mxu0 %v2835_v60  ;;  %v5777_v60 = vld [vmem:[#allocation33 + $0x84] ss:$8 sps:$4 sm:$0xff]  }
 0x608   :  { %3738 = vmatpush1.bf16.msra.mxu1 %v5685_v58  ;;  %3781 = vmatpush1.bf16.msra.mxu0 %v5688_v59  ;;  %v5774_v58 = vld [vmem:[#allocation33 + $0x194] ss:$8 sps:$4 sm:$0xff]   ;;  %v5772_v59 = vld [vmem:[#allocation33 + $0x190] ss:$8 sps:$4 sm:$0xff]  }
 0x609   :  { %3739 = vmatprep.subr.bf16.mxu1 %v5693_v61  ;;  %3782 = vmatprep.subr.bf16.mxu0 %v5696_v62  ;;  %v5775_v61 = vld [vmem:[#allocation33 + $0x80] ss:$8 sps:$4 sm:$0xff]   ;;  %v5780_v62 = vld [vmem:[#allocation33 + $0x184] ss:$8 sps:$4 sm:$0xff]  }
 0x60c   :  { %3740 = vmatpush1.bf16.msra.mxu1 %v5691_v63  ;;  %3783 = vmatpush1.bf16.msra.mxu0 %v5694_v0  ;;  %v5778_v63 = vld [vmem:[#allocation33 + $0x180] ss:$8 sps:$4 sm:$0xff]  }
 0x60d   :  { %3741 = vmatprep.subr.bf16.mxu1 %v5699_v1  ;;  %3784 = vmatprep.subr.bf16.mxu0 %v5702_v2  ;;  %v5783_v0 = vld [vmem:[#allocation36 + $0x74] ss:$8 sps:$4 sm:$0xff]   ;;  %v6820_v1 = vpop.f32.mrf.mxu0 }
 0x60f   :  { %v6822_v2 = vpop.f32.mrf.mxu0 }
 0x610   :  { %3742 = vmatpush1.bf16.msra.mxu1 %v5697_v3  ;;  %3785 = vmatpush1.bf16.msra.mxu0 %v5700_v4 }
 0x611   :  { %3743 = vmatprep.subr.bf16.mxu1 %v5705_v54  ;;  %3786 = vmatprep.subr.bf16.mxu0 %v5708_v9  ;;  %v6824_v3 = vpop.f32.mrf.mxu0  ;;  %v2901_v54 = vld [vmem:[#allocation31] sm:$0xf] }
 0x613   :  { %v6826_v4 = vpop.f32.mrf.mxu0 }
 0x614   :  { %3744 = vmatpush1.bf16.msra.mxu1 %v5703_v10  ;;  %3787 = vmatpush1.bf16.msra.mxu0 %v5706_v11  ;;  %v2910_v11 = vrot.slane %v2901_v54, %v6754_v5 }
 0x615   :  { %3745 = vmatprep.subr.bf16.mxu1 %v5711_v12  ;;  %3788 = vmatprep.subr.bf16.mxu0 %v5714_v13  ;;  %v2918_v12 = vrot.slane %v2901_v54, %v6758_v7  ;;  %v2906_v13 = vrot.slane %v2901_v54, %v6760_v8 }
 0x618   :  { %3746 = vmatpush1.bf16.msra.mxu1 %v5709_v14  ;;  %3789 = vmatpush1.bf16.msra.mxu0 %v5712_v15  ;;  %v2914_v14 = vrot.slane %v2901_v54, %v6756_v6  ;;  %v5805_v54 = vld [vmem:[#allocation39 + $0x38] sm:$0xff]  }
 0x619   :  { %3747 = vmatprep.subr.bf16.mxu1 %v5717_v16  ;;  %3790 = vmatprep.subr.bf16.mxu0 %v5720_v17 }
 0x61c   :  { %3748 = vmatpush1.bf16.msra.mxu1 %v5715_v18  ;;  %3791 = vmatpush1.bf16.msra.mxu0 %v5718_v19 }
 0x61d   :  { %3749 = vmatprep.subr.bf16.mxu1 %v5723_v20  ;;  %3792 = vmatprep.subr.bf16.mxu0 %v5726_v21 }
 0x620   :  { %3750 = vmatpush1.bf16.msra.mxu1 %v5721_v22  ;;  %3793 = vmatpush1.bf16.msra.mxu0 %v5724_v23 }
 0x621   :  { %3751 = vmatprep.subr.bf16.mxu1 %v5729_v24  ;;  %3794 = vmatprep.subr.bf16.mxu0 %v5732_v25 }
 0x624   :  { %3752 = vmatpush1.bf16.msra.mxu1 %v5727_v26  ;;  %3795 = vmatpush1.bf16.msra.mxu0 %v5730_v27 }
 0x625   :  { %3753 = vmatprep.subr.bf16.mxu1 %v5735_v28  ;;  %3796 = vmatprep.subr.bf16.mxu0 %v5738_v29 }
 0x628   :  { %3754 = vmatpush2.bf16.msra.mxu1 %v5733_v30  ;;  %3797 = vmatpush2.bf16.msra.mxu0 %v5736_v31 }
 0x629   :  { %3755 = vmatprep.subr.bf16.mxu1 %v5741_v32  ;;  %3798 = vmatprep.subr.bf16.mxu0 %v5744_v34 }
 0x62c   :  { %3756 = vmatpush2.bf16.msra.mxu1 %v5739_v35  ;;  %3799 = vmatpush2.bf16.msra.mxu0 %v5742_v36 }
 0x62d   :  { %3757 = vmatprep.subr.bf16.mxu1 %v5747_v37  ;;  %3800 = vmatprep.subr.bf16.mxu0 %v5750_v38 }
 0x630   :  { %3758 = vmatpush2.bf16.msra.mxu1 %v5745_v39  ;;  %3801 = vmatpush2.bf16.msra.mxu0 %v5748_v41  ;;  %v5781_v41 = vld [vmem:[#allocation36 + $0x70] ss:$8 sps:$4 sm:$0xff]  }
 0x631   :  { %3759 = vmatprep.subr.bf16.mxu1 %v5753_v42  ;;  %3802 = vmatprep.subr.bf16.mxu0 %v5756_v43 }
 0x634   :  { %3760 = vmatpush2.bf16.msra.mxu1 %v5751_v44  ;;  %3803 = vmatpush2.bf16.msra.mxu0 %v5754_v45  ;;  %v5786_v44 = vld [vmem:[#allocation36 + $0x64] ss:$8 sps:$4 sm:$0xff]   ;;  %v5784_v45 = vld [vmem:[#allocation36 + $0x60] ss:$8 sps:$4 sm:$0xff]  }
 0x635   :  { %3761 = vmatprep.subr.bf16.mxu1 %v5759_v48  ;;  %3804 = vmatprep.subr.bf16.mxu0 %v5762_v47  ;;  %v5789_v48 = vld [vmem:[#allocation36 + $0x54] ss:$8 sps:$4 sm:$0xff]   ;;  %v5787_v47 = vld [vmem:[#allocation36 + $0x50] ss:$8 sps:$4 sm:$0xff]  }
 0x638   :  { %3762 = vmatpush2.bf16.msra.mxu1 %v5757_v49  ;;  %3805 = vmatpush2.bf16.msra.mxu0 %v5760_v50  ;;  %v5792_v49 = vld [vmem:[#allocation36 + $0x44] ss:$8 sps:$4 sm:$0xff]   ;;  %v5790_v50 = vld [vmem:[#allocation36 + $0x40] ss:$8 sps:$4 sm:$0xff]  }
 0x639   :  { %3763 = vmatprep.subr.bf16.mxu1 %v5765_v51  ;;  %3806 = vmatprep.subr.bf16.mxu0 %v5768_v53  ;;  %v5795_v51 = vld [vmem:[#allocation36 + $0x34] ss:$8 sps:$4 sm:$0xff]   ;;  %v5798_v53 = vld [vmem:[#allocation36 + $0x24] ss:$8 sps:$4 sm:$0xff]  }
 0x63c   :  { %3764 = vmatpush2.bf16.msra.mxu1 %v5763_v52  ;;  %3807 = vmatpush2.bf16.msra.mxu0 %v5766_v55  ;;  %v5793_v52 = vld [vmem:[#allocation36 + $0x30] ss:$8 sps:$4 sm:$0xff]   ;;  %v5796_v55 = vld [vmem:[#allocation36 + $0x20] ss:$8 sps:$4 sm:$0xff]  }
 0x63d   :  { %3765 = vmatprep.subr.bf16.mxu1 %v5771_v56  ;;  %3808 = vmatprep.subr.bf16.mxu0 %v5774_v58  ;;  %v5801_v56 = vld [vmem:[#allocation36 + $0x14] ss:$8 sps:$4 sm:$0xff]   ;;  %v5799_v58 = vld [vmem:[#allocation36 + $0x10] ss:$8 sps:$4 sm:$0xff]  }
 0x640   :  { %3766 = vmatpush2.bf16.msra.mxu1 %v5769_v57  ;;  %3809 = vmatpush2.bf16.msra.mxu0 %v5772_v59  ;;  %v2572_v57 = vrot.slane %v6814_v40, %v6756_v6  ;;  %v5806_v6 = vld [vmem:[#allocation39 + $0x30] sm:$0xff]  }
 0x641   :  { %3767 = vmatprep.subr.bf16.mxu1 %v5777_v60  ;;  %3810 = vmatprep.subr.bf16.mxu0 %v5780_v62  ;;  %v5804_v60 = vld [vmem:[#allocation36 + $0x4] ss:$8 sps:$4 sm:$0xff]   ;;  %v5802_v62 = vld [vmem:[#allocation36] ss:$8 sps:$4 sm:$0xff]  }
 0x642   :  { %v2823_v59 = vadd.f32 %v6824_v3, %v2572_v57  ;;  %v5808_v3 = vld [vmem:[#allocation39 + $0x20] sm:$0xff]  }
 0x644   :  { %3768 = vmatpush2.bf16.msra.mxu1 %v5775_v61  ;;  %3811 = vmatpush2.bf16.msra.mxu0 %v5778_v63  ;;  %v2819_v61 = vadd.f32 %v6820_v1, %v2572_v57  ;;  %v2833_v63 = vmax.f32 %v2823_v59, 0.0  ;;  %v5807_v1 = vld [vmem:[#allocation39 + $0x28] sm:$0xff]  }
 0x645   :  { %3936 = vmatprep.subr.bf16.mxu1 %v5783_v0 }
 0x646   :  { %v2829_v0 = vmax.f32 %v2819_v61, 0.0 }
 0x6c7   :  { %v3277_v9 = vpop.f32.mrf.mxu1  ;;  %v3320_v10 = vpop.f32.mrf.mxu0 }
 0x6c8   :  { %v3278_v23 = vadd.f32 %v3277_v9, %v2906_v13  ;;  %v3321_v24 = vadd.f32 %v3320_v10, %v2914_v14  ;;  %v3827_v9 = vpack.c.bf16 %v2833_v63, %v2829_v0  ;;  %v5809_v10 = vld [vmem:[#allocation39 + $0x18] sm:$0xff]  }
 0x6c9   :  { %v3279_v15 = vpop.f32.mrf.mxu1  ;;  %v3322_v16 = vpop.f32.mrf.mxu0 }
 0x6ca   :  { %v3280_v19 = vadd.f32 %v3279_v15, %v2910_v11  ;;  %v3323_v20 = vadd.f32 %v3322_v16, %v2918_v12  ;;  %v3329_v36 = vmax.f32 %v3278_v23, 0.0  ;;  %v3331_v37 = vmax.f32 %v3321_v24, 0.0  ;;  %v5812_v16 = vld [vmem:[#allocation39] sm:$0xff]   ;;  %v5822_v24 = vld [vmem:[#allocation37 + $0x18] sm:$0xff]  }
 0x6cb   :  { %v3281_v17 = vpop.f32.mrf.mxu1  ;;  %v3324_v18 = vpop.f32.mrf.mxu0  ;;  %v5820_v23 = vld [vmem:[#allocation37 + $0x20] sm:$0xff]  }
 0x6cc   :  { %v3282_v21 = vadd.f32 %v3281_v17, %v2906_v13  ;;  %v3325_v22 = vadd.f32 %v3324_v18, %v2914_v14  ;;  %v3330_v31 = vmax.f32 %v3280_v19, 0.0  ;;  %v3332_v32 = vmax.f32 %v3323_v20, 0.0  ;;  %v5811_v13 = vld [vmem:[#allocation39 + $0x8] sm:$0xff]   ;;  %v5813_v20 = vld [vmem:[#allocation37 + $0x78] sm:$0xff]  }
 0x6cd   :  { %v3283_v25 = vpop.f32.mrf.mxu1  ;;  %v3326_v26 = vpop.f32.mrf.mxu0  ;;  %5064 = vmatprep.subr.bf16.mxu0 %v5813_v20  ;;  %v5841_v20 = vld [vmem:[#allocation40 + $0x30] ss:$8 sps:$4 sm:$0xff]  }
 0x6ce   :  { %v3284_v27 = vadd.f32 %v3283_v25, %v2910_v11  ;;  %v3327_v28 = vadd.f32 %v3326_v26, %v2918_v12  ;;  %v3333_v29 = vmax.f32 %v3282_v21, 0.0  ;;  %v3335_v30 = vmax.f32 %v3325_v22, 0.0  ;;  %v5810_v11 = vld [vmem:[#allocation39 + $0x10] sm:$0xff]   ;;  %v5814_v21 = vld [vmem:[#allocation37 + $0x38] sm:$0xff]   ;;  %v5818_v22 = vld [vmem:[#allocation37 + $0x28] sm:$0xff]  }
 0x6cf   :  { %v2576_v12 = vrot.slane %v6814_v40, %v6758_v7  ;;  %v5815_v7 = vld [vmem:[#allocation37 + $0x70] sm:$0xff]  }
 0x6d0   :  { %v3334_v34 = vmax.f32 %v3284_v27, 0.0  ;;  %v3336_v35 = vmax.f32 %v3327_v28, 0.0  ;;  %v3337_v42 = vpack.c.bf16 %v3333_v29, %v3329_v36  ;;  %v3339_v43 = vpack.c.bf16 %v3335_v30, %v3331_v37  ;;  %v5816_v40 = vld [vmem:[#allocation37 + $0x30] sm:$0xff]   ;;  %v5825_v27 = vld [vmem:[#allocation37 + $0x48] sm:$0xff]   ;;  %v5827_v29 = vld [vmem:[#allocation37 + $0x40] sm:$0xff]  }
 0x6d1   :  { %v2825_v14 = vadd.f32 %v6826_v4, %v2576_v12  ;;  %v2821_v15 = vadd.f32 %v6822_v2, %v2576_v12  ;;  %v5817_v4 = vld [vmem:[#allocation37 + $0x68] sm:$0xff]   ;;  %v5819_v2 = vld [vmem:[#allocation37 + $0x60] sm:$0xff]   ;;  %v5823_v25 = vld [vmem:[#allocation37 + $0x50] sm:$0xff]  }
 0x6d2   :  { %v3338_v38 = vpack.c.bf16 %v3334_v34, %v3330_v31  ;;  %v3340_v39 = vpack.c.bf16 %v3336_v35, %v3332_v32  ;;  %v5824_v26 = vld [vmem:[#allocation37 + $0x10] sm:$0xff]   ;;  %v5826_v28 = vld [vmem:[#allocation37 + $0x8] sm:$0xff]   ;;  %v5828_v30 = vld [vmem:[#allocation37] sm:$0xff]  }
 0x6d3   :  { %v2834_v17 = vmax.f32 %v2825_v14, 0.0  ;;  %v2830_v18 = vmax.f32 %v2821_v15, 0.0  ;;  %v5831_v31 = vld [vmem:[#allocation40 + $0x74] ss:$8 sps:$4 sm:$0xff]   ;;  %v5832_v14 = vld [vmem:[#allocation40 + $0x60] ss:$8 sps:$4 sm:$0xff]  }
 0x6d4   :  { %3769 = vmatprep.mubr.bf16.mxu1 %v3338_v38  ;;  %3812 = vmatprep.mubr.bf16.mxu0 %v3340_v39  ;;  %v3405_v32 = vld [vmem:[#allocation34] sm:$0x3] }
 0x6d5   :  { %3770 = vmatmul.mubr.bf16.vlgmr.msra.gmra.mxu1 %v3337_v42  ;;  %3813 = vmatmul.mubr.bf16.vlgmr.msra.gmra.mxu0 %v3339_v43  ;;  %v4163_v19 = vpack.c.bf16 %v2834_v17, %v2830_v18  ;;  %v3410_v34 = vrot.slane %v3405_v32, %v6760_v8  ;;  %v3414_v35 = vrot.slane %v3405_v32, %v6754_v5  ;;  %v5837_v15 = vld [vmem:[#allocation40 + $0x54] ss:$8 sps:$4 sm:$0xff]   ;;  %v5840_v17 = vld [vmem:[#allocation40 + $0x44] ss:$8 sps:$4 sm:$0xff]   ;;  %v5838_v18 = vld [vmem:[#allocation40 + $0x40] ss:$8 sps:$4 sm:$0xff]  }
 0x6d6   :  { %3937 = vmatpush1.bf16.msra.mxu1 %v5781_v41  ;;  %3968 = vmatprep.mubr.bf16.mxu1 %v6485_v46  ;;  %v4925_v32 = vld [vmem:[%s6911_s12] ss:$0 sm:$0xff] }
 0x6d7   :  { %3938 = vmatprep.subr.bf16.mxu1 %v5786_v44  ;;  %5065 = vmatpush3.bf16.msra.mxu0 %v5814_v21  ;;  %v5846_v21 = vld [vmem:[#allocation40 + $0x24] ss:$8 sps:$4 sm:$0xff]  }
 0x6d8   :  { %5066 = vmatprep.subr.bf16.mxu0 %v5815_v7  ;;  %v5844_v7 = vld [vmem:[#allocation40 + $0x20] ss:$8 sps:$4 sm:$0xff]  }
 0x6da   :  { %3939 = vmatpush1.bf16.msra.mxu1 %v5784_v45 }
 0x6db   :  { %3940 = vmatprep.subr.bf16.mxu1 %v5789_v48  ;;  %5067 = vmatpush3.bf16.msra.mxu0 %v5816_v40 }
 0x6dc   :  { %5068 = vmatprep.subr.bf16.mxu0 %v5817_v4 }
 0x6de   :  { %3941 = vmatpush1.bf16.msra.mxu1 %v5787_v47 }
 0x6df   :  { %3942 = vmatprep.subr.bf16.mxu1 %v5792_v49  ;;  %5069 = vmatpush3.bf16.msra.mxu0 %v5818_v22 }
 0x6e0   :  { %5070 = vmatprep.subr.bf16.mxu0 %v5819_v2  ;;  %v5847_v2 = vld [vmem:[#allocation40 + $0x10] ss:$8 sps:$4 sm:$0xff]  }
 0x6e2   :  { %3943 = vmatpush1.bf16.msra.mxu1 %v5790_v50 }
 0x6e3   :  { %3944 = vmatprep.subr.bf16.mxu1 %v5795_v51  ;;  %5071 = vmatpush3.bf16.msra.mxu0 %v5820_v23 }
 0x6e6   :  { %3945 = vmatpush1.bf16.msra.mxu1 %v5793_v52 }
 0x6e7   :  { %3946 = vmatprep.subr.bf16.mxu1 %v5798_v53 }
 0x6ea   :  { %3947 = vmatpush1.bf16.msra.mxu1 %v5796_v55  ;;  %v3844_v55 = vld [vmem:[%s6909_s4] sm:$0x3] }
 0x6eb   :  { %3948 = vmatprep.subr.bf16.mxu1 %v5801_v56  ;;  %v3853_v57 = vrot.slane %v3844_v55, %v6754_v5 }
 0x6ee   :  { %3949 = vmatpush1.bf16.msra.mxu1 %v5799_v58  ;;  %v3849_v58 = vrot.slane %v3844_v55, %v6760_v8 }
 0x6ef   :  { %3950 = vmatprep.subr.bf16.mxu1 %v5804_v60 }
 0x6f2   :  { %3951 = vmatpush1.bf16.msra.mxu1 %v5802_v62 }
 0x6f3   :  { %5155 = vmatprep.subr.bf16.mxu1 %v6486_v33 }
 0x6f5   :  { %3969 = vmatmul.mubr.bf16.vlgmr.msra.gmra.mxu1 %v3827_v9 }
 0x6f6   :  { %5156 = vmatpush3.bf16.msra.mxu1 %v5805_v54  ;;  %5171 = vmatprep.mubr.msk.bf16.mxu1 %vm6487_vm0, %v6486_v33 }
 0x6f7   :  { %5157 = vmatprep.subr.bf16.mxu1 %v6486_v33 }
 0x6fa   :  { %5158 = vmatpush3.bf16.msra.mxu1 %v5806_v6 }
 0x6fb   :  { %5159 = vmatprep.subr.bf16.mxu1 %v6486_v33 }
 0x6fe   :  { %5160 = vmatpush3.bf16.msra.mxu1 %v5807_v1 }
 0x6ff   :  { %5161 = vmatprep.subr.bf16.mxu1 %v6486_v33 }
 0x702   :  { %5162 = vmatpush3.bf16.msra.mxu1 %v5808_v3 }
 0x703   :  { %5163 = vmatprep.subr.bf16.mxu1 %v6486_v33 }
 0x706   :  { %5164 = vmatpush3.bf16.msra.mxu1 %v5809_v10 }
 0x707   :  { %5165 = vmatprep.subr.bf16.mxu1 %v6486_v33 }
 0x70a   :  { %5166 = vmatpush3.bf16.msra.mxu1 %v5810_v11  ;;  %v5829_v11 = vld [vmem:[#allocation40 + $0x70] ss:$8 sps:$4 sm:$0xff]  }
 0x70b   :  { %5167 = vmatprep.subr.bf16.mxu1 %v6486_v33 }
 0x70e   :  { %5168 = vmatpush3.bf16.msra.mxu1 %v5811_v13  ;;  %v5834_v13 = vld [vmem:[#allocation40 + $0x64] ss:$8 sps:$4 sm:$0xff]  }
 0x70f   :  { %5169 = vmatprep.subr.bf16.mxu1 %v6486_v33  ;;  %v5821_v33 = vld [vmem:[#allocation37 + $0x58] sm:$0xff]  }
 0x710   :  { %5072 = vmatprep.subr.bf16.mxu0 %v5821_v33  ;;  %v5852_v33 = vld [vmem:[#allocation40 + $0x4] ss:$8 sps:$4 sm:$0xff]  }
 0x711   :  { %5073 = vmatpush3.bf16.msra.mxu0 %v5822_v24 }
 0x712   :  { %5170 = vmatpush3.bf16.msra.mxu1 %v5812_v16  ;;  %5074 = vmatprep.subr.bf16.mxu0 %v5823_v25  ;;  %v5835_v16 = vld [vmem:[#allocation40 + $0x50] ss:$8 sps:$4 sm:$0xff]  }
 0x715   :  { %5172 = vmatmul.mubr.bf16.vlgmr.msra.gmra.mxu1 %v4163_v19  ;;  %5075 = vmatpush3.bf16.msra.mxu0 %v5824_v26  ;;  %v5843_v19 = vld [vmem:[#allocation40 + $0x34] ss:$8 sps:$4 sm:$0xff]  }
 0x716   :  { %5076 = vmatprep.subr.bf16.mxu0 %v5825_v27  ;;  %v5850_v27 = vld [vmem:[#allocation40] ss:$8 sps:$4 sm:$0xff]  }
 0x719   :  { %5077 = vmatpush3.bf16.msra.mxu0 %v5826_v28 }
 0x71a   :  { %5078 = vmatprep.subr.bf16.mxu0 %v5827_v29 }
 0x71d   :  { %5079 = vmatpush3.bf16.msra.mxu0 %v5828_v30 }
 0x71e   :  { %4387 = vmatprep.subr.bf16.mxu0 %v5831_v31 }
 0x795   :  { %v3771_v36 = vpop.f32.mrf.mxu1  ;;  %v3814_v37 = vpop.f32.mrf.mxu0 }
 0x796   :  { %v3772_v38 = vadd.f32 %v3771_v36, %v3410_v34 }
 0x797   :  { %v3773_v39 = vpop.f32.mrf.mxu1  ;;  %v3816_v41 = vpop.f32.mrf.mxu0 }
 0x798   :  { %v3815_v42 = vadd.f32 %v3814_v37, %v3772_v38  ;;  %v3774_v43 = vadd.f32 %v3773_v39, %v3414_v35 }
 0x799   :  { %v3775_v44 = vpop.f32.mrf.mxu1  ;;  %v3818_v45 = vpop.f32.mrf.mxu0 }
 0x79a   :  { %3823 = vst [vmem:[%s6666_s24] sm:$0xff] %v3815_v42  ;;  %v3817_v48 = vadd.f32 %v3816_v41, %v3774_v43  ;;  %v3776_v47 = vadd.f32 %v3775_v44, %v3410_v34  ;;  %v4295_v42 = vld [vmem:[%s6912_s29] sm:$0x3] }
 0x79b   :  { %v3777_v49 = vpop.f32.mrf.mxu1  ;;  %v3820_v52 = vpop.f32.mrf.mxu0  ;;  %v4300_v43 = vrot.slane %v4295_v42, %v6760_v8  ;;  %v4304_v44 = vrot.slane %v4295_v42, %v6754_v5 }
 0x79c   :  { %3824 = vst [vmem:[%s6666_s24 + $0x8] sm:$0xff] %v3817_v48  ;;  %v3819_v50 = vadd.f32 %v3818_v45, %v3776_v47  ;;  %v3778_v51 = vadd.f32 %v3777_v49, %v3414_v35 }
 0x79e   :  { %3825 = vst [vmem:[%s6666_s24 + $0x10] sm:$0xff] %v3819_v50  ;;  %v3821_v53 = vadd.f32 %v3820_v52, %v3778_v51 }
 0x7a0   :  { %3826 = vst [vmem:[%s6666_s24 + $0x18] sm:$0xff] %v3821_v53  ;;  %s6910_s24 = sld [smem:[#allocation72_spill]] }
 0x7a6   :  { %v4942_v22 = vld [vmem:[%s6910_s24] ss:$0 sm:$0xff] }
 0x7b5   :  { %v3970_v56 = vpop.f32.mrf.mxu1 }
 0x7b6   :  { %v3971_v63 = vadd.f32 %v3970_v56, %v3849_v58 }
 0x7b7   :  { %v3972_v59 = vpop.f32.mrf.mxu1 }
 0x7b8   :  { %v3973_v61 = vadd.f32 %v3972_v59, %v3853_v57  ;;  %v3979_v3 = vmax.f32 %v3971_v63, 0.0 }
 0x7b9   :  { %v3974_v60 = vpop.f32.mrf.mxu1 }
 0x7ba   :  { %v3975_v62 = vadd.f32 %v3974_v60, %v3849_v58  ;;  %v3980_v6 = vmax.f32 %v3973_v61, 0.0 }
 0x7bb   :  { %v3976_v0 = vpop.f32.mrf.mxu1 }
 0x7bc   :  { %v3977_v54 = vadd.f32 %v3976_v0, %v3853_v57  ;;  %v3981_v9 = vmax.f32 %v3975_v62, 0.0 }
 0x7be   :  { %v3982_v1 = vmax.f32 %v3977_v54, 0.0  ;;  %v3983_v12 = vpack.c.bf16 %v3981_v9, %v3979_v3 }
 0x7c0   :  { %v3984_v10 = vpack.c.bf16 %v3982_v1, %v3980_v6 }
 0x7c2   :  { %4152 = vmatprep.mubr.bf16.mxu0 %v3984_v10 }
 0x7c3   :  { %4153 = vmatmul.mubr.bf16.vlgmr.msra.gmra.mxu0 %v3983_v12 }
 0x7c4   :  { %4388 = vmatpush1.bf16.msra.mxu0 %v5829_v11  ;;  %4419 = vmatprep.mubr.bf16.mxu0 %v6485_v46  ;;  %v5849_v46 = vld [vmem:[#allocation40 + $0x14] ss:$8 sps:$4 sm:$0xff]  }
 0x7c5   :  { %4389 = vmatprep.subr.bf16.mxu0 %v5834_v13 }
 0x7c8   :  { %4390 = vmatpush1.bf16.msra.mxu0 %v5832_v14 }
 0x7c9   :  { %4391 = vmatprep.subr.bf16.mxu0 %v5837_v15 }
 0x7cc   :  { %4392 = vmatpush1.bf16.msra.mxu0 %v5835_v16 }
 0x7cd   :  { %4393 = vmatprep.subr.bf16.mxu0 %v5840_v17 }
 0x7d0   :  { %4394 = vmatpush1.bf16.msra.mxu0 %v5838_v18 }
 0x7d1   :  { %4395 = vmatprep.subr.bf16.mxu0 %v5843_v19 }
 0x7d4   :  { %4396 = vmatpush1.bf16.msra.mxu0 %v5841_v20 }
 0x7d5   :  { %v4269_v40 = vpop.f32.mrf.mxu1  ;;  %4397 = vmatprep.subr.bf16.mxu0 %v5846_v21 }
 0x7d6   :  { %v4270_v25 = vadd.f32 %v4942_v22, %v4269_v40 }
 0x7d7   :  { %v5173_v4 = vpop.f32.mrf.mxu1 }
 0x7d8   :  { %4398 = vmatpush1.bf16.msra.mxu0 %v5844_v7  ;;  %v4276_v29 = vmax.f32 %v4270_v25, 0.0 }
 0x7d9   :  { %v4272_v23 = vpop.f32.mrf.mxu1  ;;  %4399 = vmatprep.subr.bf16.mxu0 %v5849_v46 }
 0x7da   :  { %v4273_v24 = vadd.f32 %v4942_v22, %v4272_v23 }
 0x7db   :  { %v5174_v26 = vpop.f32.mrf.mxu1 }
 0x7dc   :  { %4400 = vmatpush1.bf16.msra.mxu0 %v5847_v2  ;;  %v4277_v28 = vmax.f32 %v4273_v24, 0.0 }
 0x7dd   :  { %4401 = vmatprep.subr.bf16.mxu0 %v5852_v33 }
 0x7de   :  { %v4278_v30 = vpack.c.bf16 %v4277_v28, %v4276_v29 }
 0x7e0   :  { %4402 = vmatpush1.bf16.msra.mxu0 %v5850_v27 }
 0x7e3   :  { %4420 = vmatmul.mubr.bf16.vlgmr.msra.gmra.mxu0 %v4278_v30 }
 0x883   :  { %v5080_v31 = vpop.f32.mrf.mxu0 }
 0x885   :  { %v5081_v34 = vpop.f32.mrf.mxu0 }
 0x886   :  { %v5082_v35 = vadd.f32 %v5081_v34, %v5080_v31 }
 0x887   :  { %v5083_v36 = vpop.f32.mrf.mxu0 }
 0x888   :  { %v4155_v37 = vadd.f32 %v5082_v35, %v4925_v32 }
 0x889   :  { %v5084_v38 = vpop.f32.mrf.mxu0 }
 0x88a   :  { %4161 = vst [vmem:[%s6671_s3] sm:$0xff] %v4155_v37  ;;  %v5085_v39 = vadd.f32 %v5084_v38, %v5083_v36 }
 0x88c   :  { %v4158_v41 = vadd.f32 %v5085_v39, %v4925_v32 }
 0x88e   :  { %4162 = vst [vmem:[%s6671_s3 + $0x8] sm:$0xff] %v4158_v41 }
 0x8a3   :  { %v4421_v45 = vpop.f32.mrf.mxu0 }
 0x8a4   :  { %v4422_v48 = vadd.f32 %v4421_v45, %v4300_v43 }
 0x8a5   :  { %v4423_v47 = vpop.f32.mrf.mxu0 }
 0x8a6   :  { %v4967_v49 = vmul.f32 -1.442695, %v4422_v48  ;;  %v4424_v50 = vadd.f32 %v4423_v47, %v4304_v44 }
 0x8a7   :  { %v4425_v51 = vpop.f32.mrf.mxu0 }
 0x8a8   :  { %5853 = vpow2.f32 %v4967_v49  ;;  %v4968_v52 = vmul.f32 -1.442695, %v4424_v50  ;;  %v4426_v53 = vadd.f32 %v4425_v51, %v4300_v43 }
 0x8a9   :  { %v4427_v55 = vpop.f32.mrf.mxu0 }
 0x8aa   :  { %5855 = vpow2.f32 %v4968_v52  ;;  %v4969_v56 = vmul.f32 -1.442695, %v4426_v53  ;;  %v4428_v57 = vadd.f32 %v4427_v55, %v4304_v44 }
 0x8ac   :  { %5857 = vpow2.f32 %v4969_v56  ;;  %v4970_v58 = vmul.f32 -1.442695, %v4428_v57 }
 0x8ae   :  { %5859 = vpow2.f32 %v4970_v58 }
 0x8b5   :  { %v5854_v8 = vpop.eup %5853 }
 0x8b6   :  { %v4442_v5 = vadd.f32 1.0, %v5854_v8 }
 0x8b7   :  { %v5856_v59 = vpop.eup %5855 }
 0x8b8   :  { %5861 = vrcp.f32 %v4442_v5  ;;  %v4443_v60 = vadd.f32 1.0, %v5856_v59 }
 0x8b9   :  { %v5858_v61 = vpop.eup %5857 }
 0x8ba   :  { %5863 = vrcp.f32 %v4443_v60  ;;  %v4444_v62 = vadd.f32 1.0, %v5858_v61 }
 0x8bb   :  { %v5860_v63 = vpop.eup %5859 }
 0x8bc   :  { %5865 = vrcp.f32 %v4444_v62  ;;  %v4445_v0 = vadd.f32 1.0, %v5860_v63 }
 0x8be   :  { %5867 = vrcp.f32 %v4445_v0 }
 0x8c5   :  { %v5862_v54 = vpop.eup %5861 }
 0x8c6   :  { %4454 = vst [vmem:[%s6676_s14] sm:$0xff] %v5862_v54 }
 0x8c7   :  { %v5864_v9 = vpop.eup %5863 }
 0x8c8   :  { %4455 = vst [vmem:[%s6676_s14 + $0x8] sm:$0xff] %v5864_v9 }
 0x8c9   :  { %v5866_v6 = vpop.eup %5865 }
 0x8ca   :  { %4456 = vst [vmem:[%s6676_s14 + $0x10] sm:$0xff] %v5866_v6 }
 0x8cb   :  { %v5868_v1 = vpop.eup %5867 }
 0x8cc   :  { %4457 = vst [vmem:[%s6676_s14 + $0x18] sm:$0xff] %v5868_v1 }
 0x8cd   :  { %4474 = vsyncpa [#allocation3], 1 }
 0x8ce   :  { %4475 = vsyncpa [#allocation5], 1 }
 0x8cf   :  { %4476 = vsyncpa [#allocation8], 1 }
 0x8d0   :  { %4477 = vsyncpa [#allocation11], 1 }
 0x8d1   :  { %4478 = vsyncpa [#allocation14], 1 }
 0x8d2   :  { %4479 = vsyncpa [#allocation17], 1 }
 0x8d3   :  { %4480 = vsyncpa [#allocation20], 1 }
 0x8d4   :  { %4481 = vsyncpa [#allocation23], 1 }
 0x8d5   :  { %4482 = vsyncpa [#allocation26], 1 }
 0x8d6   :  { %4483 = vsyncpa [#allocation29], 1 }
 0x8d7   :  { %4484 = vsyncpa [#allocation32], 1 }
 0x8d8   :  { %4485 = vsyncpa [#allocation35], 1 }
 0x8d9   :  { %4486 = vsyncpa [#allocation38], 1 }
 0x8da   :  { %4487 = vsyncpa [#allocation41], 1 }

// kernel: fused_forward.1
= control target key start
LH: loop header
LB: loop body
LE: loop exit
PB: predicated region body
PF: predicated region fallthrough
CT: control target
= control target key end

     0   :  { %s6417_s6 = smov 1   ;;  %s6418_s10 = smov 2   ;;  %s6872_s0 = inlined_call_operand.smem [shape: u32[37], index: -1, kind: input, shape index: {}] }
   0x1   :  { %s6496_s5 = sld [smem:[%s6872_s0]]   ;;  %s6419_s14 = smov 3  }
   0x2   :  { %s6501_s9 = sld [smem:[%s6872_s0 + %s6417_s6]]   ;;  %s6420_s18 = smov 4  }
   0x3   :  { %s6506_s13 = sld [smem:[%s6872_s0 + %s6418_s10]]   ;;  %s6421_s22 = smov 5  }
   0x4   :  { %s6511_s17 = sld [smem:[%s6872_s0 + %s6419_s14]]   ;;  %s6422_s26 = smov 6  }
   0x5   :  { %s6516_s21 = sld [smem:[%s6872_s0 + %s6420_s18]]   ;;  %s6423_s30 = smov 7  }
   0x6   :  { %s6521_s25 = sld [smem:[%s6872_s0 + %s6421_s22]]   ;;  %s6424_s4 = smov 8  }
   0x7   :  { %6875 = sst [smem:[#allocation56_spill]] %s6496_s5  ;;  %s6425_s10 = smov 9  }
   0x8   :  { %6876 = sst [smem:[#allocation57_spill]] %s6501_s9  ;;  %s6426_s15 = smov 10  }
   0x9   :  { %6877 = sst [smem:[#allocation58_spill]] %s6506_s13  ;;  %s6427_s20 = smov 11  }
   0xa   :  { %s6526_s29 = sld [smem:[%s6872_s0 + %s6422_s26]]   ;;  %s6428_s26 = smov 12  }
   0xb   :  { %s6531_s3 = sld [smem:[%s6872_s0 + %s6423_s30]]   ;;  %s6429_s1 = smov 13  }
   0xc   :  { %s6536_s8 = sld [smem:[%s6872_s0 + %s6424_s4]]   ;;  %s6430_s7 = smov 14  }
   0xd   :  { %s6541_s14 = sld [smem:[%s6872_s0 + %s6425_s10]]   ;;  %s6432_s22 = smov 16  }
   0xe   :  { %s6546_s19 = sld [smem:[%s6872_s0 + %s6426_s15]]   ;;  %s6431_s15 = smov 15  }
   0xf   :  { %s6551_s24 = sld [smem:[%s6872_s0 + %s6427_s20]]   ;;  %s6433_s28 = smov 17  }
  0x10   :  { %s6556_s30 = sld [smem:[%s6872_s0 + %s6428_s26]]  }
  0x11   :  { %6878 = sst [smem:[#allocation59_spill]] %s6531_s3 }
  0x12   :  { %s6561_s6 = sld [smem:[%s6872_s0 + %s6429_s1]]  }
  0x13   :  { %6879 = sst [smem:[#allocation60_spill]] %s6541_s14 }
  0x14   :  { %s6566_s12 = sld [smem:[%s6872_s0 + %s6430_s7]]   ;;  %s6434_s7 = smov 18  }
  0x15   :  { %6880 = sst [smem:[#allocation61_spill]] %s6551_s24 }
  0x16   :  { %s6571_s20 = sld [smem:[%s6872_s0 + %s6431_s15]]   ;;  %s6435_s15 = smov 19  }
  0x17   :  { %s6576_s27 = sld [smem:[%s6872_s0 + %s6432_s22]]   ;;  %s6436_s22 = smov 20  }
  0x18   :  { %6881 = sst [smem:[#allocation62_spill]] %s6561_s6 }
  0x19   :  { %s6581_s4 = sld [smem:[%s6872_s0 + %s6433_s28]]   ;;  %s6437_s28 = smov 21  }
  0x1a   :  { %s6586_s13 = sld [smem:[%s6872_s0 + %s6434_s7]]   ;;  %s6438_s7 = smov 22  }
  0x1b   :  { %s6591_s9 = sld [smem:[%s6872_s0 + %s6435_s15]]   ;;  %s6439_s15 = smov 23  }
  0x1c   :  { %6882 = sst [smem:[#allocation63_spill]] %s6571_s20 }
  0x1d   :  { %s6596_s5 = sld [smem:[%s6872_s0 + %s6436_s22]]   ;;  %s6440_s22 = smov 24  }
  0x1e   :  { %s6606_s20 = sld [smem:[%s6872_s0 + %s6438_s7]]   ;;  %s6442_s7 = smov 26  }
  0x1f   :  { %6883 = sst [smem:[#allocation64_spill]] %s6581_s4 }
  0x20   :  { %s6601_s4 = sld [smem:[%s6872_s0 + %s6437_s28]]   ;;  %s6441_s28 = smov 25  }
  0x21   :  { %6884 = sst [smem:[#allocation65_spill]] %s6591_s9 }
  0x22   :  { %s6611_s9 = sld [smem:[%s6872_s0 + %s6439_s15]]   ;;  %s6443_s15 = smov 27  }
  0x23   :  { %s6616_s6 = sld [smem:[%s6872_s0 + %s6440_s22]]   ;;  %s6444_s22 = smov 28  }
  0x24   :  { %s6626_s24 = sld [smem:[%s6872_s0 + %s6442_s7]]   ;;  %s6446_s7 = smov 30  }
  0x25   :  { %s6636_s14 = sld [smem:[%s6872_s0 + %s6444_s22]]   ;;  %s6448_s22 = smov 32  }
  0x26   :  { %6885 = sst [smem:[#allocation66_spill]] %s6601_s4 }
  0x27   :  { %s6621_s4 = sld [smem:[%s6872_s0 + %s6441_s28]]   ;;  %s6445_s28 = smov 29  }
  0x28   :  { %6886 = sst [smem:[#allocation67_spill]] %s6611_s9 }
  0x29   :  { %s6631_s9 = sld [smem:[%s6872_s0 + %s6443_s15]]   ;;  %s6447_s15 = smov 31  }
  0x2a   :  { %6888 = sst [smem:[#allocation69_spill]] %s6626_s24 }
  0x2b   :  { %6889 = sst [smem:[#allocation70_spill]] %s6636_s14 }
  0x2c   :  { %s6646_s24 = sld [smem:[%s6872_s0 + %s6446_s7]]   ;;  %s6450_s7 = smov 34  }
  0x2d   :  { %6887 = sst [smem:[#allocation68_spill]] %s6621_s4 }
  0x2e   :  { %s6641_s4 = sld [smem:[%s6872_s0 + %s6445_s28]]   ;;  %s6449_s28 = smov 33  }
  0x2f   :  { %s6651_s3 = sld [smem:[%s6872_s0 + %s6447_s15]]   ;;  %s6451_s15 = smov 35  }
  0x30   :  { %s6656_s14 = sld [smem:[%s6872_s0 + %s6448_s22]]   ;;  %s6452_s22 = smov 36  }
  0x32   :  { %6891 = sst [smem:[#allocation72_spill]] %s6646_s24 }
  0x33   :  { %s6666_s24 = sld [smem:[%s6872_s0 + %s6450_s7]]  }
  0x34   :  { %6890 = sst [smem:[#allocation71_spill]] %s6641_s4 }
  0x35   :  { %6892 = sst [smem:[#allocation73_spill]] %s6651_s3 }
  0x36   :  { %6893 = sst [smem:[#allocation74_spill]] %s6656_s14 }
  0x37   :  { %s6661_s4 = sld [smem:[%s6872_s0 + %s6449_s28]]  }
  0x38   :  { %s6671_s3 = sld [smem:[%s6872_s0 + %s6451_s15]]  }
  0x39   :  { %s6676_s14 = sld [smem:[%s6872_s0 + %s6452_s22]]  }
  0x3a   :  { %79 = vsyncpa [#allocation3], 0 }
  0x3b   :  { %80 = vsyncpa [#allocation5], 0 }
  0x3c   :  { %81 = vsyncpa [#allocation8], 0 }
  0x3d   :  { %82 = vsyncpa [#allocation11], 0 }
  0x3e   :  { %83 = vsyncpa [#allocation14], 0 }
  0x3f   :  { %84 = vsyncpa [#allocation17], 0 }
  0x40   :  { %85 = vsyncpa [#allocation20], 0 }
  0x41   :  { %86 = vsyncpa [#allocation23], 0 }
  0x42   :  { %87 = vsyncpa [#allocation26], 0 }
  0x43   :  { %88 = vsyncpa [#allocation29], 0 }
  0x44   :  { %89 = vsyncpa [#allocation32], 0 }
  0x45   :  { %90 = vsyncpa [#allocation35], 0 }
  0x46   :  { %91 = vsyncpa [#allocation38], 0 }
  0x47   :  { %92 = vsyncpa [#allocation41], 0  ;;  %s6453_s28 = smov [#allocation4]   ;;  %s6454_s2 = smov [#allocation7]  }
  0x48   :  { %s117_s1 = sshll.u32 %s6453_s28, 4  ;;  %s139_s7 = sshll.u32 %s6454_s2, 4  ;;  %s118_s1 = int_to_ptr.vmem [resolvable:$true] %s117_s1  ;;  %s140_s7 = int_to_ptr.vmem [resolvable:$true] %s139_s7 }
  0x49   :  { %s5877_s0 = scalar_lea.vmem %s118_s1, 64  ;;  %p5882_p1 = scmp.lt.s32.totalorder %s118_s1, %s118_s1 }
  0x4a   :  { %p5878_p0 = scmp.ne.s32.totalorder %s118_s1, %s5877_s0  ;;  %p5883_p2 = scmp.lt.s32.totalorder %s5877_s0, %s5877_s0 }
  0x4c   :  { %p5884_p3 = por %p5883_p2, %p5882_p1 }
  0x4e   :  { %p5885_p4 = pnand %p5884_p3, %p5878_p0 }
  0x50   :  { %5888 = shalt.err (!%p5885_p4)
}
  0x51   :  { %120 = dma.hbm_to_vmem [thread:$0]  %s6516_s21, 64, %s118_s1, [#allocation5]  }
  0x52   :  { %s5897_s10 = scalar_lea.vmem %s140_s7, 32  ;;  %p5902_p6 = scmp.lt.s32.totalorder %s140_s7, %s140_s7 }
  0x53   :  { %p5898_p5 = scmp.ne.s32.totalorder %s140_s7, %s5897_s10  ;;  %p5903_p7 = scmp.lt.s32.totalorder %s5897_s10, %s5897_s10 }
  0x55   :  { %p5904_p8 = por %p5903_p7, %p5902_p6 }
  0x57   :  { %p5905_p9 = pnand %p5904_p8, %p5898_p5 }
  0x59   :  { %5908 = shalt.err (!%p5905_p9)
}
  0x5a   :  { %142 = dma.hbm_to_vmem [thread:$0]  %s6526_s29, 32, %s140_s7, [#allocation8]  }
  0x5b   :  { %s6455_s11 = smov [#allocation10]   ;;  %s6456_s16 = smov [#allocation13]  }
  0x5c   :  { %s161_s15 = sshll.u32 %s6455_s11, 4  ;;  %s183_s18 = sshll.u32 %s6456_s16, 4  ;;  %s162_s15 = int_to_ptr.vmem [resolvable:$true] %s161_s15  ;;  %s184_s18 = int_to_ptr.vmem [resolvable:$true] %s183_s18 }
  0x5d   :  { %s5917_s22 = scalar_lea.vmem %s162_s15, 32  ;;  %p5922_p11 = scmp.lt.s32.totalorder %s162_s15, %s162_s15 }
  0x5e   :  { %p5918_p10 = scmp.ne.s32.totalorder %s162_s15, %s5917_s22  ;;  %p5923_p12 = scmp.lt.s32.totalorder %s5917_s22, %s5917_s22 }
  0x60   :  { %p5924_p13 = por %p5923_p12, %p5922_p11 }
  0x62   :  { %p5925_p0 = pnand %p5924_p13, %p5918_p10 }
  0x64   :  { %5928 = shalt.err (!%p5925_p0)
}
  0x65   :  { %164 = dma.hbm_to_vmem [thread:$0]  %s6536_s8, 32, %s162_s15, [#allocation11]  }
  0x66   :  { %s5937_s21 = scalar_lea.vmem %s184_s18, 16  ;;  %s5941_s23 = scalar_lea.vmem %s184_s18, 32 }
  0x67   :  { %p5938_p1 = scmp.ne.s32.totalorder %s184_s18, %s5937_s21  ;;  %p5942_p2 = scmp.lt.s32.totalorder %s184_s18, %s184_s18 }
  0x68   :  { %p5943_p3 = scmp.lt.s32.totalorder %s5941_s23, %s5937_s21 }
  0x6a   :  { %p5944_p4 = por %p5943_p3, %p5942_p2 }
  0x6c   :  { %p5945_p5 = pnand %p5944_p4, %p5938_p1 }
  0x6e   :  { %5948 = shalt.err (!%p5945_p5)
}
  0x6f   :  { %186 = dma.hbm_to_vmem [thread:$0]  %s6546_s19, 16, %s184_s18, [#allocation14]  }
  0x70   :  { %s6457_s29 = smov [#allocation16]   ;;  %s6458_s28 = smov [#allocation19]  }
  0x71   :  { %s205_s26 = sshll.u32 %s6457_s29, 4  ;;  %s227_s1 = sshll.u32 %s6458_s28, 4  ;;  %s206_s26 = int_to_ptr.vmem [resolvable:$true] %s205_s26  ;;  %s228_s1 = int_to_ptr.vmem [resolvable:$true] %s227_s1 }
  0x72   :  { %s5957_s2 = scalar_lea.vmem %s206_s26, 16  ;;  %s5961_s7 = scalar_lea.vmem %s206_s26, 32 }
  0x73   :  { %p5958_p6 = scmp.ne.s32.totalorder %s206_s26, %s5957_s2  ;;  %p5962_p7 = scmp.lt.s32.totalorder %s206_s26, %s206_s26 }
  0x74   :  { %p5963_p8 = scmp.lt.s32.totalorder %s5961_s7, %s5957_s2 }
  0x76   :  { %p5964_p9 = por %p5963_p8, %p5962_p7 }
  0x78   :  { %p5965_p10 = pnand %p5964_p9, %p5958_p6 }
  0x7a   :  { %5968 = shalt.err (!%p5965_p10)
}
  0x7b   :  { %208 = dma.hbm_to_vmem [thread:$0]  %s6556_s30, 16, %s206_s26, [#allocation17]  }
  0x7c   :  { %s5977_s8 = scalar_lea.vmem %s228_s1, 16  ;;  %s5981_s0 = scalar_lea.vmem %s228_s1, 32 }
  0x7d   :  { %p5978_p11 = scmp.ne.s32.totalorder %s228_s1, %s5977_s8  ;;  %p5982_p12 = scmp.lt.s32.totalorder %s228_s1, %s228_s1 }
  0x7e   :  { %p5983_p13 = scmp.lt.s32.totalorder %s5981_s0, %s5977_s8 }
  0x80   :  { %p5984_p0 = por %p5983_p13, %p5982_p12 }
  0x82   :  { %p5985_p1 = pnand %p5984_p0, %p5978_p11 }
  0x84   :  { %5988 = shalt.err (!%p5985_p1)
}
  0x85   :  { %230 = dma.hbm_to_vmem [thread:$0]  %s6566_s12, 16, %s228_s1, [#allocation20]  }
  0x86   :  { %s6459_s19 = smov [#allocation22]   ;;  %s6460_s11 = smov [#allocation25]  }
  0x87   :  { %s248_s10 = sshll.u32 %s6459_s19, 4  ;;  %s273_s15 = sshll.u32 %s6460_s11, 4  ;;  %s249_s10 = int_to_ptr.vmem [resolvable:$true] %s248_s10  ;;  %s274_s15 = int_to_ptr.vmem [resolvable:$true] %s273_s15 }
  0x88   :  { %s5997_s16 = scalar_lea.vmem %s249_s10, 1024  ;;  %p6002_p3 = scmp.lt.s32.totalorder %s249_s10, %s249_s10 }
  0x89   :  { %p5998_p2 = scmp.ne.s32.totalorder %s249_s10, %s5997_s16  ;;  %p6003_p4 = scmp.lt.s32.totalorder %s5997_s16, %s5997_s16 }
  0x8b   :  { %p6004_p5 = por %p6003_p4, %p6002_p3 }
  0x8d   :  { %p6005_p6 = pnand %p6004_p5, %p5998_p2 }
  0x8f   :  { %6008 = shalt.err (!%p6005_p6)
}
  0x90   :  { %s6461_s30 = smov 64   ;;  %s6462_s18 = smov 4  }
  0x91   :  { %254 = dma.hbm_to_vmem [thread:$0]  %s6576_s27, 1024, %s249_s10, [#allocation23], %s6461_s30, %s6461_s30, %s6462_s18  }
  0x92   :  { %s6017_s12 = scalar_lea.vmem %s274_s15, 16  ;;  %s6021_s22 = scalar_lea.vmem %s274_s15, 32 }
  0x93   :  { %p6018_p7 = scmp.ne.s32.totalorder %s274_s15, %s6017_s12  ;;  %p6022_p8 = scmp.lt.s32.totalorder %s274_s15, %s274_s15 }
  0x94   :  { %p6023_p9 = scmp.lt.s32.totalorder %s6021_s22, %s6017_s12 }
  0x96   :  { %p6024_p10 = por %p6023_p9, %p6022_p8 }
  0x98   :  { %p6025_p11 = pnand %p6024_p10, %p6018_p7 }
  0x9a   :  { %6028 = shalt.err (!%p6025_p11)
}
  0x9b   :  { %276 = dma.hbm_to_vmem [thread:$0]  %s6586_s13, 16, %s274_s15, [#allocation26]  }
  0x9c   :  { %s6463_s21 = smov [#allocation28]   ;;  %s6464_s29 = smov [#allocation31]  }
  0x9d   :  { %s295_s23 = sshll.u32 %s6463_s21, 4  ;;  %s317_s26 = sshll.u32 %s6464_s29, 4  ;;  %s296_s23 = int_to_ptr.vmem [resolvable:$true] %s295_s23  ;;  %s318_s26 = int_to_ptr.vmem [resolvable:$true] %s317_s26 }
  0x9e   :  { %s6037_s28 = scalar_lea.vmem %s296_s23, 64  ;;  %p6042_p13 = scmp.lt.s32.totalorder %s296_s23, %s296_s23 }
  0x9f   :  { %p6038_p12 = scmp.ne.s32.totalorder %s296_s23, %s6037_s28  ;;  %p6043_p0 = scmp.lt.s32.totalorder %s6037_s28, %s6037_s28 }
  0xa1   :  { %p6044_p1 = por %p6043_p0, %p6042_p13 }
  0xa3   :  { %p6045_p2 = pnand %p6044_p1, %p6038_p12 }
  0xa5   :  { %6048 = shalt.err (!%p6045_p2)
}
  0xa6   :  { %298 = dma.hbm_to_vmem [thread:$0]  %s6596_s5, 64, %s296_s23, [#allocation29]  }
  0xa7   :  { %s6057_s27 = scalar_lea.vmem %s318_s26, 64  ;;  %p6062_p4 = scmp.lt.s32.totalorder %s318_s26, %s318_s26 }
  0xa8   :  { %p6058_p3 = scmp.ne.s32.totalorder %s318_s26, %s6057_s27  ;;  %p6063_p5 = scmp.lt.s32.totalorder %s6057_s27, %s6057_s27 }
  0xaa   :  { %p6064_p6 = por %p6063_p5, %p6062_p4 }
  0xac   :  { %p6065_p7 = pnand %p6064_p6, %p6058_p3 }
  0xae   :  { %6068 = shalt.err (!%p6065_p7)
}
  0xaf   :  { %320 = dma.hbm_to_vmem [thread:$0]  %s6606_s20, 64, %s318_s26, [#allocation32]  }
  0xb0   :  { %s6465_s13 = smov [#allocation34]   ;;  %s6466_s2 = smov [#allocation37]  }
  0xb1   :  { %s339_s1 = sshll.u32 %s6465_s13, 4  ;;  %s362_s7 = sshll.u32 %s6466_s2, 4  ;;  %s340_s1 = int_to_ptr.vmem [resolvable:$true] %s339_s1  ;;  %s363_s7 = int_to_ptr.vmem [resolvable:$true] %s362_s7 }
  0xb2   :  { %s6077_s8 = scalar_lea.vmem %s340_s1, 32  ;;  %p6082_p9 = scmp.lt.s32.totalorder %s340_s1, %s340_s1 }
  0xb3   :  { %p6078_p8 = scmp.ne.s32.totalorder %s340_s1, %s6077_s8  ;;  %p6083_p10 = scmp.lt.s32.totalorder %s6077_s8, %s6077_s8 }
  0xb5   :  { %p6084_p11 = por %p6083_p10, %p6082_p9 }
  0xb7   :  { %p6085_p12 = pnand %p6084_p11, %p6078_p8 }
  0xb9   :  { %6088 = shalt.err (!%p6085_p12)
}
  0xba   :  { %342 = dma.hbm_to_vmem [thread:$0]  %s6616_s6, 32, %s340_s1, [#allocation35]  }
  0xbb   :  { %s6097_s5 = scalar_lea.vmem %s363_s7, 2048  ;;  %p6102_p0 = scmp.lt.s32.totalorder %s363_s7, %s363_s7 }
  0xbc   :  { %p6098_p13 = scmp.ne.s32.totalorder %s363_s7, %s6097_s5  ;;  %p6103_p1 = scmp.lt.s32.totalorder %s6097_s5, %s6097_s5 }
  0xbe   :  { %p6104_p2 = por %p6103_p1, %p6102_p0 }
  0xc0   :  { %p6105_p3 = pnand %p6104_p2, %p6098_p13 }
  0xc2   :  { %6108 = shalt.err (!%p6105_p3)
}
  0xc3   :  { %368 = dma.hbm_to_vmem [thread:$0]  %s6631_s9, 2048, %s363_s7, [#allocation38], %s6461_s30, %s6461_s30, %s6462_s18  }
  0xc4   :  { %s6467_s20 = smov [#allocation2]  }
  0xc5   :  { %s104_s0 = sshll.u32 %s6467_s20, 4  ;;  %s105_s0 = int_to_ptr.vmem [resolvable:$true] %s104_s0 }
  0xc6   :  { %s6117_s19 = scalar_lea.vmem %s105_s0, 8192  ;;  %p6122_p5 = scmp.lt.s32.totalorder %s105_s0, %s105_s0 }
  0xc7   :  { %p6118_p4 = scmp.ne.s32.totalorder %s105_s0, %s6117_s19  ;;  %p6123_p6 = scmp.lt.s32.totalorder %s6117_s19, %s6117_s19 }
  0xc9   :  { %p6124_p7 = por %p6123_p6, %p6122_p5 }
  0xcb   :  { %p6125_p8 = pnand %p6124_p7, %p6118_p4 }
  0xcd   :  { %6128 = shalt.err (!%p6125_p8)
}
  0xce   :  { %s6468_s6 = smov 256   ;;  %s6469_s10 = smov 16  }
  0xcf   :  { %110 = dma.hbm_to_vmem [thread:$0]  %s6511_s17, 8192, %s105_s0, [#allocation3], %s6468_s6, %s6468_s6, %s6469_s10  }
  0xd0   :  { %s6470_s11 = smov [#allocation6]  }
  0xd1   :  { %s126_s15 = sshll.u32 %s6470_s11, 4  ;;  %s127_s15 = int_to_ptr.vmem [resolvable:$true] %s126_s15 }
  0xd2   :  { %s6137_s9 = scalar_lea.vmem %s127_s15, 8192  ;;  %p6142_p10 = scmp.lt.s32.totalorder %s127_s15, %s127_s15 }
  0xd3   :  { %p6138_p9 = scmp.ne.s32.totalorder %s127_s15, %s6137_s9  ;;  %p6143_p11 = scmp.lt.s32.totalorder %s6137_s9, %s6137_s9 }
  0xd5   :  { %p6144_p12 = por %p6143_p11, %p6142_p10 }
  0xd7   :  { %p6145_p13 = pnand %p6144_p12, %p6138_p9 }
  0xd9   :  { %6148 = shalt.err (!%p6145_p13)
}
  0xda   :  { %s6471_s16 = smov 128   ;;  %s6472_s12 = smov 8  }
  0xdb   :  { %132 = dma.hbm_to_vmem [thread:$0]  %s6521_s25, 8192, %s127_s15, [#allocation5], %s6471_s16, %s6471_s16, %s6472_s12  }
  0xdc   :  { %s6473_s22 = smov [#allocation9]   ;;  %s6474_s17 = smov [#allocation12]  }
  0xdd   :  { %s148_s21 = sshll.u32 %s6473_s22, 4  ;;  %s170_s23 = sshll.u32 %s6474_s17, 4  ;;  %s149_s21 = int_to_ptr.vmem [resolvable:$true] %s148_s21  ;;  %s171_s23 = int_to_ptr.vmem [resolvable:$true] %s170_s23 }
  0xde   :  { %s6157_s29 = scalar_lea.vmem %s149_s21, 2048  ;;  %p6162_p1 = scmp.lt.s32.totalorder %s149_s21, %s149_s21 }
  0xdf   :  { %p6158_p0 = scmp.ne.s32.totalorder %s149_s21, %s6157_s29  ;;  %p6163_p2 = scmp.lt.s32.totalorder %s6157_s29, %s6157_s29 }
  0xe1   :  { %p6164_p3 = por %p6163_p2, %p6162_p1 }
  0xe3   :  { %p6165_p4 = pnand %p6164_p3, %p6158_p0 }
  0xe5   :  { %6168 = shalt.err (!%p6165_p4)
}
  0xe6   :  { %s6894_s26 = sld [smem:[#allocation59_spill]]  ;;  %s6177_s28 = scalar_lea.vmem %s171_s23, 2048 }
  0xe7   :  { %p6178_p5 = scmp.ne.s32.totalorder %s171_s23, %s6177_s28  ;;  %p6182_p6 = scmp.lt.s32.totalorder %s171_s23, %s171_s23 }
  0xe8   :  { %p6183_p7 = scmp.lt.s32.totalorder %s6177_s28, %s6177_s28 }
  0xea   :  { %p6184_p8 = por %p6183_p7, %p6182_p6 }
  0xec   :  { %154 = dma.hbm_to_vmem [thread:$0]  %s6894_s26, 2048, %s149_s21, [#allocation8], %s6471_s16, %s6471_s16, %s6472_s12  }
  0xed   :  { %p6185_p9 = pnand %p6184_p8, %p6178_p5 }
  0xef   :  { %6188 = shalt.err (!%p6185_p9)
}
  0xf0   :  { %s6895_s25 = sld [smem:[#allocation60_spill]]  ;;  %s6475_s27 = smov [#allocation15]  }
  0xf1   :  { %s192_s13 = sshll.u32 %s6475_s27, 4  ;;  %s6476_s1 = smov [#allocation18]   ;;  %s193_s13 = int_to_ptr.vmem [resolvable:$true] %s192_s13 }
  0xf2   :  { %s214_s2 = sshll.u32 %s6476_s1, 4  ;;  %s6197_s7 = scalar_lea.vmem %s193_s13, 2048  ;;  %s215_s2 = int_to_ptr.vmem [resolvable:$true] %s214_s2 }
  0xf3   :  { %p6198_p10 = scmp.ne.s32.totalorder %s193_s13, %s6197_s7  ;;  %p6202_p11 = scmp.lt.s32.totalorder %s193_s13, %s193_s13 }
  0xf4   :  { %p6203_p12 = scmp.lt.s32.totalorder %s6197_s7, %s6197_s7 }
  0xf6   :  { %176 = dma.hbm_to_vmem [thread:$0]  %s6895_s25, 2048, %s171_s23, [#allocation11], %s6461_s30, %s6461_s30, %s6462_s18  }
  0xf7   :  { %p6204_p13 = por %p6203_p12, %p6202_p11 }
  0xf9   :  { %p6205_p0 = pnand %p6204_p13, %p6198_p10 }
  0xfb   :  { %6208 = shalt.err (!%p6205_p0)
}
  0xfc   :  { %s6896_s8 = sld [smem:[#allocation61_spill]]  ;;  %s6217_s5 = scalar_lea.vmem %s215_s2, 1024 }
  0xfd   :  { %p6218_p1 = scmp.ne.s32.totalorder %s215_s2, %s6217_s5  ;;  %p6222_p2 = scmp.lt.s32.totalorder %s215_s2, %s215_s2 }
  0xfe   :  { %p6223_p3 = scmp.lt.s32.totalorder %s6217_s5, %s6217_s5 }
 0x100   :  { %p6224_p4 = por %p6223_p3, %p6222_p2 }
 0x102   :  { %198 = dma.hbm_to_vmem [thread:$0]  %s6896_s8, 2048, %s193_s13, [#allocation14], %s6461_s30, %s6461_s30, %s6462_s18  }
 0x103   :  { %p6225_p5 = pnand %p6224_p4, %p6218_p1 }
 0x105   :  { %6228 = shalt.err (!%p6225_p5)
}
 0x106   :  { %s6897_s20 = sld [smem:[#allocation62_spill]]  ;;  %s6477_s0 = smov [#allocation21]  }
 0x107   :  { %s236_s19 = sshll.u32 %s6477_s0, 4  ;;  %s6478_s11 = smov [#allocation24]   ;;  %s237_s19 = int_to_ptr.vmem [resolvable:$true] %s236_s19 }
 0x108   :  { %s260_s15 = sshll.u32 %s6478_s11, 4  ;;  %s6237_s9 = scalar_lea.vmem %s237_s19, 2048  ;;  %s261_s15 = int_to_ptr.vmem [resolvable:$true] %s260_s15 }
 0x109   :  { %p6238_p6 = scmp.ne.s32.totalorder %s237_s19, %s6237_s9  ;;  %p6242_p7 = scmp.lt.s32.totalorder %s237_s19, %s237_s19 }
 0x10a   :  { %p6243_p8 = scmp.lt.s32.totalorder %s6237_s9, %s6237_s9 }
 0x10c   :  { %220 = dma.hbm_to_vmem [thread:$0]  %s6897_s20, 1024, %s215_s2, [#allocation17], %s6461_s30, %s6461_s30, %s6462_s18  }
 0x10d   :  { %p6244_p9 = por %p6243_p8, %p6242_p7 }
 0x10f   :  { %p6245_p10 = pnand %p6244_p9, %p6238_p6 }
 0x111   :  { %6248 = shalt.err (!%p6245_p10)
}
 0x112   :  { %s6898_s22 = sld [smem:[#allocation63_spill]]  ;;  %s6257_s21 = scalar_lea.vmem %s261_s15, 1024 }
 0x113   :  { %p6258_p11 = scmp.ne.s32.totalorder %s261_s15, %s6257_s21  ;;  %p6262_p12 = scmp.lt.s32.totalorder %s261_s15, %s261_s15 }
 0x114   :  { %p6263_p13 = scmp.lt.s32.totalorder %s6257_s21, %s6257_s21 }
 0x116   :  { %p6264_p0 = por %p6263_p13, %p6262_p12 }
 0x118   :  { %242 = dma.hbm_to_vmem [thread:$0]  %s6898_s22, 2048, %s237_s19, [#allocation20], %s6461_s30, %s6461_s30, %s6462_s18  }
 0x119   :  { %p6265_p1 = pnand %p6264_p0, %p6258_p11 }
 0x11b   :  { %6268 = shalt.err (!%p6265_p1)
}
 0x11c   :  { %s6899_s17 = sld [smem:[#allocation64_spill]]  ;;  %s6479_s23 = smov [#allocation27]  }
 0x11d   :  { %s282_s29 = sshll.u32 %s6479_s23, 4  ;;  %s6480_s26 = smov [#allocation30]   ;;  %s283_s29 = int_to_ptr.vmem [resolvable:$true] %s282_s29 }
 0x11e   :  { %s304_s28 = sshll.u32 %s6480_s26, 4  ;;  %s6277_s25 = scalar_lea.vmem %s283_s29, 4096  ;;  %s305_s28 = int_to_ptr.vmem [resolvable:$true] %s304_s28 }
 0x11f   :  { %p6278_p2 = scmp.ne.s32.totalorder %s283_s29, %s6277_s25  ;;  %p6282_p3 = scmp.lt.s32.totalorder %s283_s29, %s283_s29 }
 0x120   :  { %p6283_p4 = scmp.lt.s32.totalorder %s6277_s25, %s6277_s25 }
 0x122   :  { %266 = dma.hbm_to_vmem [thread:$0]  %s6899_s17, 1024, %s261_s15, [#allocation23], %s6461_s30, %s6461_s30, %s6462_s18  }
 0x123   :  { %p6284_p5 = por %p6283_p4, %p6282_p3 }
 0x125   :  { %p6285_p6 = pnand %p6284_p5, %p6278_p2 }
 0x127   :  { %6288 = shalt.err (!%p6285_p6)
}
 0x128   :  { %s6900_s27 = sld [smem:[#allocation65_spill]]  ;;  %s6297_s13 = scalar_lea.vmem %s305_s28, 8192 }
 0x129   :  { %p6298_p7 = scmp.ne.s32.totalorder %s305_s28, %s6297_s13  ;;  %p6302_p8 = scmp.lt.s32.totalorder %s305_s28, %s305_s28 }
 0x12a   :  { %p6303_p9 = scmp.lt.s32.totalorder %s6297_s13, %s6297_s13 }
 0x12c   :  { %p6304_p10 = por %p6303_p9, %p6302_p8 }
 0x12e   :  { %288 = dma.hbm_to_vmem [thread:$0]  %s6900_s27, 4096, %s283_s29, [#allocation26], %s6468_s6, %s6468_s6, %s6469_s10  }
 0x12f   :  { %p6305_p11 = pnand %p6304_p10, %p6298_p7 }
 0x131   :  { %6308 = shalt.err (!%p6305_p11)
}
 0x132   :  { %s6901_s1 = sld [smem:[#allocation66_spill]]  ;;  %s6481_s2 = smov [#allocation33]  }
 0x133   :  { %s326_s7 = sshll.u32 %s6481_s2, 4  ;;  %s6482_s8 = smov [#allocation36]   ;;  %s327_s7 = int_to_ptr.vmem [resolvable:$true] %s326_s7 }
 0x134   :  { %s348_s5 = sshll.u32 %s6482_s8, 4  ;;  %s6317_s20 = scalar_lea.vmem %s327_s7, 8192  ;;  %s349_s5 = int_to_ptr.vmem [resolvable:$true] %s348_s5 }
 0x135   :  { %p6318_p12 = scmp.ne.s32.totalorder %s327_s7, %s6317_s20  ;;  %p6322_p13 = scmp.lt.s32.totalorder %s327_s7, %s327_s7 }
 0x136   :  { %p6323_p0 = scmp.lt.s32.totalorder %s6317_s20, %s6317_s20 }
 0x138   :  { %310 = dma.hbm_to_vmem [thread:$0]  %s6901_s1, 8192, %s305_s28, [#allocation29], %s6468_s6, %s6468_s6, %s6469_s10  }
 0x139   :  { %p6324_p1 = por %p6323_p0, %p6322_p13 }
 0x13b   :  { %p6325_p2 = pnand %p6324_p1, %p6318_p12 }
 0x13d   :  { %6328 = shalt.err (!%p6325_p2)
}
 0x13e   :  { %s6902_s0 = sld [smem:[#allocation67_spill]]  ;;  %s6337_s19 = scalar_lea.vmem %s349_s5, 2048 }
 0x13f   :  { %p6338_p3 = scmp.ne.s32.totalorder %s349_s5, %s6337_s19  ;;  %p6342_p4 = scmp.lt.s32.totalorder %s349_s5, %s349_s5 }
 0x140   :  { %p6343_p5 = scmp.lt.s32.totalorder %s6337_s19, %s6337_s19 }
 0x142   :  { %p6344_p6 = por %p6343_p5, %p6342_p4 }
 0x144   :  { %332 = dma.hbm_to_vmem [thread:$0]  %s6902_s0, 8192, %s327_s7, [#allocation32], %s6471_s16, %s6471_s16, %s6472_s12  }
 0x145   :  { %p6345_p7 = pnand %p6344_p6, %p6338_p3 }
 0x147   :  { %6348 = shalt.err (!%p6345_p7)
}
 0x148   :  { %s6903_s6 = sld [smem:[#allocation68_spill]]  ;;  %s6483_s10 = smov [#allocation39]  }
 0x149   :  { %s376_s11 = sshll.u32 %s6483_s10, 4  ;;  %s6484_s15 = smov [#allocation40]   ;;  %s377_s11 = int_to_ptr.vmem [resolvable:$true] %s376_s11 }
 0x14a   :  { %s390_s9 = sshll.u32 %s6484_s15, 4  ;;  %s6357_s22 = scalar_lea.vmem %s377_s11, 1024  ;;  %s391_s9 = int_to_ptr.vmem [resolvable:$true] %s390_s9 }
 0x14b   :  { %p6358_p8 = scmp.ne.s32.totalorder %s377_s11, %s6357_s22  ;;  %p6362_p9 = scmp.lt.s32.totalorder %s377_s11, %s377_s11 }
 0x14c   :  { %p6363_p10 = scmp.lt.s32.totalorder %s6357_s22, %s6357_s22 }
 0x14e   :  { %354 = dma.hbm_to_vmem [thread:$0]  %s6903_s6, 2048, %s349_s5, [#allocation35], %s6471_s16, %s6471_s16, %s6472_s12  }
 0x14f   :  { %p6364_p11 = por %p6363_p10, %p6362_p9 }
 0x151   :  { %p6365_p12 = pnand %p6364_p11, %p6358_p8 }
 0x153   :  { %6368 = shalt.err (!%p6365_p12)
}
 0x154   :  { %s6904_s21 = sld [smem:[#allocation71_spill]]  ;;  %s6377_s17 = scalar_lea.vmem %s391_s9, 2048 }
 0x155   :  { %p6378_p13 = scmp.ne.s32.totalorder %s391_s9, %s6377_s17  ;;  %p6382_p0 = scmp.lt.s32.totalorder %s391_s9, %s391_s9 }
 0x156   :  { %p6383_p1 = scmp.lt.s32.totalorder %s6377_s17, %s6377_s17 }
 0x158   :  { %p6384_p2 = por %p6383_p1, %p6382_p0 }
 0x15a   :  { %382 = dma.hbm_to_vmem [thread:$0]  %s6904_s21, 1024, %s377_s11, [#allocation38], %s6461_s30, %s6461_s30, %s6462_s18  }
 0x15b   :  { %p6385_p3 = pnand %p6384_p2, %p6378_p13 }
 0x15d   :  { %6388 = shalt.err (!%p6385_p3)
}
 0x15e   :  { %s6905_s23 = sld [smem:[#allocation73_spill]] }
 0x164   :  { %396 = dma.hbm_to_vmem [thread:$0]  %s6905_s23, 2048, %s391_s9, [#allocation41], %s6471_s16, %s6471_s16, %s6472_s12  }
 0x165   :  { %6389 = dma.done.wait [#allocation3], 8192  }
 0x166   :  { %6390 = vsyncadd [#allocation3], 4294959104 }
 0x167   :  { %6391 = dma.done.wait [#allocation5], 8256  }
 0x168   :  { %6392 = vsyncadd [#allocation5], 4294959040 }
 0x169   :  { %6393 = dma.done.wait [#allocation8], 2080  }
 0x16a   :  { %6394 = vsyncadd [#allocation8], 4294965216 }
 0x16b   :  { %6395 = dma.done.wait [#allocation11], 2080  }
 0x16c   :  { %6396 = vsyncadd [#allocation11], 4294965216 }
 0x16d   :  { %6397 = dma.done.wait [#allocation14], 2064  }
 0x16e   :  { %6398 = vsyncadd [#allocation14], 4294965232 }
 0x16f   :  { %6399 = dma.done.wait [#allocation17], 1040  }
 0x170   :  { %6400 = vsyncadd [#allocation17], 4294966256 }
 0x171   :  { %6401 = dma.done.wait [#allocation20], 2064  }
 0x172   :  { %6402 = vsyncadd [#allocation20], 4294965232 }
 0x173   :  { %6403 = dma.done.wait [#allocation23], 2048  }
 0x174   :  { %6404 = vsyncadd [#allocation23], 4294965248 }
 0x175   :  { %6405 = dma.done.wait [#allocation26], 4112  }
 0x176   :  { %6406 = vsyncadd [#allocation26], 4294963184 }
 0x177   :  { %6407 = dma.done.wait [#allocation29], 8256  }
 0x178   :  { %6408 = vsyncadd [#allocation29], 4294959040 }
 0x179   :  { %6409 = dma.done.wait [#allocation32], 8256  }
 0x17a   :  { %6410 = vsyncadd [#allocation32], 4294959040 }
 0x17b   :  { %6411 = dma.done.wait [#allocation35], 2080  }
 0x17c   :  { %6412 = vsyncadd [#allocation35], 4294965216 }
 0x17d   :  { %6413 = dma.done.wait [#allocation38], 3072  }
 0x17e   :  { %6414 = vsyncadd [#allocation38], 4294964224 }
 0x17f   :  { %6415 = dma.done.wait [#allocation41], 2048  }
 0x180   :  { %6416 = vsyncadd [#allocation41], 4294965248  ;;  %v5246_v0 = vld [vmem:[#allocation2 + $0xe4] ss:$16 sps:$4 sm:$0xff]   ;;  %v5248_v1 = vld [vmem:[#allocation2 + $0xe0] ss:$16 sps:$4 sm:$0xff]  }
 0x181   :  { %896 = vmatprep.subr.bf16.mxu0 %v5246_v0  ;;  %v5249_v2 = vld [vmem:[#allocation2 + $0xec] ss:$16 sps:$4 sm:$0xff]   ;;  %v5251_v3 = vld [vmem:[#allocation2 + $0xe8] ss:$16 sps:$4 sm:$0xff]   ;;  %v5252_v4 = vld [vmem:[#allocation2 + $0xc4] ss:$16 sps:$4 sm:$0xff]  }
 0x182   :  { %897 = vmatpush1.bf16.msra.mxu0 %v5248_v1  ;;  %v5254_v5 = vld [vmem:[#allocation2 + $0xc0] ss:$16 sps:$4 sm:$0xff]   ;;  %939 = vmatprep.subr.bf16.mxu1 %v5249_v2  ;;  %v5255_v6 = vld [vmem:[#allocation2 + $0xcc] ss:$16 sps:$4 sm:$0xff]   ;;  %v5257_v7 = vld [vmem:[#allocation2 + $0xc8] ss:$16 sps:$4 sm:$0xff]  }
 0x183   :  { %940 = vmatpush1.bf16.msra.mxu1 %v5251_v3  ;;  %898 = vmatprep.subr.bf16.mxu0 %v5252_v4  ;;  %v5258_v8 = vld [vmem:[#allocation2 + $0xa4] ss:$16 sps:$4 sm:$0xff]   ;;  %v5260_v9 = vld [vmem:[#allocation2 + $0xa0] ss:$16 sps:$4 sm:$0xff]   ;;  %v5261_v10 = vld [vmem:[#allocation2 + $0xac] ss:$16 sps:$4 sm:$0xff]  }
 0x184   :  { %941 = vmatprep.subr.bf16.mxu1 %v5255_v6  ;;  %v5264_v11 = vld [vmem:[#allocation2 + $0x84] ss:$16 sps:$4 sm:$0xff]   ;;  %v5263_v12 = vld [vmem:[#allocation2 + $0xa8] ss:$16 sps:$4 sm:$0xff]   ;;  %v5267_v13 = vld [vmem:[#allocation2 + $0x8c] ss:$16 sps:$4 sm:$0xff]  }
 0x185   :  { %v5266_v14 = vld [vmem:[#allocation2 + $0x80] ss:$16 sps:$4 sm:$0xff]   ;;  %v5270_v15 = vld [vmem:[#allocation2 + $0x64] ss:$16 sps:$4 sm:$0xff]   ;;  %v5269_v16 = vld [vmem:[#allocation2 + $0x88] ss:$16 sps:$4 sm:$0xff]  }
 0x186   :  { %899 = vmatpush1.bf16.msra.mxu0 %v5254_v5  ;;  %v5273_v17 = vld [vmem:[#allocation2 + $0x6c] ss:$16 sps:$4 sm:$0xff]   ;;  %v5272_v18 = vld [vmem:[#allocation2 + $0x60] ss:$16 sps:$4 sm:$0xff]   ;;  %v5276_v19 = vld [vmem:[#allocation2 + $0x44] ss:$16 sps:$4 sm:$0xff]  }
 0x187   :  { %900 = vmatprep.subr.bf16.mxu0 %v5258_v8  ;;  %942 = vmatpush1.bf16.msra.mxu1 %v5257_v7  ;;  %v5275_v20 = vld [vmem:[#allocation2 + $0x68] ss:$16 sps:$4 sm:$0xff]   ;;  %v5279_v21 = vld [vmem:[#allocation2 + $0x4c] ss:$16 sps:$4 sm:$0xff]   ;;  %v5278_v22 = vld [vmem:[#allocation2 + $0x40] ss:$16 sps:$4 sm:$0xff]  }
 0x188   :  { %943 = vmatprep.subr.bf16.mxu1 %v5261_v10  ;;  %v5282_v23 = vld [vmem:[#allocation2 + $0x24] ss:$16 sps:$4 sm:$0xff]   ;;  %v5281_v24 = vld [vmem:[#allocation2 + $0x48] ss:$16 sps:$4 sm:$0xff]   ;;  %v5285_v25 = vld [vmem:[#allocation2 + $0x2c] ss:$16 sps:$4 sm:$0xff]  }
 0x189   :  { %v5284_v26 = vld [vmem:[#allocation2 + $0x20] ss:$16 sps:$4 sm:$0xff]   ;;  %v5288_v27 = vld [vmem:[#allocation2 + $0x4] ss:$16 sps:$4 sm:$0xff]   ;;  %v5287_v28 = vld [vmem:[#allocation2 + $0x28] ss:$16 sps:$4 sm:$0xff]  }
 0x18a   :  { %901 = vmatpush1.bf16.msra.mxu0 %v5260_v9  ;;  %v5291_v29 = vld [vmem:[#allocation2 + $0xc] ss:$16 sps:$4 sm:$0xff]   ;;  %v5290_v30 = vld [vmem:[#allocation2] ss:$16 sps:$4 sm:$0xff]   ;;  %v5294_v31 = vld [vmem:[#allocation2 + $0x1e4] ss:$16 sps:$4 sm:$0xff]  }
 0x18b   :  { %902 = vmatprep.subr.bf16.mxu0 %v5264_v11  ;;  %944 = vmatpush1.bf16.msra.mxu1 %v5263_v12  ;;  %v5293_v32 = vld [vmem:[#allocation2 + $0x8] ss:$16 sps:$4 sm:$0xff]   ;;  %v5297_v33 = vld [vmem:[#allocation2 + $0x1ec] ss:$16 sps:$4 sm:$0xff]   ;;  %v5296_v34 = vld [vmem:[#allocation2 + $0x1e0] ss:$16 sps:$4 sm:$0xff]  }
 0x18c   :  { %945 = vmatprep.subr.bf16.mxu1 %v5267_v13  ;;  %v5300_v35 = vld [vmem:[#allocation2 + $0x1c4] ss:$16 sps:$4 sm:$0xff]   ;;  %v5299_v36 = vld [vmem:[#allocation2 + $0x1e8] ss:$16 sps:$4 sm:$0xff]   ;;  %v5303_v37 = vld [vmem:[#allocation2 + $0x1cc] ss:$16 sps:$4 sm:$0xff]  }
 0x18d   :  { %v5302_v38 = vld [vmem:[#allocation2 + $0x1c0] ss:$16 sps:$4 sm:$0xff]   ;;  %s6906_s30 = sld [smem:[#allocation56_spill]]  ;;  %v5306_v39 = vld [vmem:[#allocation2 + $0x1a4] ss:$16 sps:$4 sm:$0xff]   ;;  %vm6487_vm0 = vmmov 0  }
 0x18e   :  { %903 = vmatpush1.bf16.msra.mxu0 %v5266_v14  ;;  %v5305_v40 = vld [vmem:[#allocation2 + $0x1c8] ss:$16 sps:$4 sm:$0xff]   ;;  %v5309_v41 = vld [vmem:[#allocation2 + $0x1ac] ss:$16 sps:$4 sm:$0xff]   ;;  %v5308_v42 = vld [vmem:[#allocation2 + $0x1a0] ss:$16 sps:$4 sm:$0xff]  }
 0x18f   :  { %904 = vmatprep.subr.bf16.mxu0 %v5270_v15  ;;  %946 = vmatpush1.bf16.msra.mxu1 %v5269_v16  ;;  %v5312_v43 = vld [vmem:[#allocation2 + $0x184] ss:$16 sps:$4 sm:$0xff]   ;;  %v5311_v44 = vld [vmem:[#allocation2 + $0x1a8] ss:$16 sps:$4 sm:$0xff]   ;;  %v5315_v45 = vld [vmem:[#allocation2 + $0x18c] ss:$16 sps:$4 sm:$0xff]  }
 0x190   :  { %947 = vmatprep.subr.bf16.mxu1 %v5273_v17  ;;  %v5314_v46 = vld [vmem:[#allocation2 + $0x180] ss:$16 sps:$4 sm:$0xff]   ;;  %v5318_v48 = vld [vmem:[#allocation2 + $0x164] ss:$16 sps:$4 sm:$0xff]   ;;  %v5317_v49 = vld [vmem:[#allocation2 + $0x188] ss:$16 sps:$4 sm:$0xff]  }
 0x191   :  { %v5321_v50 = vld [vmem:[#allocation2 + $0x16c] ss:$16 sps:$4 sm:$0xff]   ;;  %v5320_v51 = vld [vmem:[#allocation2 + $0x160] ss:$16 sps:$4 sm:$0xff]   ;;  %v5324_v52 = vld [vmem:[#allocation2 + $0x144] ss:$16 sps:$4 sm:$0xff]  }
 0x192   :  { %905 = vmatpush1.bf16.msra.mxu0 %v5272_v18  ;;  %v5323_v53 = vld [vmem:[#allocation2 + $0x168] ss:$16 sps:$4 sm:$0xff]   ;;  %v5327_v54 = vld [vmem:[#allocation2 + $0x14c] ss:$16 sps:$4 sm:$0xff]   ;;  %v5326_v55 = vld [vmem:[#allocation2 + $0x140] ss:$16 sps:$4 sm:$0xff]  }
 0x193   :  { %906 = vmatprep.subr.bf16.mxu0 %v5276_v19  ;;  %948 = vmatpush1.bf16.msra.mxu1 %v5275_v20  ;;  %v5343_v47 = vld [vmem:[%s6906_s30 + $0x4] ss:$8 sps:$4 sm:$0xff]   ;;  %v5329_v57 = vld [vmem:[#allocation2 + $0x148] ss:$16 sps:$4 sm:$0xff]   ;;  %v5332_v59 = vld [vmem:[#allocation2 + $0x120] ss:$16 sps:$4 sm:$0xff]  }
 0x194   :  { %949 = vmatprep.subr.bf16.mxu1 %v5279_v21  ;;  %928 = vmatprep.mubr.bf16.mxu0 %v5343_v47  ;;  %v5330_v56 = vld [vmem:[#allocation2 + $0x124] ss:$16 sps:$4 sm:$0xff]   ;;  %v5333_v58 = vld [vmem:[#allocation2 + $0x12c] ss:$16 sps:$4 sm:$0xff]   ;;  %v5335_v61 = vld [vmem:[#allocation2 + $0x128] ss:$16 sps:$4 sm:$0xff]  }
 0x195   :  { %971 = vmatprep.mubr.bf16.mxu1 %v5343_v47  ;;  %v5336_v60 = vld [vmem:[#allocation2 + $0x104] ss:$16 sps:$4 sm:$0xff]   ;;  %v5339_v62 = vld [vmem:[#allocation2 + $0x10c] ss:$16 sps:$4 sm:$0xff]   ;;  %v5338_v63 = vld [vmem:[#allocation2 + $0x100] ss:$16 sps:$4 sm:$0xff]  }
 0x196   :  { %907 = vmatpush1.bf16.msra.mxu0 %v5278_v22  ;;  %v5347_v0 = vld [vmem:[#allocation6 + $0x74] ss:$8 sps:$4 sm:$0xff]   ;;  %v5345_v4 = vld [vmem:[#allocation6 + $0x70] ss:$8 sps:$4 sm:$0xff]   ;;  %v5353_v5 = vld [vmem:[#allocation6 + $0x64] ss:$8 sps:$4 sm:$0xff]  }
 0x197   :  { %908 = vmatprep.subr.bf16.mxu0 %v5282_v23  ;;  %950 = vmatpush1.bf16.msra.mxu1 %v5281_v24  ;;  %v5344_v1 = vld [vmem:[#allocation2 + $0x108] ss:$16 sps:$4 sm:$0xff]   ;;  %v5348_v6 = vld [vmem:[#allocation6 + $0x170] ss:$8 sps:$4 sm:$0xff]   ;;  %v5351_v8 = vld [vmem:[#allocation6 + $0x60] ss:$8 sps:$4 sm:$0xff]  }
 0x198   :  { %951 = vmatprep.subr.bf16.mxu1 %v5285_v25  ;;  %v5341_v2 = vld [vmem:[%s6906_s30] ss:$8 sps:$4 sm:$0xff]   ;;  %v5354_v10 = vld [vmem:[#allocation6 + $0x160] ss:$8 sps:$4 sm:$0xff]   ;;  %v5357_v12 = vld [vmem:[#allocation6 + $0x50] ss:$8 sps:$4 sm:$0xff]  }
 0x199   :  { %v5350_v3 = vld [vmem:[#allocation6 + $0x174] ss:$8 sps:$4 sm:$0xff]   ;;  %v5356_v7 = vld [vmem:[#allocation6 + $0x164] ss:$8 sps:$4 sm:$0xff]   ;;  %v5360_v14 = vld [vmem:[#allocation6 + $0x150] ss:$8 sps:$4 sm:$0xff]  }
 0x19a   :  { %909 = vmatpush1.bf16.msra.mxu0 %v5284_v26  ;;  %v5359_v9 = vld [vmem:[#allocation6 + $0x54] ss:$8 sps:$4 sm:$0xff]   ;;  %v5365_v13 = vld [vmem:[#allocation6 + $0x44] ss:$8 sps:$4 sm:$0xff]   ;;  %v5363_v16 = vld [vmem:[#allocation6 + $0x40] ss:$8 sps:$4 sm:$0xff]  }
 0x19b   :  { %910 = vmatprep.subr.bf16.mxu0 %v5288_v27  ;;  %952 = vmatpush1.bf16.msra.mxu1 %v5287_v28  ;;  %v5362_v11 = vld [vmem:[#allocation6 + $0x154] ss:$8 sps:$4 sm:$0xff]   ;;  %v5368_v15 = vld [vmem:[#allocation6 + $0x144] ss:$8 sps:$4 sm:$0xff]   ;;  %v5366_v17 = vld [vmem:[#allocation6 + $0x140] ss:$8 sps:$4 sm:$0xff]  }
 0x19c   :  { %953 = vmatprep.subr.bf16.mxu1 %v5291_v29  ;;  %v5371_v18 = vld [vmem:[#allocation6 + $0x34] ss:$8 sps:$4 sm:$0xff]   ;;  %v5369_v19 = vld [vmem:[#allocation6 + $0x30] ss:$8 sps:$4 sm:$0xff]   ;;  %v5377_v21 = vld [vmem:[#allocation6 + $0x24] ss:$8 sps:$4 sm:$0xff]  }
 0x19d   :  { %v5374_v20 = vld [vmem:[#allocation6 + $0x134] ss:$8 sps:$4 sm:$0xff]   ;;  %v5372_v22 = vld [vmem:[#allocation6 + $0x130] ss:$8 sps:$4 sm:$0xff]   ;;  %v5380_v23 = vld [vmem:[#allocation6 + $0x124] ss:$8 sps:$4 sm:$0xff]  }
 0x19e   :  { %911 = vmatpush1.bf16.msra.mxu0 %v5290_v30  ;;  %v5375_v24 = vld [vmem:[#allocation6 + $0x20] ss:$8 sps:$4 sm:$0xff]   ;;  %v5383_v25 = vld [vmem:[#allocation6 + $0x14] ss:$8 sps:$4 sm:$0xff]   ;;  %v5381_v28 = vld [vmem:[#allocation6 + $0x10] ss:$8 sps:$4 sm:$0xff]  }
 0x19f   :  { %912 = vmatprep.subr.bf16.mxu0 %v5294_v31  ;;  %954 = vmatpush1.bf16.msra.mxu1 %v5293_v32  ;;  %v5378_v26 = vld [vmem:[#allocation6 + $0x120] ss:$8 sps:$4 sm:$0xff]   ;;  %v5386_v27 = vld [vmem:[#allocation6 + $0x114] ss:$8 sps:$4 sm:$0xff]   ;;  %v5389_v29 = vld [vmem:[#allocation6 + $0x4] ss:$8 sps:$4 sm:$0xff]  }
 0x1a0   :  { %955 = vmatprep.subr.bf16.mxu1 %v5297_v33  ;;  %v5384_v30 = vld [vmem:[#allocation6 + $0x110] ss:$8 sps:$4 sm:$0xff]   ;;  %v5392_v31 = vld [vmem:[#allocation6 + $0x104] ss:$8 sps:$4 sm:$0xff]   ;;  %v5387_v32 = vld [vmem:[#allocation6] ss:$8 sps:$4 sm:$0xff]  }
 0x1a1   :  { %v5395_v33 = vld [vmem:[#allocation6 + $0xf4] ss:$8 sps:$4 sm:$0xff]   ;;  %v5416_v47 = vld [vmem:[#allocation6 + $0x1c4] ss:$8 sps:$4 sm:$0xff]   ;;  %s6907_s18 = sld [smem:[#allocation57_spill]] }
 0x1a2   :  { %913 = vmatpush2.bf16.msra.mxu0 %v5296_v34  ;;  %v5390_v34 = vld [vmem:[#allocation6 + $0x100] ss:$8 sps:$4 sm:$0xff]   ;;  %s6908_s16 = sld [smem:[#allocation58_spill]] }
 0x1a3   :  { %914 = vmatprep.subr.bf16.mxu0 %v5300_v35  ;;  %956 = vmatpush2.bf16.msra.mxu1 %v5299_v36  ;;  %v5398_v35 = vld [vmem:[#allocation6 + $0x1f4] ss:$8 sps:$4 sm:$0xff]   ;;  %v5393_v36 = vld [vmem:[#allocation6 + $0xf0] ss:$8 sps:$4 sm:$0xff]   ;;  %s6911_s12 = sld [smem:[#allocation70_spill]] }
 0x1a4   :  { %957 = vmatprep.subr.bf16.mxu1 %v5303_v37  ;;  %v5401_v37 = vld [vmem:[#allocation6 + $0xe4] ss:$8 sps:$4 sm:$0xff]   ;;  %s6912_s29 = sld [smem:[#allocation74_spill]] }
 0x1a6   :  { %915 = vmatpush2.bf16.msra.mxu0 %v5302_v38  ;;  %v5396_v38 = vld [vmem:[#allocation6 + $0x1f0] ss:$8 sps:$4 sm:$0xff]  }
 0x1a7   :  { %916 = vmatprep.subr.bf16.mxu0 %v5306_v39  ;;  %958 = vmatpush2.bf16.msra.mxu1 %v5305_v40  ;;  %v5404_v39 = vld [vmem:[#allocation6 + $0x1e4] ss:$8 sps:$4 sm:$0xff]   ;;  %v5399_v40 = vld [vmem:[#allocation6 + $0xe0] ss:$8 sps:$4 sm:$0xff]  }
 0x1a8   :  { %959 = vmatprep.subr.bf16.mxu1 %v5309_v41  ;;  %v5407_v41 = vld [vmem:[#allocation6 + $0xd4] ss:$8 sps:$4 sm:$0xff]  }
 0x1aa   :  { %917 = vmatpush2.bf16.msra.mxu0 %v5308_v42  ;;  %v5402_v42 = vld [vmem:[#allocation6 + $0x1e0] ss:$8 sps:$4 sm:$0xff]  }
 0x1ab   :  { %918 = vmatprep.subr.bf16.mxu0 %v5312_v43  ;;  %960 = vmatpush2.bf16.msra.mxu1 %v5311_v44  ;;  %v5410_v43 = vld [vmem:[#allocation6 + $0x1d4] ss:$8 sps:$4 sm:$0xff]   ;;  %v5405_v44 = vld [vmem:[#allocation6 + $0xd0] ss:$8 sps:$4 sm:$0xff]  }
 0x1ac   :  { %961 = vmatprep.subr.bf16.mxu1 %v5315_v45  ;;  %v5413_v45 = vld [vmem:[#allocation6 + $0xc4] ss:$8 sps:$4 sm:$0xff]  }
 0x1ae   :  { %919 = vmatpush2.bf16.msra.mxu0 %v5314_v46  ;;  %v5408_v46 = vld [vmem:[#allocation6 + $0x1d0] ss:$8 sps:$4 sm:$0xff]  }
 0x1af   :  { %920 = vmatprep.subr.bf16.mxu0 %v5318_v48  ;;  %962 = vmatpush2.bf16.msra.mxu1 %v5317_v49  ;;  %v5411_v48 = vld [vmem:[#allocation6 + $0xc0] ss:$8 sps:$4 sm:$0xff]   ;;  %v5419_v49 = vld [vmem:[#allocation6 + $0xb4] ss:$8 sps:$4 sm:$0xff]  }
 0x1b0   :  { %963 = vmatprep.subr.bf16.mxu1 %v5321_v50  ;;  %v5414_v50 = vld [vmem:[#allocation6 + $0x1c0] ss:$8 sps:$4 sm:$0xff]  }
 0x1b2   :  { %921 = vmatpush2.bf16.msra.mxu0 %v5320_v51  ;;  %v5417_v51 = vld [vmem:[#allocation6 + $0xb0] ss:$8 sps:$4 sm:$0xff]  }
 0x1b3   :  { %922 = vmatprep.subr.bf16.mxu0 %v5324_v52  ;;  %964 = vmatpush2.bf16.msra.mxu1 %v5323_v53  ;;  %v5422_v52 = vld [vmem:[#allocation6 + $0x1b4] ss:$8 sps:$4 sm:$0xff]   ;;  %v5420_v53 = vld [vmem:[#allocation6 + $0x1b0] ss:$8 sps:$4 sm:$0xff]  }
 0x1b4   :  { %965 = vmatprep.subr.bf16.mxu1 %v5327_v54  ;;  %v5425_v54 = vld [vmem:[#allocation6 + $0xa4] ss:$8 sps:$4 sm:$0xff]  }
 0x1b6   :  { %923 = vmatpush2.bf16.msra.mxu0 %v5326_v55  ;;  %v5423_v55 = vld [vmem:[#allocation6 + $0xa0] ss:$8 sps:$4 sm:$0xff]  }
 0x1b7   :  { %924 = vmatprep.subr.bf16.mxu0 %v5330_v56  ;;  %966 = vmatpush2.bf16.msra.mxu1 %v5329_v57  ;;  %v5428_v56 = vld [vmem:[#allocation6 + $0x1a4] ss:$8 sps:$4 sm:$0xff]   ;;  %v5426_v57 = vld [vmem:[#allocation6 + $0x1a0] ss:$8 sps:$4 sm:$0xff]  }
 0x1b8   :  { %967 = vmatprep.subr.bf16.mxu1 %v5333_v58  ;;  %v5431_v58 = vld [vmem:[#allocation6 + $0x94] ss:$8 sps:$4 sm:$0xff]  }
 0x1ba   :  { %925 = vmatpush2.bf16.msra.mxu0 %v5332_v59  ;;  %v5429_v59 = vld [vmem:[#allocation6 + $0x90] ss:$8 sps:$4 sm:$0xff]  }
 0x1bb   :  { %926 = vmatprep.subr.bf16.mxu0 %v5336_v60  ;;  %968 = vmatpush2.bf16.msra.mxu1 %v5335_v61  ;;  %v5434_v60 = vld [vmem:[#allocation6 + $0x194] ss:$8 sps:$4 sm:$0xff]   ;;  %v5432_v61 = vld [vmem:[#allocation6 + $0x190] ss:$8 sps:$4 sm:$0xff]  }
 0x1bc   :  { %969 = vmatprep.subr.bf16.mxu1 %v5339_v62  ;;  %v5437_v62 = vld [vmem:[#allocation6 + $0x84] ss:$8 sps:$4 sm:$0xff]  }
 0x1be   :  { %927 = vmatpush2.bf16.msra.mxu0 %v5338_v63  ;;  %v5435_v63 = vld [vmem:[#allocation6 + $0x80] ss:$8 sps:$4 sm:$0xff]  }
 0x1bf   :  { %1390 = vmatprep.subr.bf16.mxu0 %v5347_v0  ;;  %970 = vmatpush2.bf16.msra.mxu1 %v5344_v1  ;;  %v5440_v0 = vld [vmem:[#allocation6 + $0x184] ss:$8 sps:$4 sm:$0xff]   ;;  %v5438_v1 = vld [vmem:[#allocation6 + $0x180] ss:$8 sps:$4 sm:$0xff]  }
 0x1c0   :  { %1433 = vmatprep.subr.bf16.mxu1 %v5350_v3  ;;  %v546_v3 = vlaneseq }
 0x1c1   :  { %929 = vmatmul.mubr.bf16.vlgmr.msra.gmra.mxu0 %v5341_v2 }
 0x1c2   :  { %1391 = vmatpush1.bf16.msra.mxu0 %v5345_v4  ;;  %972 = vmatmul.mubr.bf16.vlgmr.msra.gmra.mxu1 %v5341_v2  ;;  %v5443_v2 = vld [vmem:[#allocation9 + $0x74] ss:$8 sps:$4 sm:$0xff]   ;;  %v547_v4 = vshrl.u32 %v546_v3, 7  ;;  %v5473_v3 = vld [vmem:[#allocation15 + $0x20] sm:$0xff]  }
 0x1c3   :  { %1392 = vmatprep.subr.bf16.mxu0 %v5353_v5  ;;  %1434 = vmatpush1.bf16.msra.mxu1 %v5348_v6 }
 0x1c4   :  { %1435 = vmatprep.subr.bf16.mxu1 %v5356_v7  ;;  %v6754_v5 = vsub.s32 1, %v547_v4  ;;  %v6756_v6 = vsub.s32 2, %v547_v4  ;;  %v6758_v7 = vsub.s32 3, %v547_v4 }
 0x1c6   :  { %1393 = vmatpush1.bf16.msra.mxu0 %v5351_v8  ;;  %v6760_v8 = vsub.s32 0, %v547_v4  ;;  %v5474_v4 = vld [vmem:[#allocation15 + $0x58] sm:$0xff]  }
 0x1c7   :  { %1394 = vmatprep.subr.bf16.mxu0 %v5359_v9  ;;  %1436 = vmatpush1.bf16.msra.mxu1 %v5354_v10  ;;  %v544_v9 = vld [vmem:[#allocation4] sm:$0xf] }
 0x1c8   :  { %1437 = vmatprep.subr.bf16.mxu1 %v5362_v11  ;;  %v553_v11 = vrot.slane %v544_v9, %v6754_v5 }
 0x1ca   :  { %1395 = vmatpush1.bf16.msra.mxu0 %v5357_v12  ;;  %v557_v12 = vrot.slane %v544_v9, %v6756_v6 }
 0x1cb   :  { %1396 = vmatprep.subr.bf16.mxu0 %v5365_v13  ;;  %1438 = vmatpush1.bf16.msra.mxu1 %v5360_v14  ;;  %v561_v13 = vrot.slane %v544_v9, %v6758_v7  ;;  %v549_v14 = vrot.slane %v544_v9, %v6760_v8  ;;  %v5475_v9 = vld [vmem:[#allocation15 + $0x18] sm:$0xff]  }
 0x1cc   :  { %1439 = vmatprep.subr.bf16.mxu1 %v5368_v15 }
 0x1ce   :  { %1397 = vmatpush1.bf16.msra.mxu0 %v5363_v16 }
 0x1cf   :  { %1398 = vmatprep.subr.bf16.mxu0 %v5371_v18  ;;  %1440 = vmatpush1.bf16.msra.mxu1 %v5366_v17 }
 0x1d0   :  { %1441 = vmatprep.subr.bf16.mxu1 %v5374_v20 }
 0x1d2   :  { %1399 = vmatpush1.bf16.msra.mxu0 %v5369_v19 }
 0x1d3   :  { %1400 = vmatprep.subr.bf16.mxu0 %v5377_v21  ;;  %1442 = vmatpush1.bf16.msra.mxu1 %v5372_v22 }
 0x1d4   :  { %1443 = vmatprep.subr.bf16.mxu1 %v5380_v23 }
 0x1d6   :  { %1401 = vmatpush1.bf16.msra.mxu0 %v5375_v24 }
 0x1d7   :  { %1402 = vmatprep.subr.bf16.mxu0 %v5383_v25  ;;  %1444 = vmatpush1.bf16.msra.mxu1 %v5378_v26 }
 0x1d8   :  { %1445 = vmatprep.subr.bf16.mxu1 %v5386_v27 }
 0x1da   :  { %1403 = vmatpush1.bf16.msra.mxu0 %v5381_v28 }
 0x1db   :  { %1404 = vmatprep.subr.bf16.mxu0 %v5389_v29  ;;  %1446 = vmatpush1.bf16.msra.mxu1 %v5384_v30 }
 0x1dc   :  { %1447 = vmatprep.subr.bf16.mxu1 %v5392_v31 }
 0x1de   :  { %1405 = vmatpush1.bf16.msra.mxu0 %v5387_v32 }
 0x1df   :  { %1406 = vmatprep.subr.bf16.mxu0 %v5395_v33  ;;  %1448 = vmatpush1.bf16.msra.mxu1 %v5390_v34 }
 0x1e0   :  { %1449 = vmatprep.subr.bf16.mxu1 %v5398_v35 }
 0x1e2   :  { %1407 = vmatpush2.bf16.msra.mxu0 %v5393_v36 }
 0x1e3   :  { %1408 = vmatprep.subr.bf16.mxu0 %v5401_v37  ;;  %1450 = vmatpush2.bf16.msra.mxu1 %v5396_v38 }
 0x1e4   :  { %1451 = vmatprep.subr.bf16.mxu1 %v5404_v39  ;;  %v5441_v39 = vld [vmem:[#allocation9 + $0x70] ss:$8 sps:$4 sm:$0xff]  }
 0x1e6   :  { %1409 = vmatpush2.bf16.msra.mxu0 %v5399_v40 }
 0x1e7   :  { %1410 = vmatprep.subr.bf16.mxu0 %v5407_v41  ;;  %1452 = vmatpush2.bf16.msra.mxu1 %v5402_v42  ;;  %v5446_v42 = vld [vmem:[#allocation9 + $0x64] ss:$8 sps:$4 sm:$0xff]  }
 0x1e8   :  { %1453 = vmatprep.subr.bf16.mxu1 %v5410_v43 }
 0x1ea   :  { %1411 = vmatpush2.bf16.msra.mxu0 %v5405_v44  ;;  %v5444_v44 = vld [vmem:[#allocation9 + $0x60] ss:$8 sps:$4 sm:$0xff]  }
 0x1eb   :  { %1412 = vmatprep.subr.bf16.mxu0 %v5413_v45  ;;  %1454 = vmatpush2.bf16.msra.mxu1 %v5408_v46  ;;  %v5449_v45 = vld [vmem:[#allocation9 + $0x54] ss:$8 sps:$4 sm:$0xff]   ;;  %v6485_v46 = vmov 0  }
 0x1ec   :  { %1455 = vmatprep.subr.bf16.mxu1 %v5416_v47  ;;  %v5447_v47 = vld [vmem:[#allocation9 + $0x50] ss:$8 sps:$4 sm:$0xff]  }
 0x1ee   :  { %1413 = vmatpush2.bf16.msra.mxu0 %v5411_v48  ;;  %v5452_v48 = vld [vmem:[#allocation9 + $0x44] ss:$8 sps:$4 sm:$0xff]  }
 0x1ef   :  { %1414 = vmatprep.subr.bf16.mxu0 %v5419_v49  ;;  %1456 = vmatpush2.bf16.msra.mxu1 %v5414_v50  ;;  %v5450_v49 = vld [vmem:[#allocation9 + $0x40] ss:$8 sps:$4 sm:$0xff]   ;;  %v5455_v50 = vld [vmem:[#allocation9 + $0x34] ss:$8 sps:$4 sm:$0xff]  }
 0x1f0   :  { %1457 = vmatprep.subr.bf16.mxu1 %v5422_v52  ;;  %v5458_v52 = vld [vmem:[#allocation9 + $0x24] ss:$8 sps:$4 sm:$0xff]  }
 0x1f2   :  { %1415 = vmatpush2.bf16.msra.mxu0 %v5417_v51  ;;  %v5453_v51 = vld [vmem:[#allocation9 + $0x30] ss:$8 sps:$4 sm:$0xff]  }
 0x1f3   :  { %1416 = vmatprep.subr.bf16.mxu0 %v5425_v54  ;;  %1458 = vmatpush2.bf16.msra.mxu1 %v5420_v53  ;;  %v5456_v53 = vld [vmem:[#allocation9 + $0x20] ss:$8 sps:$4 sm:$0xff]   ;;  %v5461_v54 = vld [vmem:[#allocation9 + $0x14] ss:$8 sps:$4 sm:$0xff]  }
 0x1f4   :  { %1459 = vmatprep.subr.bf16.mxu1 %v5428_v56  ;;  %v5464_v56 = vld [vmem:[#allocation9 + $0x4] ss:$8 sps:$4 sm:$0xff]  }
 0x1f6   :  { %1417 = vmatpush2.bf16.msra.mxu0 %v5423_v55  ;;  %v5459_v55 = vld [vmem:[#allocation9 + $0x10] ss:$8 sps:$4 sm:$0xff]  }
 0x1f7   :  { %1418 = vmatprep.subr.bf16.mxu0 %v5431_v58  ;;  %1460 = vmatpush2.bf16.msra.mxu1 %v5426_v57  ;;  %v5462_v57 = vld [vmem:[#allocation9] ss:$8 sps:$4 sm:$0xff]  }
 0x1f8   :  { %1461 = vmatprep.subr.bf16.mxu1 %v5434_v60  ;;  %v5466_v58 = vld [vmem:[#allocation15 + $0x78] sm:$0xff]  }
 0x1f9   :  { %v5467_v60 = vld [vmem:[#allocation15 + $0x38] sm:$0xff]  }
 0x1fa   :  { %1419 = vmatpush2.bf16.msra.mxu0 %v5429_v59  ;;  %v5465_v59 = vld [vmem:[%s6907_s18] sm:$0xff]  }
 0x1fb   :  { %1420 = vmatprep.subr.bf16.mxu0 %v5437_v62  ;;  %1462 = vmatpush2.bf16.msra.mxu1 %v5432_v61  ;;  %v5484_v61 = vld [vmem:[%s6908_s16 + $0x4] ss:$8 sps:$4 sm:$0xff]   ;;  %v5468_v62 = vld [vmem:[#allocation15 + $0x70] sm:$0xff]  }
 0x1fc   :  { %1463 = vmatprep.subr.bf16.mxu1 %v5440_v0  ;;  %v5470_v0 = vld [vmem:[#allocation15 + $0x68] sm:$0xff]  }
 0x1fe   :  { %1421 = vmatpush2.bf16.msra.mxu0 %v5435_v63  ;;  %v5469_v63 = vld [vmem:[#allocation15 + $0x30] sm:$0xff]  }
 0x1ff   :  { %1464 = vmatpush2.bf16.msra.mxu1 %v5438_v1  ;;  %1596 = vmatprep.subr.bf16.mxu0 %v5443_v2  ;;  %v5471_v1 = vld [vmem:[#allocation15 + $0x28] sm:$0xff]   ;;  %v5472_v2 = vld [vmem:[#allocation15 + $0x60] sm:$0xff]  }
 0x281   :  { %v930_v10 = vpop.f32.mrf.mxu0 }
 0x282   :  { %v973_v16 = vpop.f32.mrf.mxu1  ;;  %v931_v23 = vadd.f32 %v930_v10, %v549_v14  ;;  %v5476_v10 = vld [vmem:[#allocation15 + $0x50] sm:$0xff]  }
 0x283   :  { %v932_v15 = vpop.f32.mrf.mxu0  ;;  %v974_v18 = vadd.f32 %v973_v16, %v557_v12  ;;  %v5482_v16 = vld [vmem:[%s6908_s16] ss:$8 sps:$4 sm:$0xff]  }
 0x284   :  { %v933_v17 = vadd.f32 %v932_v15, %v553_v11  ;;  %v975_v20 = vpop.f32.mrf.mxu1  ;;  %v982_v36 = vmax.f32 %v931_v23, 0.0  ;;  %v5481_v15 = vld [vmem:[#allocation15] sm:$0xff]  }
 0x285   :  { %v934_v19 = vpop.f32.mrf.mxu0  ;;  %v976_v22 = vadd.f32 %v975_v20, %v561_v13  ;;  %v984_v29 = vmax.f32 %v974_v18, 0.0  ;;  %v5486_v18 = vld [vmem:[#allocation12 + $0x38] sm:$0xff]   ;;  %v5488_v20 = vld [vmem:[#allocation12 + $0x30] sm:$0xff]   ;;  %v5491_v23 = vld [vmem:[#allocation12 + $0x60] sm:$0xff]  }
 0x286   :  { %v935_v21 = vadd.f32 %v934_v19, %v549_v14  ;;  %v977_v25 = vpop.f32.mrf.mxu1  ;;  %v983_v28 = vmax.f32 %v933_v17, 0.0  ;;  %v5480_v14 = vld [vmem:[#allocation15 + $0x40] sm:$0xff]   ;;  %v5485_v17 = vld [vmem:[#allocation12 + $0x78] sm:$0xff]   ;;  %v5487_v19 = vld [vmem:[#allocation12 + $0x70] sm:$0xff]  }
 0x287   :  { %v936_v24 = vpop.f32.mrf.mxu0  ;;  %v978_v27 = vadd.f32 %v977_v25, %v557_v12  ;;  %v985_v32 = vmax.f32 %v976_v22, 0.0  ;;  %v5478_v12 = vld [vmem:[#allocation15 + $0x48] sm:$0xff]   ;;  %4971 = vmatprep.subr.bf16.mxu1 %v5485_v17  ;;  %v5493_v25 = vld [vmem:[#allocation12 + $0x58] sm:$0xff]  }
 0x288   :  { %v937_v26 = vadd.f32 %v936_v24, %v553_v11  ;;  %v986_v30 = vmax.f32 %v935_v21, 0.0  ;;  %v979_v31 = vpop.f32.mrf.mxu1  ;;  %v5477_v11 = vld [vmem:[#allocation15 + $0x10] sm:$0xff]   ;;  %v5489_v21 = vld [vmem:[#allocation12 + $0x68] sm:$0xff]   ;;  %v5492_v24 = vld [vmem:[#allocation12 + $0x20] sm:$0xff]  }
 0x289   :  { %v988_v34 = vmax.f32 %v978_v27, 0.0  ;;  %v980_v35 = vadd.f32 %v979_v31, %v561_v13  ;;  %v5479_v13 = vld [vmem:[#allocation15 + $0x8] sm:$0xff]   ;;  %v5499_v31 = vld [vmem:[#allocation12 + $0x40] sm:$0xff]  }
 0x28a   :  { %v987_v33 = vmax.f32 %v937_v26, 0.0  ;;  %v990_v40 = vpack.c.bf16 %v986_v30, %v982_v36  ;;  %v5490_v22 = vld [vmem:[#allocation12 + $0x28] sm:$0xff]   ;;  %v5494_v26 = vld [vmem:[#allocation12 + $0x18] sm:$0xff]   ;;  %v5495_v27 = vld [vmem:[#allocation12 + $0x50] sm:$0xff]  }
 0x28b   :  { %v989_v38 = vmax.f32 %v980_v35, 0.0  ;;  %v992_v41 = vpack.c.bf16 %v988_v34, %v984_v29  ;;  %v5497_v29 = vld [vmem:[#allocation12 + $0x48] sm:$0xff]   ;;  %v5525_v34 = vld [vmem:[#allocation22 + $0x38] sm:$0xff]   ;;  %v5526_v35 = vld [vmem:[#allocation22 + $0x30] sm:$0xff]  }
 0x28c   :  { %v991_v37 = vpack.c.bf16 %v987_v33, %v983_v28  ;;  %v5496_v28 = vld [vmem:[#allocation12 + $0x10] sm:$0xff]   ;;  %v5498_v30 = vld [vmem:[#allocation12 + $0x8] sm:$0xff]   ;;  %v6486_v33 = vmov 0.0   ;;  %v5505_v17 = vld [vmem:[#allocation18 + $0x18] sm:$0xff]  }
 0x28d   :  { %v993_v43 = vpack.c.bf16 %v989_v38, %v985_v32  ;;  %v5500_v32 = vld [vmem:[#allocation12] sm:$0xff]   ;;  %v5527_v36 = vld [vmem:[#allocation22 + $0x28] sm:$0xff]   ;;  %v1058_v38 = vld [vmem:[#allocation7] sm:$0x3] }
 0x28e   :  { %1422 = vmatprep.mubr.bf16.mxu0 %v991_v37  ;;  %v5528_v37 = vld [vmem:[#allocation22 + $0x20] sm:$0xff]  }
 0x28f   :  { %1423 = vmatmul.mubr.bf16.vlgmr.msra.gmra.mxu0 %v990_v40  ;;  %1465 = vmatprep.mubr.bf16.mxu1 %v993_v43  ;;  %v5529_v40 = vld [vmem:[#allocation22 + $0x18] sm:$0xff]  }
 0x290   :  { %1597 = vmatpush1.bf16.msra.mxu0 %v5441_v39  ;;  %1466 = vmatmul.mubr.bf16.vlgmr.msra.gmra.mxu1 %v992_v41  ;;  %v1063_v39 = vrot.slane %v1058_v38, %v6760_v8 }
 0x291   :  { %1598 = vmatprep.subr.bf16.mxu0 %v5446_v42  ;;  %1628 = vmatprep.mubr.bf16.mxu0 %v6485_v46 }
 0x292   :  { %4972 = vmatpush3.bf16.msra.mxu1 %v5486_v18  ;;  %v5506_v18 = vld [vmem:[#allocation18 + $0x10] sm:$0xff]  }
 0x293   :  { %4973 = vmatprep.subr.bf16.mxu1 %v5487_v19  ;;  %v1067_v19 = vrot.slane %v1058_v38, %v6754_v5 }
 0x294   :  { %1599 = vmatpush1.bf16.msra.mxu0 %v5444_v44 }
 0x295   :  { %1600 = vmatprep.subr.bf16.mxu0 %v5449_v45 }
 0x296   :  { %4974 = vmatpush3.bf16.msra.mxu1 %v5488_v20 }
 0x297   :  { %4975 = vmatprep.subr.bf16.mxu1 %v5489_v21 }
 0x298   :  { %1601 = vmatpush1.bf16.msra.mxu0 %v5447_v47 }
 0x299   :  { %1602 = vmatprep.subr.bf16.mxu0 %v5452_v48 }
 0x29a   :  { %4976 = vmatpush3.bf16.msra.mxu1 %v5490_v22 }
 0x29b   :  { %4977 = vmatprep.subr.bf16.mxu1 %v5491_v23 }
 0x29c   :  { %1603 = vmatpush1.bf16.msra.mxu0 %v5450_v49 }
 0x29d   :  { %1604 = vmatprep.subr.bf16.mxu0 %v5455_v50 }
 0x29e   :  { %4978 = vmatpush3.bf16.msra.mxu1 %v5492_v24 }
 0x29f   :  { %4979 = vmatprep.subr.bf16.mxu1 %v5493_v25  ;;  %v5507_v25 = vld [vmem:[#allocation18 + $0x8] sm:$0xff]  }
 0x2a0   :  { %1605 = vmatpush1.bf16.msra.mxu0 %v5453_v51 }
 0x2a1   :  { %1606 = vmatprep.subr.bf16.mxu0 %v5458_v52 }
 0x2a2   :  { %4980 = vmatpush3.bf16.msra.mxu1 %v5494_v26 }
 0x2a3   :  { %4981 = vmatprep.subr.bf16.mxu1 %v5495_v27  ;;  %v4688_v27 = vld [vmem:[#allocation16] ss:$0 sm:$0xff] }
 0x2a4   :  { %1607 = vmatpush1.bf16.msra.mxu0 %v5456_v53 }
 0x2a5   :  { %1608 = vmatprep.subr.bf16.mxu0 %v5461_v54 }
 0x2a6   :  { %4982 = vmatpush3.bf16.msra.mxu1 %v5496_v28 }
 0x2a7   :  { %4983 = vmatprep.subr.bf16.mxu1 %v5497_v29 }
 0x2a8   :  { %1609 = vmatpush1.bf16.msra.mxu0 %v5459_v55 }
 0x2a9   :  { %1610 = vmatprep.subr.bf16.mxu0 %v5464_v56  ;;  %v1498_v56 = vld [vmem:[#allocation10] sm:$0x3] }
 0x2aa   :  { %4984 = vmatpush3.bf16.msra.mxu1 %v5498_v30 }
 0x2ab   :  { %4985 = vmatprep.subr.bf16.mxu1 %v5499_v31 }
 0x2ac   :  { %1611 = vmatpush1.bf16.msra.mxu0 %v5462_v57 }
 0x2ad   :  { %4993 = vmatprep.subr.bf16.mxu0 %v5466_v58  ;;  %v1507_v58 = vrot.slane %v1498_v56, %v6754_v5 }
 0x2ae   :  { %4986 = vmatpush3.bf16.msra.mxu1 %v5500_v32 }
 0x2af   :  { %1629 = vmatmul.mubr.bf16.vlgmr.msra.gmra.mxu0 %v5465_v59  ;;  %5095 = vmatprep.subr.bf16.mxu1 %v6486_v33  ;;  %v1503_v59 = vrot.slane %v1498_v56, %v6760_v8  ;;  %v5520_v56 = vld [vmem:[#allocation21 + $0x10] sm:$0xff]  }
 0x2b0   :  { %4994 = vmatpush3.bf16.msra.mxu0 %v5467_v60  ;;  %2002 = vmatprep.mubr.bf16.mxu0 %v5484_v61 }
 0x2b1   :  { %4995 = vmatprep.subr.bf16.mxu0 %v5468_v62 }
 0x2b4   :  { %4996 = vmatpush3.bf16.msra.mxu0 %v5469_v63 }
 0x2b5   :  { %4997 = vmatprep.subr.bf16.mxu0 %v5470_v0 }
 0x2b8   :  { %4998 = vmatpush3.bf16.msra.mxu0 %v5471_v1 }
 0x2b9   :  { %4999 = vmatprep.subr.bf16.mxu0 %v5472_v2 }
 0x2bc   :  { %5000 = vmatpush3.bf16.msra.mxu0 %v5473_v3 }
 0x2bd   :  { %5001 = vmatprep.subr.bf16.mxu0 %v5474_v4 }
 0x2c0   :  { %5002 = vmatpush3.bf16.msra.mxu0 %v5475_v9 }
 0x2c1   :  { %5003 = vmatprep.subr.bf16.mxu0 %v5476_v10 }
 0x2c4   :  { %5004 = vmatpush3.bf16.msra.mxu0 %v5477_v11 }
 0x2c5   :  { %5005 = vmatprep.subr.bf16.mxu0 %v5478_v12  ;;  %v5501_v12 = vld [vmem:[#allocation18 + $0x38] sm:$0xff]  }
 0x2c8   :  { %5006 = vmatpush3.bf16.msra.mxu0 %v5479_v13 }
 0x2c9   :  { %5007 = vmatprep.subr.bf16.mxu0 %v5480_v14  ;;  %v5502_v14 = vld [vmem:[#allocation18 + $0x30] sm:$0xff]  }
 0x2cc   :  { %5008 = vmatpush3.bf16.msra.mxu0 %v5481_v15  ;;  %v5503_v15 = vld [vmem:[#allocation18 + $0x28] sm:$0xff]  }
 0x2cd   :  { %5115 = vmatprep.subr.bf16.mxu0 %v6486_v33 }
 0x2cf   :  { %2003 = vmatmul.mubr.bf16.vlgmr.msra.gmra.mxu0 %v5482_v16  ;;  %v5504_v16 = vld [vmem:[#allocation18 + $0x20] sm:$0xff]  }
 0x2d0   :  { %5131 = vmatprep.mubr.msk.bf16.mxu0 %vm6487_vm0, %v6486_v33  ;;  %5116 = vmatpush3.bf16.msra.mxu0 %v5525_v34  ;;  %v5508_v34 = vld [vmem:[#allocation18] sm:$0xff]  }
 0x2d1   :  { %5117 = vmatprep.subr.bf16.mxu0 %v6486_v33 }
 0x2d4   :  { %5118 = vmatpush3.bf16.msra.mxu0 %v5526_v35 }
 0x2d5   :  { %5119 = vmatprep.subr.bf16.mxu0 %v6486_v33 }
 0x2d8   :  { %5120 = vmatpush3.bf16.msra.mxu0 %v5527_v36  ;;  %v5509_v36 = vld [vmem:[#allocation21 + $0x78] sm:$0xff]  }
 0x2d9   :  { %5121 = vmatprep.subr.bf16.mxu0 %v6486_v33 }
 0x2dc   :  { %5122 = vmatpush3.bf16.msra.mxu0 %v5528_v37 }
 0x2dd   :  { %5123 = vmatprep.subr.bf16.mxu0 %v6486_v33 }
 0x2e0   :  { %5124 = vmatpush3.bf16.msra.mxu0 %v5529_v40 }
 0x2e1   :  { %5125 = vmatprep.subr.bf16.mxu0 %v6486_v33 }
 0x34f   :  { %v1424_v41 = vpop.f32.mrf.mxu0 }
 0x350   :  { %v1425_v42 = vadd.f32 %v1424_v41, %v1063_v39  ;;  %v1467_v44 = vpop.f32.mrf.mxu1 }
 0x351   :  { %v1426_v43 = vpop.f32.mrf.mxu0 }
 0x352   :  { %v6780_v47 = vpop.f32.mrf.mxu1  ;;  %v1468_v48 = vadd.f32 %v1467_v44, %v1425_v42  ;;  %v1427_v26 = vadd.f32 %v1426_v43, %v1067_v19  ;;  %v5510_v42 = vld [vmem:[#allocation21 + $0x38] sm:$0xff]   ;;  %v5511_v44 = vld [vmem:[#allocation21 + $0x70] sm:$0xff]  }
 0x353   :  { %v1428_v45 = vpop.f32.mrf.mxu0 }
 0x354   :  { %v1429_v49 = vadd.f32 %v1428_v45, %v1063_v39  ;;  %v1471_v50 = vpop.f32.mrf.mxu1  ;;  %v1476_v52 = vmax.f32 %v1468_v48, 0.0  ;;  %v1470_v35 = vadd.f32 %v6780_v47, %v1427_v26  ;;  %v5512_v48 = vld [vmem:[#allocation21 + $0x30] sm:$0xff]   ;;  %v5513_v47 = vld [vmem:[#allocation21 + $0x68] sm:$0xff]  }
 0x355   :  { %v1430_v55 = vpop.f32.mrf.mxu0 }
 0x356   :  { %v1472_v51 = vadd.f32 %v1471_v50, %v1429_v49  ;;  %v1431_v21 = vadd.f32 %v1430_v55, %v1067_v19  ;;  %v1473_v23 = vpop.f32.mrf.mxu1  ;;  %v1477_v41 = vmax.f32 %v1470_v35, 0.0  ;;  %v5514_v49 = vld [vmem:[#allocation21 + $0x28] sm:$0xff]   ;;  %v5515_v50 = vld [vmem:[#allocation21 + $0x60] sm:$0xff]   ;;  %v5519_v55 = vld [vmem:[#allocation21 + $0x50] sm:$0xff]  }
 0x357   :  { %v5537_v19 = vld [vmem:[#allocation24 + $0x18] sm:$0xff]  }
 0x358   :  { %v1478_v53 = vmax.f32 %v1472_v51, 0.0  ;;  %v1474_v29 = vadd.f32 %v1473_v23, %v1431_v21  ;;  %v5516_v51 = vld [vmem:[#allocation21 + $0x20] sm:$0xff]   ;;  %v4707_v23 = vld [vmem:[#allocation19] ss:$0 sm:$0xff] }
 0x359   :  { %v5543_v35 = vld [vmem:[#allocation27 + $0xe4] ss:$16 sps:$4 sm:$0xff]  }
 0x35a   :  { %v6782_v54 = vpack.c.bf16 %v1478_v53, %v1476_v52  ;;  %v1479_v38 = vmax.f32 %v1474_v29, 0.0  ;;  %v5517_v52 = vld [vmem:[#allocation21 + $0x58] sm:$0xff]   ;;  %v5540_v29 = vld [vmem:[#allocation24] sm:$0xff]  }
 0x35b   :  { %v5518_v53 = vld [vmem:[#allocation21 + $0x18] sm:$0xff]  }
 0x35c   :  { %v2129_v45 = vpack.c.bf16 %v1479_v38, %v1477_v41  ;;  %v5549_v38 = vld [vmem:[#allocation27 + $0xc4] ss:$16 sps:$4 sm:$0xff]   ;;  %v5550_v41 = vld [vmem:[#allocation27 + $0xc8] ss:$16 sps:$4 sm:$0xff]  }
 0x36f   :  { %v1630_v57 = vpop.f32.mrf.mxu0 }
 0x370   :  { %v1631_v0 = vadd.f32 %v1630_v57, %v1503_v59  ;;  %v5521_v57 = vld [vmem:[#allocation21 + $0x48] sm:$0xff]  }
 0x371   :  { %v1632_v60 = vpop.f32.mrf.mxu0 }
 0x372   :  { %v1633_v62 = vadd.f32 %v1632_v60, %v1507_v58  ;;  %v1639_v10 = vmax.f32 %v1631_v0, 0.0  ;;  %v5524_v60 = vld [vmem:[#allocation21] sm:$0xff]  }
 0x373   :  { %v1634_v61 = vpop.f32.mrf.mxu0 }
 0x374   :  { %v1635_v63 = vadd.f32 %v1634_v61, %v1503_v59  ;;  %v1640_v4 = vmax.f32 %v1633_v62, 0.0  ;;  %v5523_v59 = vld [vmem:[#allocation21 + $0x40] sm:$0xff]   ;;  %v5530_v61 = vld [vmem:[#allocation22 + $0x10] sm:$0xff]   ;;  %v5531_v62 = vld [vmem:[#allocation22 + $0x8] sm:$0xff]  }
 0x375   :  { %v1636_v1 = vpop.f32.mrf.mxu0  ;;  %5126 = vmatpush3.bf16.msra.mxu0 %v5530_v61  ;;  %v5582_v61 = vld [vmem:[#allocation27 + $0x2c] ss:$16 sps:$4 sm:$0xff]  }
 0x376   :  { %v1637_v2 = vadd.f32 %v1636_v1, %v1507_v58  ;;  %v1641_v3 = vmax.f32 %v1635_v63, 0.0  ;;  %v5522_v58 = vld [vmem:[#allocation21 + $0x8] sm:$0xff]   ;;  %5127 = vmatprep.subr.bf16.mxu0 %v6486_v33  ;;  %v5532_v63 = vld [vmem:[#allocation22] sm:$0xff]  }
 0x378   :  { %v1642_v9 = vmax.f32 %v1637_v2, 0.0  ;;  %v1643_v13 = vpack.c.bf16 %v1641_v3, %v1639_v10  ;;  %v4671_v3 = vld [vmem:[#allocation13] ss:$0 sm:$0xff] }
 0x379   :  { %5128 = vmatpush3.bf16.msra.mxu0 %v5531_v62  ;;  %v5577_v62 = vld [vmem:[#allocation27 + $0x20] ss:$16 sps:$4 sm:$0xff]  }
 0x37a   :  { %v1644_v11 = vpack.c.bf16 %v1642_v9, %v1640_v4  ;;  %5129 = vmatprep.subr.bf16.mxu0 %v6486_v33 }
 0x37c   :  { %1812 = vmatprep.mubr.bf16.mxu1 %v1644_v11 }
 0x37d   :  { %1813 = vmatmul.mubr.bf16.vlgmr.msra.gmra.mxu1 %v1643_v13  ;;  %5130 = vmatpush3.bf16.msra.mxu0 %v5532_v63  ;;  %v5580_v63 = vld [vmem:[#allocation27 + $0x28] ss:$16 sps:$4 sm:$0xff]  }
 0x37e   :  { %5096 = vmatpush3.bf16.msra.mxu1 %v5501_v12  ;;  %5111 = vmatprep.mubr.msk.bf16.mxu1 %vm6487_vm0, %v6486_v33 }
 0x37f   :  { %5097 = vmatprep.subr.bf16.mxu1 %v6486_v33  ;;  %5135 = vmatprep.subr.bf16.mxu0 %v6486_v33 }
 0x382   :  { %5098 = vmatpush3.bf16.msra.mxu1 %v5502_v14  ;;  %v5533_v14 = vld [vmem:[#allocation24 + $0x38] sm:$0xff]  }
 0x383   :  { %5099 = vmatprep.subr.bf16.mxu1 %v6486_v33 }
 0x386   :  { %5100 = vmatpush3.bf16.msra.mxu1 %v5503_v15 }
 0x387   :  { %5101 = vmatprep.subr.bf16.mxu1 %v6486_v33 }
 0x38a   :  { %5102 = vmatpush3.bf16.msra.mxu1 %v5504_v16  ;;  %v5534_v16 = vld [vmem:[#allocation24 + $0x30] sm:$0xff]  }
 0x38b   :  { %5103 = vmatprep.subr.bf16.mxu1 %v6486_v33 }
 0x38e   :  { %5104 = vmatpush3.bf16.msra.mxu1 %v5505_v17  ;;  %v5535_v17 = vld [vmem:[#allocation24 + $0x28] sm:$0xff]  }
 0x38f   :  { %v5009_v20 = vpop.f32.mrf.mxu0  ;;  %5105 = vmatprep.subr.bf16.mxu1 %v6486_v33 }
 0x391   :  { %v5010_v22 = vpop.f32.mrf.mxu0 }
 0x392   :  { %v5011_v24 = vadd.f32 %v5010_v22, %v5009_v20  ;;  %5106 = vmatpush3.bf16.msra.mxu1 %v5506_v18  ;;  %v5536_v18 = vld [vmem:[#allocation24 + $0x20] sm:$0xff]   ;;  %v5538_v20 = vld [vmem:[#allocation24 + $0x10] sm:$0xff]  }
 0x393   :  { %v5012_v28 = vpop.f32.mrf.mxu0  ;;  %5107 = vmatprep.subr.bf16.mxu1 %v6486_v33 }
 0x394   :  { %v2005_v31 = vadd.f32 %v5011_v24, %v4688_v27  ;;  %v5539_v24 = vld [vmem:[#allocation24 + $0x8] sm:$0xff]  }
 0x395   :  { %v5013_v30 = vpop.f32.mrf.mxu0 }
 0x396   :  { %v5014_v32 = vadd.f32 %v5013_v30, %v5012_v28  ;;  %5108 = vmatpush3.bf16.msra.mxu1 %v5507_v25  ;;  %v2011_v39 = vmax.f32 %v2005_v31, 0.0 }
 0x397   :  { %5109 = vmatprep.subr.bf16.mxu1 %v6486_v33 }
 0x398   :  { %v2008_v37 = vadd.f32 %v5014_v32, %v4688_v27 }
 0x39a   :  { %v2012_v40 = vmax.f32 %v2008_v37, 0.0  ;;  %5110 = vmatpush3.bf16.msra.mxu1 %v5508_v34  ;;  %v5541_v34 = vld [vmem:[#allocation27 + $0xe0] ss:$16 sps:$4 sm:$0xff]   ;;  %v5546_v37 = vld [vmem:[#allocation27 + $0xec] ss:$16 sps:$4 sm:$0xff]  }
 0x39b   :  { %5033 = vmatprep.subr.bf16.mxu1 %v5509_v36  ;;  %v5544_v36 = vld [vmem:[#allocation27 + $0xe8] ss:$16 sps:$4 sm:$0xff]  }
 0x39c   :  { %v2013_v43 = vpack.c.bf16 %v2012_v40, %v2011_v39  ;;  %v5552_v39 = vld [vmem:[#allocation27 + $0xcc] ss:$16 sps:$4 sm:$0xff]   ;;  %v5547_v40 = vld [vmem:[#allocation27 + $0xc0] ss:$16 sps:$4 sm:$0xff]  }
 0x39e   :  { %5112 = vmatmul.mubr.bf16.vlgmr.msra.gmra.mxu1 %v2013_v43  ;;  %v5558_v43 = vld [vmem:[#allocation27 + $0xac] ss:$16 sps:$4 sm:$0xff]  }
 0x39f   :  { %5034 = vmatpush3.bf16.msra.mxu1 %v5510_v42  ;;  %2396 = vmatprep.mubr.bf16.mxu1 %v2129_v45  ;;  %v5555_v42 = vld [vmem:[#allocation27 + $0xa4] ss:$16 sps:$4 sm:$0xff]   ;;  %v5556_v45 = vld [vmem:[#allocation27 + $0xa8] ss:$16 sps:$4 sm:$0xff]  }
 0x3a0   :  { %5035 = vmatprep.subr.bf16.mxu1 %v5511_v44  ;;  %v5553_v44 = vld [vmem:[#allocation27 + $0xa0] ss:$16 sps:$4 sm:$0xff]  }
 0x3a3   :  { %5036 = vmatpush3.bf16.msra.mxu1 %v5512_v48  ;;  %v5561_v48 = vld [vmem:[#allocation27 + $0x84] ss:$16 sps:$4 sm:$0xff]  }
 0x3a4   :  { %5037 = vmatprep.subr.bf16.mxu1 %v5513_v47  ;;  %v5564_v47 = vld [vmem:[#allocation27 + $0x8c] ss:$16 sps:$4 sm:$0xff]  }
 0x3a7   :  { %5038 = vmatpush3.bf16.msra.mxu1 %v5514_v49  ;;  %v5559_v49 = vld [vmem:[#allocation27 + $0x80] ss:$16 sps:$4 sm:$0xff]  }
 0x3a8   :  { %5039 = vmatprep.subr.bf16.mxu1 %v5515_v50  ;;  %v5562_v50 = vld [vmem:[#allocation27 + $0x88] ss:$16 sps:$4 sm:$0xff]  }
 0x3ab   :  { %5040 = vmatpush3.bf16.msra.mxu1 %v5516_v51  ;;  %v5567_v51 = vld [vmem:[#allocation27 + $0x64] ss:$16 sps:$4 sm:$0xff]  }
 0x3ac   :  { %5041 = vmatprep.subr.bf16.mxu1 %v5517_v52  ;;  %v5570_v52 = vld [vmem:[#allocation27 + $0x6c] ss:$16 sps:$4 sm:$0xff]  }
 0x3af   :  { %5042 = vmatpush3.bf16.msra.mxu1 %v5518_v53  ;;  %v5565_v53 = vld [vmem:[#allocation27 + $0x60] ss:$16 sps:$4 sm:$0xff]  }
 0x3b0   :  { %5043 = vmatprep.subr.bf16.mxu1 %v5519_v55  ;;  %v5568_v55 = vld [vmem:[#allocation27 + $0x68] ss:$16 sps:$4 sm:$0xff]  }
 0x3b3   :  { %5044 = vmatpush3.bf16.msra.mxu1 %v5520_v56  ;;  %v5573_v56 = vld [vmem:[#allocation27 + $0x44] ss:$16 sps:$4 sm:$0xff]  }
 0x3b4   :  { %5045 = vmatprep.subr.bf16.mxu1 %v5521_v57  ;;  %v5576_v57 = vld [vmem:[#allocation27 + $0x4c] ss:$16 sps:$4 sm:$0xff]  }
 0x3b7   :  { %5046 = vmatpush3.bf16.msra.mxu1 %v5522_v58  ;;  %v5571_v58 = vld [vmem:[#allocation27 + $0x40] ss:$16 sps:$4 sm:$0xff]  }
 0x3b8   :  { %5047 = vmatprep.subr.bf16.mxu1 %v5523_v59  ;;  %v5574_v59 = vld [vmem:[#allocation27 + $0x48] ss:$16 sps:$4 sm:$0xff]  }
 0x3bb   :  { %5048 = vmatpush3.bf16.msra.mxu1 %v5524_v60  ;;  %v5579_v60 = vld [vmem:[#allocation27 + $0x24] ss:$16 sps:$4 sm:$0xff]  }
 0x3bc   :  { %2741 = vmatprep.subr.bf16.mxu1 %v5543_v35 }
 0x3be   :  { %2397 = vmatmul.mubr.bf16.vlgmr.msra.gmra.mxu1 %v6782_v54 }
 0x3bf   :  { %2773 = vmatprep.mubr.bf16.mxu1 %v6485_v46  ;;  %2742 = vmatpush1.bf16.msra.mxu1 %v5541_v34  ;;  %v5592_v34 = vld [vmem:[#allocation30 + $0xe8] ss:$16 sps:$4 sm:$0xff]  }
 0x3c0   :  { %2743 = vmatprep.subr.bf16.mxu1 %v5549_v38  ;;  %v5595_v38 = vld [vmem:[#allocation30 + $0xc0] ss:$16 sps:$4 sm:$0xff]  }
 0x3c3   :  { %2744 = vmatpush1.bf16.msra.mxu1 %v5547_v40  ;;  %v5603_v40 = vld [vmem:[#allocation30 + $0xa4] ss:$16 sps:$4 sm:$0xff]  }
 0x3c4   :  { %2745 = vmatprep.subr.bf16.mxu1 %v5555_v42  ;;  %v5601_v42 = vld [vmem:[#allocation30 + $0xa0] ss:$16 sps:$4 sm:$0xff]  }
 0x3c7   :  { %2746 = vmatpush1.bf16.msra.mxu1 %v5553_v44  ;;  %v5609_v44 = vld [vmem:[#allocation30 + $0x84] ss:$16 sps:$4 sm:$0xff]  }
 0x3c8   :  { %2747 = vmatprep.subr.bf16.mxu1 %v5561_v48  ;;  %v5607_v48 = vld [vmem:[#allocation30 + $0x80] ss:$16 sps:$4 sm:$0xff]  }
 0x3cb   :  { %2748 = vmatpush1.bf16.msra.mxu1 %v5559_v49  ;;  %v5615_v49 = vld [vmem:[#allocation30 + $0x64] ss:$16 sps:$4 sm:$0xff]  }
 0x3cc   :  { %2749 = vmatprep.subr.bf16.mxu1 %v5567_v51  ;;  %v5613_v51 = vld [vmem:[#allocation30 + $0x60] ss:$16 sps:$4 sm:$0xff]  }
 0x3cf   :  { %2750 = vmatpush1.bf16.msra.mxu1 %v5565_v53  ;;  %v5621_v53 = vld [vmem:[#allocation30 + $0x44] ss:$16 sps:$4 sm:$0xff]  }
 0x3d0   :  { %2751 = vmatprep.subr.bf16.mxu1 %v5573_v56  ;;  %v5619_v56 = vld [vmem:[#allocation30 + $0x40] ss:$16 sps:$4 sm:$0xff]  }
 0x3d3   :  { %2752 = vmatpush1.bf16.msra.mxu1 %v5571_v58  ;;  %v5627_v58 = vld [vmem:[#allocation30 + $0x24] ss:$16 sps:$4 sm:$0xff]  }
 0x3d4   :  { %2753 = vmatprep.subr.bf16.mxu1 %v5579_v60  ;;  %v5625_v60 = vld [vmem:[#allocation30 + $0x20] ss:$16 sps:$4 sm:$0xff]  }
 0x3d7   :  { %2754 = vmatpush1.bf16.msra.mxu1 %v5577_v62  ;;  %v5633_v62 = vld [vmem:[#allocation30 + $0x4] ss:$16 sps:$4 sm:$0xff]  }
 0x43d   :  { %v4987_v0 = vpop.f32.mrf.mxu1 }
 0x43f   :  { %v4988_v1 = vpop.f32.mrf.mxu1 }
 0x440   :  { %v4989_v2 = vadd.f32 %v4988_v1, %v4987_v0  ;;  %v5585_v0 = vld [vmem:[#allocation27 + $0x4] ss:$16 sps:$4 sm:$0xff]   ;;  %v5588_v1 = vld [vmem:[#allocation27 + $0xc] ss:$16 sps:$4 sm:$0xff]  }
 0x441   :  { %v4990_v4 = vpop.f32.mrf.mxu1  ;;  %2755 = vmatprep.subr.bf16.mxu1 %v5585_v0  ;;  %v5631_v0 = vld [vmem:[#allocation30] ss:$16 sps:$4 sm:$0xff]  }
 0x442   :  { %v1815_v9 = vadd.f32 %v4989_v2, %v4671_v3  ;;  %v5583_v2 = vld [vmem:[#allocation27] ss:$16 sps:$4 sm:$0xff]  }
 0x443   :  { %v4991_v54 = vpop.f32.mrf.mxu1  ;;  %2756 = vmatpush1.bf16.msra.mxu1 %v5583_v2  ;;  %v5639_v2 = vld [vmem:[#allocation30 + $0x1e4] ss:$16 sps:$4 sm:$0xff]  }
 0x444   :  { %v4992_v10 = vadd.f32 %v4991_v54, %v4990_v4  ;;  %v1821_v12 = vmax.f32 %v1815_v9, 0.0  ;;  %v5591_v4 = vld [vmem:[#allocation30 + $0xe4] ss:$16 sps:$4 sm:$0xff]   ;;  %v5594_v54 = vld [vmem:[#allocation30 + $0xec] ss:$16 sps:$4 sm:$0xff]  }
 0x445   :  { %3243 = vmatprep.subr.bf16.mxu1 %v5591_v4  ;;  %v5637_v4 = vld [vmem:[#allocation30 + $0x1e0] ss:$16 sps:$4 sm:$0xff]  }
 0x446   :  { %v1818_v11 = vadd.f32 %v4992_v10, %v4671_v3  ;;  %v5586_v3 = vld [vmem:[#allocation27 + $0x8] ss:$16 sps:$4 sm:$0xff]  }
 0x448   :  { %v1822_v13 = vmax.f32 %v1818_v11, 0.0 }
 0x44a   :  { %v2162_v15 = vpack.c.bf16 %v1822_v13, %v1821_v12 }
 0x44c   :  { %5132 = vmatmul.mubr.bf16.vlgmr.msra.gmra.mxu0 %v2162_v15 }
 0x44d   :  { %5136 = vmatpush3.bf16.msra.mxu0 %v5533_v14  ;;  %5151 = vmatprep.mubr.msk.bf16.mxu0 %vm6487_vm0, %v6486_v33 }
 0x44e   :  { %5137 = vmatprep.subr.bf16.mxu0 %v6486_v33 }
 0x451   :  { %5138 = vmatpush3.bf16.msra.mxu0 %v5534_v16 }
 0x452   :  { %5139 = vmatprep.subr.bf16.mxu0 %v6486_v33 }
 0x455   :  { %5140 = vmatpush3.bf16.msra.mxu0 %v5535_v17 }
 0x456   :  { %5141 = vmatprep.subr.bf16.mxu0 %v6486_v33 }
 0x459   :  { %5142 = vmatpush3.bf16.msra.mxu0 %v5536_v18 }
 0x45a   :  { %5143 = vmatprep.subr.bf16.mxu0 %v6486_v33 }
 0x45d   :  { %5144 = vmatpush3.bf16.msra.mxu0 %v5537_v19 }
 0x45e   :  { %v2119_v21 = vpop.f32.mrf.mxu1  ;;  %5145 = vmatprep.subr.bf16.mxu0 %v6486_v33 }
 0x45f   :  { %v2120_v27 = vadd.f32 %v4707_v23, %v2119_v21 }
 0x460   :  { %v5113_v22 = vpop.f32.mrf.mxu1 }
 0x461   :  { %5146 = vmatpush3.bf16.msra.mxu0 %v5538_v20  ;;  %v2126_v31 = vmax.f32 %v2120_v27, 0.0  ;;  %v4748_v20 = vld [vmem:[#allocation25] ss:$0 sm:$0xff] }
 0x462   :  { %v2122_v25 = vpop.f32.mrf.mxu1  ;;  %5147 = vmatprep.subr.bf16.mxu0 %v6486_v33 }
 0x463   :  { %v2123_v26 = vadd.f32 %v4707_v23, %v2122_v25 }
 0x464   :  { %v5114_v28 = vpop.f32.mrf.mxu1 }
 0x465   :  { %5148 = vmatpush3.bf16.msra.mxu0 %v5539_v24  ;;  %v2127_v30 = vmax.f32 %v2123_v26, 0.0 }
 0x466   :  { %5149 = vmatprep.subr.bf16.mxu0 %v6486_v33 }
 0x467   :  { %v2405_v32 = vpack.c.bf16 %v2127_v30, %v2126_v31 }
 0x469   :  { %5150 = vmatpush3.bf16.msra.mxu0 %v5540_v29 }
 0x46a   :  { %2784 = vmatprep.subr.bf16.mxu0 %v5546_v37  ;;  %v5600_v37 = vld [vmem:[#allocation30 + $0xcc] ss:$16 sps:$4 sm:$0xff]  }
 0x46c   :  { %5152 = vmatmul.mubr.bf16.vlgmr.msra.gmra.mxu0 %v2405_v32  ;;  %v5589_v32 = vld [vmem:[#allocation30 + $0xe0] ss:$16 sps:$4 sm:$0xff]  }
 0x46d   :  { %2816 = vmatprep.mubr.bf16.mxu0 %v6485_v46  ;;  %2785 = vmatpush1.bf16.msra.mxu0 %v5544_v36  ;;  %v5597_v36 = vld [vmem:[#allocation30 + $0xc4] ss:$16 sps:$4 sm:$0xff]  }
 0x46e   :  { %2786 = vmatprep.subr.bf16.mxu0 %v5552_v39  ;;  %v5598_v39 = vld [vmem:[#allocation30 + $0xc8] ss:$16 sps:$4 sm:$0xff]  }
 0x471   :  { %2787 = vmatpush1.bf16.msra.mxu0 %v5550_v41  ;;  %v5606_v41 = vld [vmem:[#allocation30 + $0xac] ss:$16 sps:$4 sm:$0xff]  }
 0x472   :  { %2788 = vmatprep.subr.bf16.mxu0 %v5558_v43  ;;  %v5604_v43 = vld [vmem:[#allocation30 + $0xa8] ss:$16 sps:$4 sm:$0xff]  }
 0x475   :  { %2789 = vmatpush1.bf16.msra.mxu0 %v5556_v45  ;;  %v5612_v45 = vld [vmem:[#allocation30 + $0x8c] ss:$16 sps:$4 sm:$0xff]  }
 0x476   :  { %2790 = vmatprep.subr.bf16.mxu0 %v5564_v47  ;;  %v5610_v47 = vld [vmem:[#allocation30 + $0x88] ss:$16 sps:$4 sm:$0xff]  }
 0x479   :  { %2791 = vmatpush1.bf16.msra.mxu0 %v5562_v50  ;;  %v5618_v50 = vld [vmem:[#allocation30 + $0x6c] ss:$16 sps:$4 sm:$0xff]  }
 0x47a   :  { %2792 = vmatprep.subr.bf16.mxu0 %v5570_v52  ;;  %v5616_v52 = vld [vmem:[#allocation30 + $0x68] ss:$16 sps:$4 sm:$0xff]  }
 0x47d   :  { %2793 = vmatpush1.bf16.msra.mxu0 %v5568_v55  ;;  %v5624_v55 = vld [vmem:[#allocation30 + $0x4c] ss:$16 sps:$4 sm:$0xff]  }
 0x47e   :  { %2794 = vmatprep.subr.bf16.mxu0 %v5576_v57  ;;  %v5049_v13 = vpop.f32.mrf.mxu1  ;;  %v5622_v57 = vld [vmem:[#allocation30 + $0x48] ss:$16 sps:$4 sm:$0xff]  }
 0x480   :  { %v5050_v14 = vpop.f32.mrf.mxu1 }
 0x481   :  { %2795 = vmatpush1.bf16.msra.mxu0 %v5574_v59  ;;  %v5051_v16 = vadd.f32 %v5050_v14, %v5049_v13  ;;  %v5630_v59 = vld [vmem:[#allocation30 + $0x2c] ss:$16 sps:$4 sm:$0xff]   ;;  %v5651_v13 = vld [vmem:[#allocation30 + $0x1a4] ss:$16 sps:$4 sm:$0xff]  }
 0x482   :  { %2796 = vmatprep.subr.bf16.mxu0 %v5582_v61  ;;  %v5052_v15 = vpop.f32.mrf.mxu1  ;;  %v5628_v61 = vld [vmem:[#allocation30 + $0x28] ss:$16 sps:$4 sm:$0xff]   ;;  %v5654_v14 = vld [vmem:[#allocation30 + $0x1ac] ss:$16 sps:$4 sm:$0xff]  }
 0x484   :  { %v5053_v17 = vpop.f32.mrf.mxu1 }
 0x485   :  { %2797 = vmatpush1.bf16.msra.mxu0 %v5580_v63  ;;  %v5054_v21 = vadd.f32 %v5053_v17, %v5052_v15  ;;  %v5636_v63 = vld [vmem:[#allocation30 + $0xc] ss:$16 sps:$4 sm:$0xff]   ;;  %v5649_v15 = vld [vmem:[#allocation30 + $0x1a0] ss:$16 sps:$4 sm:$0xff]   ;;  %v5657_v17 = vld [vmem:[#allocation30 + $0x184] ss:$16 sps:$4 sm:$0xff]  }
 0x486   :  { %2798 = vmatprep.subr.bf16.mxu0 %v5588_v1  ;;  %v5634_v1 = vld [vmem:[#allocation30 + $0x8] ss:$16 sps:$4 sm:$0xff]  }
 0x489   :  { %2799 = vmatpush1.bf16.msra.mxu0 %v5586_v3  ;;  %v5642_v3 = vld [vmem:[#allocation30 + $0x1ec] ss:$16 sps:$4 sm:$0xff]  }
 0x48a   :  { %3286 = vmatprep.subr.bf16.mxu0 %v5594_v54  ;;  %v5640_v54 = vld [vmem:[#allocation30 + $0x1e8] ss:$16 sps:$4 sm:$0xff]  }
 0x50c   :  { %v2261_v9 = vpop.f32.mrf.mxu0 }
 0x50d   :  { %v2399_v18 = vadd.f32 %v5051_v16, %v2261_v9  ;;  %v5645_v9 = vld [vmem:[#allocation30 + $0x1c4] ss:$16 sps:$4 sm:$0xff]   ;;  %v5652_v16 = vld [vmem:[#allocation30 + $0x1a8] ss:$16 sps:$4 sm:$0xff]  }
 0x50e   :  { %v5133_v10 = vpop.f32.mrf.mxu0 }
 0x50f   :  { %v5648_v10 = vld [vmem:[#allocation30 + $0x1cc] ss:$16 sps:$4 sm:$0xff]  }
 0x510   :  { %v2264_v11 = vpop.f32.mrf.mxu0 }
 0x511   :  { %v2402_v24 = vadd.f32 %v5054_v21, %v2264_v11  ;;  %v5643_v11 = vld [vmem:[#allocation30 + $0x1c0] ss:$16 sps:$4 sm:$0xff]   ;;  %v5663_v21 = vld [vmem:[#allocation30 + $0x164] ss:$16 sps:$4 sm:$0xff]  }
 0x512   :  { %v5134_v12 = vpop.f32.mrf.mxu0 }
 0x513   :  { %v5646_v12 = vld [vmem:[#allocation30 + $0x1c8] ss:$16 sps:$4 sm:$0xff]  }
 0x52c   :  { %v2504_v19 = vpop.f32.mrf.mxu0 }
 0x52d   :  { %v2511_v22 = vadd.f32 %v2504_v19, %v2399_v18  ;;  %v5660_v18 = vld [vmem:[#allocation30 + $0x18c] ss:$16 sps:$4 sm:$0xff]   ;;  %v5655_v19 = vld [vmem:[#allocation30 + $0x180] ss:$16 sps:$4 sm:$0xff]  }
 0x52e   :  { %v5153_v23 = vpop.f32.mrf.mxu0 }
 0x52f   :  { %v2520_v25 = vadd.f32 %v4748_v20, %v2511_v22  ;;  %v5666_v22 = vld [vmem:[#allocation30 + $0x16c] ss:$16 sps:$4 sm:$0xff]   ;;  %v5661_v23 = vld [vmem:[#allocation30 + $0x160] ss:$16 sps:$4 sm:$0xff]  }
 0x530   :  { %v2507_v26 = vpop.f32.mrf.mxu0 }
 0x531   :  { %v2522_v27 = vmax.f32 %v2520_v25, 0.0  ;;  %v2512_v28 = vadd.f32 %v2507_v26, %v2402_v24  ;;  %v5664_v24 = vld [vmem:[#allocation30 + $0x168] ss:$16 sps:$4 sm:$0xff]   ;;  %v5669_v25 = vld [vmem:[#allocation30 + $0x144] ss:$16 sps:$4 sm:$0xff]  }
 0x532   :  { %v5154_v29 = vpop.f32.mrf.mxu0  ;;  %v5672_v26 = vld [vmem:[#allocation30 + $0x14c] ss:$16 sps:$4 sm:$0xff]  }
 0x533   :  { %2524 = vst [vmem:[%s6661_s4] sm:$0xff] %v2522_v27  ;;  %v2521_v30 = vadd.f32 %v4748_v20, %v2512_v28  ;;  %v5658_v20 = vld [vmem:[#allocation30 + $0x188] ss:$16 sps:$4 sm:$0xff]   ;;  %v5675_v29 = vld [vmem:[#allocation30 + $0x124] ss:$16 sps:$4 sm:$0xff]  }
 0x534   :  { %v5670_v28 = vld [vmem:[#allocation30 + $0x148] ss:$16 sps:$4 sm:$0xff]  }
 0x535   :  { %v2523_v31 = vmax.f32 %v2521_v30, 0.0  ;;  %v5678_v30 = vld [vmem:[#allocation30 + $0x12c] ss:$16 sps:$4 sm:$0xff]  }
 0x537   :  { %2525 = vst [vmem:[%s6661_s4 + $0x8] sm:$0xff] %v2523_v31  ;;  %v2526_v35 = vpack.c.bf16 %v2523_v31, %v2522_v27  ;;  %v5667_v27 = vld [vmem:[#allocation30 + $0x140] ss:$16 sps:$4 sm:$0xff]   ;;  %s6909_s4 = sld [smem:[#allocation69_spill]] }
 0x538   :  { %v5673_v31 = vld [vmem:[#allocation30 + $0x120] ss:$16 sps:$4 sm:$0xff]  }
 0x539   :  { %2774 = vmatmul.mubr.bf16.vlgmr.msra.gmra.mxu1 %v2526_v35  ;;  %2817 = vmatmul.mubr.bf16.vlgmr.msra.gmra.mxu0 %v2526_v35  ;;  %v5684_v35 = vld [vmem:[#allocation30 + $0x10c] ss:$16 sps:$4 sm:$0xff]  }
 0x53a   :  { %3244 = vmatpush1.bf16.msra.mxu1 %v5589_v32  ;;  %3287 = vmatpush1.bf16.msra.mxu0 %v5592_v34  ;;  %v5676_v32 = vld [vmem:[#allocation30 + $0x128] ss:$16 sps:$4 sm:$0xff]   ;;  %v5681_v34 = vld [vmem:[#allocation30 + $0x104] ss:$16 sps:$4 sm:$0xff]  }
 0x53b   :  { %3245 = vmatprep.subr.bf16.mxu1 %v5597_v36  ;;  %3288 = vmatprep.subr.bf16.mxu0 %v5600_v37  ;;  %v5679_v36 = vld [vmem:[#allocation30 + $0x100] ss:$16 sps:$4 sm:$0xff]   ;;  %v5682_v37 = vld [vmem:[#allocation30 + $0x108] ss:$16 sps:$4 sm:$0xff]  }
 0x53e   :  { %3246 = vmatpush1.bf16.msra.mxu1 %v5595_v38  ;;  %3289 = vmatpush1.bf16.msra.mxu0 %v5598_v39  ;;  %v5687_v38 = vld [vmem:[#allocation33 + $0x74] ss:$8 sps:$4 sm:$0xff]  }
 0x53f   :  { %3247 = vmatprep.subr.bf16.mxu1 %v5603_v40  ;;  %3290 = vmatprep.subr.bf16.mxu0 %v5606_v41  ;;  %v5690_v39 = vld [vmem:[#allocation33 + $0x174] ss:$8 sps:$4 sm:$0xff]   ;;  %v6814_v40 = vld [vmem:[#allocation28] sm:$0xf] }
 0x542   :  { %3248 = vmatpush1.bf16.msra.mxu1 %v5601_v42  ;;  %3291 = vmatpush1.bf16.msra.mxu0 %v5604_v43  ;;  %v2568_v42 = vrot.slane %v6814_v40, %v6754_v5  ;;  %v2564_v43 = vrot.slane %v6814_v40, %v6760_v8 }
 0x543   :  { %3249 = vmatprep.subr.bf16.mxu1 %v5609_v44  ;;  %3292 = vmatprep.subr.bf16.mxu0 %v5612_v45 }
 0x546   :  { %3250 = vmatpush1.bf16.msra.mxu1 %v5607_v48  ;;  %3293 = vmatpush1.bf16.msra.mxu0 %v5610_v47 }
 0x547   :  { %3251 = vmatprep.subr.bf16.mxu1 %v5615_v49  ;;  %3294 = vmatprep.subr.bf16.mxu0 %v5618_v50 }
 0x54a   :  { %3252 = vmatpush1.bf16.msra.mxu1 %v5613_v51  ;;  %3295 = vmatpush1.bf16.msra.mxu0 %v5616_v52 }
 0x54b   :  { %3253 = vmatprep.subr.bf16.mxu1 %v5621_v53  ;;  %3296 = vmatprep.subr.bf16.mxu0 %v5624_v55 }
 0x54e   :  { %3254 = vmatpush1.bf16.msra.mxu1 %v5619_v56  ;;  %3297 = vmatpush1.bf16.msra.mxu0 %v5622_v57 }
 0x54f   :  { %3255 = vmatprep.subr.bf16.mxu1 %v5627_v58  ;;  %3298 = vmatprep.subr.bf16.mxu0 %v5630_v59  ;;  %v5685_v58 = vld [vmem:[#allocation33 + $0x70] ss:$8 sps:$4 sm:$0xff]  }
 0x550   :  { %v5688_v59 = vld [vmem:[#allocation33 + $0x170] ss:$8 sps:$4 sm:$0xff]  }
 0x552   :  { %3256 = vmatpush1.bf16.msra.mxu1 %v5625_v60  ;;  %3299 = vmatpush1.bf16.msra.mxu0 %v5628_v61  ;;  %v5693_v61 = vld [vmem:[#allocation33 + $0x64] ss:$8 sps:$4 sm:$0xff]  }
 0x553   :  { %3257 = vmatprep.subr.bf16.mxu1 %v5633_v62  ;;  %3300 = vmatprep.subr.bf16.mxu0 %v5636_v63  ;;  %v5696_v62 = vld [vmem:[#allocation33 + $0x164] ss:$8 sps:$4 sm:$0xff]   ;;  %v5691_v63 = vld [vmem:[#allocation33 + $0x60] ss:$8 sps:$4 sm:$0xff]  }
 0x556   :  { %3258 = vmatpush1.bf16.msra.mxu1 %v5631_v0  ;;  %3301 = vmatpush1.bf16.msra.mxu0 %v5634_v1  ;;  %v5694_v0 = vld [vmem:[#allocation33 + $0x160] ss:$8 sps:$4 sm:$0xff]   ;;  %v5699_v1 = vld [vmem:[#allocation33 + $0x54] ss:$8 sps:$4 sm:$0xff]  }
 0x557   :  { %3259 = vmatprep.subr.bf16.mxu1 %v5639_v2  ;;  %3302 = vmatprep.subr.bf16.mxu0 %v5642_v3  ;;  %v5702_v2 = vld [vmem:[#allocation33 + $0x154] ss:$8 sps:$4 sm:$0xff]   ;;  %v5697_v3 = vld [vmem:[#allocation33 + $0x50] ss:$8 sps:$4 sm:$0xff]  }
 0x55a   :  { %3260 = vmatpush2.bf16.msra.mxu1 %v5637_v4  ;;  %3303 = vmatpush2.bf16.msra.mxu0 %v5640_v54  ;;  %v5700_v4 = vld [vmem:[#allocation33 + $0x150] ss:$8 sps:$4 sm:$0xff]   ;;  %v5705_v54 = vld [vmem:[#allocation33 + $0x44] ss:$8 sps:$4 sm:$0xff]  }
 0x55b   :  { %3261 = vmatprep.subr.bf16.mxu1 %v5645_v9  ;;  %3304 = vmatprep.subr.bf16.mxu0 %v5648_v10  ;;  %v5708_v9 = vld [vmem:[#allocation33 + $0x144] ss:$8 sps:$4 sm:$0xff]   ;;  %v5703_v10 = vld [vmem:[#allocation33 + $0x40] ss:$8 sps:$4 sm:$0xff]  }
 0x55e   :  { %3262 = vmatpush2.bf16.msra.mxu1 %v5643_v11  ;;  %3305 = vmatpush2.bf16.msra.mxu0 %v5646_v12  ;;  %v5706_v11 = vld [vmem:[#allocation33 + $0x140] ss:$8 sps:$4 sm:$0xff]   ;;  %v5711_v12 = vld [vmem:[#allocation33 + $0x34] ss:$8 sps:$4 sm:$0xff]  }
 0x55f   :  { %3263 = vmatprep.subr.bf16.mxu1 %v5651_v13  ;;  %3306 = vmatprep.subr.bf16.mxu0 %v5654_v14  ;;  %v5714_v13 = vld [vmem:[#allocation33 + $0x134] ss:$8 sps:$4 sm:$0xff]   ;;  %v5709_v14 = vld [vmem:[#allocation33 + $0x30] ss:$8 sps:$4 sm:$0xff]  }
 0x562   :  { %3264 = vmatpush2.bf16.msra.mxu1 %v5649_v15  ;;  %3307 = vmatpush2.bf16.msra.mxu0 %v5652_v16  ;;  %v5712_v15 = vld [vmem:[#allocation33 + $0x130] ss:$8 sps:$4 sm:$0xff]   ;;  %v5717_v16 = vld [vmem:[#allocation33 + $0x24] ss:$8 sps:$4 sm:$0xff]  }
 0x563   :  { %3265 = vmatprep.subr.bf16.mxu1 %v5657_v17  ;;  %3308 = vmatprep.subr.bf16.mxu0 %v5660_v18  ;;  %v5720_v17 = vld [vmem:[#allocation33 + $0x124] ss:$8 sps:$4 sm:$0xff]   ;;  %v5715_v18 = vld [vmem:[#allocation33 + $0x20] ss:$8 sps:$4 sm:$0xff]  }
 0x566   :  { %3266 = vmatpush2.bf16.msra.mxu1 %v5655_v19  ;;  %3309 = vmatpush2.bf16.msra.mxu0 %v5658_v20  ;;  %v5718_v19 = vld [vmem:[#allocation33 + $0x120] ss:$8 sps:$4 sm:$0xff]   ;;  %v5723_v20 = vld [vmem:[#allocation33 + $0x14] ss:$8 sps:$4 sm:$0xff]  }
 0x567   :  { %3267 = vmatprep.subr.bf16.mxu1 %v5663_v21  ;;  %3310 = vmatprep.subr.bf16.mxu0 %v5666_v22  ;;  %v5726_v21 = vld [vmem:[#allocation33 + $0x114] ss:$8 sps:$4 sm:$0xff]   ;;  %v5721_v22 = vld [vmem:[#allocation33 + $0x10] ss:$8 sps:$4 sm:$0xff]  }
 0x56a   :  { %3268 = vmatpush2.bf16.msra.mxu1 %v5661_v23  ;;  %3311 = vmatpush2.bf16.msra.mxu0 %v5664_v24  ;;  %v5724_v23 = vld [vmem:[#allocation33 + $0x110] ss:$8 sps:$4 sm:$0xff]   ;;  %v5729_v24 = vld [vmem:[#allocation33 + $0x4] ss:$8 sps:$4 sm:$0xff]  }
 0x56b   :  { %3269 = vmatprep.subr.bf16.mxu1 %v5669_v25  ;;  %3312 = vmatprep.subr.bf16.mxu0 %v5672_v26  ;;  %v5732_v25 = vld [vmem:[#allocation33 + $0x104] ss:$8 sps:$4 sm:$0xff]   ;;  %v5727_v26 = vld [vmem:[#allocation33] ss:$8 sps:$4 sm:$0xff]  }
 0x56e   :  { %3270 = vmatpush2.bf16.msra.mxu1 %v5667_v27  ;;  %3313 = vmatpush2.bf16.msra.mxu0 %v5670_v28  ;;  %v5730_v27 = vld [vmem:[#allocation33 + $0x100] ss:$8 sps:$4 sm:$0xff]   ;;  %v5735_v28 = vld [vmem:[#allocation33 + $0xf4] ss:$8 sps:$4 sm:$0xff]  }
 0x56f   :  { %3271 = vmatprep.subr.bf16.mxu1 %v5675_v29  ;;  %3314 = vmatprep.subr.bf16.mxu0 %v5678_v30  ;;  %v5738_v29 = vld [vmem:[#allocation33 + $0x1f4] ss:$8 sps:$4 sm:$0xff]   ;;  %v5733_v30 = vld [vmem:[#allocation33 + $0xf0] ss:$8 sps:$4 sm:$0xff]  }
 0x572   :  { %3272 = vmatpush2.bf16.msra.mxu1 %v5673_v31  ;;  %3315 = vmatpush2.bf16.msra.mxu0 %v5676_v32  ;;  %v5736_v31 = vld [vmem:[#allocation33 + $0x1f0] ss:$8 sps:$4 sm:$0xff]   ;;  %v5741_v32 = vld [vmem:[#allocation33 + $0xe4] ss:$8 sps:$4 sm:$0xff]  }
 0x573   :  { %3273 = vmatprep.subr.bf16.mxu1 %v5681_v34  ;;  %3316 = vmatprep.subr.bf16.mxu0 %v5684_v35  ;;  %v5744_v34 = vld [vmem:[#allocation33 + $0x1e4] ss:$8 sps:$4 sm:$0xff]   ;;  %v5739_v35 = vld [vmem:[#allocation33 + $0xe0] ss:$8 sps:$4 sm:$0xff]  }
 0x576   :  { %3274 = vmatpush2.bf16.msra.mxu1 %v5679_v36  ;;  %3317 = vmatpush2.bf16.msra.mxu0 %v5682_v37  ;;  %v5742_v36 = vld [vmem:[#allocation33 + $0x1e0] ss:$8 sps:$4 sm:$0xff]   ;;  %v5747_v37 = vld [vmem:[#allocation33 + $0xd4] ss:$8 sps:$4 sm:$0xff]  }
 0x577   :  { %3737 = vmatprep.subr.bf16.mxu1 %v5687_v38  ;;  %3780 = vmatprep.subr.bf16.mxu0 %v5690_v39  ;;  %v5750_v38 = vld [vmem:[#allocation33 + $0x1d4] ss:$8 sps:$4 sm:$0xff]   ;;  %v5745_v39 = vld [vmem:[#allocation33 + $0xd0] ss:$8 sps:$4 sm:$0xff]  }
 0x5f9   :  { %v2775_v41 = vpop.f32.mrf.mxu1 }
 0x5fa   :  { %v2776_v49 = vadd.f32 %v2775_v41, %v2564_v43  ;;  %v5748_v41 = vld [vmem:[#allocation33 + $0x1d0] ss:$8 sps:$4 sm:$0xff]  }
 0x5fb   :  { %v2777_v44 = vpop.f32.mrf.mxu1 }
 0x5fc   :  { %v2778_v48 = vadd.f32 %v2777_v44, %v2568_v42  ;;  %v2827_v56 = vmax.f32 %v2776_v49, 0.0  ;;  %v5751_v44 = vld [vmem:[#allocation33 + $0xc0] ss:$8 sps:$4 sm:$0xff]   ;;  %v5757_v49 = vld [vmem:[#allocation33 + $0xb0] ss:$8 sps:$4 sm:$0xff]  }
 0x5fd   :  { %v2779_v45 = vpop.f32.mrf.mxu1 }
 0x5fe   :  { %v2780_v47 = vadd.f32 %v2779_v45, %v2564_v43  ;;  %v2828_v53 = vmax.f32 %v2778_v48, 0.0  ;;  %v5756_v43 = vld [vmem:[#allocation33 + $0x1c4] ss:$8 sps:$4 sm:$0xff]   ;;  %v5754_v45 = vld [vmem:[#allocation33 + $0x1c0] ss:$8 sps:$4 sm:$0xff]  }
 0x5ff   :  { %v2781_v50 = vpop.f32.mrf.mxu1  ;;  %v5759_v48 = vld [vmem:[#allocation33 + $0xb4] ss:$8 sps:$4 sm:$0xff]  }
 0x600   :  { %v2782_v51 = vadd.f32 %v2781_v50, %v2568_v42  ;;  %v2831_v52 = vmax.f32 %v2780_v47, 0.0  ;;  %v5753_v42 = vld [vmem:[#allocation33 + $0xc4] ss:$8 sps:$4 sm:$0xff]   ;;  %v5762_v47 = vld [vmem:[#allocation33 + $0x1b4] ss:$8 sps:$4 sm:$0xff]  }
 0x601   :  { %v5760_v50 = vld [vmem:[#allocation33 + $0x1b0] ss:$8 sps:$4 sm:$0xff]  }
 0x602   :  { %v2832_v55 = vmax.f32 %v2782_v51, 0.0  ;;  %v2835_v60 = vpack.c.bf16 %v2831_v52, %v2827_v56  ;;  %v5765_v51 = vld [vmem:[#allocation33 + $0xa4] ss:$8 sps:$4 sm:$0xff]   ;;  %v5763_v52 = vld [vmem:[#allocation33 + $0xa0] ss:$8 sps:$4 sm:$0xff]  }
 0x603   :  { %v5771_v56 = vld [vmem:[#allocation33 + $0x94] ss:$8 sps:$4 sm:$0xff]  }
 0x604   :  { %v2836_v57 = vpack.c.bf16 %v2832_v55, %v2828_v53  ;;  %v5768_v53 = vld [vmem:[#allocation33 + $0x1a4] ss:$8 sps:$4 sm:$0xff]   ;;  %v5766_v55 = vld [vmem:[#allocation33 + $0x1a0] ss:$8 sps:$4 sm:$0xff]  }
 0x606   :  { %3275 = vmatprep.mubr.bf16.mxu1 %v2836_v57  ;;  %3318 = vmatprep.mubr.bf16.mxu0 %v2836_v57  ;;  %v5769_v57 = vld [vmem:[#allocation33 + $0x90] ss:$8 sps:$4 sm:$0xff]  }
 0x607   :  { %3276 = vmatmul.mubr.bf16.vlgmr.msra.gmra.mxu1 %v2835_v60  ;;  %3319 = vmatmul.mubr.bf16.vlgmr.msra.gmra.mxu0 %v2835_v60  ;;  %v5777_v60 = vld [vmem:[#allocation33 + $0x84] ss:$8 sps:$4 sm:$0xff]  }
 0x608   :  { %3738 = vmatpush1.bf16.msra.mxu1 %v5685_v58  ;;  %3781 = vmatpush1.bf16.msra.mxu0 %v5688_v59  ;;  %v5774_v58 = vld [vmem:[#allocation33 + $0x194] ss:$8 sps:$4 sm:$0xff]   ;;  %v5772_v59 = vld [vmem:[#allocation33 + $0x190] ss:$8 sps:$4 sm:$0xff]  }
 0x609   :  { %3739 = vmatprep.subr.bf16.mxu1 %v5693_v61  ;;  %3782 = vmatprep.subr.bf16.mxu0 %v5696_v62  ;;  %v5775_v61 = vld [vmem:[#allocation33 + $0x80] ss:$8 sps:$4 sm:$0xff]   ;;  %v5780_v62 = vld [vmem:[#allocation33 + $0x184] ss:$8 sps:$4 sm:$0xff]  }
 0x60c   :  { %3740 = vmatpush1.bf16.msra.mxu1 %v5691_v63  ;;  %3783 = vmatpush1.bf16.msra.mxu0 %v5694_v0  ;;  %v5778_v63 = vld [vmem:[#allocation33 + $0x180] ss:$8 sps:$4 sm:$0xff]  }
 0x60d   :  { %3741 = vmatprep.subr.bf16.mxu1 %v5699_v1  ;;  %3784 = vmatprep.subr.bf16.mxu0 %v5702_v2  ;;  %v5783_v0 = vld [vmem:[#allocation36 + $0x74] ss:$8 sps:$4 sm:$0xff]   ;;  %v6820_v1 = vpop.f32.mrf.mxu0 }
 0x60f   :  { %v6822_v2 = vpop.f32.mrf.mxu0 }
 0x610   :  { %3742 = vmatpush1.bf16.msra.mxu1 %v5697_v3  ;;  %3785 = vmatpush1.bf16.msra.mxu0 %v5700_v4 }
 0x611   :  { %3743 = vmatprep.subr.bf16.mxu1 %v5705_v54  ;;  %3786 = vmatprep.subr.bf16.mxu0 %v5708_v9  ;;  %v6824_v3 = vpop.f32.mrf.mxu0  ;;  %v2901_v54 = vld [vmem:[#allocation31] sm:$0xf] }
 0x613   :  { %v6826_v4 = vpop.f32.mrf.mxu0 }
 0x614   :  { %3744 = vmatpush1.bf16.msra.mxu1 %v5703_v10  ;;  %3787 = vmatpush1.bf16.msra.mxu0 %v5706_v11  ;;  %v2910_v11 = vrot.slane %v2901_v54, %v6754_v5 }
 0x615   :  { %3745 = vmatprep.subr.bf16.mxu1 %v5711_v12  ;;  %3788 = vmatprep.subr.bf16.mxu0 %v5714_v13  ;;  %v2918_v12 = vrot.slane %v2901_v54, %v6758_v7  ;;  %v2906_v13 = vrot.slane %v2901_v54, %v6760_v8 }
 0x618   :  { %3746 = vmatpush1.bf16.msra.mxu1 %v5709_v14  ;;  %3789 = vmatpush1.bf16.msra.mxu0 %v5712_v15  ;;  %v2914_v14 = vrot.slane %v2901_v54, %v6756_v6  ;;  %v5805_v54 = vld [vmem:[#allocation39 + $0x38] sm:$0xff]  }
 0x619   :  { %3747 = vmatprep.subr.bf16.mxu1 %v5717_v16  ;;  %3790 = vmatprep.subr.bf16.mxu0 %v5720_v17 }
 0x61c   :  { %3748 = vmatpush1.bf16.msra.mxu1 %v5715_v18  ;;  %3791 = vmatpush1.bf16.msra.mxu0 %v5718_v19 }
 0x61d   :  { %3749 = vmatprep.subr.bf16.mxu1 %v5723_v20  ;;  %3792 = vmatprep.subr.bf16.mxu0 %v5726_v21 }
 0x620   :  { %3750 = vmatpush1.bf16.msra.mxu1 %v5721_v22  ;;  %3793 = vmatpush1.bf16.msra.mxu0 %v5724_v23 }
 0x621   :  { %3751 = vmatprep.subr.bf16.mxu1 %v5729_v24  ;;  %3794 = vmatprep.subr.bf16.mxu0 %v5732_v25 }
 0x624   :  { %3752 = vmatpush1.bf16.msra.mxu1 %v5727_v26  ;;  %3795 = vmatpush1.bf16.msra.mxu0 %v5730_v27 }
 0x625   :  { %3753 = vmatprep.subr.bf16.mxu1 %v5735_v28  ;;  %3796 = vmatprep.subr.bf16.mxu0 %v5738_v29 }
 0x628   :  { %3754 = vmatpush2.bf16.msra.mxu1 %v5733_v30  ;;  %3797 = vmatpush2.bf16.msra.mxu0 %v5736_v31 }
 0x629   :  { %3755 = vmatprep.subr.bf16.mxu1 %v5741_v32  ;;  %3798 = vmatprep.subr.bf16.mxu0 %v5744_v34 }
 0x62c   :  { %3756 = vmatpush2.bf16.msra.mxu1 %v5739_v35  ;;  %3799 = vmatpush2.bf16.msra.mxu0 %v5742_v36 }
 0x62d   :  { %3757 = vmatprep.subr.bf16.mxu1 %v5747_v37  ;;  %3800 = vmatprep.subr.bf16.mxu0 %v5750_v38 }
 0x630   :  { %3758 = vmatpush2.bf16.msra.mxu1 %v5745_v39  ;;  %3801 = vmatpush2.bf16.msra.mxu0 %v5748_v41  ;;  %v5781_v41 = vld [vmem:[#allocation36 + $0x70] ss:$8 sps:$4 sm:$0xff]  }
 0x631   :  { %3759 = vmatprep.subr.bf16.mxu1 %v5753_v42  ;;  %3802 = vmatprep.subr.bf16.mxu0 %v5756_v43 }
 0x634   :  { %3760 = vmatpush2.bf16.msra.mxu1 %v5751_v44  ;;  %3803 = vmatpush2.bf16.msra.mxu0 %v5754_v45  ;;  %v5786_v44 = vld [vmem:[#allocation36 + $0x64] ss:$8 sps:$4 sm:$0xff]   ;;  %v5784_v45 = vld [vmem:[#allocation36 + $0x60] ss:$8 sps:$4 sm:$0xff]  }
 0x635   :  { %3761 = vmatprep.subr.bf16.mxu1 %v5759_v48  ;;  %3804 = vmatprep.subr.bf16.mxu0 %v5762_v47  ;;  %v5789_v48 = vld [vmem:[#allocation36 + $0x54] ss:$8 sps:$4 sm:$0xff]   ;;  %v5787_v47 = vld [vmem:[#allocation36 + $0x50] ss:$8 sps:$4 sm:$0xff]  }
 0x638   :  { %3762 = vmatpush2.bf16.msra.mxu1 %v5757_v49  ;;  %3805 = vmatpush2.bf16.msra.mxu0 %v5760_v50  ;;  %v5792_v49 = vld [vmem:[#allocation36 + $0x44] ss:$8 sps:$4 sm:$0xff]   ;;  %v5790_v50 = vld [vmem:[#allocation36 + $0x40] ss:$8 sps:$4 sm:$0xff]  }
 0x639   :  { %3763 = vmatprep.subr.bf16.mxu1 %v5765_v51  ;;  %3806 = vmatprep.subr.bf16.mxu0 %v5768_v53  ;;  %v5795_v51 = vld [vmem:[#allocation36 + $0x34] ss:$8 sps:$4 sm:$0xff]   ;;  %v5798_v53 = vld [vmem:[#allocation36 + $0x24] ss:$8 sps:$4 sm:$0xff]  }
 0x63c   :  { %3764 = vmatpush2.bf16.msra.mxu1 %v5763_v52  ;;  %3807 = vmatpush2.bf16.msra.mxu0 %v5766_v55  ;;  %v5793_v52 = vld [vmem:[#allocation36 + $0x30] ss:$8 sps:$4 sm:$0xff]   ;;  %v5796_v55 = vld [vmem:[#allocation36 + $0x20] ss:$8 sps:$4 sm:$0xff]  }
 0x63d   :  { %3765 = vmatprep.subr.bf16.mxu1 %v5771_v56  ;;  %3808 = vmatprep.subr.bf16.mxu0 %v5774_v58  ;;  %v5801_v56 = vld [vmem:[#allocation36 + $0x14] ss:$8 sps:$4 sm:$0xff]   ;;  %v5799_v58 = vld [vmem:[#allocation36 + $0x10] ss:$8 sps:$4 sm:$0xff]  }
 0x640   :  { %3766 = vmatpush2.bf16.msra.mxu1 %v5769_v57  ;;  %3809 = vmatpush2.bf16.msra.mxu0 %v5772_v59  ;;  %v2572_v57 = vrot.slane %v6814_v40, %v6756_v6  ;;  %v5806_v6 = vld [vmem:[#allocation39 + $0x30] sm:$0xff]  }
 0x641   :  { %3767 = vmatprep.subr.bf16.mxu1 %v5777_v60  ;;  %3810 = vmatprep.subr.bf16.mxu0 %v5780_v62  ;;  %v5804_v60 = vld [vmem:[#allocation36 + $0x4] ss:$8 sps:$4 sm:$0xff]   ;;  %v5802_v62 = vld [vmem:[#allocation36] ss:$8 sps:$4 sm:$0xff]  }
 0x642   :  { %v2823_v59 = vadd.f32 %v6824_v3, %v2572_v57  ;;  %v5808_v3 = vld [vmem:[#allocation39 + $0x20] sm:$0xff]  }
 0x644   :  { %3768 = vmatpush2.bf16.msra.mxu1 %v5775_v61  ;;  %3811 = vmatpush2.bf16.msra.mxu0 %v5778_v63  ;;  %v2819_v61 = vadd.f32 %v6820_v1, %v2572_v57  ;;  %v2833_v63 = vmax.f32 %v2823_v59, 0.0  ;;  %v5807_v1 = vld [vmem:[#allocation39 + $0x28] sm:$0xff]  }
 0x645   :  { %3936 = vmatprep.subr.bf16.mxu1 %v5783_v0 }
 0x646   :  { %v2829_v0 = vmax.f32 %v2819_v61, 0.0 }
 0x6c7   :  { %v3277_v9 = vpop.f32.mrf.mxu1  ;;  %v3320_v10 = vpop.f32.mrf.mxu0 }
 0x6c8   :  { %v3278_v23 = vadd.f32 %v3277_v9, %v2906_v13  ;;  %v3321_v24 = vadd.f32 %v3320_v10, %v2914_v14  ;;  %v3827_v9 = vpack.c.bf16 %v2833_v63, %v2829_v0  ;;  %v5809_v10 = vld [vmem:[#allocation39 + $0x18] sm:$0xff]  }
 0x6c9   :  { %v3279_v15 = vpop.f32.mrf.mxu1  ;;  %v3322_v16 = vpop.f32.mrf.mxu0 }
 0x6ca   :  { %v3280_v19 = vadd.f32 %v3279_v15, %v2910_v11  ;;  %v3323_v20 = vadd.f32 %v3322_v16, %v2918_v12  ;;  %v3329_v36 = vmax.f32 %v3278_v23, 0.0  ;;  %v3331_v37 = vmax.f32 %v3321_v24, 0.0  ;;  %v5812_v16 = vld [vmem:[#allocation39] sm:$0xff]   ;;  %v5822_v24 = vld [vmem:[#allocation37 + $0x18] sm:$0xff]  }
 0x6cb   :  { %v3281_v17 = vpop.f32.mrf.mxu1  ;;  %v3324_v18 = vpop.f32.mrf.mxu0  ;;  %v5820_v23 = vld [vmem:[#allocation37 + $0x20] sm:$0xff]  }
 0x6cc   :  { %v3282_v21 = vadd.f32 %v3281_v17, %v2906_v13  ;;  %v3325_v22 = vadd.f32 %v3324_v18, %v2914_v14  ;;  %v3330_v31 = vmax.f32 %v3280_v19, 0.0  ;;  %v3332_v32 = vmax.f32 %v3323_v20, 0.0  ;;  %v5811_v13 = vld [vmem:[#allocation39 + $0x8] sm:$0xff]   ;;  %v5813_v20 = vld [vmem:[#allocation37 + $0x78] sm:$0xff]  }
 0x6cd   :  { %v3283_v25 = vpop.f32.mrf.mxu1  ;;  %v3326_v26 = vpop.f32.mrf.mxu0  ;;  %5064 = vmatprep.subr.bf16.mxu0 %v5813_v20  ;;  %v5841_v20 = vld [vmem:[#allocation40 + $0x30] ss:$8 sps:$4 sm:$0xff]  }
 0x6ce   :  { %v3284_v27 = vadd.f32 %v3283_v25, %v2910_v11  ;;  %v3327_v28 = vadd.f32 %v3326_v26, %v2918_v12  ;;  %v3333_v29 = vmax.f32 %v3282_v21, 0.0  ;;  %v3335_v30 = vmax.f32 %v3325_v22, 0.0  ;;  %v5810_v11 = vld [vmem:[#allocation39 + $0x10] sm:$0xff]   ;;  %v5814_v21 = vld [vmem:[#allocation37 + $0x38] sm:$0xff]   ;;  %v5818_v22 = vld [vmem:[#allocation37 + $0x28] sm:$0xff]  }
 0x6cf   :  { %v2576_v12 = vrot.slane %v6814_v40, %v6758_v7  ;;  %v5815_v7 = vld [vmem:[#allocation37 + $0x70] sm:$0xff]  }
 0x6d0   :  { %v3334_v34 = vmax.f32 %v3284_v27, 0.0  ;;  %v3336_v35 = vmax.f32 %v3327_v28, 0.0  ;;  %v3337_v42 = vpack.c.bf16 %v3333_v29, %v3329_v36  ;;  %v3339_v43 = vpack.c.bf16 %v3335_v30, %v3331_v37  ;;  %v5816_v40 = vld [vmem:[#allocation37 + $0x30] sm:$0xff]   ;;  %v5825_v27 = vld [vmem:[#allocation37 + $0x48] sm:$0xff]   ;;  %v5827_v29 = vld [vmem:[#allocation37 + $0x40] sm:$0xff]  }
 0x6d1   :  { %v2825_v14 = vadd.f32 %v6826_v4, %v2576_v12  ;;  %v2821_v15 = vadd.f32 %v6822_v2, %v2576_v12  ;;  %v5817_v4 = vld [vmem:[#allocation37 + $0x68] sm:$0xff]   ;;  %v5819_v2 = vld [vmem:[#allocation37 + $0x60] sm:$0xff]   ;;  %v5823_v25 = vld [vmem:[#allocation37 + $0x50] sm:$0xff]  }
 0x6d2   :  { %v3338_v38 = vpack.c.bf16 %v3334_v34, %v3330_v31  ;;  %v3340_v39 = vpack.c.bf16 %v3336_v35, %v3332_v32  ;;  %v5824_v26 = vld [vmem:[#allocation37 + $0x10] sm:$0xff]   ;;  %v5826_v28 = vld [vmem:[#allocation37 + $0x8] sm:$0xff]   ;;  %v5828_v30 = vld [vmem:[#allocation37] sm:$0xff]  }
 0x6d3   :  { %v2834_v17 = vmax.f32 %v2825_v14, 0.0  ;;  %v2830_v18 = vmax.f32 %v2821_v15, 0.0  ;;  %v5831_v31 = vld [vmem:[#allocation40 + $0x74] ss:$8 sps:$4 sm:$0xff]   ;;  %v5832_v14 = vld [vmem:[#allocation40 + $0x60] ss:$8 sps:$4 sm:$0xff]  }
 0x6d4   :  { %3769 = vmatprep.mubr.bf16.mxu1 %v3338_v38  ;;  %3812 = vmatprep.mubr.bf16.mxu0 %v3340_v39  ;;  %v3405_v32 = vld [vmem:[#allocation34] sm:$0x3] }
 0x6d5   :  { %3770 = vmatmul.mubr.bf16.vlgmr.msra.gmra.mxu1 %v3337_v42  ;;  %3813 = vmatmul.mubr.bf16.vlgmr.msra.gmra.mxu0 %v3339_v43  ;;  %v4163_v19 = vpack.c.bf16 %v2834_v17, %v2830_v18  ;;  %v3410_v34 = vrot.slane %v3405_v32, %v6760_v8  ;;  %v3414_v35 = vrot.slane %v3405_v32, %v6754_v5  ;;  %v5837_v15 = vld [vmem:[#allocation40 + $0x54] ss:$8 sps:$4 sm:$0xff]   ;;  %v5840_v17 = vld [vmem:[#allocation40 + $0x44] ss:$8 sps:$4 sm:$0xff]   ;;  %v5838_v18 = vld [vmem:[#allocation40 + $0x40] ss:$8 sps:$4 sm:$0xff]  }
 0x6d6   :  { %3937 = vmatpush1.bf16.msra.mxu1 %v5781_v41  ;;  %3968 = vmatprep.mubr.bf16.mxu1 %v6485_v46  ;;  %v4925_v32 = vld [vmem:[%s6911_s12] ss:$0 sm:$0xff] }
 0x6d7   :  { %3938 = vmatprep.subr.bf16.mxu1 %v5786_v44  ;;  %5065 = vmatpush3.bf16.msra.mxu0 %v5814_v21  ;;  %v5846_v21 = vld [vmem:[#allocation40 + $0x24] ss:$8 sps:$4 sm:$0xff]  }
 0x6d8   :  { %5066 = vmatprep.subr.bf16.mxu0 %v5815_v7  ;;  %v5844_v7 = vld [vmem:[#allocation40 + $0x20] ss:$8 sps:$4 sm:$0xff]  }
 0x6da   :  { %3939 = vmatpush1.bf16.msra.mxu1 %v5784_v45 }
 0x6db   :  { %3940 = vmatprep.subr.bf16.mxu1 %v5789_v48  ;;  %5067 = vmatpush3.bf16.msra.mxu0 %v5816_v40 }
 0x6dc   :  { %5068 = vmatprep.subr.bf16.mxu0 %v5817_v4 }
 0x6de   :  { %3941 = vmatpush1.bf16.msra.mxu1 %v5787_v47 }
 0x6df   :  { %3942 = vmatprep.subr.bf16.mxu1 %v5792_v49  ;;  %5069 = vmatpush3.bf16.msra.mxu0 %v5818_v22 }
 0x6e0   :  { %5070 = vmatprep.subr.bf16.mxu0 %v5819_v2  ;;  %v5847_v2 = vld [vmem:[#allocation40 + $0x10] ss:$8 sps:$4 sm:$0xff]  }
 0x6e2   :  { %3943 = vmatpush1.bf16.msra.mxu1 %v5790_v50 }
 0x6e3   :  { %3944 = vmatprep.subr.bf16.mxu1 %v5795_v51  ;;  %5071 = vmatpush3.bf16.msra.mxu0 %v5820_v23 }
 0x6e6   :  { %3945 = vmatpush1.bf16.msra.mxu1 %v5793_v52 }
 0x6e7   :  { %3946 = vmatprep.subr.bf16.mxu1 %v5798_v53 }
 0x6ea   :  { %3947 = vmatpush1.bf16.msra.mxu1 %v5796_v55  ;;  %v3844_v55 = vld [vmem:[%s6909_s4] sm:$0x3] }
 0x6eb   :  { %3948 = vmatprep.subr.bf16.mxu1 %v5801_v56  ;;  %v3853_v57 = vrot.slane %v3844_v55, %v6754_v5 }
 0x6ee   :  { %3949 = vmatpush1.bf16.msra.mxu1 %v5799_v58  ;;  %v3849_v58 = vrot.slane %v3844_v55, %v6760_v8 }
 0x6ef   :  { %3950 = vmatprep.subr.bf16.mxu1 %v5804_v60 }
 0x6f2   :  { %3951 = vmatpush1.bf16.msra.mxu1 %v5802_v62 }
 0x6f3   :  { %5155 = vmatprep.subr.bf16.mxu1 %v6486_v33 }
 0x6f5   :  { %3969 = vmatmul.mubr.bf16.vlgmr.msra.gmra.mxu1 %v3827_v9 }
 0x6f6   :  { %5156 = vmatpush3.bf16.msra.mxu1 %v5805_v54  ;;  %5171 = vmatprep.mubr.msk.bf16.mxu1 %vm6487_vm0, %v6486_v33 }
 0x6f7   :  { %5157 = vmatprep.subr.bf16.mxu1 %v6486_v33 }
 0x6fa   :  { %5158 = vmatpush3.bf16.msra.mxu1 %v5806_v6 }
 0x6fb   :  { %5159 = vmatprep.subr.bf16.mxu1 %v6486_v33 }
 0x6fe   :  { %5160 = vmatpush3.bf16.msra.mxu1 %v5807_v1 }
 0x6ff   :  { %5161 = vmatprep.subr.bf16.mxu1 %v6486_v33 }
 0x702   :  { %5162 = vmatpush3.bf16.msra.mxu1 %v5808_v3 }
 0x703   :  { %5163 = vmatprep.subr.bf16.mxu1 %v6486_v33 }
 0x706   :  { %5164 = vmatpush3.bf16.msra.mxu1 %v5809_v10 }
 0x707   :  { %5165 = vmatprep.subr.bf16.mxu1 %v6486_v33 }
 0x70a   :  { %5166 = vmatpush3.bf16.msra.mxu1 %v5810_v11  ;;  %v5829_v11 = vld [vmem:[#allocation40 + $0x70] ss:$8 sps:$4 sm:$0xff]  }
 0x70b   :  { %5167 = vmatprep.subr.bf16.mxu1 %v6486_v33 }
 0x70e   :  { %5168 = vmatpush3.bf16.msra.mxu1 %v5811_v13  ;;  %v5834_v13 = vld [vmem:[#allocation40 + $0x64] ss:$8 sps:$4 sm:$0xff]  }
 0x70f   :  { %5169 = vmatprep.subr.bf16.mxu1 %v6486_v33  ;;  %v5821_v33 = vld [vmem:[#allocation37 + $0x58] sm:$0xff]  }
 0x710   :  { %5072 = vmatprep.subr.bf16.mxu0 %v5821_v33  ;;  %v5852_v33 = vld [vmem:[#allocation40 + $0x4] ss:$8 sps:$4 sm:$0xff]  }
 0x711   :  { %5073 = vmatpush3.bf16.msra.mxu0 %v5822_v24 }
 0x712   :  { %5170 = vmatpush3.bf16.msra.mxu1 %v5812_v16  ;;  %5074 = vmatprep.subr.bf16.mxu0 %v5823_v25  ;;  %v5835_v16 = vld [vmem:[#allocation40 + $0x50] ss:$8 sps:$4 sm:$0xff]  }
 0x715   :  { %5172 = vmatmul.mubr.bf16.vlgmr.msra.gmra.mxu1 %v4163_v19  ;;  %5075 = vmatpush3.bf16.msra.mxu0 %v5824_v26  ;;  %v5843_v19 = vld [vmem:[#allocation40 + $0x34] ss:$8 sps:$4 sm:$0xff]  }
 0x716   :  { %5076 = vmatprep.subr.bf16.mxu0 %v5825_v27  ;;  %v5850_v27 = vld [vmem:[#allocation40] ss:$8 sps:$4 sm:$0xff]  }
 0x719   :  { %5077 = vmatpush3.bf16.msra.mxu0 %v5826_v28 }
 0x71a   :  { %5078 = vmatprep.subr.bf16.mxu0 %v5827_v29 }
 0x71d   :  { %5079 = vmatpush3.bf16.msra.mxu0 %v5828_v30 }
 0x71e   :  { %4387 = vmatprep.subr.bf16.mxu0 %v5831_v31 }
 0x795   :  { %v3771_v36 = vpop.f32.mrf.mxu1  ;;  %v3814_v37 = vpop.f32.mrf.mxu0 }
 0x796   :  { %v3772_v38 = vadd.f32 %v3771_v36, %v3410_v34 }
 0x797   :  { %v3773_v39 = vpop.f32.mrf.mxu1  ;;  %v3816_v41 = vpop.f32.mrf.mxu0 }
 0x798   :  { %v3815_v42 = vadd.f32 %v3814_v37, %v3772_v38  ;;  %v3774_v43 = vadd.f32 %v3773_v39, %v3414_v35 }
 0x799   :  { %v3775_v44 = vpop.f32.mrf.mxu1  ;;  %v3818_v45 = vpop.f32.mrf.mxu0 }
 0x79a   :  { %3823 = vst [vmem:[%s6666_s24] sm:$0xff] %v3815_v42  ;;  %v3817_v48 = vadd.f32 %v3816_v41, %v3774_v43  ;;  %v3776_v47 = vadd.f32 %v3775_v44, %v3410_v34  ;;  %v4295_v42 = vld [vmem:[%s6912_s29] sm:$0x3] }
 0x79b   :  { %v3777_v49 = vpop.f32.mrf.mxu1  ;;  %v3820_v52 = vpop.f32.mrf.mxu0  ;;  %v4300_v43 = vrot.slane %v4295_v42, %v6760_v8  ;;  %v4304_v44 = vrot.slane %v4295_v42, %v6754_v5 }
 0x79c   :  { %3824 = vst [vmem:[%s6666_s24 + $0x8] sm:$0xff] %v3817_v48  ;;  %v3819_v50 = vadd.f32 %v3818_v45, %v3776_v47  ;;  %v3778_v51 = vadd.f32 %v3777_v49, %v3414_v35 }
 0x79e   :  { %3825 = vst [vmem:[%s6666_s24 + $0x10] sm:$0xff] %v3819_v50  ;;  %v3821_v53 = vadd.f32 %v3820_v52, %v3778_v51 }
 0x7a0   :  { %3826 = vst [vmem:[%s6666_s24 + $0x18] sm:$0xff] %v3821_v53  ;;  %s6910_s24 = sld [smem:[#allocation72_spill]] }
 0x7a6   :  { %v4942_v22 = vld [vmem:[%s6910_s24] ss:$0 sm:$0xff] }
 0x7b5   :  { %v3970_v56 = vpop.f32.mrf.mxu1 }
 0x7b6   :  { %v3971_v63 = vadd.f32 %v3970_v56, %v3849_v58 }
 0x7b7   :  { %v3972_v59 = vpop.f32.mrf.mxu1 }
 0x7b8   :  { %v3973_v61 = vadd.f32 %v3972_v59, %v3853_v57  ;;  %v3979_v3 = vmax.f32 %v3971_v63, 0.0 }
 0x7b9   :  { %v3974_v60 = vpop.f32.mrf.mxu1 }
 0x7ba   :  { %v3975_v62 = vadd.f32 %v3974_v60, %v3849_v58  ;;  %v3980_v6 = vmax.f32 %v3973_v61, 0.0 }
 0x7bb   :  { %v3976_v0 = vpop.f32.mrf.mxu1 }
 0x7bc   :  { %v3977_v54 = vadd.f32 %v3976_v0, %v3853_v57  ;;  %v3981_v9 = vmax.f32 %v3975_v62, 0.0 }
 0x7be   :  { %v3982_v1 = vmax.f32 %v3977_v54, 0.0  ;;  %v3983_v12 = vpack.c.bf16 %v3981_v9, %v3979_v3 }
 0x7c0   :  { %v3984_v10 = vpack.c.bf16 %v3982_v1, %v3980_v6 }
 0x7c2   :  { %4152 = vmatprep.mubr.bf16.mxu0 %v3984_v10 }
 0x7c3   :  { %4153 = vmatmul.mubr.bf16.vlgmr.msra.gmra.mxu0 %v3983_v12 }
 0x7c4   :  { %4388 = vmatpush1.bf16.msra.mxu0 %v5829_v11  ;;  %4419 = vmatprep.mubr.bf16.mxu0 %v6485_v46  ;;  %v5849_v46 = vld [vmem:[#allocation40 + $0x14] ss:$8 sps:$4 sm:$0xff]  }
 0x7c5   :  { %4389 = vmatprep.subr.bf16.mxu0 %v5834_v13 }
 0x7c8   :  { %4390 = vmatpush1.bf16.msra.mxu0 %v5832_v14 }
 0x7c9   :  { %4391 = vmatprep.subr.bf16.mxu0 %v5837_v15 }
 0x7cc   :  { %4392 = vmatpush1.bf16.msra.mxu0 %v5835_v16 }
 0x7cd   :  { %4393 = vmatprep.subr.bf16.mxu0 %v5840_v17 }
 0x7d0   :  { %4394 = vmatpush1.bf16.msra.mxu0 %v5838_v18 }
 0x7d1   :  { %4395 = vmatprep.subr.bf16.mxu0 %v5843_v19 }
 0x7d4   :  { %4396 = vmatpush1.bf16.msra.mxu0 %v5841_v20 }
 0x7d5   :  { %v4269_v40 = vpop.f32.mrf.mxu1  ;;  %4397 = vmatprep.subr.bf16.mxu0 %v5846_v21 }
 0x7d6   :  { %v4270_v25 = vadd.f32 %v4942_v22, %v4269_v40 }
 0x7d7   :  { %v5173_v4 = vpop.f32.mrf.mxu1 }
 0x7d8   :  { %4398 = vmatpush1.bf16.msra.mxu0 %v5844_v7  ;;  %v4276_v29 = vmax.f32 %v4270_v25, 0.0 }
 0x7d9   :  { %v4272_v23 = vpop.f32.mrf.mxu1  ;;  %4399 = vmatprep.subr.bf16.mxu0 %v5849_v46 }
 0x7da   :  { %v4273_v24 = vadd.f32 %v4942_v22, %v4272_v23 }
 0x7db   :  { %v5174_v26 = vpop.f32.mrf.mxu1 }
 0x7dc   :  { %4400 = vmatpush1.bf16.msra.mxu0 %v5847_v2  ;;  %v4277_v28 = vmax.f32 %v4273_v24, 0.0 }
 0x7dd   :  { %4401 = vmatprep.subr.bf16.mxu0 %v5852_v33 }
 0x7de   :  { %v4278_v30 = vpack.c.bf16 %v4277_v28, %v4276_v29 }
 0x7e0   :  { %4402 = vmatpush1.bf16.msra.mxu0 %v5850_v27 }
 0x7e3   :  { %4420 = vmatmul.mubr.bf16.vlgmr.msra.gmra.mxu0 %v4278_v30 }
 0x883   :  { %v5080_v31 = vpop.f32.mrf.mxu0 }
 0x885   :  { %v5081_v34 = vpop.f32.mrf.mxu0 }
 0x886   :  { %v5082_v35 = vadd.f32 %v5081_v34, %v5080_v31 }
 0x887   :  { %v5083_v36 = vpop.f32.mrf.mxu0 }
 0x888   :  { %v4155_v37 = vadd.f32 %v5082_v35, %v4925_v32 }
 0x889   :  { %v5084_v38 = vpop.f32.mrf.mxu0 }
 0x88a   :  { %4161 = vst [vmem:[%s6671_s3] sm:$0xff] %v4155_v37  ;;  %v5085_v39 = vadd.f32 %v5084_v38, %v5083_v36 }
 0x88c   :  { %v4158_v41 = vadd.f32 %v5085_v39, %v4925_v32 }
 0x88e   :  { %4162 = vst [vmem:[%s6671_s3 + $0x8] sm:$0xff] %v4158_v41 }
 0x8a3   :  { %v4421_v45 = vpop.f32.mrf.mxu0 }
 0x8a4   :  { %v4422_v48 = vadd.f32 %v4421_v45, %v4300_v43 }
 0x8a5   :  { %v4423_v47 = vpop.f32.mrf.mxu0 }
 0x8a6   :  { %v4967_v49 = vmul.f32 -1.442695, %v4422_v48  ;;  %v4424_v50 = vadd.f32 %v4423_v47, %v4304_v44 }
 0x8a7   :  { %v4425_v51 = vpop.f32.mrf.mxu0 }
 0x8a8   :  { %5853 = vpow2.f32 %v4967_v49  ;;  %v4968_v52 = vmul.f32 -1.442695, %v4424_v50  ;;  %v4426_v53 = vadd.f32 %v4425_v51, %v4300_v43 }
 0x8a9   :  { %v4427_v55 = vpop.f32.mrf.mxu0 }
 0x8aa   :  { %5855 = vpow2.f32 %v4968_v52  ;;  %v4969_v56 = vmul.f32 -1.442695, %v4426_v53  ;;  %v4428_v57 = vadd.f32 %v4427_v55, %v4304_v44 }
 0x8ac   :  { %5857 = vpow2.f32 %v4969_v56  ;;  %v4970_v58 = vmul.f32 -1.442695, %v4428_v57 }
 0x8ae   :  { %5859 = vpow2.f32 %v4970_v58 }
 0x8b5   :  { %v5854_v8 = vpop.eup %5853 }
 0x8b6   :  { %v4442_v5 = vadd.f32 1.0, %v5854_v8 }
 0x8b7   :  { %v5856_v59 = vpop.eup %5855 }
 0x8b8   :  { %5861 = vrcp.f32 %v4442_v5  ;;  %v4443_v60 = vadd.f32 1.0, %v5856_v59 }
 0x8b9   :  { %v5858_v61 = vpop.eup %5857 }
 0x8ba   :  { %5863 = vrcp.f32 %v4443_v60  ;;  %v4444_v62 = vadd.f32 1.0, %v5858_v61 }
 0x8bb   :  { %v5860_v63 = vpop.eup %5859 }
 0x8bc   :  { %5865 = vrcp.f32 %v4444_v62  ;;  %v4445_v0 = vadd.f32 1.0, %v5860_v63 }
 0x8be   :  { %5867 = vrcp.f32 %v4445_v0 }
 0x8c5   :  { %v5862_v54 = vpop.eup %5861 }
 0x8c6   :  { %4454 = vst [vmem:[%s6676_s14] sm:$0xff] %v5862_v54 }
 0x8c7   :  { %v5864_v9 = vpop.eup %5863 }
 0x8c8   :  { %4455 = vst [vmem:[%s6676_s14 + $0x8] sm:$0xff] %v5864_v9 }
 0x8c9   :  { %v5866_v6 = vpop.eup %5865 }
 0x8ca   :  { %4456 = vst [vmem:[%s6676_s14 + $0x10] sm:$0xff] %v5866_v6 }
 0x8cb   :  { %v5868_v1 = vpop.eup %5867 }
 0x8cc   :  { %4457 = vst [vmem:[%s6676_s14 + $0x18] sm:$0xff] %v5868_v1 }
 0x8cd   :  { %4474 = vsyncpa [#allocation3], 1 }
 0x8ce   :  { %4475 = vsyncpa [#allocation5], 1 }
 0x8cf   :  { %4476 = vsyncpa [#allocation8], 1 }
 0x8d0   :  { %4477 = vsyncpa [#allocation11], 1 }
 0x8d1   :  { %4478 = vsyncpa [#allocation14], 1 }
 0x8d2   :  { %4479 = vsyncpa [#allocation17], 1 }
 0x8d3   :  { %4480 = vsyncpa [#allocation20], 1 }
 0x8d4   :  { %4481 = vsyncpa [#allocation23], 1 }
 0x8d5   :  { %4482 = vsyncpa [#allocation26], 1 }
 0x8d6   :  { %4483 = vsyncpa [#allocation29], 1 }
 0x8d7   :  { %4484 = vsyncpa [#allocation32], 1 }
 0x8d8   :  { %4485 = vsyncpa [#allocation35], 1 }
 0x8d9   :  { %4486 = vsyncpa [#allocation38], 1 }
 0x8da   :  { %4487 = vsyncpa [#allocation41], 1 }

</bundles_post_ra>
